<compile_context>
chip_gen: v7x
topology: tpu7x:2x2x1
jax: 0.10.0
libtpu: 0.0.40
codegen_flags: <defaults>
</compile_context>

<pallas_src>
import jax
import jax.numpy as jnp
from jax import lax
from jax.experimental import pallas as pl
from jax.experimental.pallas import tpu as pltpu

EPS = 1e-5                       # PyTorch BatchNorm2d default eps
VMEM_LIMIT = 48 * 1024 * 1024    # > 16/32 MiB scoped defaults, < 64 MiB v7x physical


# ----------------------------- Pallas kernels -----------------------------

def _make_mepcover_kernel(H, W, Cp, rates, d_max):
    """Fused MEPCover: dilated-3x3 conv (+ folded 1x1 shortcut + BN) + ReLU.

    xpad_ref: (Hp, Wp, Cp) f32  -- input zero-padded by d_max, channels padded to Cp
    w_ref:    (9*Cp, Cout) bf16 -- 3x3 taps packed on K, BN scales + 1x1 folded in
    b_ref:    (1, Cout) f32     -- combined BN3+BN1 bias
    o_ref:    (HW, Cout) bf16
    """
    HW = H * W

    def kernel(xpad_ref, w_ref, b_ref, o_ref):
        r = pl.program_id(1)

        def compute(d):
            base = d_max - d
            taps = []
            for dy in range(3):
                for dx in range(3):
                    oy, ox = base + dy * d, base + dx * d
                    t = xpad_ref[pl.ds(oy, H), pl.ds(ox, W), :]        # (H, W, Cp)
                    taps.append(t.reshape(HW, Cp).astype(jnp.bfloat16))
            xk = jnp.concatenate(taps, axis=-1)                        # (HW, 9*Cp)
            acc = jnp.dot(xk, w_ref[...], preferred_element_type=jnp.float32)
            o_ref[...] = jnp.maximum(acc + b_ref[...], 0.0).astype(o_ref.dtype)

        # static tap offsets per rate -> one pl.when branch per rate
        for ri, d in enumerate(rates):
            pl.when(r == ri)(lambda d=d: compute(d))

    return kernel


def head_kernel(aspp_ref, wd_ref, bd_ref, wu_ref, bu_ref, wp_ref, bp_ref,
                up_ref, proj_ref, acc_ref):
    """Fused contrast_head + project for one (batch, HW-tile, branch) grid point.

    aspp_ref: (TM, 512) bf16    wd/wu/wp: per-branch folded 1x1 weights (bf16)
    up_ref:   (TM, 256) f32     proj_ref: (TM, 256) f32 (resident across branches)
    acc_ref:  (TM, 256) f32 scratch accumulating the partial `project` matmuls.
    """
    i = pl.program_id(2)

    @pl.when(i == 0)
    def _():
        acc_ref[...] = jnp.zeros_like(acc_ref)

    d = jnp.dot(aspp_ref[...], wd_ref[...], preferred_element_type=jnp.float32)
    d = jnp.maximum(d + bd_ref[...], 0.0)                              # ASPPDown
    u = jnp.dot(d.astype(wu_ref.dtype), wu_ref[...],
                preferred_element_type=jnp.float32)
    u = jnp.maximum(u + bu_ref[...], 0.0)                              # ASPPUp
    up_ref[...] = u                                                    # module output
    # project: accumulate up_i @ w_proj[i*256:(i+1)*256] instead of concat in HBM
    acc_ref[...] += jnp.dot(u.astype(wp_ref.dtype), wp_ref[...],
                            preferred_element_type=jnp.float32)

    @pl.when(i == pl.num_programs(2) - 1)
    def _():
        proj_ref[...] = jnp.maximum(acc_ref[...] + bp_ref[...], 0.0)


# --------------------------- pallas_call wrappers ---------------------------

def mepcover_call(xpad, w3f, bias, *, H, W, rates, d_max):
    # xpad: (N, Hp, Wp, Cp) f32   w3f: (R, 9*Cp, 512) bf16   bias: (R, 1, 512) f32
    N, Hp, Wp, Cp = xpad.shape
    R, K, Cout = w3f.shape
    HW = H * W
    kernel = _make_mepcover_kernel(H, W, Cp, rates, d_max)
    # TODO(synk): HW (halo) tiling of the dilated conv is not implemented; the
    # whole spatial plane is one block (fine up to a few thousand rows in VMEM).
    return pl.pallas_call(
        kernel,
        out_shape=jax.ShapeDtypeStruct((R, N, HW, Cout), jnp.bfloat16),
        grid=(N, R),
        in_specs=[
            pl.BlockSpec((None, Hp, Wp, Cp), lambda n, r: (n, 0, 0, 0)),
            pl.BlockSpec((None, K, Cout), lambda n, r: (r, 0, 0)),
            pl.BlockSpec((None, 1, Cout), lambda n, r: (r, 0, 0)),
        ],
        out_specs=pl.BlockSpec((None, None, HW, Cout), lambda n, r: (r, n, 0, 0)),
        compiler_params=pltpu.CompilerParams(
            dimension_semantics=("parallel", "parallel"),
            vmem_limit_bytes=VMEM_LIMIT),
    )(xpad, w3f, bias)


def _pick_tile(hw):
    for t in (1024, 512, 256, 128):
        if hw % t == 0:
            return t
    return hw


def head_call(aspp, wd, bd, wu, bu, wp, bp):
    # aspp: (R, N, HW, 512) bf16 -> up: (R, N, HW, 256) f32, proj: (N, HW, 256) f32
    R, N, HW, C = aspp.shape
    P = wd.shape[-1]
    TM = _pick_tile(HW)
    return pl.pallas_call(
        head_kernel,
        out_shape=(jax.ShapeDtypeStruct((R, N, HW, P), jnp.float32),
                   jax.ShapeDtypeStruct((N, HW, P), jnp.float32)),
        grid=(N, HW // TM, R),
        in_specs=[
            pl.BlockSpec((None, None, TM, C), lambda n, h, i: (i, n, h, 0)),
            pl.BlockSpec((None, C, P), lambda n, h, i: (i, 0, 0)),
            pl.BlockSpec((None, 1, P), lambda n, h, i: (i, 0, 0)),
            pl.BlockSpec((None, P, P), lambda n, h, i: (i, 0, 0)),
            pl.BlockSpec((None, 1, P), lambda n, h, i: (i, 0, 0)),
            pl.BlockSpec((None, P, P), lambda n, h, i: (i, 0, 0)),
            pl.BlockSpec((1, P), lambda n, h, i: (0, 0)),
        ],
        out_specs=(
            pl.BlockSpec((None, None, TM, P), lambda n, h, i: (i, n, h, 0)),
            pl.BlockSpec((None, TM, P), lambda n, h, i: (n, h, 0)),
        ),
        scratch_shapes=[pltpu.VMEM((TM, P), jnp.float32)],
        compiler_params=pltpu.CompilerParams(
            dimension_semantics=("parallel", "parallel", "arbitrary"),
            vmem_limit_bytes=VMEM_LIMIT),
    )(aspp, wd, bd, wu, bu, wp, bp)


# ------------------------------ parameter glue ------------------------------

def bn_fold(gamma, beta, mean, var):
    s = gamma / jnp.sqrt(var + EPS)
    return s, beta - mean * s


def init_params(key, in_channels, rates, out_channels=256):
    """Deterministic synthetic parameters in PyTorch layouts (OIHW / (O,I))."""
    R = len(rates)
    ks = iter(jax.random.split(key, 128))

    def nrm(shape, scale=0.1):
        return scale * jax.random.normal(next(ks), shape, jnp.float32)

    def bn(c):
        return dict(gamma=jax.random.uniform(next(ks), (c,), jnp.float32, 0.5, 1.5),
                    beta=nrm((c,)),
                    mean=nrm((c,)),
                    var=jax.random.uniform(next(ks), (c,), jnp.float32, 0.5, 1.5))

    return dict(
        w3=[nrm((512, in_channels, 3, 3)) for _ in range(R)],        # MEPCover.conv3
        w1=[nrm((512, in_channels)) for _ in range(R)],              # MEPCover.conv1
        bn3=[bn(512) for _ in range(R)],
        bn1=[bn(512) for _ in range(R)],
        w_down=[nrm((out_channels, 512)) for _ in range(3)],         # ASPPDown
        bn_down=[bn(out_channels) for _ in range(3)],
        w_up=[nrm((out_channels, out_channels)) for _ in range(3)],  # ASPPUp
        bn_up=[bn(out_channels) for _ in range(3)],
        w_proj=nrm((out_channels, 3 * out_channels)),                # project
        bn_proj=bn(out_channels),
    )


def fold_params(p, rates, cin_pad, out_channels=256):
    """Fold eval-mode BN into conv weights/bias, pack 3x3 taps on K, cast bf16."""
    R = len(rates)
    Cin = p['w3'][0].shape[1]
    w3f, bc = [], []
    for r in range(R):
        s3, b3 = bn_fold(**p['bn3'][r])
        s1, b1 = bn_fold(**p['bn1'][r])
        # OIHW (512, Cin, 3, 3) -> (kh*kw, Cin, 512), BN3 scale folded in
        w3 = jnp.transpose(p['w3'][r], (2, 3, 1, 0)).reshape(9, Cin, 512) * s3[None, None, :]
        w1 = jnp.transpose(p['w1'][r], (1, 0)) * s1[None, :]          # (Cin, 512)
        w3 = w3.at[4].add(w1)                 # fold 1x1 shortcut into center tap
        w3 = jnp.pad(w3, ((0, 0), (0, cin_pad - Cin), (0, 0)))        # lane-align K
        w3f.append(w3.reshape(9 * cin_pad, 512))
        bc.append((b3 + b1)[None, :])

    def fold_pw(w_oi, bnp):
        s, b = bn_fold(**bnp)
        return (jnp.transpose(w_oi, (1, 0)) * s[None, :]).astype(jnp.bfloat16), b[None, :]

    wd, bd = zip(*[fold_pw(p['w_down'][i], p['bn_down'][i]) for i in range(3)])
    wu, bu = zip(*[fold_pw(p['w_up'][i], p['bn_up'][i]) for i in range(3)])
    wp_full, bp = fold_pw(p['w_proj'], p['bn_proj'])                  # (3*oc, oc)

    return dict(
        w3f=jnp.stack(w3f).astype(jnp.bfloat16),        # (R, 9*Cp, 512)
        b_cover=jnp.stack(bc),                          # (R, 1, 512) f32
        wd=jnp.stack(wd), bd=jnp.stack(bd),             # (3,512,256) bf16 / (3,1,256)
        wu=jnp.stack(wu), bu=jnp.stack(bu),             # (3,256,256) bf16 / (3,1,256)
        wp=wp_full.reshape(3, out_channels, out_channels),  # per-branch proj slices
        bp=bp,                                          # (1, 256) f32
    )


# ------------------------------ forward pass ------------------------------

def mep_forward(x_nchw, kp, rates, cin_pad):
    """MEP.forward: returns (project(cat(up)), [up_0, up_1, up_2]) in NCHW."""
    N, Cin, H, W = x_nchw.shape
    d_max = max(rates)
    x = jnp.transpose(x_nchw, (0, 2, 3, 1))                            # NCHW -> NHWC
    xpad = jnp.pad(x, ((0, 0), (d_max, d_max), (d_max, d_max), (0, cin_pad - Cin)))

    aspp = mepcover_call(xpad, kp['w3f'], kp['b_cover'],
                         H=H, W=W, rates=rates, d_max=d_max)           # (R,N,HW,512) bf16

    # contrast_head (attention='none') + project, fused. Dropout(0.1) == identity (eval).
    up, proj = head_call(aspp, kp['wd'], kp['bd'], kp['wu'], kp['bu'],
                         kp['wp'], kp['bp'])

    to_nchw = lambda t: jnp.transpose(t.reshape(N, H, W, t.shape[-1]), (0, 3, 1, 2))
    return to_nchw(proj), [to_nchw(up[i]) for i in range(3)]


# ------------------------- pure-JAX f32 reference -------------------------

def _conv2d_nchw(x, w_oihw, dilation=1, padding=0):
    return lax.conv_general_dilated(
        x, w_oihw, window_strides=(1, 1),
        padding=[(padding, padding), (padding, padding)],
        rhs_dilation=(dilation, dilation),
        dimension_numbers=('NCHW', 'OIHW', 'NCHW'))


def _bn_ref(x, bnp):
    s = bnp['gamma'] / jnp.sqrt(bnp['var'] + EPS)
    b = bnp['beta'] - bnp['mean'] * s
    return x * s[None, :, None, None] + b[None, :, None, None]


def mep_reference(x, p, rates):
    aspp = []
    for i, r in enumerate(rates):
        out = _bn_ref(_conv2d_nchw(x, p['w3'][i], dilation=r, padding=r), p['bn3'][i])
        ident = _bn_ref(_conv2d_nchw(x, p['w1'][i][:, :, None, None]), p['bn1'][i])
        aspp.append(jax.nn.relu(out + ident))
    ups = []
    for i in range(3):
        d = jax.nn.relu(_bn_ref(_conv2d_nchw(aspp[i], p['w_down'][i][:, :, None, None]),
                                p['bn_down'][i]))
        u = jax.nn.relu(_bn_ref(_conv2d_nchw(d, p['w_up'][i][:, :, None, None]),
                                p['bn_up'][i]))
        ups.append(u)
    res = jnp.concatenate(ups, axis=1)
    proj = jax.nn.relu(_bn_ref(_conv2d_nchw(res, p['w_proj'][:, :, None, None]),
                               p['bn_proj']))
    return proj, ups


def assert_close(got, ref, name):
    # bf16 matmul operands vs f32 reference: scale-aware tolerance (review note).
    got = jnp.asarray(got, jnp.float32)
    ref = jnp.asarray(ref, jnp.float32)
    err = float(jnp.max(jnp.abs(got - ref)))
    scale = float(jnp.std(ref)) + 1e-6
    assert err <= 0.15 * scale + 0.05, f"{name}: max_err={err:.5f} scale={scale:.5f}"


# --------------------------------- main ---------------------------------

if __name__ == "__main__":
    key = jax.random.PRNGKey(0)
    kx, kparam = jax.random.split(key)

    N, Cin, H, W = 2, 4, 16, 16
    rates = [1, 2, 3]            # contrast_head requires exactly 3 branches
    out_channels = 256

    x = jax.random.normal(kx, (N, Cin, H, W), jnp.float32)
    params = init_params(kparam, Cin, rates, out_channels)

    cin_pad = max(128, ((Cin + 127) // 128) * 128)   # lane-align the packed K dim
    kparams = fold_params(params, rates, cin_pad, out_channels)

    proj, ups = mep_forward(x, kparams, rates, cin_pad)
    proj = jax.block_until_ready(proj)
    ups = [jax.block_until_ready(u) for u in ups]

    assert proj.shape == (N, out_channels, H, W)
    assert len(ups) == 3 and all(u.shape == (N, out_channels, H, W) for u in ups)

    proj_ref, ups_ref = mep_reference(x, params, rates)
    assert_close(proj, proj_ref, "proj")
    for i, (u, ur) in enumerate(zip(ups, ups_ref)):
        assert_close(u, ur, f"up_{i}")

    # TODO(synk): CBAM / ScaledDotProductAttention branches (attention != 'none')
    # are not implemented; BatchNorm is eval-mode (folded), Dropout is identity.
    print("KERNEL_OK")
</pallas_src>

<mosaic_0001>
module attributes {stable_mosaic.version = 11 : i64} {
  func.func @kernel(%arg0: i32, %arg1: i32, %arg2: memref<1x22x22x128xf32, #tpu.memory_space<vmem>>, %arg3: memref<1x1152x512xbf16, #tpu.memory_space<vmem>>, %arg4: memref<1x1x512xf32, #tpu.memory_space<vmem>>, %arg5: memref<1x1x256x512xbf16, #tpu.memory_space<vmem>>) attributes {dimension_semantics = [#tpu.dimension_semantics<parallel>, #tpu.dimension_semantics<parallel>], iteration_bounds = array<i64: 2, 3>, scalar_prefetch = 0 : i64, scratch_operands = 0 : i64, tpu.core_type = #tpu.core_type<tc>, window_params = [{transform_indices = @transform_0, window_bounds = array<i64: 1, 22, 22, 128>}, {transform_indices = @transform_1, window_bounds = array<i64: 1, 1152, 512>}, {transform_indices = @transform_2, window_bounds = array<i64: 1, 1, 512>}, {transform_indices = @transform_3, window_bounds = array<i64: 1, 1, 256, 512>}]} {
    %c0_i32 = arith.constant 0 : i32
    %0 = arith.cmpi eq, %arg1, %c0_i32 : i32
    %1 = arith.extui %0 : i1 to i32
    %c0_i32_0 = arith.constant 0 : i32
    %2 = arith.cmpi ne, %1, %c0_i32_0 : i32
    scf.if %2 {
      %c0 = arith.constant 0 : index
      %c2 = arith.constant 2 : index
      %c2_3 = arith.constant 2 : index
      %c0_4 = arith.constant 0 : index
      %9 = vector.load %arg2[%c0, %c2, %c2_3, %c0_4] : memref<1x22x22x128xf32, #tpu.memory_space<vmem>>, vector<1x16x16x128xf32>
      %10 = vector.shape_cast %9 : vector<1x16x16x128xf32> to vector<16x16x128xf32>
      %11 = vector.shape_cast %10 : vector<16x16x128xf32> to vector<256x128xf32>
      %12 = arith.truncf %11 : vector<256x128xf32> to vector<256x128xbf16>
      %c0_5 = arith.constant 0 : index
      %c2_6 = arith.constant 2 : index
      %c3 = arith.constant 3 : index
      %c0_7 = arith.constant 0 : index
      %13 = vector.load %arg2[%c0_5, %c2_6, %c3, %c0_7] : memref<1x22x22x128xf32, #tpu.memory_space<vmem>>, vector<1x16x16x128xf32>
      %14 = vector.shape_cast %13 : vector<1x16x16x128xf32> to vector<16x16x128xf32>
      %15 = vector.shape_cast %14 : vector<16x16x128xf32> to vector<256x128xf32>
      %16 = arith.truncf %15 : vector<256x128xf32> to vector<256x128xbf16>
      %c0_8 = arith.constant 0 : index
      %c2_9 = arith.constant 2 : index
      %c4 = arith.constant 4 : index
      %c0_10 = arith.constant 0 : index
      %17 = vector.load %arg2[%c0_8, %c2_9, %c4, %c0_10] : memref<1x22x22x128xf32, #tpu.memory_space<vmem>>, vector<1x16x16x128xf32>
      %18 = vector.shape_cast %17 : vector<1x16x16x128xf32> to vector<16x16x128xf32>
      %19 = vector.shape_cast %18 : vector<16x16x128xf32> to vector<256x128xf32>
      %20 = arith.truncf %19 : vector<256x128xf32> to vector<256x128xbf16>
      %c0_11 = arith.constant 0 : index
      %c3_12 = arith.constant 3 : index
      %c2_13 = arith.constant 2 : index
      %c0_14 = arith.constant 0 : index
      %21 = vector.load %arg2[%c0_11, %c3_12, %c2_13, %c0_14] : memref<1x22x22x128xf32, #tpu.memory_space<vmem>>, vector<1x16x16x128xf32>
      %22 = vector.shape_cast %21 : vector<1x16x16x128xf32> to vector<16x16x128xf32>
      %23 = vector.shape_cast %22 : vector<16x16x128xf32> to vector<256x128xf32>
      %24 = arith.truncf %23 : vector<256x128xf32> to vector<256x128xbf16>
      %c0_15 = arith.constant 0 : index
      %c3_16 = arith.constant 3 : index
      %c3_17 = arith.constant 3 : index
      %c0_18 = arith.constant 0 : index
      %25 = vector.load %arg2[%c0_15, %c3_16, %c3_17, %c0_18] : memref<1x22x22x128xf32, #tpu.memory_space<vmem>>, vector<1x16x16x128xf32>
      %26 = vector.shape_cast %25 : vector<1x16x16x128xf32> to vector<16x16x128xf32>
      %27 = vector.shape_cast %26 : vector<16x16x128xf32> to vector<256x128xf32>
      %28 = arith.truncf %27 : vector<256x128xf32> to vector<256x128xbf16>
      %c0_19 = arith.constant 0 : index
      %c3_20 = arith.constant 3 : index
      %c4_21 = arith.constant 4 : index
      %c0_22 = arith.constant 0 : index
      %29 = vector.load %arg2[%c0_19, %c3_20, %c4_21, %c0_22] : memref<1x22x22x128xf32, #tpu.memory_space<vmem>>, vector<1x16x16x128xf32>
      %30 = vector.shape_cast %29 : vector<1x16x16x128xf32> to vector<16x16x128xf32>
      %31 = vector.shape_cast %30 : vector<16x16x128xf32> to vector<256x128xf32>
      %32 = arith.truncf %31 : vector<256x128xf32> to vector<256x128xbf16>
      %c0_23 = arith.constant 0 : index
      %c4_24 = arith.constant 4 : index
      %c2_25 = arith.constant 2 : index
      %c0_26 = arith.constant 0 : index
      %33 = vector.load %arg2[%c0_23, %c4_24, %c2_25, %c0_26] : memref<1x22x22x128xf32, #tpu.memory_space<vmem>>, vector<1x16x16x128xf32>
      %34 = vector.shape_cast %33 : vector<1x16x16x128xf32> to vector<16x16x128xf32>
      %35 = vector.shape_cast %34 : vector<16x16x128xf32> to vector<256x128xf32>
      %36 = arith.truncf %35 : vector<256x128xf32> to vector<256x128xbf16>
      %c0_27 = arith.constant 0 : index
      %c4_28 = arith.constant 4 : index
      %c3_29 = arith.constant 3 : index
      %c0_30 = arith.constant 0 : index
      %37 = vector.load %arg2[%c0_27, %c4_28, %c3_29, %c0_30] : memref<1x22x22x128xf32, #tpu.memory_space<vmem>>, vector<1x16x16x128xf32>
      %38 = vector.shape_cast %37 : vector<1x16x16x128xf32> to vector<16x16x128xf32>
      %39 = vector.shape_cast %38 : vector<16x16x128xf32> to vector<256x128xf32>
      %40 = arith.truncf %39 : vector<256x128xf32> to vector<256x128xbf16>
      %c0_31 = arith.constant 0 : index
      %c4_32 = arith.constant 4 : index
      %c4_33 = arith.constant 4 : index
      %c0_34 = arith.constant 0 : index
      %41 = vector.load %arg2[%c0_31, %c4_32, %c4_33, %c0_34] : memref<1x22x22x128xf32, #tpu.memory_space<vmem>>, vector<1x16x16x128xf32>
      %42 = vector.shape_cast %41 : vector<1x16x16x128xf32> to vector<16x16x128xf32>
      %43 = vector.shape_cast %42 : vector<16x16x128xf32> to vector<256x128xf32>
      %44 = arith.truncf %43 : vector<256x128xf32> to vector<256x128xbf16>
      %45 = tpu.concatenate %12, %16, %20, %24, %28, %32, %36, %40, %44 in 1 : vector<256x128xbf16>, vector<256x128xbf16>, vector<256x128xbf16>, vector<256x128xbf16>, vector<256x128xbf16>, vector<256x128xbf16>, vector<256x128xbf16>, vector<256x128xbf16>, vector<256x128xbf16> -> vector<256x1152xbf16>
      %c0_35 = arith.constant 0 : index
      %c0_36 = arith.constant 0 : index
      %c0_37 = arith.constant 0 : index
      %46 = vector.load %arg3[%c0_35, %c0_36, %c0_37] : memref<1x1152x512xbf16, #tpu.memory_space<vmem>>, vector<1x1152x512xbf16>
      %47 = vector.shape_cast %46 : vector<1x1152x512xbf16> to vector<1152x512xbf16>
      %cst = arith.constant dense<0.000000e+00> : vector<256x512xf32>
      %48 = tpu.matmul %45, %47, %cst {dimension_numbers = #tpu.dot_dimension_numbers<[1], [0], [0], [1], [0, 0, 1, 1], [], []>} : vector<256x1152xbf16>, vector<1152x512xbf16>, vector<256x512xf32> -> vector<256x512xf32>
      %c0_38 = arith.constant 0 : index
      %c0_39 = arith.constant 0 : index
      %c0_40 = arith.constant 0 : index
      %49 = vector.load %arg4[%c0_38, %c0_39, %c0_40] : memref<1x1x512xf32, #tpu.memory_space<vmem>>, vector<1x1x512xf32>
      %50 = vector.shape_cast %49 : vector<1x1x512xf32> to vector<1x512xf32>
      %51 = vector.broadcast %50 : vector<1x512xf32> to vector<256x512xf32>
      %52 = arith.addf %48, %51 : vector<256x512xf32>
      %cst_41 = arith.constant 0.000000e+00 : f32
      %53 = vector.broadcast %cst_41 : f32 to vector<256x512xf32>
      %54 = arith.maximumf %52, %53 : vector<256x512xf32>
      %55 = arith.truncf %54 : vector<256x512xf32> to vector<256x512xbf16>
      %c0_42 = arith.constant 0 : index
      %c0_43 = arith.constant 0 : index
      %c0_44 = arith.constant 0 : index
      %c0_45 = arith.constant 0 : index
      %56 = vector.load %arg5[%c0_42, %c0_43, %c0_44, %c0_45] : memref<1x1x256x512xbf16, #tpu.memory_space<vmem>>, vector<1x1x256x512xbf16>
      %57 = vector.shape_cast %56 : vector<1x1x256x512xbf16> to vector<256x512xbf16>
      %58 = vector.shape_cast %55 : vector<256x512xbf16> to vector<1x1x256x512xbf16>
      tpu.vector_store %arg5[%c0_42, %c0_43, %c0_44, %c0_45], %58 {strides = array<i32>} : memref<1x1x256x512xbf16, #tpu.memory_space<vmem>>, vector<1x1x256x512xbf16>,
    } else {
    }
    %c1_i32 = arith.constant 1 : i32
    %3 = arith.cmpi eq, %arg1, %c1_i32 : i32
    %4 = arith.extui %3 : i1 to i32
    %c0_i32_1 = arith.constant 0 : i32
    %5 = arith.cmpi ne, %4, %c0_i32_1 : i32
    scf.if %5 {
      %c0 = arith.constant 0 : index
      %c1 = arith.constant 1 : index
      %c1_3 = arith.constant 1 : index
      %c0_4 = arith.constant 0 : index
      %9 = vector.load %arg2[%c0, %c1, %c1_3, %c0_4] : memref<1x22x22x128xf32, #tpu.memory_space<vmem>>, vector<1x16x16x128xf32>
      %10 = vector.shape_cast %9 : vector<1x16x16x128xf32> to vector<16x16x128xf32>
      %11 = vector.shape_cast %10 : vector<16x16x128xf32> to vector<256x128xf32>
      %12 = arith.truncf %11 : vector<256x128xf32> to vector<256x128xbf16>
      %c0_5 = arith.constant 0 : index
      %c1_6 = arith.constant 1 : index
      %c3 = arith.constant 3 : index
      %c0_7 = arith.constant 0 : index
      %13 = vector.load %arg2[%c0_5, %c1_6, %c3, %c0_7] : memref<1x22x22x128xf32, #tpu.memory_space<vmem>>, vector<1x16x16x128xf32>
      %14 = vector.shape_cast %13 : vector<1x16x16x128xf32> to vector<16x16x128xf32>
      %15 = vector.shape_cast %14 : vector<16x16x128xf32> to vector<256x128xf32>
      %16 = arith.truncf %15 : vector<256x128xf32> to vector<256x128xbf16>
      %c0_8 = arith.constant 0 : index
      %c1_9 = arith.constant 1 : index
      %c5 = arith.constant 5 : index
      %c0_10 = arith.constant 0 : index
      %17 = vector.load %arg2[%c0_8, %c1_9, %c5, %c0_10] : memref<1x22x22x128xf32, #tpu.memory_space<vmem>>, vector<1x16x16x128xf32>
      %18 = vector.shape_cast %17 : vector<1x16x16x128xf32> to vector<16x16x128xf32>
      %19 = vector.shape_cast %18 : vector<16x16x128xf32> to vector<256x128xf32>
      %20 = arith.truncf %19 : vector<256x128xf32> to vector<256x128xbf16>
      %c0_11 = arith.constant 0 : index
      %c3_12 = arith.constant 3 : index
      %c1_13 = arith.constant 1 : index
      %c0_14 = arith.constant 0 : index
      %21 = vector.load %arg2[%c0_11, %c3_12, %c1_13, %c0_14] : memref<1x22x22x128xf32, #tpu.memory_space<vmem>>, vector<1x16x16x128xf32>
      %22 = vector.shape_cast %21 : vector<1x16x16x128xf32> to vector<16x16x128xf32>
      %23 = vector.shape_cast %22 : vector<16x16x128xf32> to vector<256x128xf32>
      %24 = arith.truncf %23 : vector<256x128xf32> to vector<256x128xbf16>
      %c0_15 = arith.constant 0 : index
      %c3_16 = arith.constant 3 : index
      %c3_17 = arith.constant 3 : index
      %c0_18 = arith.constant 0 : index
      %25 = vector.load %arg2[%c0_15, %c3_16, %c3_17, %c0_18] : memref<1x22x22x128xf32, #tpu.memory_space<vmem>>, vector<1x16x16x128xf32>
      %26 = vector.shape_cast %25 : vector<1x16x16x128xf32> to vector<16x16x128xf32>
      %27 = vector.shape_cast %26 : vector<16x16x128xf32> to vector<256x128xf32>
      %28 = arith.truncf %27 : vector<256x128xf32> to vector<256x128xbf16>
      %c0_19 = arith.constant 0 : index
      %c3_20 = arith.constant 3 : index
      %c5_21 = arith.constant 5 : index
      %c0_22 = arith.constant 0 : index
      %29 = vector.load %arg2[%c0_19, %c3_20, %c5_21, %c0_22] : memref<1x22x22x128xf32, #tpu.memory_space<vmem>>, vector<1x16x16x128xf32>
      %30 = vector.shape_cast %29 : vector<1x16x16x128xf32> to vector<16x16x128xf32>
      %31 = vector.shape_cast %30 : vector<16x16x128xf32> to vector<256x128xf32>
      %32 = arith.truncf %31 : vector<256x128xf32> to vector<256x128xbf16>
      %c0_23 = arith.constant 0 : index
      %c5_24 = arith.constant 5 : index
      %c1_25 = arith.constant 1 : index
      %c0_26 = arith.constant 0 : index
      %33 = vector.load %arg2[%c0_23, %c5_24, %c1_25, %c0_26] : memref<1x22x22x128xf32, #tpu.memory_space<vmem>>, vector<1x16x16x128xf32>
      %34 = vector.shape_cast %33 : vector<1x16x16x128xf32> to vector<16x16x128xf32>
      %35 = vector.shape_cast %34 : vector<16x16x128xf32> to vector<256x128xf32>
      %36 = arith.truncf %35 : vector<256x128xf32> to vector<256x128xbf16>
      %c0_27 = arith.constant 0 : index
      %c5_28 = arith.constant 5 : index
      %c3_29 = arith.constant 3 : index
      %c0_30 = arith.constant 0 : index
      %37 = vector.load %arg2[%c0_27, %c5_28, %c3_29, %c0_30] : memref<1x22x22x128xf32, #tpu.memory_space<vmem>>, vector<1x16x16x128xf32>
      %38 = vector.shape_cast %37 : vector<1x16x16x128xf32> to vector<16x16x128xf32>
      %39 = vector.shape_cast %38 : vector<16x16x128xf32> to vector<256x128xf32>
      %40 = arith.truncf %39 : vector<256x128xf32> to vector<256x128xbf16>
      %c0_31 = arith.constant 0 : index
      %c5_32 = arith.constant 5 : index
      %c5_33 = arith.constant 5 : index
      %c0_34 = arith.constant 0 : index
      %41 = vector.load %arg2[%c0_31, %c5_32, %c5_33, %c0_34] : memref<1x22x22x128xf32, #tpu.memory_space<vmem>>, vector<1x16x16x128xf32>
      %42 = vector.shape_cast %41 : vector<1x16x16x128xf32> to vector<16x16x128xf32>
      %43 = vector.shape_cast %42 : vector<16x16x128xf32> to vector<256x128xf32>
      %44 = arith.truncf %43 : vector<256x128xf32> to vector<256x128xbf16>
      %45 = tpu.concatenate %12, %16, %20, %24, %28, %32, %36, %40, %44 in 1 : vector<256x128xbf16>, vector<256x128xbf16>, vector<256x128xbf16>, vector<256x128xbf16>, vector<256x128xbf16>, vector<256x128xbf16>, vector<256x128xbf16>, vector<256x128xbf16>, vector<256x128xbf16> -> vector<256x1152xbf16>
      %c0_35 = arith.constant 0 : index
      %c0_36 = arith.constant 0 : index
      %c0_37 = arith.constant 0 : index
      %46 = vector.load %arg3[%c0_35, %c0_36, %c0_37] : memref<1x1152x512xbf16, #tpu.memory_space<vmem>>, vector<1x1152x512xbf16>
      %47 = vector.shape_cast %46 : vector<1x1152x512xbf16> to vector<1152x512xbf16>
      %cst = arith.constant dense<0.000000e+00> : vector<256x512xf32>
      %48 = tpu.matmul %45, %47, %cst {dimension_numbers = #tpu.dot_dimension_numbers<[1], [0], [0], [1], [0, 0, 1, 1], [], []>} : vector<256x1152xbf16>, vector<1152x512xbf16>, vector<256x512xf32> -> vector<256x512xf32>
      %c0_38 = arith.constant 0 : index
      %c0_39 = arith.constant 0 : index
      %c0_40 = arith.constant 0 : index
      %49 = vector.load %arg4[%c0_38, %c0_39, %c0_40] : memref<1x1x512xf32, #tpu.memory_space<vmem>>, vector<1x1x512xf32>
      %50 = vector.shape_cast %49 : vector<1x1x512xf32> to vector<1x512xf32>
      %51 = vector.broadcast %50 : vector<1x512xf32> to vector<256x512xf32>
      %52 = arith.addf %48, %51 : vector<256x512xf32>
      %cst_41 = arith.constant 0.000000e+00 : f32
      %53 = vector.broadcast %cst_41 : f32 to vector<256x512xf32>
      %54 = arith.maximumf %52, %53 : vector<256x512xf32>
      %55 = arith.truncf %54 : vector<256x512xf32> to vector<256x512xbf16>
      %c0_42 = arith.constant 0 : index
      %c0_43 = arith.constant 0 : index
      %c0_44 = arith.constant 0 : index
      %c0_45 = arith.constant 0 : index
      %56 = vector.load %arg5[%c0_42, %c0_43, %c0_44, %c0_45] : memref<1x1x256x512xbf16, #tpu.memory_space<vmem>>, vector<1x1x256x512xbf16>
      %57 = vector.shape_cast %56 : vector<1x1x256x512xbf16> to vector<256x512xbf16>
      %58 = vector.shape_cast %55 : vector<256x512xbf16> to vector<1x1x256x512xbf16>
      tpu.vector_store %arg5[%c0_42, %c0_43, %c0_44, %c0_45], %58 {strides = array<i32>} : memref<1x1x256x512xbf16, #tpu.memory_space<vmem>>, vector<1x1x256x512xbf16>,
    } else {
    }
    %c2_i32 = arith.constant 2 : i32
    %6 = arith.cmpi eq, %arg1, %c2_i32 : i32
    %7 = arith.extui %6 : i1 to i32
    %c0_i32_2 = arith.constant 0 : i32
    %8 = arith.cmpi ne, %7, %c0_i32_2 : i32
    scf.if %8 {
      %c0 = arith.constant 0 : index
      %c0_3 = arith.constant 0 : index
      %c0_4 = arith.constant 0 : index
      %c0_5 = arith.constant 0 : index
      %9 = vector.load %arg2[%c0, %c0_3, %c0_4, %c0_5] : memref<1x22x22x128xf32, #tpu.memory_space<vmem>>, vector<1x16x16x128xf32>
      %10 = vector.shape_cast %9 : vector<1x16x16x128xf32> to vector<16x16x128xf32>
      %11 = vector.shape_cast %10 : vector<16x16x128xf32> to vector<256x128xf32>
      %12 = arith.truncf %11 : vector<256x128xf32> to vector<256x128xbf16>
      %c0_6 = arith.constant 0 : index
      %c0_7 = arith.constant 0 : index
      %c3 = arith.constant 3 : index
      %c0_8 = arith.constant 0 : index
      %13 = vector.load %arg2[%c0_6, %c0_7, %c3, %c0_8] : memref<1x22x22x128xf32, #tpu.memory_space<vmem>>, vector<1x16x16x128xf32>
      %14 = vector.shape_cast %13 : vector<1x16x16x128xf32> to vector<16x16x128xf32>
      %15 = vector.shape_cast %14 : vector<16x16x128xf32> to vector<256x128xf32>
      %16 = arith.truncf %15 : vector<256x128xf32> to vector<256x128xbf16>
      %c0_9 = arith.constant 0 : index
      %c0_10 = arith.constant 0 : index
      %c6 = arith.constant 6 : index
      %c0_11 = arith.constant 0 : index
      %17 = vector.load %arg2[%c0_9, %c0_10, %c6, %c0_11] : memref<1x22x22x128xf32, #tpu.memory_space<vmem>>, vector<1x16x16x128xf32>
      %18 = vector.shape_cast %17 : vector<1x16x16x128xf32> to vector<16x16x128xf32>
      %19 = vector.shape_cast %18 : vector<16x16x128xf32> to vector<256x128xf32>
      %20 = arith.truncf %19 : vector<256x128xf32> to vector<256x128xbf16>
      %c0_12 = arith.constant 0 : index
      %c3_13 = arith.constant 3 : index
      %c0_14 = arith.constant 0 : index
      %c0_15 = arith.constant 0 : index
      %21 = vector.load %arg2[%c0_12, %c3_13, %c0_14, %c0_15] : memref<1x22x22x128xf32, #tpu.memory_space<vmem>>, vector<1x16x16x128xf32>
      %22 = vector.shape_cast %21 : vector<1x16x16x128xf32> to vector<16x16x128xf32>
      %23 = vector.shape_cast %22 : vector<16x16x128xf32> to vector<256x128xf32>
      %24 = arith.truncf %23 : vector<256x128xf32> to vector<256x128xbf16>
      %c0_16 = arith.constant 0 : index
      %c3_17 = arith.constant 3 : index
      %c3_18 = arith.constant 3 : index
      %c0_19 = arith.constant 0 : index
      %25 = vector.load %arg2[%c0_16, %c3_17, %c3_18, %c0_19] : memref<1x22x22x128xf32, #tpu.memory_space<vmem>>, vector<1x16x16x128xf32>
      %26 = vector.shape_cast %25 : vector<1x16x16x128xf32> to vector<16x16x128xf32>
      %27 = vector.shape_cast %26 : vector<16x16x128xf32> to vector<256x128xf32>
      %28 = arith.truncf %27 : vector<256x128xf32> to vector<256x128xbf16>
      %c0_20 = arith.constant 0 : index
      %c3_21 = arith.constant 3 : index
      %c6_22 = arith.constant 6 : index
      %c0_23 = arith.constant 0 : index
      %29 = vector.load %arg2[%c0_20, %c3_21, %c6_22, %c0_23] : memref<1x22x22x128xf32, #tpu.memory_space<vmem>>, vector<1x16x16x128xf32>
      %30 = vector.shape_cast %29 : vector<1x16x16x128xf32> to vector<16x16x128xf32>
      %31 = vector.shape_cast %30 : vector<16x16x128xf32> to vector<256x128xf32>
      %32 = arith.truncf %31 : vector<256x128xf32> to vector<256x128xbf16>
      %c0_24 = arith.constant 0 : index
      %c6_25 = arith.constant 6 : index
      %c0_26 = arith.constant 0 : index
      %c0_27 = arith.constant 0 : index
      %33 = vector.load %arg2[%c0_24, %c6_25, %c0_26, %c0_27] : memref<1x22x22x128xf32, #tpu.memory_space<vmem>>, vector<1x16x16x128xf32>
      %34 = vector.shape_cast %33 : vector<1x16x16x128xf32> to vector<16x16x128xf32>
      %35 = vector.shape_cast %34 : vector<16x16x128xf32> to vector<256x128xf32>
      %36 = arith.truncf %35 : vector<256x128xf32> to vector<256x128xbf16>
      %c0_28 = arith.constant 0 : index
      %c6_29 = arith.constant 6 : index
      %c3_30 = arith.constant 3 : index
      %c0_31 = arith.constant 0 : index
      %37 = vector.load %arg2[%c0_28, %c6_29, %c3_30, %c0_31] : memref<1x22x22x128xf32, #tpu.memory_space<vmem>>, vector<1x16x16x128xf32>
      %38 = vector.shape_cast %37 : vector<1x16x16x128xf32> to vector<16x16x128xf32>
      %39 = vector.shape_cast %38 : vector<16x16x128xf32> to vector<256x128xf32>
      %40 = arith.truncf %39 : vector<256x128xf32> to vector<256x128xbf16>
      %c0_32 = arith.constant 0 : index
      %c6_33 = arith.constant 6 : index
      %c6_34 = arith.constant 6 : index
      %c0_35 = arith.constant 0 : index
      %41 = vector.load %arg2[%c0_32, %c6_33, %c6_34, %c0_35] : memref<1x22x22x128xf32, #tpu.memory_space<vmem>>, vector<1x16x16x128xf32>
      %42 = vector.shape_cast %41 : vector<1x16x16x128xf32> to vector<16x16x128xf32>
      %43 = vector.shape_cast %42 : vector<16x16x128xf32> to vector<256x128xf32>
      %44 = arith.truncf %43 : vector<256x128xf32> to vector<256x128xbf16>
      %45 = tpu.concatenate %12, %16, %20, %24, %28, %32, %36, %40, %44 in 1 : vector<256x128xbf16>, vector<256x128xbf16>, vector<256x128xbf16>, vector<256x128xbf16>, vector<256x128xbf16>, vector<256x128xbf16>, vector<256x128xbf16>, vector<256x128xbf16>, vector<256x128xbf16> -> vector<256x1152xbf16>
      %c0_36 = arith.constant 0 : index
      %c0_37 = arith.constant 0 : index
      %c0_38 = arith.constant 0 : index
      %46 = vector.load %arg3[%c0_36, %c0_37, %c0_38] : memref<1x1152x512xbf16, #tpu.memory_space<vmem>>, vector<1x1152x512xbf16>
      %47 = vector.shape_cast %46 : vector<1x1152x512xbf16> to vector<1152x512xbf16>
      %cst = arith.constant dense<0.000000e+00> : vector<256x512xf32>
      %48 = tpu.matmul %45, %47, %cst {dimension_numbers = #tpu.dot_dimension_numbers<[1], [0], [0], [1], [0, 0, 1, 1], [], []>} : vector<256x1152xbf16>, vector<1152x512xbf16>, vector<256x512xf32> -> vector<256x512xf32>
      %c0_39 = arith.constant 0 : index
      %c0_40 = arith.constant 0 : index
      %c0_41 = arith.constant 0 : index
      %49 = vector.load %arg4[%c0_39, %c0_40, %c0_41] : memref<1x1x512xf32, #tpu.memory_space<vmem>>, vector<1x1x512xf32>
      %50 = vector.shape_cast %49 : vector<1x1x512xf32> to vector<1x512xf32>
      %51 = vector.broadcast %50 : vector<1x512xf32> to vector<256x512xf32>
      %52 = arith.addf %48, %51 : vector<256x512xf32>
      %cst_42 = arith.constant 0.000000e+00 : f32
      %53 = vector.broadcast %cst_42 : f32 to vector<256x512xf32>
      %54 = arith.maximumf %52, %53 : vector<256x512xf32>
      %55 = arith.truncf %54 : vector<256x512xf32> to vector<256x512xbf16>
      %c0_43 = arith.constant 0 : index
      %c0_44 = arith.constant 0 : index
      %c0_45 = arith.constant 0 : index
      %c0_46 = arith.constant 0 : index
      %56 = vector.load %arg5[%c0_43, %c0_44, %c0_45, %c0_46] : memref<1x1x256x512xbf16, #tpu.memory_space<vmem>>, vector<1x1x256x512xbf16>
      %57 = vector.shape_cast %56 : vector<1x1x256x512xbf16> to vector<256x512xbf16>
      %58 = vector.shape_cast %55 : vector<256x512xbf16> to vector<1x1x256x512xbf16>
      tpu.vector_store %arg5[%c0_43, %c0_44, %c0_45, %c0_46], %58 {strides = array<i32>} : memref<1x1x256x512xbf16, #tpu.memory_space<vmem>>, vector<1x1x256x512xbf16>,
    } else {
    }
    return
  }
  func.func @transform_0(%arg0: i32, %arg1: i32) -> (i32, i32, i32, i32) {
    %c0_i32 = arith.constant 0 : i32
    %c0_i32_0 = arith.constant 0 : i32
    %c0_i32_1 = arith.constant 0 : i32
    %c0_i32_2 = arith.constant 0 : i32
    return %arg0, %c0_i32, %c0_i32_0, %c0_i32_1 : i32, i32, i32, i32
  }
  func.func @transform_1(%arg0: i32, %arg1: i32) -> (i32, i32, i32) {
    %c0_i32 = arith.constant 0 : i32
    %c0_i32_0 = arith.constant 0 : i32
    %c0_i32_1 = arith.constant 0 : i32
    return %arg1, %c0_i32, %c0_i32_0 : i32, i32, i32
  }
  func.func @transform_2(%arg0: i32, %arg1: i32) -> (i32, i32, i32) {
    %c0_i32 = arith.constant 0 : i32
    %c0_i32_0 = arith.constant 0 : i32
    %c0_i32_1 = arith.constant 0 : i32
    return %arg1, %c0_i32, %c0_i32_0 : i32, i32, i32
  }
  func.func @transform_3(%arg0: i32, %arg1: i32) -> (i32, i32, i32, i32) {
    %c0_i32 = arith.constant 0 : i32
    %c0_i32_0 = arith.constant 0 : i32
    %c0_i32_1 = arith.constant 0 : i32
    return %arg1, %arg0, %c0_i32, %c0_i32_0 : i32, i32, i32, i32
  }
}

</mosaic_0001>

<bundles_post_ra>
// kernel: tpu_custom_call.1
= control target key start
LH: loop header
LB: loop body
LE: loop exit
PB: predicated region body
PF: predicated region fallthrough
CT: control target
= control target key end

     0   :  { %s23312_s0 = inlined_call_operand.vmem [shape: f32[2,22,22,128], index: 0, kind: input, shape index: {}]   ;;  %s23313_s1 = inlined_call_operand.hbm [shape: bf16[3,1152,512], index: 1, kind: input, shape index: {}]   ;;  %s23314_s2 = inlined_call_operand.hbm [shape: f32[3,1,512], index: 2, kind: input, shape index: {}]   ;;  %s23315_s3 = inlined_call_operand.hbm [shape: bf16[3,2,256,512], index: 3, kind: output, shape index: {}]  }
   0x1   :  { %23321 = sst [smem:[#allocation15_spill]] %s23313_s1 }
   0x2   :  { %8 = vsyncpa [#allocation3], 0 }
   0x3   :  { %10 = vsyncpa [#allocation3 + $0x1], 0 }
   0x4   :  { %11 = vsyncpa [#allocation6], 0 }
   0x5   :  { %13 = vsyncpa [#allocation6 + $0x1], 0 }
   0x6   :  { %14 = vsyncpa [#allocation4], 0 }
   0x7   :  { %16 = vsyncpa [#allocation4 + $0x1], 0  ;;  %s20074_s12 = smov 0   ;;  %s20076_s13 = smov 0  }
   0x8   :  { %s20078_s14 = smov 0   ;;  %s20080_s15 = smov 0  }
   0x9   :  { %s20082_s16 = smov 0   ;;  %s20084_s17 = smov 0  }
   0xa   :  { %s20086_s18 = smov 0   ;;  %s20088_s19 = smov 0  }
   0xb   :  { %s20090_s20 = smov 0   ;;  %s20092_s21 = smov 0  }
   0xc   :  { %s20094_s22 = smov 0  }
   0xd LB: > { %23322 = sst [smem:[#allocation11_spill]] %s20038_s21  ;;  %s14484_s23 = sadd.s32 4294967295, %s20042_s22   ;;  %s20042_s22 = sphi %s20094_s22, %s22_s22   ;;  %s20038_s21 = sphi %s20092_s21, %s23341_s21   ;;  %s20034_s20 = sphi %s20090_s20, %s23349_s20   ;;  %s20030_s19 = sphi %s20088_s19, %s23339_s19   ;;  %s20026_s18 = sphi %s20086_s18, %s23348_s18   ;;  %s20022_s17 = sphi %s20084_s17, %s23347_s17   ;;  %s20018_s16 = sphi %s20082_s16, %s23346_s16   ;;  %s20014_s15 = sphi %s20080_s15, %s23345_s15   ;;  %s20010_s14 = sphi %s20078_s14, %s23344_s14   ;;  %s20006_s13 = sphi %s20076_s13, %s23343_s13   ;;  %s20002_s12 = sphi %s20074_s12, %s23342_s12  }
   0xe   : > { %s14485_s24 = sadd.s32 4294967294, %s20042_s22   ;;  %s31_s25 = sadd.s32 1, %s20034_s20 }
   0xf   : > { %s34_s26 = sadd.s32 1, %s20038_s21  ;;  %p32_p0 = scmp.ge.s32.totalorder %s31_s25, 3 }
  0x10   : > { %s67_s27 = sadd.s32 1, %s20022_s17  ;;  %p74_p1 = scmp.ne.s32.totalorder %s20022_s17, %s20018_s16 }
  0x11   : > { %p75_p2 = scmp.eq.s32.totalorder %s20042_s22, 0  ;;  %s23351_s25 = smov (%p32_p0, %s31_s25), 0 }
  0x12   : > { %23323 = sst [smem:[#allocation12_spill]] %s23351_s25  ;;  %s23353_s26 = smov (!%p32_p0, %s34_s26), %s20038_s21 }
  0x13   : > { %s64_s28 = ssub.s32 %s20034_s20, %s23351_s25  ;;  %p20140_p3 = por %p75_p2, %p74_p1 }
  0x14   : > { %p36_p4 = scmp.ge.s32.totalorder %s23353_s26, 2  ;;  %p65_p5 = scmp.eq.s32.totalorder %s64_s28, 0 }
  0x15   : > { %p80_p6 = scmp.ne.s32.totalorder %s20018_s16, %s20014_s15  ;;  %p81_p7 = scmp.eq.s32.totalorder %s14484_s23, 0 }
  0x16   : > { %s23355_s26 = smov (%p36_p4, %s23353_s26), 0  ;;  %s121_s7 = sadd.s32 1, %s20010_s14 }
  0x17   : > { %23325 = sst [smem:[#allocation13_spill]] %s23355_s26  ;;  %p20150_p8 = por %p81_p7, %p80_p6 }
  0x18   : > { %s20148_s30 = scalar_select %p65_p5, %s20022_s17, %s67_s27  }
  0x19   : > { %s23327_s4 = scalar_select %p20150_p8, 1, 0 }
  0x1a   : > { %23326 = sst [smem:[#allocation14_spill]] %s20148_s30  ;;  %s117_s5 = ssub.s32 %s20038_s21, %s23355_s26 }
  0x1b   : > { %s118_s6 = sor.u32 %s117_s5, %s64_s28  ;;  %p131_p10 = scmp.ne.s32.totalorder %s20010_s14, %s20006_s13 }
  0x1c   : > { %p119_p9 = scmp.eq.s32.totalorder %s118_s6, 0  ;;  %p132_p11 = scmp.eq.s32.totalorder %s14484_s23, 5 }
  0x1d   : > { %p137_p12 = scmp.ne.s32.totalorder %s20006_s13, %s20002_s12  ;;  %p138_p0 = scmp.eq.s32.totalorder %s14485_s24, 5 }
  0x1e   : > { %s20162_s8 = scalar_select %p119_p9, %s20010_s14, %s121_s7  }
  0x1f   : > { %p20164_p13 = por %p132_p11, %p131_p10  ;;  %p18463_p1 = scmp.lt.s32.totalorder %s20042_s22, 6 }
  0x20   : > { %p20169_p2 = por %p138_p0, %p137_p12  ;;  %s20174_s11 = sand.u32 1, %s20022_s17  }
  0x21   : > { %s23328_s9 = scalar_select %p20164_p13, 1, 0 }
  0x22   : > { %s23329_s10 = scalar_select %p20169_p2, 1, 0 }
  0x23   : > { %s18442_s15 = smul.u32 2304, %s20174_s11  ;;  %p20180_p4 = pnand %p18463_p1, %p20140_p3 }
  0x24   : > { %s18443_s27 = smul.u32 36864, %s20034_s20  ;;  %s23331_s1 = sld [smem:[#allocation15_spill]] }
  0x25   : > { %s170_s6 = scalar_lea.vmem [#allocation2], %s18442_s15  ;;  %s167_s29 = scalar_lea.sflag [#allocation3], %s20174_s11 }
  0x26   : > { %s177_s7 = sshll.u32 %s170_s6, 4  ;;  %p19858_p6 = pneg %p20180_p4  ;;  %s20189_s7 = int_to_ptr.vmem [resolvable:$true] %s177_s7 }
  0x2a   : > { %s20187_s24 = scalar_lea.hbm %s23331_s1, %s18443_s27  ;;  %s19861_s5 = scalar_lea.hbm %s23331_s1, 110592 }
  0x2b   : > { %s19856_s26 = scalar_lea.hbm %s20187_s24, 36864  ;;  %p19862_p10 = scmp.lt.u32.totalorder %s20187_s24, %s23331_s1 }
  0x2c   : > { %p19857_p3 = scmp.ne.s32.totalorder %s20187_s24, %s19856_s26  ;;  %p19863_p11 = scmp.lt.u32.totalorder %s19861_s5, %s19856_s26 }
  0x2d   : > { %p19865_p0 = scmp.lt.u32.totalorder %s19856_s26, %s20187_s24 }
  0x2e   : > { %p19859_p7 = pnand %p19858_p6, %p19857_p3  ;;  %p19864_p12 = por %p19863_p11, %p19862_p10 }
  0x30   : > { %p19860_p9 = pneg %p19859_p7  ;;  %p19866_p1 = por %p19865_p0, %p19864_p12 }
  0x32   : > { %p19867_p5 = pnand %p19866_p1, %p19860_p9 }
  0x34   : > { %19870 = shalt.err (!%p19867_p5)
}
  0x35   : > { %s19871_s15 = scalar_lea.vmem %s20189_s7, 36864  ;;  %s20044_s6 = smov [#allocation2]  }
  0x36   : > { %p19872_p3 = scmp.ne.s32.totalorder %s20189_s7, %s19871_s15  ;;  %s19876_s27 = sshll.u32 %s20044_s6, 4  ;;  %s19877_s27 = int_to_ptr.vmem [resolvable:$false] %s19876_s27 }
  0x37   : > { %s19878_s21 = scalar_lea.vmem %s19877_s27, 73728  ;;  %p19879_p13 = scmp.lt.s32.totalorder %s20189_s7, %s19877_s27 }
  0x38   : > { %p19874_p7 = pnand %p19872_p3, %p19858_p6  ;;  %p19880_p10 = scmp.lt.s32.totalorder %s19878_s21, %s19871_s15 }
  0x3a   : > { %p19875_p2 = pneg %p19874_p7  ;;  %p19881_p11 = por %p19880_p10, %p19879_p13 }
  0x3c   : > { %p19882_p12 = pnand %p19881_p11, %p19875_p2 }
  0x3e   : > { %19885 = shalt.err (!%p19882_p12)
}
  0x3f   : > { %s20045_s25 = smov 256   ;;  %s20046_s26 = smov 16  }
  0x40   : > { %18455 = dma.hbm_to_vmem [thread:$0]  (!%p20180_p4), %s20187_s24, 36864, %s20189_s7, %s167_s29, %s20045_s25, %s20045_s25, %s20046_s26  }
  0x41   : > { %p204_p5 = scmp.lt.s32.totalorder %s20042_s22, 7  ;;  %s14489_s28 = sshll.u32 %s20174_s11, 2 }
  0x42   : > { %s16329_s5 = sshll.u32 %s20034_s20, 6  ;;  %p23332_p13 = scmp.ge.s32.totalorder %s20042_s22, 1 }
  0x43   : > { %s20232_s21 = scalar_lea.hbm %s23314_s2, %s16329_s5  ;;  %s191_s1 = scalar_lea.vmem [#allocation5], %s14489_s28 }
  0x44   : > { %p20225_p2 = pnand %p23332_p13, %p204_p5  ;;  %s199_s30 = sshll.u32 %s191_s1, 4  ;;  %s200_s30 = int_to_ptr.vmem [resolvable:$true] %s199_s30 }
  0x45   : > { %s188_s24 = scalar_lea.sflag [#allocation6], %s20174_s11  ;;  %s19886_s7 = scalar_lea.hbm %s20232_s21, 64 }
  0x46   : > { %s23333_s15 = scalar_select %p20225_p2, 1, 0 }
  0x47   : > { %p19887_p9 = scmp.ne.s32.totalorder %s20232_s21, %s19886_s7  ;;  %s19891_s26 = scalar_lea.hbm %s23314_s2, 192 }
  0x48   : > { %p19892_p3 = scmp.lt.u32.totalorder %s20232_s21, %s23314_s2  ;;  %p19893_p7 = scmp.lt.u32.totalorder %s19891_s26, %s19886_s7 }
  0x49   : > { %p19889_p0 = pnand %p19887_p9, %p19858_p6  ;;  %p19895_p11 = scmp.lt.u32.totalorder %s19886_s7, %s20232_s21 }
  0x4a   : > { %p19894_p10 = por %p19893_p7, %p19892_p3 }
  0x4b   : > { %p19890_p1 = pneg %p19889_p0 }
  0x4c   : > { %p19896_p12 = por %p19895_p11, %p19894_p10 }
  0x4e   : > { %p19897_p5 = pnand %p19896_p12, %p19890_p1 }
  0x50   : > { %19900 = shalt.err (!%p19897_p5)
}
  0x51   : > { %s19901_s1 = scalar_lea.vmem %s200_s30, 64  ;;  %s20047_s11 = smov [#allocation5]  }
  0x52   : > { %p19902_p13 = scmp.ne.s32.totalorder %s200_s30, %s19901_s1  ;;  %s19906_s28 = sshll.u32 %s20047_s11, 4  ;;  %s19907_s28 = int_to_ptr.vmem [resolvable:$false] %s19906_s28 }
  0x53   : > { %s19908_s27 = scalar_lea.vmem %s19907_s28, 128  ;;  %p19909_p8 = scmp.lt.s32.totalorder %s200_s30, %s19907_s28 }
  0x54   : > { %p19904_p9 = pnand %p19902_p13, %p19858_p6  ;;  %p19910_p2 = scmp.lt.s32.totalorder %s19908_s27, %s19901_s1 }
  0x56   : > { %p19905_p0 = pneg %p19904_p9  ;;  %p19911_p3 = por %p19910_p2, %p19909_p8 }
  0x58   : > { %p19912_p7 = pnand %p19911_p3, %p19905_p0 }
  0x5a   : > { %19915 = shalt.err (!%p19912_p7)
}
  0x5b   : > { %18458 = dma.hbm_to_vmem [thread:$0]  (!%p20180_p4), %s20232_s21, 64, %s200_s30, %s188_s24  }
  0x5c   : > { %p23334_p1 = scmp.ne.s32.totalorder %s23333_s15, 0 }
  0x5d   : > { %s210_s7 = sand.u32 (!%p23334_p1), 1, %s20018_s16   ;;  %p23335_p6 = scmp.ne.s32.totalorder (!%p23334_p1), %s23327_s4, 0 }
  0x5e   : > { %208 = sbr.rel (%p23334_p1) target bundleno = 2895 (0xb4f), region = 32  ;;  %s211_s25 = scalar_lea.sflag (!%p23334_p1), [#allocation3], %s210_s7 }
  0x5f   : > { %s18444_s29 = smul.u32 (!%p23334_p1), 2304, %s210_s7 }
  0x61   : > { %s20257_s26 = scalar_lea.vmem (!%p23334_p1), [#allocation2], %s18444_s29 }
  0x65   : > { %19989 = dma.done.wait (%p23335_p6), %s211_s25, 36864  }
  0x66   : > { %19991 = vsyncadd (%p23335_p6), %s211_s25, 4294930432  ;;  %s14493_s5 = sshll.u32 %s210_s7, 2  ;;  %s220_s23 = scalar_lea.sflag [#allocation6], %s210_s7 }
  0x67   : > { %s20263_s6 = scalar_lea.vmem [#allocation5], %s14493_s5 }
  0x68   : > { %19993 = dma.done.wait (%p23335_p6), %s220_s23, 64  }
  0x69   : > { %19995 = vsyncadd (%p23335_p6), %s220_s23, 4294967232  ;;  %s253_s30 = sand.u32 1, %s20006_s13   ;;  %p256_p8 = scmp.lt.s32.totalorder %s20030_s19, 1 }
  0x6a   : > { %s14494_s15 = sshll.u32 %s253_s30, 9  ;;  %p14496_p4 = scmp.ne.s32.totalorder %s20026_s18, 0 }
  0x6b   : > { %s257_s21 = scalar_select %p256_p8, %s20030_s19, 1 }
  0x6c   : > { %s20279_s27 = scalar_lea.vmem [#allocation7], %s14494_s15  ;;  %265 = sbr.rel (%p14496_p4) target bundleno = 1027 (0x403), region = 44  ;;  %v18560_v0 = vld [vmem:[%s20257_s26 + $0x4] ss:$16 sps:$4 sm:$0xff] (!%p14496_p4)   ;;  %v18562_v1 = vld [vmem:[%s20257_s26 + $0xc] ss:$16 sps:$4 sm:$0xff] (!%p14496_p4)  }
  0x6d   : > { %s18445_s24 = smul.u32 528, %s257_s21  ;;  %2451 = vmatprep.subr.bf16.mxu0 (!%p14496_p4), %v18560_v0  ;;  %v18564_v2 = vld [vmem:[%s20257_s26] ss:$16 sps:$4 sm:$0xff] (!%p14496_p4)   ;;  %v18565_v3 = vld [vmem:[%s20257_s26 + $0x8] ss:$16 sps:$4 sm:$0xff] (!%p14496_p4)   ;;  %3416 = vmatprep.subr.bf16.mxu1 (!%p14496_p4), %v18562_v1 }
  0x6e   : > { %v18566_v4 = vld [vmem:[%s20257_s26 + $0x24] ss:$16 sps:$4 sm:$0xff] (!%p14496_p4)   ;;  %2452 = vmatpush1.bf16.msra.mxu0 (!%p14496_p4), %v18564_v2  ;;  %3417 = vmatpush1.bf16.msra.mxu1 (!%p14496_p4), %v18565_v3  ;;  %v18568_v5 = vld [vmem:[%s20257_s26 + $0x2c] ss:$16 sps:$4 sm:$0xff] (!%p14496_p4)   ;;  %v18570_v6 = vld [vmem:[%s20257_s26 + $0x20] ss:$16 sps:$4 sm:$0xff] (!%p14496_p4)  }
  0x6f   : > { %s20277_s28 = scalar_lea.vmem %s23312_s0, %s18445_s24  ;;  %2453 = vmatprep.subr.bf16.mxu0 (!%p14496_p4), %v18566_v4  ;;  %v18571_v7 = vld [vmem:[%s20257_s26 + $0x28] ss:$16 sps:$4 sm:$0xff] (!%p14496_p4)   ;;  %3418 = vmatprep.subr.bf16.mxu1 (!%p14496_p4), %v18568_v5  ;;  %v18572_v8 = vld [vmem:[%s20257_s26 + $0x44] ss:$16 sps:$4 sm:$0xff] (!%p14496_p4)   ;;  %v18574_v9 = vld [vmem:[%s20257_s26 + $0x4c] ss:$16 sps:$4 sm:$0xff] (!%p14496_p4)  }
  0x70   : > { %v18576_v10 = vld [vmem:[%s20257_s26 + $0x40] ss:$16 sps:$4 sm:$0xff] (!%p14496_p4)   ;;  %v18577_v11 = vld [vmem:[%s20257_s26 + $0x48] ss:$16 sps:$4 sm:$0xff] (!%p14496_p4)   ;;  %v18578_v12 = vld [vmem:[%s20257_s26 + $0x64] ss:$16 sps:$4 sm:$0xff] (!%p14496_p4)  }
  0x71   : > { %v18580_v13 = vld [vmem:[%s20257_s26 + $0x6c] ss:$16 sps:$4 sm:$0xff] (!%p14496_p4)   ;;  %v18582_v14 = vld [vmem:[%s20257_s26 + $0x60] ss:$16 sps:$4 sm:$0xff] (!%p14496_p4)   ;;  %v18583_v15 = vld [vmem:[%s20257_s26 + $0x68] ss:$16 sps:$4 sm:$0xff] (!%p14496_p4)  }
  0x72   : > { %2454 = vmatpush1.bf16.msra.mxu0 (!%p14496_p4), %v18570_v6  ;;  %3419 = vmatpush1.bf16.msra.mxu1 (!%p14496_p4), %v18571_v7  ;;  %v18584_v16 = vld [vmem:[%s20257_s26 + $0x84] ss:$16 sps:$4 sm:$0xff] (!%p14496_p4)   ;;  %v18586_v17 = vld [vmem:[%s20257_s26 + $0x8c] ss:$16 sps:$4 sm:$0xff] (!%p14496_p4)   ;;  %v18588_v18 = vld [vmem:[%s20257_s26 + $0x80] ss:$16 sps:$4 sm:$0xff] (!%p14496_p4)  }
  0x73   : > { %2455 = vmatprep.subr.bf16.mxu0 %v18572_v8  ;;  %3420 = vmatprep.subr.bf16.mxu1 %v18574_v9  ;;  %v18589_v19 = vld [vmem:[%s20257_s26 + $0x88] ss:$16 sps:$4 sm:$0xff]   ;;  %v18590_v20 = vld [vmem:[%s20257_s26 + $0xa4] ss:$16 sps:$4 sm:$0xff]   ;;  %v18592_v21 = vld [vmem:[%s20257_s26 + $0xac] ss:$16 sps:$4 sm:$0xff]  }
  0x74   : > { %v18594_v22 = vld [vmem:[%s20257_s26 + $0xa0] ss:$16 sps:$4 sm:$0xff]   ;;  %v18595_v23 = vld [vmem:[%s20257_s26 + $0xa8] ss:$16 sps:$4 sm:$0xff]   ;;  %v18596_v24 = vld [vmem:[%s20257_s26 + $0xc4] ss:$16 sps:$4 sm:$0xff]  }
  0x75   : > { %v18598_v25 = vld [vmem:[%s20257_s26 + $0xcc] ss:$16 sps:$4 sm:$0xff]   ;;  %v18600_v26 = vld [vmem:[%s20257_s26 + $0xc0] ss:$16 sps:$4 sm:$0xff]   ;;  %v18601_v27 = vld [vmem:[%s20257_s26 + $0xc8] ss:$16 sps:$4 sm:$0xff]  }
  0x76   : > { %2456 = vmatpush1.bf16.msra.mxu0 %v18576_v10  ;;  %3421 = vmatpush1.bf16.msra.mxu1 %v18577_v11  ;;  %v18602_v28 = vld [vmem:[%s20257_s26 + $0xe4] ss:$16 sps:$4 sm:$0xff]   ;;  %v18604_v29 = vld [vmem:[%s20257_s26 + $0xec] ss:$16 sps:$4 sm:$0xff]   ;;  %v18606_v30 = vld [vmem:[%s20257_s26 + $0xe0] ss:$16 sps:$4 sm:$0xff]  }
  0x77   : > { %2457 = vmatprep.subr.bf16.mxu0 %v18578_v12  ;;  %3422 = vmatprep.subr.bf16.mxu1 %v18580_v13  ;;  %v18607_v31 = vld [vmem:[%s20257_s26 + $0xe8] ss:$16 sps:$4 sm:$0xff]   ;;  %v18608_v32 = vld [vmem:[%s20257_s26 + $0x104] ss:$16 sps:$4 sm:$0xff]   ;;  %v18610_v33 = vld [vmem:[%s20257_s26 + $0x10c] ss:$16 sps:$4 sm:$0xff]  }
  0x78   : > { %v18612_v34 = vld [vmem:[%s20257_s26 + $0x100] ss:$16 sps:$4 sm:$0xff]   ;;  %v18613_v35 = vld [vmem:[%s20257_s26 + $0x108] ss:$16 sps:$4 sm:$0xff]   ;;  %v18614_v36 = vld [vmem:[%s20257_s26 + $0x124] ss:$16 sps:$4 sm:$0xff]  }
  0x79   : > { %v18616_v37 = vld [vmem:[%s20257_s26 + $0x12c] ss:$16 sps:$4 sm:$0xff]   ;;  %v18618_v38 = vld [vmem:[%s20257_s26 + $0x120] ss:$16 sps:$4 sm:$0xff]   ;;  %v18619_v39 = vld [vmem:[%s20257_s26 + $0x128] ss:$16 sps:$4 sm:$0xff]  }
  0x7a   : > { %2458 = vmatpush1.bf16.msra.mxu0 %v18582_v14  ;;  %3423 = vmatpush1.bf16.msra.mxu1 %v18583_v15  ;;  %v18620_v40 = vld [vmem:[%s20257_s26 + $0x144] ss:$16 sps:$4 sm:$0xff]   ;;  %v18622_v41 = vld [vmem:[%s20257_s26 + $0x14c] ss:$16 sps:$4 sm:$0xff]   ;;  %v18624_v42 = vld [vmem:[%s20257_s26 + $0x140] ss:$16 sps:$4 sm:$0xff]  }
  0x7b   : > { %2459 = vmatprep.subr.bf16.mxu0 %v18584_v16  ;;  %3424 = vmatprep.subr.bf16.mxu1 %v18586_v17  ;;  %v18625_v43 = vld [vmem:[%s20257_s26 + $0x148] ss:$16 sps:$4 sm:$0xff]   ;;  %v18626_v44 = vld [vmem:[%s20257_s26 + $0x164] ss:$16 sps:$4 sm:$0xff]   ;;  %v18628_v45 = vld [vmem:[%s20257_s26 + $0x16c] ss:$16 sps:$4 sm:$0xff]  }
  0x7c   : > { %v14529_v46 = vld [vmem:[%s20277_s28 + $0x33] sm:$0xff]  ;;  %v14530_v49 = vld [vmem:[%s20277_s28 + $0x3b] sm:$0xff]  ;;  %v14531_v7 = vld [vmem:[%s20277_s28 + $0x4b] sm:$0xff] }
  0x7d   : > { %v18630_v47 = vld [vmem:[%s20257_s26 + $0x160] ss:$16 sps:$4 sm:$0xff]   ;;  %v18631_v48 = vld [vmem:[%s20257_s26 + $0x168] ss:$16 sps:$4 sm:$0xff]   ;;  %v18632_v50 = vld [vmem:[%s20257_s26 + $0x184] ss:$16 sps:$4 sm:$0xff]   ;;  %v347_v51 = vpack.c.bf16 %v14530_v49, %v14529_v46 }
  0x7e   : > { %2460 = vmatpush1.bf16.msra.mxu0 %v18588_v18  ;;  %3425 = vmatpush1.bf16.msra.mxu1 %v18589_v19  ;;  %v18634_v52 = vld [vmem:[%s20257_s26 + $0x18c] ss:$16 sps:$4 sm:$0xff]   ;;  %v18636_v53 = vld [vmem:[%s20257_s26 + $0x180] ss:$16 sps:$4 sm:$0xff]   ;;  %v18637_v54 = vld [vmem:[%s20257_s26 + $0x188] ss:$16 sps:$4 sm:$0xff]  }
  0x7f   : > { %2461 = vmatprep.subr.bf16.mxu0 %v18590_v20  ;;  %3426 = vmatprep.subr.bf16.mxu1 %v18592_v21  ;;  %v18638_v55 = vld [vmem:[%s20257_s26 + $0x1a4] ss:$16 sps:$4 sm:$0xff]   ;;  %v18640_v56 = vld [vmem:[%s20257_s26 + $0x1ac] ss:$16 sps:$4 sm:$0xff]   ;;  %v18642_v57 = vld [vmem:[%s20257_s26 + $0x1a0] ss:$16 sps:$4 sm:$0xff]  }
  0x80   : > { %2483 = vmatprep.mubr.bf16.mxu0 %v347_v51  ;;  %3448 = vmatprep.mubr.bf16.mxu1 %v347_v51  ;;  %v18643_v58 = vld [vmem:[%s20257_s26 + $0x1a8] ss:$16 sps:$4 sm:$0xff]   ;;  %v18644_v59 = vld [vmem:[%s20257_s26 + $0x1c4] ss:$16 sps:$4 sm:$0xff]   ;;  %v18646_v60 = vld [vmem:[%s20257_s26 + $0x1cc] ss:$16 sps:$4 sm:$0xff]  }
  0x81   : > { %v18648_v61 = vld [vmem:[%s20257_s26 + $0x1c0] ss:$16 sps:$4 sm:$0xff]   ;;  %v18649_v62 = vld [vmem:[%s20257_s26 + $0x1c8] ss:$16 sps:$4 sm:$0xff]   ;;  %v18650_v63 = vld [vmem:[%s20257_s26 + $0x1e4] ss:$16 sps:$4 sm:$0xff]  }
  0x82   : > { %2462 = vmatpush1.bf16.msra.mxu0 %v18594_v22  ;;  %3427 = vmatpush1.bf16.msra.mxu1 %v18595_v23  ;;  %v18652_v0 = vld [vmem:[%s20257_s26 + $0x1ec] ss:$16 sps:$4 sm:$0xff]   ;;  %v18654_v1 = vld [vmem:[%s20257_s26 + $0x1e0] ss:$16 sps:$4 sm:$0xff]   ;;  %v18655_v2 = vld [vmem:[%s20257_s26 + $0x1e8] ss:$16 sps:$4 sm:$0xff]  }
  0x83   : > { %2463 = vmatprep.subr.bf16.mxu0 %v18596_v24  ;;  %3428 = vmatprep.subr.bf16.mxu1 %v18598_v25  ;;  %v14497_v3 = vld [vmem:[%s20277_s28 + $0x32] sm:$0xff]  ;;  %v14498_v4 = vld [vmem:[%s20277_s28 + $0x3a] sm:$0xff]  ;;  %v14499_v13 = vld [vmem:[%s20277_s28 + $0x4a] sm:$0xff] }
  0x84   : > { %v18658_v5 = vld [vmem:[%s20257_s26 + $0x204] ss:$16 sps:$4 sm:$0xff]   ;;  %v18661_v6 = vld [vmem:[%s20257_s26 + $0x20c] ss:$16 sps:$4 sm:$0xff]   ;;  %v299_v9 = vpack.c.bf16 %v14498_v4, %v14497_v3  ;;  %v18656_v10 = vld [vmem:[%s20257_s26 + $0x200] ss:$16 sps:$4 sm:$0xff]  }
  0x85   : > { %v14532_v8 = vld [vmem:[%s20277_s28 + $0x53] sm:$0xff]  ;;  %v18667_v17 = vld [vmem:[%s20257_s26 + $0x22c] ss:$16 sps:$4 sm:$0xff]   ;;  %v14533_v19 = vld [vmem:[%s20277_s28 + $0x63] sm:$0xff] }
  0x86   : > { %2464 = vmatpush1.bf16.msra.mxu0 %v18600_v26  ;;  %3429 = vmatpush1.bf16.msra.mxu1 %v18601_v27  ;;  %v18659_v11 = vld [vmem:[%s20257_s26 + $0x208] ss:$16 sps:$4 sm:$0xff]   ;;  %v348_v12 = vpack.c.bf16 %v14532_v8, %v14531_v7  ;;  %v18662_v15 = vld [vmem:[%s20257_s26 + $0x220] ss:$16 sps:$4 sm:$0xff]   ;;  %v18664_v16 = vld [vmem:[%s20257_s26 + $0x224] ss:$16 sps:$4 sm:$0xff]  }
  0x87   : > { %2465 = vmatprep.subr.bf16.mxu0 %v18602_v28  ;;  %3430 = vmatprep.subr.bf16.mxu1 %v18604_v29  ;;  %v14500_v14 = vld [vmem:[%s20277_s28 + $0x52] sm:$0xff]  ;;  %v18673_v22 = vld [vmem:[%s20257_s26 + $0x24c] ss:$16 sps:$4 sm:$0xff]   ;;  %v14501_v27 = vld [vmem:[%s20277_s28 + $0x62] sm:$0xff] }
  0x88   : > { %v18665_v18 = vld [vmem:[%s20257_s26 + $0x228] ss:$16 sps:$4 sm:$0xff]   ;;  %v18670_v21 = vld [vmem:[%s20257_s26 + $0x244] ss:$16 sps:$4 sm:$0xff]   ;;  %v20366_v23 = vpack.c.bf16 %v14500_v14, %v14499_v13  ;;  %v18668_v25 = vld [vmem:[%s20257_s26 + $0x240] ss:$16 sps:$4 sm:$0xff]  }
  0x89   : > { %v14534_v20 = vld [vmem:[%s20277_s28 + $0x6b] sm:$0xff]  ;;  %v18676_v28 = vld [vmem:[%s20257_s26 + $0x264] ss:$16 sps:$4 sm:$0xff]   ;;  %v14538_v46 = vld [vmem:[%s20277_s28 + $0x9b] sm:$0xff] }
  0x8a   : > { %2466 = vmatpush1.bf16.msra.mxu0 %v18606_v30  ;;  %3431 = vmatpush1.bf16.msra.mxu1 %v18607_v31  ;;  %v349_v24 = vpack.c.bf16 %v14534_v20, %v14533_v19  ;;  %v18671_v26 = vld [vmem:[%s20257_s26 + $0x248] ss:$16 sps:$4 sm:$0xff]   ;;  %v18679_v29 = vld [vmem:[%s20257_s26 + $0x26c] ss:$16 sps:$4 sm:$0xff]   ;;  %v18694_v49 = vld [vmem:[%s20257_s26 + $0x2c4] ss:$16 sps:$4 sm:$0xff]  }
  0x8b   : > { %2467 = vmatprep.subr.bf16.mxu0 %v18608_v32  ;;  %3432 = vmatprep.subr.bf16.mxu1 %v18610_v33  ;;  %v14502_v30 = vld [vmem:[%s20277_s28 + $0x6a] sm:$0xff]  ;;  %v14535_v31 = vld [vmem:[%s20277_s28 + $0x7b] sm:$0xff]  ;;  %v14508_v8 = vld [vmem:[%s20277_s28 + $0xb2] sm:$0xff] }
  0x8c   : > { %v14536_v32 = vld [vmem:[%s20277_s28 + $0x83] sm:$0xff]  ;;  %v18715_v7 = vld [vmem:[%s20257_s26 + $0x32c] ss:$16 sps:$4 sm:$0xff]  }
  0x8d   : > { %v18674_v33 = vld [vmem:[%s20257_s26 + $0x260] ss:$16 sps:$4 sm:$0xff]   ;;  %v18707_v4 = vld [vmem:[%s20257_s26 + $0x308] ss:$16 sps:$4 sm:$0xff]   ;;  %v18718_v13 = vld [vmem:[%s20257_s26 + $0x344] ss:$16 sps:$4 sm:$0xff]  }
  0x8e   : > { %2468 = vmatpush1.bf16.msra.mxu0 %v18612_v34  ;;  %3433 = vmatpush1.bf16.msra.mxu1 %v18613_v35  ;;  %v18677_v34 = vld [vmem:[%s20257_s26 + $0x268] ss:$16 sps:$4 sm:$0xff]   ;;  %v18682_v35 = vld [vmem:[%s20257_s26 + $0x284] ss:$16 sps:$4 sm:$0xff]   ;;  %v18704_v3 = vld [vmem:[%s20257_s26 + $0x300] ss:$16 sps:$4 sm:$0xff]  }
  0x8f   : > { %2469 = vmatprep.subr.bf16.mxu0 %v18614_v36  ;;  %3434 = vmatprep.subr.bf16.mxu1 %v18616_v37  ;;  %v18685_v36 = vld [vmem:[%s20257_s26 + $0x28c] ss:$16 sps:$4 sm:$0xff]   ;;  %v20382_v37 = vpack.c.bf16 %v14502_v30, %v14501_v27  ;;  %v14509_v19 = vld [vmem:[%s20277_s28 + $0xc2] sm:$0xff] }
  0x90   : > { %v18721_v14 = vld [vmem:[%s20257_s26 + $0x34c] ss:$16 sps:$4 sm:$0xff]   ;;  %v18724_v20 = vld [vmem:[%s20257_s26 + $0x364] ss:$16 sps:$4 sm:$0xff]   ;;  %v18725_v27 = vld [vmem:[%s20257_s26 + $0x368] ss:$16 sps:$4 sm:$0xff]  }
  0x92   : > { %2470 = vmatpush1.bf16.msra.mxu0 %v18618_v38  ;;  %3435 = vmatpush1.bf16.msra.mxu1 %v18619_v39  ;;  %v350_v38 = vpack.c.bf16 %v14536_v32, %v14535_v31  ;;  %v18680_v39 = vld [vmem:[%s20257_s26 + $0x280] ss:$16 sps:$4 sm:$0xff]  }
  0x93   : > { %2471 = vmatprep.subr.bf16.mxu0 %v18620_v40  ;;  %3436 = vmatprep.subr.bf16.mxu1 %v18622_v41  ;;  %v18683_v40 = vld [vmem:[%s20257_s26 + $0x288] ss:$16 sps:$4 sm:$0xff]   ;;  %v18728_v32 = vld [vmem:[%s20257_s26 + $0x380] ss:$16 sps:$4 sm:$0xff]  }
  0x94   : > { %v14503_v41 = vld [vmem:[%s20277_s28 + $0x7a] sm:$0xff] }
  0x96   : > { %2472 = vmatpush1.bf16.msra.mxu0 %v18624_v42  ;;  %3437 = vmatpush1.bf16.msra.mxu1 %v18625_v43  ;;  %v18688_v42 = vld [vmem:[%s20257_s26 + $0x2a4] ss:$16 sps:$4 sm:$0xff]   ;;  %v18691_v43 = vld [vmem:[%s20257_s26 + $0x2ac] ss:$16 sps:$4 sm:$0xff]  }
  0x97   : > { %2473 = vmatprep.subr.bf16.mxu0 %v18626_v44  ;;  %3438 = vmatprep.subr.bf16.mxu1 %v18628_v45  ;;  %v14504_v44 = vld [vmem:[%s20277_s28 + $0x82] sm:$0xff]  ;;  %v14537_v45 = vld [vmem:[%s20277_s28 + $0x93] sm:$0xff] }
  0x98   : > { %v20398_v51 = vpack.c.bf16 %v14504_v44, %v14503_v41  ;;  %v18734_v41 = vld [vmem:[%s20257_s26 + $0x3a0] ss:$16 sps:$4 sm:$0xff]   ;;  %v18745_v44 = vld [vmem:[%s20257_s26 + $0x3cc] ss:$16 sps:$4 sm:$0xff]  }
  0x9a   : > { %2474 = vmatpush1.bf16.msra.mxu0 %v18630_v47  ;;  %3439 = vmatpush1.bf16.msra.mxu1 %v18631_v48  ;;  %v18686_v47 = vld [vmem:[%s20257_s26 + $0x2a0] ss:$16 sps:$4 sm:$0xff]   ;;  %v18689_v48 = vld [vmem:[%s20257_s26 + $0x2a8] ss:$16 sps:$4 sm:$0xff]  }
  0x9b   : > { %2475 = vmatprep.subr.bf16.mxu0 %v18632_v50  ;;  %3440 = vmatprep.subr.bf16.mxu1 %v18634_v52  ;;  %v18697_v50 = vld [vmem:[%s20257_s26 + $0x2cc] ss:$16 sps:$4 sm:$0xff]   ;;  %v351_v52 = vpack.c.bf16 %v14538_v46, %v14537_v45 }
  0x9e   : > { %2476 = vmatpush1.bf16.msra.mxu0 %v18636_v53  ;;  %3441 = vmatpush1.bf16.msra.mxu1 %v18637_v54  ;;  %v18692_v53 = vld [vmem:[%s20257_s26 + $0x2c0] ss:$16 sps:$4 sm:$0xff]   ;;  %v18695_v54 = vld [vmem:[%s20257_s26 + $0x2c8] ss:$16 sps:$4 sm:$0xff]  }
  0x9f   : > { %2477 = vmatprep.subr.bf16.mxu0 %v18638_v55  ;;  %3442 = vmatprep.subr.bf16.mxu1 %v18640_v56  ;;  %v14505_v55 = vld [vmem:[%s20277_s28 + $0x92] sm:$0xff] }
  0xa0   : > { %v18700_v56 = vld [vmem:[%s20257_s26 + $0x2e4] ss:$16 sps:$4 sm:$0xff]  }
  0xa2   : > { %2478 = vmatpush1.bf16.msra.mxu0 %v18642_v57  ;;  %3443 = vmatpush1.bf16.msra.mxu1 %v18643_v58  ;;  %v18703_v57 = vld [vmem:[%s20257_s26 + $0x2ec] ss:$16 sps:$4 sm:$0xff]  }
  0xa3   : > { %2479 = vmatprep.subr.bf16.mxu0 %v18644_v59  ;;  %3444 = vmatprep.subr.bf16.mxu1 %v18646_v60  ;;  %v14506_v58 = vld [vmem:[%s20277_s28 + $0x9a] sm:$0xff]  ;;  %v14539_v59 = vld [vmem:[%s20277_s28 + $0xab] sm:$0xff] }
  0xa4   : > { %v14540_v60 = vld [vmem:[%s20277_s28 + $0xb3] sm:$0xff] }
  0xa6   : > { %2480 = vmatpush1.bf16.msra.mxu0 %v18648_v61  ;;  %3445 = vmatpush1.bf16.msra.mxu1 %v18649_v62  ;;  %v18698_v61 = vld [vmem:[%s20257_s26 + $0x2e0] ss:$16 sps:$4 sm:$0xff]   ;;  %v18701_v62 = vld [vmem:[%s20257_s26 + $0x2e8] ss:$16 sps:$4 sm:$0xff]  }
  0xa7   : > { %2481 = vmatprep.subr.bf16.mxu0 %v18650_v63  ;;  %3446 = vmatprep.subr.bf16.mxu1 %v18652_v0  ;;  %v18706_v63 = vld [vmem:[%s20257_s26 + $0x304] ss:$16 sps:$4 sm:$0xff]   ;;  %v18709_v0 = vld [vmem:[%s20257_s26 + $0x30c] ss:$16 sps:$4 sm:$0xff]  }
  0xaa   : > { %2482 = vmatpush1.bf16.msra.mxu0 %v18654_v1  ;;  %3447 = vmatpush1.bf16.msra.mxu1 %v18655_v2  ;;  %v20414_v1 = vpack.c.bf16 %v14506_v58, %v14505_v55  ;;  %v352_v2 = vpack.c.bf16 %v14540_v60, %v14539_v59  ;;  %v14548_v55 = vld [vmem:[%s20277_s28 + $0x113] sm:$0xff]  ;;  %v18757_v59 = vld [vmem:[%s20257_s26 + $0x40c] ss:$16 sps:$4 sm:$0xff]  }
  0xab   : > { %2644 = vmatprep.subr.bf16.mxu0 %v18658_v5  ;;  %3609 = vmatprep.subr.bf16.mxu1 %v18661_v6  ;;  %v14507_v5 = vld [vmem:[%s20277_s28 + $0xaa] sm:$0xff]  ;;  %v18712_v6 = vld [vmem:[%s20257_s26 + $0x324] ss:$16 sps:$4 sm:$0xff]  }
  0xac   : > { %v18754_v58 = vld [vmem:[%s20257_s26 + $0x404] ss:$16 sps:$4 sm:$0xff]  }
  0xad   : > { %2484 = vmatmul.mubr.bf16.vlgmr.msra.gmra.mrb[0].mxu0 %v299_v9  ;;  %3449 = vmatmul.mubr.bf16.vlgmr.msra.gmra.mrb[0].mxu1 %v299_v9  ;;  %v14541_v9 = vld [vmem:[%s20277_s28 + $0xc3] sm:$0xff] }
  0xae   : > { %2645 = vmatpush1.bf16.msra.mxu0 %v18656_v10  ;;  %3610 = vmatpush1.bf16.msra.mxu1 %v18659_v11  ;;  %v14542_v10 = vld [vmem:[%s20277_s28 + $0xcb] sm:$0xff] }
  0xaf   : > { %2493 = vmatprep.mubr.bf16.mxu0 %v348_v12  ;;  %3458 = vmatprep.mubr.bf16.mxu1 %v348_v12  ;;  %v18710_v11 = vld [vmem:[%s20257_s26 + $0x320] ss:$16 sps:$4 sm:$0xff]   ;;  %v18713_v12 = vld [vmem:[%s20257_s26 + $0x328] ss:$16 sps:$4 sm:$0xff]  }
  0xb0   : > { %2646 = vmatprep.subr.bf16.mxu0 %v18664_v16  ;;  %3611 = vmatprep.subr.bf16.mxu1 %v18667_v17  ;;  %v353_v16 = vpack.c.bf16 %v14542_v10, %v14541_v9  ;;  %v18716_v17 = vld [vmem:[%s20257_s26 + $0x340] ss:$16 sps:$4 sm:$0xff]  }
  0xb2   : > { %2647 = vmatpush1.bf16.msra.mxu0 %v18662_v15  ;;  %3612 = vmatpush1.bf16.msra.mxu1 %v18665_v18  ;;  %v20430_v15 = vpack.c.bf16 %v14508_v8, %v14507_v5  ;;  %v18719_v18 = vld [vmem:[%s20257_s26 + $0x348] ss:$16 sps:$4 sm:$0xff]  }
  0xb3   : > { %2648 = vmatprep.subr.bf16.mxu0 %v18670_v21  ;;  %3613 = vmatprep.subr.bf16.mxu1 %v18673_v22  ;;  %v18727_v21 = vld [vmem:[%s20257_s26 + $0x36c] ss:$16 sps:$4 sm:$0xff]   ;;  %v14517_v5 = vld [vmem:[%s20277_s28 + $0x122] sm:$0xff] }
  0xb4   : > { %v14510_v22 = vld [vmem:[%s20277_s28 + $0xca] sm:$0xff] }
  0xb5   : > { %2494 = vmatmul.mubr.bf16.gmra.mrb[4].mxu0 %v20366_v23  ;;  %3459 = vmatmul.mubr.bf16.gmra.mrb[4].mxu1 %v20366_v23  ;;  %v20446_v30 = vpack.c.bf16 %v14510_v22, %v14509_v19  ;;  %v14552_v8 = vld [vmem:[%s20277_s28 + $0x143] sm:$0xff]  ;;  %v14522_v19 = vld [vmem:[%s20277_s28 + $0x15a] sm:$0xff] }
  0xb6   : > { %2503 = vmatprep.mubr.bf16.mxu0 %v349_v24  ;;  %3468 = vmatprep.mubr.bf16.mxu1 %v349_v24  ;;  %v14543_v24 = vld [vmem:[%s20277_s28 + $0xdb] sm:$0xff] }
  0xb7   : > { %2649 = vmatpush1.bf16.msra.mxu0 %v18668_v25  ;;  %3614 = vmatpush1.bf16.msra.mxu1 %v18671_v26  ;;  %v14544_v25 = vld [vmem:[%s20277_s28 + $0xe3] sm:$0xff] }
  0xb8   : > { %2650 = vmatprep.subr.bf16.mxu0 %v18676_v28  ;;  %3615 = vmatprep.subr.bf16.mxu1 %v18679_v29  ;;  %v18722_v26 = vld [vmem:[%s20257_s26 + $0x360] ss:$16 sps:$4 sm:$0xff]   ;;  %v18730_v28 = vld [vmem:[%s20257_s26 + $0x384] ss:$16 sps:$4 sm:$0xff]   ;;  %v18733_v29 = vld [vmem:[%s20257_s26 + $0x38c] ss:$16 sps:$4 sm:$0xff]   ;;  %v354_v31 = vpack.c.bf16 %v14544_v25, %v14543_v24 }
  0xb9   : > { %v14523_v25 = vld [vmem:[%s20277_s28 + $0x16a] sm:$0xff] }
  0xbb   : > { %2651 = vmatpush1.bf16.msra.mxu0 %v18674_v33  ;;  %3616 = vmatpush1.bf16.msra.mxu1 %v18677_v34  ;;  %v18731_v33 = vld [vmem:[%s20257_s26 + $0x388] ss:$16 sps:$4 sm:$0xff]   ;;  %v18736_v34 = vld [vmem:[%s20257_s26 + $0x3a4] ss:$16 sps:$4 sm:$0xff]  }
  0xbc   : > { %2652 = vmatprep.subr.bf16.mxu0 %v18682_v35  ;;  %3617 = vmatprep.subr.bf16.mxu1 %v18685_v36  ;;  %v14511_v35 = vld [vmem:[%s20277_s28 + $0xda] sm:$0xff] }
  0xbd   : > { %2504 = vmatmul.mubr.bf16.gmra.mrb[8].mxu0 %v20382_v37  ;;  %3469 = vmatmul.mubr.bf16.gmra.mrb[8].mxu1 %v20382_v37  ;;  %v18739_v36 = vld [vmem:[%s20257_s26 + $0x3ac] ss:$16 sps:$4 sm:$0xff]  }
  0xbe   : > { %2513 = vmatprep.mubr.bf16.mxu0 %v350_v38  ;;  %3478 = vmatprep.mubr.bf16.mxu1 %v350_v38  ;;  %v14512_v38 = vld [vmem:[%s20277_s28 + $0xe2] sm:$0xff] }
  0xbf   : > { %2653 = vmatpush1.bf16.msra.mxu0 %v18680_v39  ;;  %3618 = vmatpush1.bf16.msra.mxu1 %v18683_v40  ;;  %v14545_v39 = vld [vmem:[%s20277_s28 + $0xf3] sm:$0xff]  ;;  %v14546_v40 = vld [vmem:[%s20277_s28 + $0xfb] sm:$0xff]  ;;  %v20462_v45 = vpack.c.bf16 %v14512_v38, %v14511_v35  ;;  %v14560_v35 = vld [vmem:[%s20277_s28 + $0x1a3] sm:$0xff] }
  0xc0   : > { %2654 = vmatprep.subr.bf16.mxu0 %v18688_v42  ;;  %3619 = vmatprep.subr.bf16.mxu1 %v18691_v43  ;;  %v18737_v42 = vld [vmem:[%s20257_s26 + $0x3a8] ss:$16 sps:$4 sm:$0xff]   ;;  %v18742_v43 = vld [vmem:[%s20257_s26 + $0x3c4] ss:$16 sps:$4 sm:$0xff]   ;;  %v355_v46 = vpack.c.bf16 %v14546_v40, %v14545_v39 }
  0xc1   : > { %v14527_v39 = vld [vmem:[%s20277_s28 + $0x19a] sm:$0xff]  ;;  %v14528_v40 = vld [vmem:[%s20277_s28 + $0x1a2] sm:$0xff] }
  0xc3   : > { %2655 = vmatpush1.bf16.msra.mxu0 %v18686_v47  ;;  %3620 = vmatpush1.bf16.msra.mxu1 %v18689_v48  ;;  %v18740_v47 = vld [vmem:[%s20257_s26 + $0x3c0] ss:$16 sps:$4 sm:$0xff]   ;;  %v18743_v48 = vld [vmem:[%s20257_s26 + $0x3c8] ss:$16 sps:$4 sm:$0xff]  }
  0xc4   : > { %2656 = vmatprep.subr.bf16.mxu0 %v18694_v49  ;;  %3621 = vmatprep.subr.bf16.mxu1 %v18697_v50  ;;  %v18748_v49 = vld [vmem:[%s20257_s26 + $0x3e4] ss:$16 sps:$4 sm:$0xff]  }
  0xc5   : > { %2514 = vmatmul.mubr.bf16.gmra.mrb[12].mxu0 %v20398_v51  ;;  %3479 = vmatmul.mubr.bf16.gmra.mrb[12].mxu1 %v20398_v51  ;;  %v14513_v50 = vld [vmem:[%s20277_s28 + $0xf2] sm:$0xff] }
  0xc6   : > { %2523 = vmatprep.mubr.bf16.mxu0 %v351_v52  ;;  %3488 = vmatprep.mubr.bf16.mxu1 %v351_v52  ;;  %v18751_v52 = vld [vmem:[%s20257_s26 + $0x3ec] ss:$16 sps:$4 sm:$0xff]  }
  0xc7   : > { %2657 = vmatpush1.bf16.msra.mxu0 %v18692_v53  ;;  %3622 = vmatpush1.bf16.msra.mxu1 %v18695_v54  ;;  %v14514_v53 = vld [vmem:[%s20277_s28 + $0xfa] sm:$0xff]  ;;  %v14547_v54 = vld [vmem:[%s20277_s28 + $0x10b] sm:$0xff] }
  0xc8   : > { %2658 = vmatprep.subr.bf16.mxu0 %v18700_v56  ;;  %3623 = vmatprep.subr.bf16.mxu1 %v18703_v57  ;;  %v18746_v56 = vld [vmem:[%s20257_s26 + $0x3e0] ss:$16 sps:$4 sm:$0xff]   ;;  %v18749_v57 = vld [vmem:[%s20257_s26 + $0x3e8] ss:$16 sps:$4 sm:$0xff]   ;;  %v20478_v60 = vpack.c.bf16 %v14514_v53, %v14513_v50 }
  0xc9   : > { %v14563_v50 = vld [vmem:[%s20277_s28 + $0x4c] sm:$0xff] }
  0xca   : > { %v18758_v53 = vld [vmem:[%s20257_s26 + $0x420] ss:$16 sps:$4 sm:$0xff]  }
  0xcb   : > { %2659 = vmatpush1.bf16.msra.mxu0 %v18698_v61  ;;  %3624 = vmatpush1.bf16.msra.mxu1 %v18701_v62  ;;  %v356_v61 = vpack.c.bf16 %v14548_v55, %v14547_v54  ;;  %v14515_v62 = vld [vmem:[%s20277_s28 + $0x10a] sm:$0xff]  ;;  %v18766_v54 = vld [vmem:[%s20257_s26 + $0x444] ss:$16 sps:$4 sm:$0xff]  }
  0xcc   : > { %2660 = vmatprep.subr.bf16.mxu0 %v18706_v63  ;;  %3625 = vmatprep.subr.bf16.mxu1 %v18709_v0  ;;  %v14516_v63 = vld [vmem:[%s20277_s28 + $0x112] sm:$0xff]  ;;  %v14549_v0 = vld [vmem:[%s20277_s28 + $0x123] sm:$0xff]  ;;  %v18769_v55 = vld [vmem:[%s20257_s26 + $0x44c] ss:$16 sps:$4 sm:$0xff]  }
  0xcd   : > { %2524 = vmatmul.mubr.bf16.gmra.mrb[16].mxu0 %v20414_v1  ;;  %3489 = vmatmul.mubr.bf16.gmra.mrb[16].mxu1 %v20414_v1 }
  0xce   : > { %2533 = vmatprep.mubr.bf16.mxu0 %v352_v2  ;;  %3498 = vmatprep.mubr.bf16.mxu1 %v352_v2  ;;  %v14550_v2 = vld [vmem:[%s20277_s28 + $0x12b] sm:$0xff] }
  0xcf   : > { %2661 = vmatpush1.bf16.msra.mxu0 %v18704_v3  ;;  %3626 = vmatpush1.bf16.msra.mxu1 %v18707_v4  ;;  %v20486_v3 = vpack.c.bf16 %v14516_v63, %v14515_v62  ;;  %v357_v4 = vpack.c.bf16 %v14550_v2, %v14549_v0  ;;  %v14566_v62 = vld [vmem:[%s20277_s28 + $0x6c] sm:$0xff]  ;;  %v18773_v0 = vld [vmem:[%s20257_s26 + $0x468] ss:$16 sps:$4 sm:$0xff]   ;;  %v18778_v2 = vld [vmem:[%s20257_s26 + $0x484] ss:$16 sps:$4 sm:$0xff]  }
  0xd0   : > { %2662 = vmatprep.subr.bf16.mxu0 %v18712_v6  ;;  %3627 = vmatprep.subr.bf16.mxu1 %v18715_v7  ;;  %v14518_v6 = vld [vmem:[%s20277_s28 + $0x12a] sm:$0xff]  ;;  %v14551_v7 = vld [vmem:[%s20277_s28 + $0x13b] sm:$0xff] }
  0xd1   : > { %v20494_v9 = vpack.c.bf16 %v14518_v6, %v14517_v5  ;;  %v358_v10 = vpack.c.bf16 %v14552_v8, %v14551_v7  ;;  %v18770_v63 = vld [vmem:[%s20257_s26 + $0x460] ss:$16 sps:$4 sm:$0xff]   ;;  %v18779_v6 = vld [vmem:[%s20257_s26 + $0x488] ss:$16 sps:$4 sm:$0xff]   ;;  %v18784_v7 = vld [vmem:[%s20257_s26 + $0x4a4] ss:$16 sps:$4 sm:$0xff]  }
  0xd2   : > { %v18787_v8 = vld [vmem:[%s20257_s26 + $0x4ac] ss:$16 sps:$4 sm:$0xff]  }
  0xd3   : > { %2663 = vmatpush1.bf16.msra.mxu0 %v18710_v11  ;;  %3628 = vmatpush1.bf16.msra.mxu1 %v18713_v12  ;;  %v14519_v11 = vld [vmem:[%s20277_s28 + $0x13a] sm:$0xff]  ;;  %v14520_v12 = vld [vmem:[%s20277_s28 + $0x142] sm:$0xff] }
  0xd4   : > { %2664 = vmatprep.subr.bf16.mxu0 %v18718_v13  ;;  %3629 = vmatprep.subr.bf16.mxu1 %v18721_v14  ;;  %v14553_v13 = vld [vmem:[%s20277_s28 + $0x153] sm:$0xff]  ;;  %v14554_v14 = vld [vmem:[%s20277_s28 + $0x15b] sm:$0xff] }
  0xd5   : > { %2534 = vmatmul.mubr.bf16.gmra.mrb[20].mxu0 %v20430_v15  ;;  %3499 = vmatmul.mubr.bf16.gmra.mrb[20].mxu1 %v20430_v15 }
  0xd6   : > { %2543 = vmatprep.mubr.bf16.mxu0 %v353_v16  ;;  %3508 = vmatprep.mubr.bf16.mxu1 %v353_v16  ;;  %v20502_v16 = vpack.c.bf16 %v14520_v12, %v14519_v11  ;;  %v14568_v11 = vld [vmem:[%s20277_s28 + $0x84] sm:$0xff]  ;;  %v18782_v12 = vld [vmem:[%s20257_s26 + $0x4a0] ss:$16 sps:$4 sm:$0xff]  }
  0xd7   : > { %2665 = vmatpush1.bf16.msra.mxu0 %v18716_v17  ;;  %3630 = vmatpush1.bf16.msra.mxu1 %v18719_v18  ;;  %v359_v17 = vpack.c.bf16 %v14554_v14, %v14553_v13  ;;  %v14521_v18 = vld [vmem:[%s20277_s28 + $0x152] sm:$0xff] }
  0xd8   : > { %2666 = vmatprep.subr.bf16.mxu0 %v18724_v20  ;;  %3631 = vmatprep.subr.bf16.mxu1 %v18727_v21  ;;  %v14555_v20 = vld [vmem:[%s20277_s28 + $0x16b] sm:$0xff]  ;;  %v14556_v21 = vld [vmem:[%s20277_s28 + $0x173] sm:$0xff]  ;;  %v20510_v22 = vpack.c.bf16 %v14522_v19, %v14521_v18 }
  0xd9   : > { %v360_v24 = vpack.c.bf16 %v14556_v21, %v14555_v20  ;;  %v18785_v13 = vld [vmem:[%s20257_s26 + $0x4a8] ss:$16 sps:$4 sm:$0xff]   ;;  %v18790_v14 = vld [vmem:[%s20257_s26 + $0x4c4] ss:$16 sps:$4 sm:$0xff]   ;;  %v18799_v21 = vld [vmem:[%s20257_s26 + $0x4ec] ss:$16 sps:$4 sm:$0xff]  }
  0xda   : > { %v18791_v19 = vld [vmem:[%s20257_s26 + $0x4c8] ss:$16 sps:$4 sm:$0xff]   ;;  %v18796_v20 = vld [vmem:[%s20257_s26 + $0x4e4] ss:$16 sps:$4 sm:$0xff]  }
  0xdb   : > { %2667 = vmatpush1.bf16.msra.mxu0 %v18722_v26  ;;  %3632 = vmatpush1.bf16.msra.mxu1 %v18725_v27  ;;  %v14524_v26 = vld [vmem:[%s20277_s28 + $0x172] sm:$0xff]  ;;  %v14557_v27 = vld [vmem:[%s20277_s28 + $0x183] sm:$0xff] }
  0xdc   : > { %2668 = vmatprep.subr.bf16.mxu0 %v18730_v28  ;;  %3633 = vmatprep.subr.bf16.mxu1 %v18733_v29  ;;  %v14558_v28 = vld [vmem:[%s20277_s28 + $0x18b] sm:$0xff]  ;;  %v20518_v29 = vpack.c.bf16 %v14524_v26, %v14523_v25  ;;  %v14570_v25 = vld [vmem:[%s20277_s28 + $0x9c] sm:$0xff] }
  0xdd   : > { %2544 = vmatmul.mubr.bf16.gmra.mrb[24].mxu0 %v20446_v30  ;;  %3509 = vmatmul.mubr.bf16.gmra.mrb[24].mxu1 %v20446_v30  ;;  %v18794_v26 = vld [vmem:[%s20257_s26 + $0x4e0] ss:$16 sps:$4 sm:$0xff]  }
  0xde   : > { %2553 = vmatprep.mubr.bf16.mxu0 %v354_v31  ;;  %3518 = vmatprep.mubr.bf16.mxu1 %v354_v31  ;;  %v361_v31 = vpack.c.bf16 %v14558_v28, %v14557_v27  ;;  %v18797_v27 = vld [vmem:[%s20257_s26 + $0x4e8] ss:$16 sps:$4 sm:$0xff]   ;;  %v18802_v28 = vld [vmem:[%s20257_s26 + $0x504] ss:$16 sps:$4 sm:$0xff]  }
  0xdf   : > { %2669 = vmatpush1.bf16.msra.mxu0 %v18728_v32  ;;  %3634 = vmatpush1.bf16.msra.mxu1 %v18731_v33  ;;  %v14525_v32 = vld [vmem:[%s20277_s28 + $0x182] sm:$0xff]  ;;  %v14526_v33 = vld [vmem:[%s20277_s28 + $0x18a] sm:$0xff] }
  0xe0   : > { %2670 = vmatprep.subr.bf16.mxu0 %v18736_v34  ;;  %3635 = vmatprep.subr.bf16.mxu1 %v18739_v36  ;;  %v14559_v34 = vld [vmem:[%s20277_s28 + $0x19b] sm:$0xff]  ;;  %v20526_v36 = vpack.c.bf16 %v14526_v33, %v14525_v32 }
  0xe1   : > { %v362_v38 = vpack.c.bf16 %v14560_v35, %v14559_v34  ;;  %v18803_v33 = vld [vmem:[%s20257_s26 + $0x508] ss:$16 sps:$4 sm:$0xff]   ;;  %v18808_v34 = vld [vmem:[%s20257_s26 + $0x524] ss:$16 sps:$4 sm:$0xff]   ;;  %v18811_v35 = vld [vmem:[%s20257_s26 + $0x52c] ss:$16 sps:$4 sm:$0xff]  }
  0xe3   : > { %2671 = vmatpush1.bf16.msra.mxu0 %v18734_v41  ;;  %3636 = vmatpush1.bf16.msra.mxu1 %v18737_v42  ;;  %v20532_v41 = vpack.c.bf16 %v14528_v40, %v14527_v39  ;;  %v14561_v42 = vld [vmem:[%s20277_s28 + $0x34] sm:$0xff]  ;;  %v18806_v40 = vld [vmem:[%s20257_s26 + $0x520] ss:$16 sps:$4 sm:$0xff]  }
  0xe4   : > { %2672 = vmatprep.subr.bf16.mxu0 %v18742_v43  ;;  %3637 = vmatprep.subr.bf16.mxu1 %v18745_v44  ;;  %v14562_v43 = vld [vmem:[%s20277_s28 + $0x3c] sm:$0xff]  ;;  %v14572_v39 = vld [vmem:[%s20277_s28 + $0xb4] sm:$0xff] }
  0xe5   : > { %2554 = vmatmul.mubr.bf16.gmra.mrb[28].mxu0 %v20462_v45  ;;  %3519 = vmatmul.mubr.bf16.gmra.mrb[28].mxu1 %v20462_v45  ;;  %v18752_v44 = vld [vmem:[%s20257_s26 + $0x400] ss:$16 sps:$4 sm:$0xff]  }
  0xe6   : > { %2563 = vmatprep.mubr.bf16.mxu0 %v355_v46  ;;  %3528 = vmatprep.mubr.bf16.mxu1 %v355_v46  ;;  %v18755_v46 = vld [vmem:[%s20257_s26 + $0x408] ss:$16 sps:$4 sm:$0xff]  }
  0xe7   : > { %2673 = vmatpush1.bf16.msra.mxu0 %v18740_v47  ;;  %3638 = vmatpush1.bf16.msra.mxu1 %v18743_v48  ;;  %v395_v47 = vpack.c.bf16 %v14562_v43, %v14561_v42  ;;  %v18760_v48 = vld [vmem:[%s20257_s26 + $0x424] ss:$16 sps:$4 sm:$0xff]   ;;  %v18809_v42 = vld [vmem:[%s20257_s26 + $0x528] ss:$16 sps:$4 sm:$0xff]  }
  0xe8   : > { %2674 = vmatprep.subr.bf16.mxu0 %v18748_v49  ;;  %3639 = vmatprep.subr.bf16.mxu1 %v18751_v52  ;;  %v18763_v49 = vld [vmem:[%s20257_s26 + $0x42c] ss:$16 sps:$4 sm:$0xff]   ;;  %v14564_v52 = vld [vmem:[%s20277_s28 + $0x54] sm:$0xff] }
  0xe9   : > { %v18814_v43 = vld [vmem:[%s20257_s26 + $0x544] ss:$16 sps:$4 sm:$0xff]  }
  0xeb   : > { %2675 = vmatpush1.bf16.msra.mxu0 %v18746_v56  ;;  %3640 = vmatpush1.bf16.msra.mxu1 %v18749_v57  ;;  %v20552_v56 = vpack.c.bf16 %v14564_v52, %v14563_v50  ;;  %v18764_v57 = vld [vmem:[%s20257_s26 + $0x440] ss:$16 sps:$4 sm:$0xff]   ;;  %v14573_v50 = vld [vmem:[%s20277_s28 + $0xc4] sm:$0xff] }
  0xec   : > { %2837 = vmatprep.subr.bf16.mxu0 %v18754_v58  ;;  %3802 = vmatprep.subr.bf16.mxu1 %v18757_v59  ;;  %v18767_v58 = vld [vmem:[%s20257_s26 + $0x448] ss:$16 sps:$4 sm:$0xff]   ;;  %v18772_v59 = vld [vmem:[%s20257_s26 + $0x464] ss:$16 sps:$4 sm:$0xff]   ;;  %v14574_v52 = vld [vmem:[%s20277_s28 + $0xcc] sm:$0xff] }
  0xed   : > { %2564 = vmatmul.mubr.bf16.gmra.mrb[32].mxu0 %v20478_v60  ;;  %3529 = vmatmul.mubr.bf16.gmra.mrb[32].mxu1 %v20478_v60 }
  0xee   : > { %2573 = vmatprep.mubr.bf16.mxu0 %v356_v61  ;;  %3538 = vmatprep.mubr.bf16.mxu1 %v356_v61  ;;  %v14565_v61 = vld [vmem:[%s20277_s28 + $0x64] sm:$0xff] }
  0xef   : > { %v20568_v5 = vpack.c.bf16 %v14566_v62, %v14565_v61  ;;  %v14575_v61 = vld [vmem:[%s20277_s28 + $0xdc] sm:$0xff]  ;;  %v14576_v62 = vld [vmem:[%s20277_s28 + $0xe4] sm:$0xff] }
  0xf5   : > { %2574 = vmatmul.mubr.bf16.gmra.mrb[36].mxu0 %v20486_v3  ;;  %3539 = vmatmul.mubr.bf16.gmra.mrb[36].mxu1 %v20486_v3 }
  0xf6   : > { %2583 = vmatprep.mubr.bf16.mxu0 %v357_v4  ;;  %3548 = vmatprep.mubr.bf16.mxu1 %v357_v4  ;;  %v18781_v4 = vld [vmem:[%s20257_s26 + $0x48c] ss:$16 sps:$4 sm:$0xff]  }
  0xfd   : > { %2584 = vmatmul.mubr.bf16.gmra.mrb[40].mxu0 %v20494_v9  ;;  %3549 = vmatmul.mubr.bf16.gmra.mrb[40].mxu1 %v20494_v9 }
  0xfe   : > { %2593 = vmatprep.mubr.bf16.mxu0 %v358_v10  ;;  %3558 = vmatprep.mubr.bf16.mxu1 %v358_v10  ;;  %v14567_v10 = vld [vmem:[%s20277_s28 + $0x7c] sm:$0xff] }
  0xff   : > { %v20584_v18 = vpack.c.bf16 %v14568_v11, %v14567_v10  ;;  %v14577_v10 = vld [vmem:[%s20277_s28 + $0xf4] sm:$0xff]  ;;  %v14578_v11 = vld [vmem:[%s20277_s28 + $0xfc] sm:$0xff] }
 0x105   : > { %2594 = vmatmul.mubr.bf16.gmra.mrb[44].mxu0 %v20502_v16  ;;  %3559 = vmatmul.mubr.bf16.gmra.mrb[44].mxu1 %v20502_v16 }
 0x106   : > { %2603 = vmatprep.mubr.bf16.mxu0 %v359_v17  ;;  %3568 = vmatprep.mubr.bf16.mxu1 %v359_v17  ;;  %v18793_v17 = vld [vmem:[%s20257_s26 + $0x4cc] ss:$16 sps:$4 sm:$0xff]  }
 0x10d   : > { %2604 = vmatmul.mubr.bf16.gmra.mrb[48].mxu0 %v20510_v22  ;;  %3569 = vmatmul.mubr.bf16.gmra.mrb[48].mxu1 %v20510_v22 }
 0x10e   : > { %2613 = vmatprep.mubr.bf16.mxu0 %v360_v24  ;;  %3578 = vmatprep.mubr.bf16.mxu1 %v360_v24  ;;  %v14569_v24 = vld [vmem:[%s20277_s28 + $0x94] sm:$0xff] }
 0x10f   : > { %v20600_v32 = vpack.c.bf16 %v14570_v25, %v14569_v24  ;;  %v14582_v24 = vld [vmem:[%s20277_s28 + $0x12c] sm:$0xff] }
 0x115   : > { %2614 = vmatmul.mubr.bf16.gmra.mrb[52].mxu0 %v20518_v29  ;;  %3579 = vmatmul.mubr.bf16.gmra.mrb[52].mxu1 %v20518_v29 }
 0x116   : > { %2623 = vmatprep.mubr.bf16.mxu0 %v361_v31  ;;  %3588 = vmatprep.mubr.bf16.mxu1 %v361_v31  ;;  %v18805_v31 = vld [vmem:[%s20257_s26 + $0x50c] ss:$16 sps:$4 sm:$0xff]  }
 0x11d   : > { %2624 = vmatmul.mubr.bf16.gmra.mrb[56].mxu0 %v20526_v36  ;;  %3589 = vmatmul.mubr.bf16.gmra.mrb[56].mxu1 %v20526_v36 }
 0x11e   : > { %2633 = vmatprep.mubr.bf16.mxu0 %v362_v38  ;;  %3598 = vmatprep.mubr.bf16.mxu1 %v362_v38  ;;  %v14571_v38 = vld [vmem:[%s20277_s28 + $0xac] sm:$0xff] }
 0x125   : > { %2634 = vmatmul.mubr.bf16.gmra.mrb[60].mxu0 %v20532_v41  ;;  %3599 = vmatmul.mubr.bf16.gmra.mrb[60].mxu1 %v20532_v41 }
 0x126   : > { %2676 = vmatprep.mubr.bf16.mxu0 %v20366_v23  ;;  %3641 = vmatprep.mubr.bf16.mxu1 %v20366_v23  ;;  %v18761_v23 = vld [vmem:[%s20257_s26 + $0x428] ss:$16 sps:$4 sm:$0xff]  }
 0x12d   : > { %2677 = vmatmul.mubr.bf16.vlgmr.msra.gmra.mrb[0].mxu0 %v395_v47  ;;  %3642 = vmatmul.mubr.bf16.vlgmr.msra.gmra.mrb[0].mxu1 %v395_v47  ;;  %v18815_v47 = vld [vmem:[%s20257_s26 + $0x548] ss:$16 sps:$4 sm:$0xff]  }
 0x12e   : > { %2838 = vmatpush1.bf16.msra.mxu0 %v18752_v44  ;;  %3803 = vmatpush1.bf16.msra.mxu1 %v18755_v46  ;;  %v18817_v44 = vld [vmem:[%s20257_s26 + $0x54c] ss:$16 sps:$4 sm:$0xff]   ;;  %v20616_v46 = vpack.c.bf16 %v14572_v39, %v14571_v38 }
 0x12f   : > { %2686 = vmatprep.mubr.bf16.mxu0 %v20382_v37  ;;  %3651 = vmatprep.mubr.bf16.mxu1 %v20382_v37  ;;  %v18775_v37 = vld [vmem:[%s20257_s26 + $0x46c] ss:$16 sps:$4 sm:$0xff]  }
 0x130   : > { %2839 = vmatprep.subr.bf16.mxu0 %v18760_v48  ;;  %3804 = vmatprep.subr.bf16.mxu1 %v18763_v49  ;;  %v18820_v48 = vld [vmem:[%s20257_s26 + $0x564] ss:$16 sps:$4 sm:$0xff]   ;;  %v18823_v49 = vld [vmem:[%s20257_s26 + $0x56c] ss:$16 sps:$4 sm:$0xff]  }
 0x132   : > { %2840 = vmatpush1.bf16.msra.mxu0 %v18758_v53  ;;  %3805 = vmatpush1.bf16.msra.mxu1 %v18761_v23  ;;  %v18818_v53 = vld [vmem:[%s20257_s26 + $0x560] ss:$16 sps:$4 sm:$0xff]   ;;  %v18821_v23 = vld [vmem:[%s20257_s26 + $0x568] ss:$16 sps:$4 sm:$0xff]  }
 0x133   : > { %2841 = vmatprep.subr.bf16.mxu0 %v18766_v54  ;;  %3806 = vmatprep.subr.bf16.mxu1 %v18769_v55  ;;  %v18826_v54 = vld [vmem:[%s20257_s26 + $0x584] ss:$16 sps:$4 sm:$0xff]   ;;  %v18829_v55 = vld [vmem:[%s20257_s26 + $0x58c] ss:$16 sps:$4 sm:$0xff]  }
 0x135   : > { %2687 = vmatmul.mubr.bf16.gmra.mrb[4].mxu0 %v20552_v56  ;;  %3652 = vmatmul.mubr.bf16.gmra.mrb[4].mxu1 %v20552_v56 }
 0x136   : > { %2696 = vmatprep.mubr.bf16.mxu0 %v20398_v51  ;;  %3661 = vmatprep.mubr.bf16.mxu1 %v20398_v51  ;;  %v18776_v51 = vld [vmem:[%s20257_s26 + $0x480] ss:$16 sps:$4 sm:$0xff]  }
 0x137   : > { %2842 = vmatpush1.bf16.msra.mxu0 %v18764_v57  ;;  %3807 = vmatpush1.bf16.msra.mxu1 %v18767_v58  ;;  %v20632_v57 = vpack.c.bf16 %v14574_v52, %v14573_v50  ;;  %v18827_v58 = vld [vmem:[%s20257_s26 + $0x588] ss:$16 sps:$4 sm:$0xff]   ;;  %v18859_v50 = vld [vmem:[%s20257_s26 + $0x62c] ss:$16 sps:$4 sm:$0xff]  }
 0x138   : > { %2843 = vmatprep.subr.bf16.mxu0 %v18772_v59  ;;  %3808 = vmatprep.subr.bf16.mxu1 %v18775_v37  ;;  %v18832_v59 = vld [vmem:[%s20257_s26 + $0x5a4] ss:$16 sps:$4 sm:$0xff]   ;;  %v18835_v37 = vld [vmem:[%s20257_s26 + $0x5ac] ss:$16 sps:$4 sm:$0xff]  }
 0x139   : > { %v14627_v52 = vld [vmem:[%s20277_s28 + $0x63] sm:$0xff] }
 0x13b   : > { %2844 = vmatpush1.bf16.msra.mxu0 %v18770_v63  ;;  %3809 = vmatpush1.bf16.msra.mxu1 %v18773_v0  ;;  %v18830_v63 = vld [vmem:[%s20257_s26 + $0x5a0] ss:$16 sps:$4 sm:$0xff]   ;;  %v18833_v0 = vld [vmem:[%s20257_s26 + $0x5a8] ss:$16 sps:$4 sm:$0xff]  }
 0x13c   : > { %2845 = vmatprep.subr.bf16.mxu0 %v18778_v2  ;;  %3810 = vmatprep.subr.bf16.mxu1 %v18781_v4  ;;  %v18838_v2 = vld [vmem:[%s20257_s26 + $0x5c4] ss:$16 sps:$4 sm:$0xff]   ;;  %v18841_v4 = vld [vmem:[%s20257_s26 + $0x5cc] ss:$16 sps:$4 sm:$0xff]  }
 0x13d   : > { %2697 = vmatmul.mubr.bf16.gmra.mrb[8].mxu0 %v20568_v5  ;;  %3662 = vmatmul.mubr.bf16.gmra.mrb[8].mxu1 %v20568_v5 }
 0x13e   : > { %2706 = vmatprep.mubr.bf16.mxu0 %v20414_v1  ;;  %3671 = vmatprep.mubr.bf16.mxu1 %v20414_v1  ;;  %v18788_v1 = vld [vmem:[%s20257_s26 + $0x4c0] ss:$16 sps:$4 sm:$0xff]  }
 0x13f   : > { %2846 = vmatpush1.bf16.msra.mxu0 %v18776_v51  ;;  %3811 = vmatpush1.bf16.msra.mxu1 %v18779_v6  ;;  %v20648_v51 = vpack.c.bf16 %v14576_v62, %v14575_v61  ;;  %v18839_v6 = vld [vmem:[%s20257_s26 + $0x5c8] ss:$16 sps:$4 sm:$0xff]  }
 0x140   : > { %2847 = vmatprep.subr.bf16.mxu0 %v18784_v7  ;;  %3812 = vmatprep.subr.bf16.mxu1 %v18787_v8  ;;  %v18844_v7 = vld [vmem:[%s20257_s26 + $0x5e4] ss:$16 sps:$4 sm:$0xff]   ;;  %v18847_v8 = vld [vmem:[%s20257_s26 + $0x5ec] ss:$16 sps:$4 sm:$0xff]  }
 0x141   : > { %v14629_v61 = vld [vmem:[%s20277_s28 + $0x7b] sm:$0xff]  ;;  %v14630_v62 = vld [vmem:[%s20277_s28 + $0x83] sm:$0xff] }
 0x143   : > { %2848 = vmatpush1.bf16.msra.mxu0 %v18782_v12  ;;  %3813 = vmatpush1.bf16.msra.mxu1 %v18785_v13  ;;  %v18842_v12 = vld [vmem:[%s20257_s26 + $0x5e0] ss:$16 sps:$4 sm:$0xff]   ;;  %v18845_v13 = vld [vmem:[%s20257_s26 + $0x5e8] ss:$16 sps:$4 sm:$0xff]  }
 0x144   : > { %2849 = vmatprep.subr.bf16.mxu0 %v18790_v14  ;;  %3814 = vmatprep.subr.bf16.mxu1 %v18793_v17  ;;  %v18850_v14 = vld [vmem:[%s20257_s26 + $0x604] ss:$16 sps:$4 sm:$0xff]   ;;  %v18853_v17 = vld [vmem:[%s20257_s26 + $0x60c] ss:$16 sps:$4 sm:$0xff]  }
 0x145   : > { %2707 = vmatmul.mubr.bf16.gmra.mrb[12].mxu0 %v20584_v18  ;;  %3672 = vmatmul.mubr.bf16.gmra.mrb[12].mxu1 %v20584_v18 }
 0x146   : > { %2716 = vmatprep.mubr.bf16.mxu0 %v20430_v15  ;;  %3681 = vmatprep.mubr.bf16.mxu1 %v20430_v15  ;;  %v18800_v15 = vld [vmem:[%s20257_s26 + $0x500] ss:$16 sps:$4 sm:$0xff]  }
 0x147   : > { %2850 = vmatpush1.bf16.msra.mxu0 %v18788_v1  ;;  %3815 = vmatpush1.bf16.msra.mxu1 %v18791_v19  ;;  %v20664_v1 = vpack.c.bf16 %v14578_v11, %v14577_v10  ;;  %v14580_v19 = vld [vmem:[%s20277_s28 + $0x114] sm:$0xff] }
 0x148   : > { %2851 = vmatprep.subr.bf16.mxu0 %v18796_v20  ;;  %3816 = vmatprep.subr.bf16.mxu1 %v18799_v21  ;;  %v14581_v21 = vld [vmem:[%s20277_s28 + $0x124] sm:$0xff]  ;;  %v14631_v10 = vld [vmem:[%s20277_s28 + $0x93] sm:$0xff]  ;;  %v14632_v11 = vld [vmem:[%s20277_s28 + $0x9b] sm:$0xff] }
 0x149   : > { %v20680_v25 = vpack.c.bf16 %v14582_v24, %v14581_v21  ;;  %v18892_v21 = vld [vmem:[%s20257_s26 + $0x6e4] ss:$16 sps:$4 sm:$0xff]   ;;  %v18895_v24 = vld [vmem:[%s20257_s26 + $0x6ec] ss:$16 sps:$4 sm:$0xff]  }
 0x14b   : > { %2852 = vmatpush1.bf16.msra.mxu0 %v18794_v26  ;;  %3817 = vmatpush1.bf16.msra.mxu1 %v18797_v27  ;;  %v14584_v26 = vld [vmem:[%s20277_s28 + $0x144] sm:$0xff] }
 0x14c   : > { %2853 = vmatprep.subr.bf16.mxu0 %v18802_v28  ;;  %3818 = vmatprep.subr.bf16.mxu1 %v18805_v31  ;;  %v14586_v28 = vld [vmem:[%s20277_s28 + $0x15c] sm:$0xff]  ;;  %v14587_v31 = vld [vmem:[%s20277_s28 + $0x16c] sm:$0xff] }
 0x14d   : > { %2717 = vmatmul.mubr.bf16.gmra.mrb[16].mxu0 %v20600_v32  ;;  %3682 = vmatmul.mubr.bf16.gmra.mrb[16].mxu1 %v20600_v32 }
 0x14e   : > { %2726 = vmatprep.mubr.bf16.mxu0 %v20446_v30  ;;  %3691 = vmatprep.mubr.bf16.mxu1 %v20446_v30  ;;  %v18812_v30 = vld [vmem:[%s20257_s26 + $0x540] ss:$16 sps:$4 sm:$0xff]  }
 0x14f   : > { %2854 = vmatpush1.bf16.msra.mxu0 %v18800_v15  ;;  %3819 = vmatpush1.bf16.msra.mxu1 %v18803_v33  ;;  %v14588_v15 = vld [vmem:[%s20277_s28 + $0x174] sm:$0xff] }
 0x150   : > { %2855 = vmatprep.subr.bf16.mxu0 %v18808_v34  ;;  %3820 = vmatprep.subr.bf16.mxu1 %v18811_v35  ;;  %v20704_v33 = vpack.c.bf16 %v14588_v15, %v14587_v31  ;;  %v14590_v34 = vld [vmem:[%s20277_s28 + $0x18c] sm:$0xff]  ;;  %v18898_v31 = vld [vmem:[%s20257_s26 + $0x704] ss:$16 sps:$4 sm:$0xff]  }
 0x151   : > { %v14623_v35 = vld [vmem:[%s20277_s28 + $0x1b2] sm:$0xff]  ;;  %v18901_v15 = vld [vmem:[%s20257_s26 + $0x70c] ss:$16 sps:$4 sm:$0xff]  }
 0x153   : > { %2856 = vmatpush1.bf16.msra.mxu0 %v18806_v40  ;;  %3821 = vmatpush1.bf16.msra.mxu1 %v18809_v42  ;;  %v14592_v40 = vld [vmem:[%s20277_s28 + $0x1a4] sm:$0xff] }
 0x154   : > { %2857 = vmatprep.subr.bf16.mxu0 %v18814_v43  ;;  %3822 = vmatprep.subr.bf16.mxu1 %v18817_v44  ;;  %v14625_v43 = vld [vmem:[%s20277_s28 + $0x4b] sm:$0xff]  ;;  %v14626_v44 = vld [vmem:[%s20277_s28 + $0x53] sm:$0xff] }
 0x155   : > { %2727 = vmatmul.mubr.bf16.gmra.mrb[20].mxu0 %v20616_v46  ;;  %3692 = vmatmul.mubr.bf16.gmra.mrb[20].mxu1 %v20616_v46 }
 0x156   : > { %2736 = vmatprep.mubr.bf16.mxu0 %v20462_v45  ;;  %3701 = vmatprep.mubr.bf16.mxu1 %v20462_v45  ;;  %v18824_v45 = vld [vmem:[%s20257_s26 + $0x580] ss:$16 sps:$4 sm:$0xff]  }
 0x157   : > { %2858 = vmatpush1.bf16.msra.mxu0 %v18812_v30  ;;  %3823 = vmatpush1.bf16.msra.mxu1 %v18815_v47  ;;  %v492_v30 = vpack.c.bf16 %v14626_v44, %v14625_v43  ;;  %v18848_v47 = vld [vmem:[%s20257_s26 + $0x600] ss:$16 sps:$4 sm:$0xff]   ;;  %v18905_v43 = vld [vmem:[%s20257_s26 + $0x728] ss:$16 sps:$4 sm:$0xff]   ;;  %v18910_v44 = vld [vmem:[%s20257_s26 + $0x744] ss:$16 sps:$4 sm:$0xff]  }
 0x158   : > { %2859 = vmatprep.subr.bf16.mxu0 %v18820_v48  ;;  %3824 = vmatprep.subr.bf16.mxu1 %v18823_v49  ;;  %v18851_v48 = vld [vmem:[%s20257_s26 + $0x608] ss:$16 sps:$4 sm:$0xff]   ;;  %v18856_v49 = vld [vmem:[%s20257_s26 + $0x624] ss:$16 sps:$4 sm:$0xff]  }
 0x15b   : > { %2860 = vmatpush1.bf16.msra.mxu0 %v18818_v53  ;;  %3825 = vmatpush1.bf16.msra.mxu1 %v18821_v23  ;;  %v14628_v53 = vld [vmem:[%s20277_s28 + $0x6b] sm:$0xff] }
 0x15c   : > { %2861 = vmatprep.subr.bf16.mxu0 %v18826_v54  ;;  %3826 = vmatprep.subr.bf16.mxu1 %v18829_v55  ;;  %v18854_v23 = vld [vmem:[%s20257_s26 + $0x620] ss:$16 sps:$4 sm:$0xff]   ;;  %v18862_v54 = vld [vmem:[%s20257_s26 + $0x644] ss:$16 sps:$4 sm:$0xff]   ;;  %v18865_v55 = vld [vmem:[%s20257_s26 + $0x64c] ss:$16 sps:$4 sm:$0xff]  }
 0x15d   : > { %2737 = vmatmul.mubr.bf16.gmra.mrb[24].mxu0 %v20632_v57  ;;  %3702 = vmatmul.mubr.bf16.gmra.mrb[24].mxu1 %v20632_v57 }
 0x15e   : > { %2746 = vmatprep.mubr.bf16.mxu0 %v20478_v60  ;;  %3711 = vmatprep.mubr.bf16.mxu1 %v20478_v60  ;;  %v18836_v60 = vld [vmem:[%s20257_s26 + $0x5c0] ss:$16 sps:$4 sm:$0xff]  }
 0x15f   : > { %2862 = vmatpush1.bf16.msra.mxu0 %v18824_v45  ;;  %3827 = vmatpush1.bf16.msra.mxu1 %v18827_v58  ;;  %v20740_v45 = vpack.c.bf16 %v14628_v53, %v14627_v52  ;;  %v18860_v58 = vld [vmem:[%s20257_s26 + $0x640] ss:$16 sps:$4 sm:$0xff]  }
 0x160   : > { %2863 = vmatprep.subr.bf16.mxu0 %v18832_v59  ;;  %3828 = vmatprep.subr.bf16.mxu1 %v18835_v37  ;;  %v18863_v59 = vld [vmem:[%s20257_s26 + $0x648] ss:$16 sps:$4 sm:$0xff]   ;;  %v18868_v37 = vld [vmem:[%s20257_s26 + $0x664] ss:$16 sps:$4 sm:$0xff]  }
 0x161   : > { %v14637_v52 = vld [vmem:[%s20277_s28 + $0xdb] sm:$0xff]  ;;  %v14638_v53 = vld [vmem:[%s20277_s28 + $0xe3] sm:$0xff] }
 0x163   : > { %2864 = vmatpush1.bf16.msra.mxu0 %v18830_v63  ;;  %3829 = vmatpush1.bf16.msra.mxu1 %v18833_v0  ;;  %v18866_v63 = vld [vmem:[%s20257_s26 + $0x660] ss:$16 sps:$4 sm:$0xff]   ;;  %v18869_v0 = vld [vmem:[%s20257_s26 + $0x668] ss:$16 sps:$4 sm:$0xff]  }
 0x164   : > { %2865 = vmatprep.subr.bf16.mxu0 %v18838_v2  ;;  %3830 = vmatprep.subr.bf16.mxu1 %v18841_v4  ;;  %v18874_v2 = vld [vmem:[%s20257_s26 + $0x684] ss:$16 sps:$4 sm:$0xff]   ;;  %v18877_v4 = vld [vmem:[%s20257_s26 + $0x68c] ss:$16 sps:$4 sm:$0xff]  }
 0x165   : > { %2747 = vmatmul.mubr.bf16.gmra.mrb[28].mxu0 %v20648_v51  ;;  %3712 = vmatmul.mubr.bf16.gmra.mrb[28].mxu1 %v20648_v51 }
 0x166   : > { %2756 = vmatprep.mubr.bf16.mxu0 %v20486_v3  ;;  %3721 = vmatprep.mubr.bf16.mxu1 %v20486_v3  ;;  %v14579_v3 = vld [vmem:[%s20277_s28 + $0x10c] sm:$0xff] }
 0x167   : > { %2866 = vmatpush1.bf16.msra.mxu0 %v18836_v60  ;;  %3831 = vmatpush1.bf16.msra.mxu1 %v18839_v6  ;;  %v20672_v20 = vpack.c.bf16 %v14580_v19, %v14579_v3  ;;  %v20756_v60 = vpack.c.bf16 %v14630_v62, %v14629_v61  ;;  %v18875_v6 = vld [vmem:[%s20257_s26 + $0x688] ss:$16 sps:$4 sm:$0xff]   ;;  %v20772_v3 = vpack.c.bf16 %v14632_v11, %v14631_v10 }
 0x168   : > { %2867 = vmatprep.subr.bf16.mxu0 %v18844_v7  ;;  %3832 = vmatprep.subr.bf16.mxu1 %v18847_v8  ;;  %v18880_v7 = vld [vmem:[%s20257_s26 + $0x6a4] ss:$16 sps:$4 sm:$0xff]   ;;  %v18883_v8 = vld [vmem:[%s20257_s26 + $0x6ac] ss:$16 sps:$4 sm:$0xff]   ;;  %v18887_v19 = vld [vmem:[%s20257_s26 + $0x6c8] ss:$16 sps:$4 sm:$0xff]  }
 0x169   : > { %v14639_v61 = vld [vmem:[%s20277_s28 + $0xf3] sm:$0xff]  ;;  %v14640_v62 = vld [vmem:[%s20277_s28 + $0xfb] sm:$0xff]  ;;  %v14641_v10 = vld [vmem:[%s20277_s28 + $0x10b] sm:$0xff] }
 0x16a   : > { %v14642_v11 = vld [vmem:[%s20277_s28 + $0x113] sm:$0xff] }
 0x16b   : > { %2868 = vmatpush1.bf16.msra.mxu0 %v18842_v12  ;;  %3833 = vmatpush1.bf16.msra.mxu1 %v18845_v13  ;;  %v18878_v12 = vld [vmem:[%s20257_s26 + $0x6a0] ss:$16 sps:$4 sm:$0xff]   ;;  %v18881_v13 = vld [vmem:[%s20257_s26 + $0x6a8] ss:$16 sps:$4 sm:$0xff]  }
 0x16c   : > { %3030 = vmatprep.subr.bf16.mxu0 %v18850_v14  ;;  %3995 = vmatprep.subr.bf16.mxu1 %v18853_v17  ;;  %v18886_v14 = vld [vmem:[%s20257_s26 + $0x6c4] ss:$16 sps:$4 sm:$0xff]   ;;  %v18889_v17 = vld [vmem:[%s20257_s26 + $0x6cc] ss:$16 sps:$4 sm:$0xff]  }
 0x16d   : > { %2757 = vmatmul.mubr.bf16.gmra.mrb[32].mxu0 %v20664_v1  ;;  %3722 = vmatmul.mubr.bf16.gmra.mrb[32].mxu1 %v20664_v1 }
 0x16e   : > { %2766 = vmatprep.mubr.bf16.mxu0 %v20494_v9  ;;  %3731 = vmatprep.mubr.bf16.mxu1 %v20494_v9  ;;  %v14583_v9 = vld [vmem:[%s20277_s28 + $0x13c] sm:$0xff] }
 0x16f   : > { %v20688_v27 = vpack.c.bf16 %v14584_v26, %v14583_v9  ;;  %v14633_v9 = vld [vmem:[%s20277_s28 + $0xab] sm:$0xff]  ;;  %v14634_v26 = vld [vmem:[%s20277_s28 + $0xb3] sm:$0xff] }
 0x175   : > { %2767 = vmatmul.mubr.bf16.gmra.mrb[36].mxu0 %v20672_v20  ;;  %3732 = vmatmul.mubr.bf16.gmra.mrb[36].mxu1 %v20672_v20 }
 0x176   : > { %2776 = vmatprep.mubr.bf16.mxu0 %v20502_v16  ;;  %3741 = vmatprep.mubr.bf16.mxu1 %v20502_v16  ;;  %v14585_v16 = vld [vmem:[%s20277_s28 + $0x154] sm:$0xff] }
 0x17d   : > { %2777 = vmatmul.mubr.bf16.gmra.mrb[40].mxu0 %v20680_v25  ;;  %3742 = vmatmul.mubr.bf16.gmra.mrb[40].mxu1 %v20680_v25 }
 0x17e   : > { %2786 = vmatprep.mubr.bf16.mxu0 %v20510_v22  ;;  %3751 = vmatprep.mubr.bf16.mxu1 %v20510_v22  ;;  %v20696_v22 = vpack.c.bf16 %v14586_v28, %v14585_v16  ;;  %v18890_v16 = vld [vmem:[%s20257_s26 + $0x6e0] ss:$16 sps:$4 sm:$0xff]   ;;  %v18893_v28 = vld [vmem:[%s20257_s26 + $0x6e8] ss:$16 sps:$4 sm:$0xff]  }
 0x185   : > { %2787 = vmatmul.mubr.bf16.gmra.mrb[44].mxu0 %v20688_v27  ;;  %3752 = vmatmul.mubr.bf16.gmra.mrb[44].mxu1 %v20688_v27 }
 0x186   : > { %2796 = vmatprep.mubr.bf16.mxu0 %v20518_v29  ;;  %3761 = vmatprep.mubr.bf16.mxu1 %v20518_v29  ;;  %v14589_v29 = vld [vmem:[%s20277_s28 + $0x184] sm:$0xff] }
 0x187   : > { %v20714_v38 = vpack.c.bf16 %v14590_v34, %v14589_v29  ;;  %v20788_v29 = vpack.c.bf16 %v14634_v26, %v14633_v9  ;;  %v18899_v34 = vld [vmem:[%s20257_s26 + $0x708] ss:$16 sps:$4 sm:$0xff]  }
 0x188   : > { %v14646_v9 = vld [vmem:[%s20277_s28 + $0x143] sm:$0xff] }
 0x18d   : > { %2797 = vmatmul.mubr.bf16.gmra.mrb[48].mxu0 %v20696_v22  ;;  %3762 = vmatmul.mubr.bf16.gmra.mrb[48].mxu1 %v20696_v22 }
 0x18e   : > { %2806 = vmatprep.mubr.bf16.mxu0 %v20526_v36  ;;  %3771 = vmatprep.mubr.bf16.mxu1 %v20526_v36  ;;  %v14624_v36 = vld [vmem:[%s20277_s28 + $0x1ba] sm:$0xff] }
 0x18f   : > { %v459_v39 = vpack.c.bf16 %v14624_v36, %v14623_v35  ;;  %v18904_v35 = vld [vmem:[%s20257_s26 + $0x724] ss:$16 sps:$4 sm:$0xff]   ;;  %v18907_v36 = vld [vmem:[%s20257_s26 + $0x72c] ss:$16 sps:$4 sm:$0xff]  }
 0x195   : > { %2807 = vmatmul.mubr.bf16.gmra.mrb[52].mxu0 %v20704_v33  ;;  %3772 = vmatmul.mubr.bf16.gmra.mrb[52].mxu1 %v20704_v33 }
 0x196   : > { %2816 = vmatprep.mubr.bf16.mxu0 %v20532_v41  ;;  %3781 = vmatprep.mubr.bf16.mxu1 %v20532_v41  ;;  %v14591_v41 = vld [vmem:[%s20277_s28 + $0x19c] sm:$0xff] }
 0x197   : > { %v20720_v42 = vpack.c.bf16 %v14592_v40, %v14591_v41  ;;  %v14636_v41 = vld [vmem:[%s20277_s28 + $0xcb] sm:$0xff] }
 0x198   : > { %v18902_v40 = vld [vmem:[%s20257_s26 + $0x720] ss:$16 sps:$4 sm:$0xff]  }
 0x19d   : > { %2817 = vmatmul.mubr.bf16.gmra.mrb[56].mxu0 %v20714_v38  ;;  %3782 = vmatmul.mubr.bf16.gmra.mrb[56].mxu1 %v20714_v38 }
 0x19e   : > { %2826 = vmatprep.mubr.bf16.mxu0 %v459_v39  ;;  %3791 = vmatprep.mubr.bf16.mxu1 %v459_v39  ;;  %v14635_v39 = vld [vmem:[%s20277_s28 + $0xc3] sm:$0xff] }
 0x1a5   : > { %2827 = vmatmul.mubr.bf16.gmra.mrb[60].mxu0 %v20720_v42  ;;  %3792 = vmatmul.mubr.bf16.gmra.mrb[60].mxu1 %v20720_v42 }
 0x1a6   : > { %2869 = vmatprep.mubr.bf16.mxu0 %v20552_v56  ;;  %3834 = vmatprep.mubr.bf16.mxu1 %v20552_v56  ;;  %v18857_v56 = vld [vmem:[%s20257_s26 + $0x628] ss:$16 sps:$4 sm:$0xff]  }
 0x1ad   : > { %2870 = vmatmul.mubr.bf16.vlgmr.msra.gmra.mrb[0].mxu0 %v492_v30  ;;  %3835 = vmatmul.mubr.bf16.vlgmr.msra.gmra.mrb[0].mxu1 %v492_v30  ;;  %v18913_v30 = vld [vmem:[%s20257_s26 + $0x74c] ss:$16 sps:$4 sm:$0xff]  }
 0x1ae   : > { %3031 = vmatpush1.bf16.msra.mxu0 %v18848_v47  ;;  %3996 = vmatpush1.bf16.msra.mxu1 %v18851_v48  ;;  %v20804_v47 = vpack.c.bf16 %v14636_v41, %v14635_v39  ;;  %v18911_v48 = vld [vmem:[%s20257_s26 + $0x748] ss:$16 sps:$4 sm:$0xff]  }
 0x1af   : > { %2879 = vmatprep.mubr.bf16.mxu0 %v20568_v5  ;;  %3844 = vmatprep.mubr.bf16.mxu1 %v20568_v5  ;;  %v18871_v5 = vld [vmem:[%s20257_s26 + $0x66c] ss:$16 sps:$4 sm:$0xff]  }
 0x1b0   : > { %3032 = vmatprep.subr.bf16.mxu0 %v18856_v49  ;;  %3997 = vmatprep.subr.bf16.mxu1 %v18859_v50  ;;  %v18916_v49 = vld [vmem:[%s20257_s26 + $0x764] ss:$16 sps:$4 sm:$0xff]   ;;  %v18919_v50 = vld [vmem:[%s20257_s26 + $0x76c] ss:$16 sps:$4 sm:$0xff]  }
 0x1b2   : > { %3033 = vmatpush1.bf16.msra.mxu0 %v18854_v23  ;;  %3998 = vmatpush1.bf16.msra.mxu1 %v18857_v56  ;;  %v18914_v23 = vld [vmem:[%s20257_s26 + $0x760] ss:$16 sps:$4 sm:$0xff]   ;;  %v18917_v56 = vld [vmem:[%s20257_s26 + $0x768] ss:$16 sps:$4 sm:$0xff]  }
 0x1b3   : > { %3034 = vmatprep.subr.bf16.mxu0 %v18862_v54  ;;  %3999 = vmatprep.subr.bf16.mxu1 %v18865_v55  ;;  %v18922_v54 = vld [vmem:[%s20257_s26 + $0x784] ss:$16 sps:$4 sm:$0xff]   ;;  %v18925_v55 = vld [vmem:[%s20257_s26 + $0x78c] ss:$16 sps:$4 sm:$0xff]  }
 0x1b5   : > { %2880 = vmatmul.mubr.bf16.gmra.mrb[4].mxu0 %v20740_v45  ;;  %3845 = vmatmul.mubr.bf16.gmra.mrb[4].mxu1 %v20740_v45 }
 0x1b6   : > { %2889 = vmatprep.mubr.bf16.mxu0 %v20584_v18  ;;  %3854 = vmatprep.mubr.bf16.mxu1 %v20584_v18  ;;  %v18872_v18 = vld [vmem:[%s20257_s26 + $0x680] ss:$16 sps:$4 sm:$0xff]  }
 0x1b7   : > { %3035 = vmatpush1.bf16.msra.mxu0 %v18860_v58  ;;  %4000 = vmatpush1.bf16.msra.mxu1 %v18863_v59  ;;  %v20820_v58 = vpack.c.bf16 %v14638_v53, %v14637_v52  ;;  %v18923_v59 = vld [vmem:[%s20257_s26 + $0x788] ss:$16 sps:$4 sm:$0xff]   ;;  %v18955_v52 = vld [vmem:[%s20257_s26 + $0x82c] ss:$16 sps:$4 sm:$0xff]  }
 0x1b8   : > { %3036 = vmatprep.subr.bf16.mxu0 %v18868_v37  ;;  %4001 = vmatprep.subr.bf16.mxu1 %v18871_v5  ;;  %v18928_v37 = vld [vmem:[%s20257_s26 + $0x7a4] ss:$16 sps:$4 sm:$0xff]   ;;  %v18931_v5 = vld [vmem:[%s20257_s26 + $0x7ac] ss:$16 sps:$4 sm:$0xff]  }
 0x1b9   : > { %v14691_v53 = vld [vmem:[%s20277_s28 + $0x7a] sm:$0xff] }
 0x1bb   : > { %3037 = vmatpush1.bf16.msra.mxu0 %v18866_v63  ;;  %4002 = vmatpush1.bf16.msra.mxu1 %v18869_v0  ;;  %v18926_v63 = vld [vmem:[%s20257_s26 + $0x7a0] ss:$16 sps:$4 sm:$0xff]   ;;  %v18929_v0 = vld [vmem:[%s20257_s26 + $0x7a8] ss:$16 sps:$4 sm:$0xff]  }
 0x1bc   : > { %3038 = vmatprep.subr.bf16.mxu0 %v18874_v2  ;;  %4003 = vmatprep.subr.bf16.mxu1 %v18877_v4  ;;  %v18934_v2 = vld [vmem:[%s20257_s26 + $0x7c4] ss:$16 sps:$4 sm:$0xff]   ;;  %v18937_v4 = vld [vmem:[%s20257_s26 + $0x7cc] ss:$16 sps:$4 sm:$0xff]  }
 0x1bd   : > { %2890 = vmatmul.mubr.bf16.gmra.mrb[8].mxu0 %v20756_v60  ;;  %3855 = vmatmul.mubr.bf16.gmra.mrb[8].mxu1 %v20756_v60 }
 0x1be   : > { %2899 = vmatprep.mubr.bf16.mxu0 %v20600_v32  ;;  %3864 = vmatprep.mubr.bf16.mxu1 %v20600_v32  ;;  %v18884_v32 = vld [vmem:[%s20257_s26 + $0x6c0] ss:$16 sps:$4 sm:$0xff]  }
 0x1bf   : > { %3039 = vmatpush1.bf16.msra.mxu0 %v18872_v18  ;;  %4004 = vmatpush1.bf16.msra.mxu1 %v18875_v6  ;;  %v20836_v18 = vpack.c.bf16 %v14640_v62, %v14639_v61  ;;  %v18935_v6 = vld [vmem:[%s20257_s26 + $0x7c8] ss:$16 sps:$4 sm:$0xff]   ;;  %v18967_v61 = vld [vmem:[%s20257_s26 + $0x86c] ss:$16 sps:$4 sm:$0xff]  }
 0x1c0   : > { %3040 = vmatprep.subr.bf16.mxu0 %v18880_v7  ;;  %4005 = vmatprep.subr.bf16.mxu1 %v18883_v8  ;;  %v18940_v7 = vld [vmem:[%s20257_s26 + $0x7e4] ss:$16 sps:$4 sm:$0xff]   ;;  %v18943_v8 = vld [vmem:[%s20257_s26 + $0x7ec] ss:$16 sps:$4 sm:$0xff]  }
 0x1c1   : > { %v14694_v62 = vld [vmem:[%s20277_s28 + $0x9a] sm:$0xff] }
 0x1c3   : > { %3041 = vmatpush1.bf16.msra.mxu0 %v18878_v12  ;;  %4006 = vmatpush1.bf16.msra.mxu1 %v18881_v13  ;;  %v18938_v12 = vld [vmem:[%s20257_s26 + $0x7e0] ss:$16 sps:$4 sm:$0xff]   ;;  %v18941_v13 = vld [vmem:[%s20257_s26 + $0x7e8] ss:$16 sps:$4 sm:$0xff]  }
 0x1c4   : > { %3042 = vmatprep.subr.bf16.mxu0 %v18886_v14  ;;  %4007 = vmatprep.subr.bf16.mxu1 %v18889_v17  ;;  %v18946_v14 = vld [vmem:[%s20257_s26 + $0x804] ss:$16 sps:$4 sm:$0xff]   ;;  %v18949_v17 = vld [vmem:[%s20257_s26 + $0x80c] ss:$16 sps:$4 sm:$0xff]  }
 0x1c5   : > { %2900 = vmatmul.mubr.bf16.gmra.mrb[12].mxu0 %v20772_v3  ;;  %3865 = vmatmul.mubr.bf16.gmra.mrb[12].mxu1 %v20772_v3 }
 0x1c6   : > { %2909 = vmatprep.mubr.bf16.mxu0 %v20616_v46  ;;  %3874 = vmatprep.mubr.bf16.mxu1 %v20616_v46  ;;  %v18896_v46 = vld [vmem:[%s20257_s26 + $0x700] ss:$16 sps:$4 sm:$0xff]  }
 0x1c7   : > { %3043 = vmatpush1.bf16.msra.mxu0 %v18884_v32  ;;  %4008 = vmatpush1.bf16.msra.mxu1 %v18887_v19  ;;  %v20852_v32 = vpack.c.bf16 %v14642_v11, %v14641_v10  ;;  %v14644_v19 = vld [vmem:[%s20277_s28 + $0x12b] sm:$0xff] }
 0x1c8   : > { %3044 = vmatprep.subr.bf16.mxu0 %v18892_v21  ;;  %4009 = vmatprep.subr.bf16.mxu1 %v18895_v24  ;;  %v14645_v24 = vld [vmem:[%s20277_s28 + $0x13b] sm:$0xff]  ;;  %v14695_v10 = vld [vmem:[%s20277_s28 + $0xaa] sm:$0xff]  ;;  %v14696_v11 = vld [vmem:[%s20277_s28 + $0xb2] sm:$0xff] }
 0x1c9   : > { %v20868_v26 = vpack.c.bf16 %v14646_v9, %v14645_v24  ;;  %v18988_v24 = vld [vmem:[%s20257_s26 + $0x8e4] ss:$16 sps:$4 sm:$0xff]   ;;  %v18991_v9 = vld [vmem:[%s20257_s26 + $0x8ec] ss:$16 sps:$4 sm:$0xff]  }
 0x1cb   : > { %3045 = vmatpush1.bf16.msra.mxu0 %v18890_v16  ;;  %4010 = vmatpush1.bf16.msra.mxu1 %v18893_v28  ;;  %v14648_v16 = vld [vmem:[%s20277_s28 + $0x15b] sm:$0xff] }
 0x1cc   : > { %3046 = vmatprep.subr.bf16.mxu0 %v18898_v31  ;;  %4011 = vmatprep.subr.bf16.mxu1 %v18901_v15  ;;  %v14650_v31 = vld [vmem:[%s20277_s28 + $0x173] sm:$0xff]  ;;  %v14651_v15 = vld [vmem:[%s20277_s28 + $0x183] sm:$0xff] }
 0x1cd   : > { %2910 = vmatmul.mubr.bf16.gmra.mrb[16].mxu0 %v20788_v29  ;;  %3875 = vmatmul.mubr.bf16.gmra.mrb[16].mxu1 %v20788_v29 }
 0x1ce   : > { %2919 = vmatprep.mubr.bf16.mxu0 %v20632_v57  ;;  %3884 = vmatprep.mubr.bf16.mxu1 %v20632_v57  ;;  %v18908_v57 = vld [vmem:[%s20257_s26 + $0x740] ss:$16 sps:$4 sm:$0xff]  }
 0x1cf   : > { %3047 = vmatpush1.bf16.msra.mxu0 %v18896_v46  ;;  %4012 = vmatpush1.bf16.msra.mxu1 %v18899_v34  ;;  %v14652_v46 = vld [vmem:[%s20277_s28 + $0x18b] sm:$0xff] }
 0x1d0   : > { %3048 = vmatprep.subr.bf16.mxu0 %v18904_v35  ;;  %4013 = vmatprep.subr.bf16.mxu1 %v18907_v36  ;;  %v20892_v34 = vpack.c.bf16 %v14652_v46, %v14651_v15  ;;  %v14654_v35 = vld [vmem:[%s20277_s28 + $0x1a3] sm:$0xff]  ;;  %v14687_v36 = vld [vmem:[%s20277_s28 + $0x1b4] sm:$0xff] }
 0x1d1   : > { %v14700_v46 = vld [vmem:[%s20277_s28 + $0xe2] sm:$0xff] }
 0x1d3   : > { %3049 = vmatpush1.bf16.msra.mxu0 %v18902_v40  ;;  %4014 = vmatpush1.bf16.msra.mxu1 %v18905_v43  ;;  %v14656_v40 = vld [vmem:[%s20277_s28 + $0x1bb] sm:$0xff] }
 0x1d4   : > { %3050 = vmatprep.subr.bf16.mxu0 %v18910_v44  ;;  %4015 = vmatprep.subr.bf16.mxu1 %v18913_v30  ;;  %v14689_v44 = vld [vmem:[%s20277_s28 + $0x62] sm:$0xff]  ;;  %v14690_v30 = vld [vmem:[%s20277_s28 + $0x6a] sm:$0xff] }
 0x1d5   : > { %2920 = vmatmul.mubr.bf16.gmra.mrb[20].mxu0 %v20804_v47  ;;  %3885 = vmatmul.mubr.bf16.gmra.mrb[20].mxu1 %v20804_v47 }
 0x1d6   : > { %2929 = vmatprep.mubr.bf16.mxu0 %v20648_v51  ;;  %3894 = vmatprep.mubr.bf16.mxu1 %v20648_v51  ;;  %v18920_v51 = vld [vmem:[%s20257_s26 + $0x780] ss:$16 sps:$4 sm:$0xff]  }
 0x1d7   : > { %3051 = vmatpush1.bf16.msra.mxu0 %v18908_v57  ;;  %4016 = vmatpush1.bf16.msra.mxu1 %v18911_v48  ;;  %v589_v57 = vpack.c.bf16 %v14690_v30, %v14689_v44  ;;  %v18944_v48 = vld [vmem:[%s20257_s26 + $0x800] ss:$16 sps:$4 sm:$0xff]  }
 0x1d8   : > { %3052 = vmatprep.subr.bf16.mxu0 %v18916_v49  ;;  %4017 = vmatprep.subr.bf16.mxu1 %v18919_v50  ;;  %v18947_v49 = vld [vmem:[%s20257_s26 + $0x808] ss:$16 sps:$4 sm:$0xff]   ;;  %v18952_v50 = vld [vmem:[%s20257_s26 + $0x824] ss:$16 sps:$4 sm:$0xff]  }
 0x1d9   : > { %v14706_v44 = vld [vmem:[%s20277_s28 + $0x12a] sm:$0xff] }
 0x1db   : > { %3053 = vmatpush1.bf16.msra.mxu0 %v18914_v23  ;;  %4018 = vmatpush1.bf16.msra.mxu1 %v18917_v56  ;;  %v14692_v23 = vld [vmem:[%s20277_s28 + $0x82] sm:$0xff] }
 0x1dc   : > { %3054 = vmatprep.subr.bf16.mxu0 %v18922_v54  ;;  %4019 = vmatprep.subr.bf16.mxu1 %v18925_v55  ;;  %v18950_v56 = vld [vmem:[%s20257_s26 + $0x820] ss:$16 sps:$4 sm:$0xff]   ;;  %v18958_v54 = vld [vmem:[%s20257_s26 + $0x844] ss:$16 sps:$4 sm:$0xff]   ;;  %v18961_v55 = vld [vmem:[%s20257_s26 + $0x84c] ss:$16 sps:$4 sm:$0xff]  }
 0x1dd   : > { %2930 = vmatmul.mubr.bf16.gmra.mrb[24].mxu0 %v20820_v58  ;;  %3895 = vmatmul.mubr.bf16.gmra.mrb[24].mxu1 %v20820_v58 }
 0x1de   : > { %2939 = vmatprep.mubr.bf16.mxu0 %v20664_v1  ;;  %3904 = vmatprep.mubr.bf16.mxu1 %v20664_v1  ;;  %v18932_v1 = vld [vmem:[%s20257_s26 + $0x7c0] ss:$16 sps:$4 sm:$0xff]  }
 0x1df   : > { %3055 = vmatpush1.bf16.msra.mxu0 %v18920_v51  ;;  %4020 = vmatpush1.bf16.msra.mxu1 %v18923_v59  ;;  %v590_v51 = vpack.c.bf16 %v14692_v23, %v14691_v53  ;;  %v18956_v59 = vld [vmem:[%s20257_s26 + $0x840] ss:$16 sps:$4 sm:$0xff]  }
 0x1e0   : > { %3056 = vmatprep.subr.bf16.mxu0 %v18928_v37  ;;  %4021 = vmatprep.subr.bf16.mxu1 %v18931_v5  ;;  %v18959_v37 = vld [vmem:[%s20257_s26 + $0x848] ss:$16 sps:$4 sm:$0xff]   ;;  %v18964_v5 = vld [vmem:[%s20257_s26 + $0x864] ss:$16 sps:$4 sm:$0xff]  }
 0x1e1   : > { %v14714_v23 = vld [vmem:[%s20277_s28 + $0x18a] sm:$0xff] }
 0x1e3   : > { %3057 = vmatpush1.bf16.msra.mxu0 %v18926_v63  ;;  %4022 = vmatpush1.bf16.msra.mxu1 %v18929_v0  ;;  %v18962_v63 = vld [vmem:[%s20257_s26 + $0x860] ss:$16 sps:$4 sm:$0xff]   ;;  %v18965_v0 = vld [vmem:[%s20257_s26 + $0x868] ss:$16 sps:$4 sm:$0xff]  }
 0x1e4   : > { %3058 = vmatprep.subr.bf16.mxu0 %v18934_v2  ;;  %4023 = vmatprep.subr.bf16.mxu1 %v18937_v4  ;;  %v18970_v2 = vld [vmem:[%s20257_s26 + $0x884] ss:$16 sps:$4 sm:$0xff]   ;;  %v18973_v4 = vld [vmem:[%s20257_s26 + $0x88c] ss:$16 sps:$4 sm:$0xff]  }
 0x1e5   : > { %2940 = vmatmul.mubr.bf16.gmra.mrb[28].mxu0 %v20836_v18  ;;  %3905 = vmatmul.mubr.bf16.gmra.mrb[28].mxu1 %v20836_v18 }
 0x1e6   : > { %2949 = vmatprep.mubr.bf16.mxu0 %v20672_v20  ;;  %3914 = vmatprep.mubr.bf16.mxu1 %v20672_v20  ;;  %v14643_v20 = vld [vmem:[%s20277_s28 + $0x123] sm:$0xff] }
 0x1e7   : > { %3059 = vmatpush1.bf16.msra.mxu0 %v18932_v1  ;;  %4024 = vmatpush1.bf16.msra.mxu1 %v18935_v6  ;;  %v20860_v21 = vpack.c.bf16 %v14644_v19, %v14643_v20  ;;  %v18971_v6 = vld [vmem:[%s20257_s26 + $0x888] ss:$16 sps:$4 sm:$0xff]   ;;  %v592_v20 = vpack.c.bf16 %v14696_v11, %v14695_v10 }
 0x1e8   : > { %3060 = vmatprep.subr.bf16.mxu0 %v18940_v7  ;;  %4025 = vmatprep.subr.bf16.mxu1 %v18943_v8  ;;  %v18976_v7 = vld [vmem:[%s20257_s26 + $0x8a4] ss:$16 sps:$4 sm:$0xff]   ;;  %v18979_v8 = vld [vmem:[%s20257_s26 + $0x8ac] ss:$16 sps:$4 sm:$0xff]   ;;  %v18983_v19 = vld [vmem:[%s20257_s26 + $0x8c8] ss:$16 sps:$4 sm:$0xff]  }
 0x1e9   : > { %v14760_v10 = vld [vmem:[%s20277_s28 + $0xb4] sm:$0xff] }
 0x1eb   : > { %3061 = vmatpush1.bf16.msra.mxu0 %v18938_v12  ;;  %4026 = vmatpush1.bf16.msra.mxu1 %v18941_v13  ;;  %v18974_v12 = vld [vmem:[%s20257_s26 + $0x8a0] ss:$16 sps:$4 sm:$0xff]   ;;  %v18977_v13 = vld [vmem:[%s20257_s26 + $0x8a8] ss:$16 sps:$4 sm:$0xff]  }
 0x1ec   : > { %3223 = vmatprep.subr.bf16.mxu0 %v18946_v14  ;;  %4188 = vmatprep.subr.bf16.mxu1 %v18949_v17  ;;  %v18982_v14 = vld [vmem:[%s20257_s26 + $0x8c4] ss:$16 sps:$4 sm:$0xff]   ;;  %v18985_v17 = vld [vmem:[%s20257_s26 + $0x8cc] ss:$16 sps:$4 sm:$0xff]  }
 0x1ed   : > { %2950 = vmatmul.mubr.bf16.gmra.mrb[32].mxu0 %v20852_v32  ;;  %3915 = vmatmul.mubr.bf16.gmra.mrb[32].mxu1 %v20852_v32 }
 0x1ee   : > { %2959 = vmatprep.mubr.bf16.mxu0 %v20680_v25  ;;  %3924 = vmatprep.mubr.bf16.mxu1 %v20680_v25  ;;  %v14647_v25 = vld [vmem:[%s20277_s28 + $0x153] sm:$0xff] }
 0x1ef   : > { %v20876_v28 = vpack.c.bf16 %v14648_v16, %v14647_v25  ;;  %v14697_v25 = vld [vmem:[%s20277_s28 + $0xc2] sm:$0xff]  ;;  %v14698_v16 = vld [vmem:[%s20277_s28 + $0xca] sm:$0xff] }
 0x1f0   : > { %v593_v15 = vpack.c.bf16 %v14698_v16, %v14697_v25  ;;  %v14767_v25 = vld [vmem:[%s20277_s28 + $0x10c] sm:$0xff]  ;;  %v14768_v16 = vld [vmem:[%s20277_s28 + $0x114] sm:$0xff] }
 0x1f5   : > { %2960 = vmatmul.mubr.bf16.gmra.mrb[36].mxu0 %v20860_v21  ;;  %3925 = vmatmul.mubr.bf16.gmra.mrb[36].mxu1 %v20860_v21 }
 0x1f6   : > { %2969 = vmatprep.mubr.bf16.mxu0 %v20688_v27  ;;  %3934 = vmatprep.mubr.bf16.mxu1 %v20688_v27  ;;  %v14649_v27 = vld [vmem:[%s20277_s28 + $0x16b] sm:$0xff] }
 0x1fd   : > { %2970 = vmatmul.mubr.bf16.gmra.mrb[40].mxu0 %v20868_v26  ;;  %3935 = vmatmul.mubr.bf16.gmra.mrb[40].mxu1 %v20868_v26 }
 0x1fe   : > { %2979 = vmatprep.mubr.bf16.mxu0 %v20696_v22  ;;  %3944 = vmatprep.mubr.bf16.mxu1 %v20696_v22  ;;  %v20884_v22 = vpack.c.bf16 %v14650_v31, %v14649_v27  ;;  %v18986_v27 = vld [vmem:[%s20257_s26 + $0x8e0] ss:$16 sps:$4 sm:$0xff]   ;;  %v18989_v31 = vld [vmem:[%s20257_s26 + $0x8e8] ss:$16 sps:$4 sm:$0xff]  }
 0x205   : > { %2980 = vmatmul.mubr.bf16.gmra.mrb[44].mxu0 %v20876_v28  ;;  %3945 = vmatmul.mubr.bf16.gmra.mrb[44].mxu1 %v20876_v28 }
 0x206   : > { %2989 = vmatprep.mubr.bf16.mxu0 %v20704_v33  ;;  %3954 = vmatprep.mubr.bf16.mxu1 %v20704_v33  ;;  %v14653_v33 = vld [vmem:[%s20277_s28 + $0x19b] sm:$0xff] }
 0x207   : > { %v20902_v39 = vpack.c.bf16 %v14654_v35, %v14653_v33  ;;  %v14701_v35 = vld [vmem:[%s20277_s28 + $0xf2] sm:$0xff] }
 0x20d   : > { %2990 = vmatmul.mubr.bf16.gmra.mrb[48].mxu0 %v20884_v22  ;;  %3955 = vmatmul.mubr.bf16.gmra.mrb[48].mxu1 %v20884_v22 }
 0x20e   : > { %2999 = vmatprep.mubr.bf16.mxu0 %v20714_v38  ;;  %3964 = vmatprep.mubr.bf16.mxu1 %v20714_v38  ;;  %v14688_v38 = vld [vmem:[%s20277_s28 + $0x1bc] sm:$0xff] }
 0x20f   : > { %v20904_v41 = vpack.c.bf16 %v14688_v38, %v14687_v36  ;;  %v14702_v36 = vld [vmem:[%s20277_s28 + $0xfa] sm:$0xff] }
 0x210   : > { %v595_v38 = vpack.c.bf16 %v14702_v36, %v14701_v35  ;;  %v14773_v36 = vld [vmem:[%s20277_s28 + $0x154] sm:$0xff] }
 0x215   : > { %3000 = vmatmul.mubr.bf16.gmra.mrb[52].mxu0 %v20892_v34  ;;  %3965 = vmatmul.mubr.bf16.gmra.mrb[52].mxu1 %v20892_v34 }
 0x216   : > { %3009 = vmatprep.mubr.bf16.mxu0 %v20720_v42  ;;  %3974 = vmatprep.mubr.bf16.mxu1 %v20720_v42  ;;  %v14655_v42 = vld [vmem:[%s20277_s28 + $0x1b3] sm:$0xff] }
 0x217   : > { %v20912_v43 = vpack.c.bf16 %v14656_v40, %v14655_v42  ;;  %v14704_v42 = vld [vmem:[%s20277_s28 + $0x112] sm:$0xff] }
 0x21d   : > { %3010 = vmatmul.mubr.bf16.gmra.mrb[56].mxu0 %v20902_v39  ;;  %3975 = vmatmul.mubr.bf16.gmra.mrb[56].mxu1 %v20902_v39 }
 0x21e   : > { %3019 = vmatprep.mubr.bf16.mxu0 %v20904_v41  ;;  %3984 = vmatprep.mubr.bf16.mxu1 %v20904_v41 }
 0x225   : > { %3020 = vmatmul.mubr.bf16.gmra.mrb[60].mxu0 %v20912_v43  ;;  %3985 = vmatmul.mubr.bf16.gmra.mrb[60].mxu1 %v20912_v43 }
 0x226   : > { %3062 = vmatprep.mubr.bf16.mxu0 %v20740_v45  ;;  %4027 = vmatprep.mubr.bf16.mxu1 %v20740_v45  ;;  %v18953_v45 = vld [vmem:[%s20257_s26 + $0x828] ss:$16 sps:$4 sm:$0xff]  }
 0x22d   : > { %3063 = vmatmul.mubr.bf16.vlgmr.msra.gmra.mrb[0].mxu0 %v589_v57  ;;  %4028 = vmatmul.mubr.bf16.vlgmr.msra.gmra.mrb[0].mxu1 %v589_v57  ;;  %v14708_v57 = vld [vmem:[%s20277_s28 + $0x142] sm:$0xff] }
 0x22e   : > { %3224 = vmatpush1.bf16.msra.mxu0 %v18944_v48  ;;  %4189 = vmatpush1.bf16.msra.mxu1 %v18947_v49  ;;  %v14710_v49 = vld [vmem:[%s20277_s28 + $0x15a] sm:$0xff] }
 0x22f   : > { %3072 = vmatprep.mubr.bf16.mxu0 %v20756_v60  ;;  %4037 = vmatprep.mubr.bf16.mxu1 %v20756_v60  ;;  %v14693_v60 = vld [vmem:[%s20277_s28 + $0x92] sm:$0xff] }
 0x230   : > { %3225 = vmatprep.subr.bf16.mxu0 %v18952_v50  ;;  %4190 = vmatprep.subr.bf16.mxu1 %v18955_v52  ;;  %v591_v1 = vpack.c.bf16 %v14694_v62, %v14693_v60  ;;  %v14712_v52 = vld [vmem:[%s20277_s28 + $0x172] sm:$0xff]  ;;  %v14753_v62 = vld [vmem:[%s20277_s28 + $0x64] sm:$0xff] }
 0x232   : > { %3226 = vmatpush1.bf16.msra.mxu0 %v18950_v56  ;;  %4191 = vmatpush1.bf16.msra.mxu1 %v18953_v45  ;;  %v14716_v45 = vld [vmem:[%s20277_s28 + $0x1a2] sm:$0xff] }
 0x233   : > { %3227 = vmatprep.subr.bf16.mxu0 %v18958_v54  ;;  %4192 = vmatprep.subr.bf16.mxu1 %v18961_v55  ;;  %v14718_v55 = vld [vmem:[%s20277_s28 + $0x1ba] sm:$0xff] }
 0x235   : > { %3073 = vmatmul.mubr.bf16.gmra.mrb[4].mxu0 %v590_v51  ;;  %4038 = vmatmul.mubr.bf16.gmra.mrb[4].mxu1 %v590_v51  ;;  %v14751_v51 = vld [vmem:[%s20277_s28 + $0x1cb] sm:$0xff] }
 0x236   : > { %3082 = vmatprep.mubr.bf16.mxu0 %v20772_v3  ;;  %4047 = vmatprep.mubr.bf16.mxu1 %v20772_v3  ;;  %v18968_v3 = vld [vmem:[%s20257_s26 + $0x880] ss:$16 sps:$4 sm:$0xff]  }
 0x237   : > { %3228 = vmatpush1.bf16.msra.mxu0 %v18956_v59  ;;  %4193 = vmatpush1.bf16.msra.mxu1 %v18959_v37  ;;  %v14752_v59 = vld [vmem:[%s20277_s28 + $0x1d3] sm:$0xff] }
 0x238   : > { %3229 = vmatprep.subr.bf16.mxu0 %v18964_v5  ;;  %4194 = vmatprep.subr.bf16.mxu1 %v18967_v61  ;;  %v652_v5 = vpack.c.bf16 %v14752_v59, %v14751_v51  ;;  %v14720_v61 = vld [vmem:[%s20277_s28 + $0x1d2] sm:$0xff] }
 0x23b   : > { %3230 = vmatpush1.bf16.msra.mxu0 %v18962_v63  ;;  %4195 = vmatpush1.bf16.msra.mxu1 %v18965_v0  ;;  %v14754_v63 = vld [vmem:[%s20277_s28 + $0x6c] sm:$0xff] }
 0x23c   : > { %3231 = vmatprep.subr.bf16.mxu0 %v18970_v2  ;;  %4196 = vmatprep.subr.bf16.mxu1 %v18973_v4  ;;  %v685_v0 = vpack.c.bf16 %v14754_v63, %v14753_v62  ;;  %v14755_v2 = vld [vmem:[%s20277_s28 + $0x7c] sm:$0xff]  ;;  %v14756_v4 = vld [vmem:[%s20277_s28 + $0x84] sm:$0xff] }
 0x23d   : > { %3083 = vmatmul.mubr.bf16.gmra.mrb[8].mxu0 %v591_v1  ;;  %4048 = vmatmul.mubr.bf16.gmra.mrb[8].mxu1 %v591_v1  ;;  %v686_v1 = vpack.c.bf16 %v14756_v4, %v14755_v2 }
 0x23e   : > { %3092 = vmatprep.mubr.bf16.mxu0 %v20788_v29  ;;  %4057 = vmatprep.mubr.bf16.mxu1 %v20788_v29  ;;  %v18980_v29 = vld [vmem:[%s20257_s26 + $0x8c0] ss:$16 sps:$4 sm:$0xff]  }
 0x23f   : > { %3232 = vmatpush1.bf16.msra.mxu0 %v18968_v3  ;;  %4197 = vmatpush1.bf16.msra.mxu1 %v18971_v6  ;;  %v14757_v3 = vld [vmem:[%s20277_s28 + $0x94] sm:$0xff]  ;;  %v14758_v6 = vld [vmem:[%s20277_s28 + $0x9c] sm:$0xff] }
 0x240   : > { %3233 = vmatprep.subr.bf16.mxu0 %v18976_v7  ;;  %4198 = vmatprep.subr.bf16.mxu1 %v18979_v8  ;;  %v687_v7 = vpack.c.bf16 %v14758_v6, %v14757_v3  ;;  %v14759_v8 = vld [vmem:[%s20277_s28 + $0xac] sm:$0xff] }
 0x241   : > { %v688_v11 = vpack.c.bf16 %v14760_v10, %v14759_v8 }
 0x243   : > { %3234 = vmatpush1.bf16.msra.mxu0 %v18974_v12  ;;  %4199 = vmatpush1.bf16.msra.mxu1 %v18977_v13  ;;  %v14761_v12 = vld [vmem:[%s20277_s28 + $0xc4] sm:$0xff]  ;;  %v14762_v13 = vld [vmem:[%s20277_s28 + $0xcc] sm:$0xff] }
 0x244   : > { %3235 = vmatprep.subr.bf16.mxu0 %v18982_v14  ;;  %4200 = vmatprep.subr.bf16.mxu1 %v18985_v17  ;;  %v689_v14 = vpack.c.bf16 %v14762_v13, %v14761_v12  ;;  %v14763_v17 = vld [vmem:[%s20277_s28 + $0xdc] sm:$0xff] }
 0x245   : > { %3093 = vmatmul.mubr.bf16.gmra.mrb[12].mxu0 %v592_v20  ;;  %4058 = vmatmul.mubr.bf16.gmra.mrb[12].mxu1 %v592_v20  ;;  %v14764_v20 = vld [vmem:[%s20277_s28 + $0xe4] sm:$0xff] }
 0x246   : > { %3102 = vmatprep.mubr.bf16.mxu0 %v20804_v47  ;;  %4067 = vmatprep.mubr.bf16.mxu1 %v20804_v47  ;;  %v14699_v47 = vld [vmem:[%s20277_s28 + $0xda] sm:$0xff] }
 0x247   : > { %3236 = vmatpush1.bf16.msra.mxu0 %v18980_v29  ;;  %4201 = vmatpush1.bf16.msra.mxu1 %v18983_v19  ;;  %v594_v33 = vpack.c.bf16 %v14700_v46, %v14699_v47  ;;  %v690_v29 = vpack.c.bf16 %v14764_v20, %v14763_v17  ;;  %v14765_v19 = vld [vmem:[%s20277_s28 + $0xf4] sm:$0xff]  ;;  %v14771_v46 = vld [vmem:[%s20277_s28 + $0x13c] sm:$0xff] }
 0x248   : > { %3237 = vmatprep.subr.bf16.mxu0 %v18988_v24  ;;  %4202 = vmatprep.subr.bf16.mxu1 %v18991_v9  ;;  %v14766_v24 = vld [vmem:[%s20277_s28 + $0xfc] sm:$0xff] }
 0x249   : > { %v691_v9 = vpack.c.bf16 %v14766_v24, %v14765_v19 }
 0x24b   : > { %3238 = vmatpush1.bf16.msra.mxu0 %v18986_v27  ;;  %4203 = vmatpush1.bf16.msra.mxu1 %v18989_v31  ;;  %v692_v27 = vpack.c.bf16 %v14768_v16, %v14767_v25  ;;  %v14769_v31 = vld [vmem:[%s20277_s28 + $0x124] sm:$0xff] }
 0x24d   : > { %3103 = vmatmul.mubr.bf16.gmra.mrb[16].mxu0 %v593_v15  ;;  %4068 = vmatmul.mubr.bf16.gmra.mrb[16].mxu1 %v593_v15  ;;  %v14770_v15 = vld [vmem:[%s20277_s28 + $0x12c] sm:$0xff] }
 0x24e   : > { %3112 = vmatprep.mubr.bf16.mxu0 %v20820_v58  ;;  %4077 = vmatprep.mubr.bf16.mxu1 %v20820_v58  ;;  %v14703_v58 = vld [vmem:[%s20277_s28 + $0x10a] sm:$0xff]  ;;  %v693_v47 = vpack.c.bf16 %v14770_v15, %v14769_v31 }
 0x24f   : > { %v596_v40 = vpack.c.bf16 %v14704_v42, %v14703_v58  ;;  %v14775_v42 = vld [vmem:[%s20277_s28 + $0x16c] sm:$0xff] }
 0x255   : > { %3113 = vmatmul.mubr.bf16.gmra.mrb[20].mxu0 %v594_v33  ;;  %4078 = vmatmul.mubr.bf16.gmra.mrb[20].mxu1 %v594_v33  ;;  %v14772_v33 = vld [vmem:[%s20277_s28 + $0x144] sm:$0xff] }
 0x256   : > { %3122 = vmatprep.mubr.bf16.mxu0 %v20836_v18  ;;  %4087 = vmatprep.mubr.bf16.mxu1 %v20836_v18  ;;  %v14705_v18 = vld [vmem:[%s20277_s28 + $0x122] sm:$0xff]  ;;  %v694_v35 = vpack.c.bf16 %v14772_v33, %v14771_v46 }
 0x257   : > { %v597_v30 = vpack.c.bf16 %v14706_v44, %v14705_v18  ;;  %v14777_v44 = vld [vmem:[%s20277_s28 + $0x184] sm:$0xff] }
 0x25d   : > { %3123 = vmatmul.mubr.bf16.gmra.mrb[24].mxu0 %v595_v38  ;;  %4088 = vmatmul.mubr.bf16.gmra.mrb[24].mxu1 %v595_v38  ;;  %v14774_v38 = vld [vmem:[%s20277_s28 + $0x15c] sm:$0xff] }
 0x25e   : > { %3132 = vmatprep.mubr.bf16.mxu0 %v20852_v32  ;;  %4097 = vmatprep.mubr.bf16.mxu1 %v20852_v32  ;;  %v14707_v32 = vld [vmem:[%s20277_s28 + $0x13a] sm:$0xff]  ;;  %v695_v58 = vpack.c.bf16 %v14774_v38, %v14773_v36 }
 0x25f   : > { %v598_v48 = vpack.c.bf16 %v14708_v57, %v14707_v32  ;;  %v14779_v57 = vld [vmem:[%s20277_s28 + $0x19c] sm:$0xff] }
 0x265   : > { %3133 = vmatmul.mubr.bf16.gmra.mrb[28].mxu0 %v596_v40  ;;  %4098 = vmatmul.mubr.bf16.gmra.mrb[28].mxu1 %v596_v40  ;;  %v14776_v40 = vld [vmem:[%s20277_s28 + $0x174] sm:$0xff] }
 0x266   : > { %3142 = vmatprep.mubr.bf16.mxu0 %v20860_v21  ;;  %4107 = vmatprep.mubr.bf16.mxu1 %v20860_v21  ;;  %v14709_v21 = vld [vmem:[%s20277_s28 + $0x152] sm:$0xff]  ;;  %v696_v18 = vpack.c.bf16 %v14776_v40, %v14775_v42 }
 0x267   : > { %v599_v50 = vpack.c.bf16 %v14710_v49, %v14709_v21  ;;  %v14783_v49 = vld [vmem:[%s20277_s28 + $0x1cc] sm:$0xff] }
 0x26d   : > { %3143 = vmatmul.mubr.bf16.gmra.mrb[32].mxu0 %v597_v30  ;;  %4108 = vmatmul.mubr.bf16.gmra.mrb[32].mxu1 %v597_v30  ;;  %v14778_v30 = vld [vmem:[%s20277_s28 + $0x18c] sm:$0xff] }
 0x26e   : > { %3152 = vmatprep.mubr.bf16.mxu0 %v20868_v26  ;;  %4117 = vmatprep.mubr.bf16.mxu1 %v20868_v26  ;;  %v14711_v26 = vld [vmem:[%s20277_s28 + $0x16a] sm:$0xff]  ;;  %v697_v32 = vpack.c.bf16 %v14778_v30, %v14777_v44 }
 0x26f   : > { %v600_v53 = vpack.c.bf16 %v14712_v52, %v14711_v26  ;;  %v991_v52 = vlaneseq }
 0x275   : > { %3153 = vmatmul.mubr.bf16.gmra.mrb[36].mxu0 %v598_v48  ;;  %4118 = vmatmul.mubr.bf16.gmra.mrb[36].mxu1 %v598_v48  ;;  %v14780_v48 = vld [vmem:[%s20277_s28 + $0x1a4] sm:$0xff] }
 0x276   : > { %3162 = vmatprep.mubr.bf16.mxu0 %v20876_v28  ;;  %4127 = vmatprep.mubr.bf16.mxu1 %v20876_v28  ;;  %v14713_v28 = vld [vmem:[%s20277_s28 + $0x182] sm:$0xff]  ;;  %v698_v21 = vpack.c.bf16 %v14780_v48, %v14779_v57 }
 0x277   : > { %v601_v56 = vpack.c.bf16 %v14714_v23, %v14713_v28 }
 0x27d   : > { %3163 = vmatmul.mubr.bf16.gmra.mrb[40].mxu0 %v599_v50  ;;  %4128 = vmatmul.mubr.bf16.gmra.mrb[40].mxu1 %v599_v50  ;;  %v14784_v50 = vld [vmem:[%s20277_s28 + $0x1d4] sm:$0xff] }
 0x27e   : > { %3172 = vmatprep.mubr.bf16.mxu0 %v20884_v22  ;;  %4137 = vmatprep.mubr.bf16.mxu1 %v20884_v22  ;;  %v14715_v22 = vld [vmem:[%s20277_s28 + $0x19a] sm:$0xff]  ;;  %v700_v26 = vpack.c.bf16 %v14784_v50, %v14783_v49 }
 0x27f   : > { %v602_v54 = vpack.c.bf16 %v14716_v45, %v14715_v22 }
 0x285   : > { %3173 = vmatmul.mubr.bf16.gmra.mrb[44].mxu0 %v600_v53  ;;  %4138 = vmatmul.mubr.bf16.gmra.mrb[44].mxu1 %v600_v53  ;;  %v992_v53 = vshrl.u32 %v991_v52, 7 }
 0x286   : > { %3182 = vmatprep.mubr.bf16.mxu0 %v20892_v34  ;;  %4147 = vmatprep.mubr.bf16.mxu1 %v20892_v34  ;;  %v14717_v34 = vld [vmem:[%s20277_s28 + $0x1b2] sm:$0xff] }
 0x287   : > { %v603_v37 = vpack.c.bf16 %v14718_v55, %v14717_v34  ;;  %v993_v28 = vsub.s32 0, %v992_v53  ;;  %v1001_v23 = vsub.s32 2, %v992_v53  ;;  %v997_v22 = vsub.s32 1, %v992_v53 }
 0x288   : > { %v1005_v45 = vsub.s32 3, %v992_v53 }
 0x28d   : > { %3183 = vmatmul.mubr.bf16.gmra.mrb[48].mxu0 %v601_v56  ;;  %4148 = vmatmul.mubr.bf16.gmra.mrb[48].mxu1 %v601_v56  ;;  %v989_v56 = vld [vmem:[%s20263_s6] sm:$0xf] }
 0x28e   : > { %3192 = vmatprep.mubr.bf16.mxu0 %v20902_v39  ;;  %4157 = vmatprep.mubr.bf16.mxu1 %v20902_v39  ;;  %v14719_v39 = vld [vmem:[%s20277_s28 + $0x1ca] sm:$0xff]  ;;  %v21077_v34 = vrot.slane %v989_v56, %v1001_v23  ;;  %v21081_v55 = vrot.slane %v989_v56, %v1005_v45 }
 0x28f   : > { %v604_v60 = vpack.c.bf16 %v14720_v61, %v14719_v39 }
 0x295   : > { %3193 = vmatmul.mubr.bf16.gmra.mrb[52].mxu0 %v602_v54  ;;  %4158 = vmatmul.mubr.bf16.gmra.mrb[52].mxu1 %v602_v54  ;;  %v21075_v54 = vrot.slane %v989_v56, %v993_v28 }
 0x296   : > { %3202 = vmatprep.mubr.bf16.mxu0 %v20912_v43  ;;  %4167 = vmatprep.mubr.bf16.mxu1 %v20912_v43  ;;  %v20048_v43 = vmov 0  }
 0x29d   : > { %3203 = vmatmul.mubr.bf16.gmra.mrb[56].mxu0 %v603_v37  ;;  %4168 = vmatmul.mubr.bf16.gmra.mrb[56].mxu1 %v603_v37 }
 0x29e   : > { %3212 = vmatprep.mubr.bf16.mxu0 %v652_v5  ;;  %4177 = vmatprep.mubr.bf16.mxu1 %v652_v5 }
 0x2a5   : > { %3213 = vmatmul.mubr.bf16.gmra.mrb[60].mxu0 %v604_v60  ;;  %4178 = vmatmul.mubr.bf16.gmra.mrb[60].mxu1 %v604_v60 }
 0x2a6   : > { %3255 = vmatprep.mubr.bf16.mxu0 %v20048_v43  ;;  %4220 = vmatprep.mubr.bf16.mxu1 %v20048_v43 }
 0x2ad   : > { %3256 = vmatmul.mubr.bf16.vlgmr.msra.gmra.mrb[0].mxu0 %v685_v0  ;;  %4221 = vmatmul.mubr.bf16.vlgmr.msra.gmra.mrb[0].mxu1 %v685_v0 }
 0x2ae   : > { %3265 = vmatprep.mubr.bf16.mxu0 %v20048_v43  ;;  %4230 = vmatprep.mubr.bf16.mxu1 %v20048_v43 }
 0x2b5   : > { %3266 = vmatmul.mubr.bf16.gmra.mrb[4].mxu0 %v686_v1  ;;  %4231 = vmatmul.mubr.bf16.gmra.mrb[4].mxu1 %v686_v1 }
 0x2b6   : > { %3275 = vmatprep.mubr.bf16.mxu0 %v20048_v43  ;;  %4240 = vmatprep.mubr.bf16.mxu1 %v20048_v43 }
 0x2bd   : > { %3276 = vmatmul.mubr.bf16.gmra.mrb[8].mxu0 %v687_v7  ;;  %4241 = vmatmul.mubr.bf16.gmra.mrb[8].mxu1 %v687_v7 }
 0x2be   : > { %3285 = vmatprep.mubr.bf16.mxu0 %v20048_v43  ;;  %4250 = vmatprep.mubr.bf16.mxu1 %v20048_v43 }
 0x2c5   : > { %3286 = vmatmul.mubr.bf16.gmra.mrb[12].mxu0 %v688_v11  ;;  %4251 = vmatmul.mubr.bf16.gmra.mrb[12].mxu1 %v688_v11 }
 0x2c6   : > { %3295 = vmatprep.mubr.bf16.mxu0 %v20048_v43  ;;  %4260 = vmatprep.mubr.bf16.mxu1 %v20048_v43 }
 0x2cd   : > { %3296 = vmatmul.mubr.bf16.gmra.mrb[16].mxu0 %v689_v14  ;;  %4261 = vmatmul.mubr.bf16.gmra.mrb[16].mxu1 %v689_v14 }
 0x2ce   : > { %3305 = vmatprep.mubr.bf16.mxu0 %v20048_v43  ;;  %4270 = vmatprep.mubr.bf16.mxu1 %v20048_v43 }
 0x2d5   : > { %3306 = vmatmul.mubr.bf16.gmra.mrb[20].mxu0 %v690_v29  ;;  %4271 = vmatmul.mubr.bf16.gmra.mrb[20].mxu1 %v690_v29 }
 0x2d6   : > { %3315 = vmatprep.mubr.bf16.mxu0 %v20048_v43  ;;  %4280 = vmatprep.mubr.bf16.mxu1 %v20048_v43 }
 0x2dd   : > { %3316 = vmatmul.mubr.bf16.gmra.mrb[24].mxu0 %v691_v9  ;;  %4281 = vmatmul.mubr.bf16.gmra.mrb[24].mxu1 %v691_v9 }
 0x2de   : > { %3325 = vmatprep.mubr.bf16.mxu0 %v20048_v43  ;;  %4290 = vmatprep.mubr.bf16.mxu1 %v20048_v43 }
 0x2e5   : > { %3326 = vmatmul.mubr.bf16.gmra.mrb[28].mxu0 %v692_v27  ;;  %4291 = vmatmul.mubr.bf16.gmra.mrb[28].mxu1 %v692_v27 }
 0x2e6   : > { %3335 = vmatprep.mubr.bf16.mxu0 %v20048_v43  ;;  %4300 = vmatprep.mubr.bf16.mxu1 %v20048_v43 }
 0x2ed   : > { %3336 = vmatmul.mubr.bf16.gmra.mrb[32].mxu0 %v693_v47  ;;  %4301 = vmatmul.mubr.bf16.gmra.mrb[32].mxu1 %v693_v47 }
 0x2ee   : > { %3345 = vmatprep.mubr.bf16.mxu0 %v20048_v43  ;;  %4310 = vmatprep.mubr.bf16.mxu1 %v20048_v43 }
 0x2f5   : > { %3346 = vmatmul.mubr.bf16.gmra.mrb[36].mxu0 %v694_v35  ;;  %4311 = vmatmul.mubr.bf16.gmra.mrb[36].mxu1 %v694_v35 }
 0x2f6   : > { %3355 = vmatprep.mubr.bf16.mxu0 %v20048_v43  ;;  %4320 = vmatprep.mubr.bf16.mxu1 %v20048_v43 }
 0x2fd   : > { %3356 = vmatmul.mubr.bf16.gmra.mrb[40].mxu0 %v695_v58  ;;  %4321 = vmatmul.mubr.bf16.gmra.mrb[40].mxu1 %v695_v58 }
 0x2fe   : > { %3365 = vmatprep.mubr.bf16.mxu0 %v20048_v43  ;;  %4330 = vmatprep.mubr.bf16.mxu1 %v20048_v43 }
 0x305   : > { %3366 = vmatmul.mubr.bf16.gmra.mrb[44].mxu0 %v696_v18  ;;  %4331 = vmatmul.mubr.bf16.gmra.mrb[44].mxu1 %v696_v18 }
 0x306   : > { %3375 = vmatprep.mubr.bf16.mxu0 %v20048_v43  ;;  %4340 = vmatprep.mubr.bf16.mxu1 %v20048_v43 }
 0x30d   : > { %3376 = vmatmul.mubr.bf16.gmra.mrb[48].mxu0 %v697_v32  ;;  %4341 = vmatmul.mubr.bf16.gmra.mrb[48].mxu1 %v697_v32 }
 0x30e   : > { %3385 = vmatprep.mubr.bf16.mxu0 %v20048_v43  ;;  %4350 = vmatprep.mubr.bf16.mxu1 %v20048_v43 }
 0x315   : > { %3386 = vmatmul.mubr.bf16.gmra.mrb[52].mxu0 %v698_v21  ;;  %4351 = vmatmul.mubr.bf16.gmra.mrb[52].mxu1 %v698_v21 }
 0x316   : > { %3395 = vmatprep.mubr.bf16.mxu0 %v20048_v43  ;;  %4360 = vmatprep.mubr.bf16.mxu1 %v20048_v43 }
 0x31d   : > { %3396 = vmatmul.mubr.bf16.gmra.mrb[56].mxu0 %v20904_v41  ;;  %4361 = vmatmul.mubr.bf16.gmra.mrb[56].mxu1 %v20904_v41  ;;  %v21079_v41 = vrot.slane %v989_v56, %v997_v22 }
 0x31e   : > { %3405 = vmatprep.mubr.bf16.mxu0 %v20048_v43  ;;  %4370 = vmatprep.mubr.bf16.mxu1 %v20048_v43 }
 0x325   : > { %3406 = vmatmul.mubr.bf16.gmra.mrb[60].mxu0 %v700_v26  ;;  %4371 = vmatmul.mubr.bf16.gmra.mrb[60].mxu1 %v700_v26 }
 0x380   : > { %v3257_v51 = vpop.f32.mrb[0].mxu0  ;;  %v4222_v59 = vpop.f32.mrb[0].mxu1 }
 0x381   : > { %v16522_v37 = vadd.f32 %v3257_v51, %v21075_v54  ;;  %v16586_v5 = vadd.f32 %v4222_v59, %v21077_v34  ;;  %v3259_v39 = vpop.f32.mrb[1].mxu0  ;;  %v4224_v61 = vpop.f32.mrb[1].mxu1 }
 0x382   : > { %v16523_v60 = vadd.f32 %v3259_v39, %v21079_v41  ;;  %v16587_v43 = vadd.f32 %v4224_v61, %v21081_v55  ;;  %v3261_v62 = vpop.f32.mrb[2].mxu0  ;;  %v4226_v63 = vpop.f32.mrb[2].mxu1 }
 0x383   : > { %v4381_v0 = vmax.f32 %v16522_v37, 0.0  ;;  %v4383_v2 = vmax.f32 %v16586_v5, 0.0  ;;  %v16524_v4 = vadd.f32 %v3261_v62, %v21075_v54  ;;  %v16588_v1 = vadd.f32 %v4226_v63, %v21077_v34  ;;  %v3263_v3 = vpop.f32.mrb[3].mxu0  ;;  %v4228_v6 = vpop.f32.mrb[3].mxu1 }
 0x384   : > { %v4382_v7 = vmax.f32 %v16523_v60, 0.0  ;;  %v4384_v8 = vmax.f32 %v16587_v43, 0.0  ;;  %v16525_v10 = vadd.f32 %v3263_v3, %v21079_v41  ;;  %v16589_v11 = vadd.f32 %v4228_v6, %v21081_v55 }
 0x385   : > { %v4385_v12 = vmax.f32 %v16524_v4, 0.0  ;;  %v4387_v13 = vmax.f32 %v16588_v1, 0.0 }
 0x386   : > { %v16330_v14 = vpack.c.bf16 %v4382_v7, %v4381_v0  ;;  %v16331_v17 = vpack.c.bf16 %v4384_v8, %v4383_v2  ;;  %v4386_v20 = vmax.f32 %v16525_v10, 0.0  ;;  %v4388_v29 = vmax.f32 %v16589_v11, 0.0 }
 0x388   : > { %4893 = vst [vmem:[%s20279_s27] sm:$0xff] %v16330_v14  ;;  %4894 = vst [vmem:[%s20279_s27 + $0x8] sm:$0xff] %v16331_v17  ;;  %v16332_v19 = vpack.c.bf16 %v4386_v20, %v4385_v12  ;;  %v16333_v24 = vpack.c.bf16 %v4388_v29, %v4387_v13  ;;  %v3267_v9 = vpop.f32.mrb[4].mxu0  ;;  %v4232_v25 = vpop.f32.mrb[4].mxu1 }
 0x389   : > { %v16526_v16 = vadd.f32 %v3267_v9, %v21075_v54  ;;  %v16590_v27 = vadd.f32 %v4232_v25, %v21077_v34  ;;  %v3269_v31 = vpop.f32.mrb[5].mxu0  ;;  %v4234_v15 = vpop.f32.mrb[5].mxu1 }
 0x38a   : > { %4895 = vst [vmem:[%s20279_s27 + $0x10] sm:$0xff] %v16332_v19  ;;  %4896 = vst [vmem:[%s20279_s27 + $0x18] sm:$0xff] %v16333_v24  ;;  %v16527_v47 = vadd.f32 %v3269_v31, %v21079_v41  ;;  %v16591_v46 = vadd.f32 %v4234_v15, %v21081_v55  ;;  %v3271_v33 = vpop.f32.mrb[6].mxu0  ;;  %v4236_v35 = vpop.f32.mrb[6].mxu1 }
 0x38b   : > { %v4389_v36 = vmax.f32 %v16526_v16, 0.0  ;;  %v4391_v38 = vmax.f32 %v16590_v27, 0.0  ;;  %v16528_v58 = vadd.f32 %v3271_v33, %v21075_v54  ;;  %v16592_v42 = vadd.f32 %v4236_v35, %v21077_v34  ;;  %v3273_v40 = vpop.f32.mrb[7].mxu0  ;;  %v4238_v18 = vpop.f32.mrb[7].mxu1 }
 0x38c   : > { %v4390_v44 = vmax.f32 %v16527_v47, 0.0  ;;  %v4392_v30 = vmax.f32 %v16591_v46, 0.0  ;;  %v16529_v32 = vadd.f32 %v3273_v40, %v21079_v41  ;;  %v16593_v57 = vadd.f32 %v4238_v18, %v21081_v55 }
 0x38d   : > { %v4393_v48 = vmax.f32 %v16528_v58, 0.0  ;;  %v4395_v21 = vmax.f32 %v16592_v42, 0.0 }
 0x38e   : > { %v16334_v49 = vpack.c.bf16 %v4390_v44, %v4389_v36  ;;  %v16335_v50 = vpack.c.bf16 %v4392_v30, %v4391_v38  ;;  %v4394_v26 = vmax.f32 %v16529_v32, 0.0  ;;  %v4396_v52 = vmax.f32 %v16593_v57, 0.0 }
 0x390   : > { %4897 = vst [vmem:[%s20279_s27 + $0x20] sm:$0xff] %v16334_v49  ;;  %4898 = vst [vmem:[%s20279_s27 + $0x28] sm:$0xff] %v16335_v50  ;;  %v16336_v53 = vpack.c.bf16 %v4394_v26, %v4393_v48  ;;  %v16337_v28 = vpack.c.bf16 %v4396_v52, %v4395_v21  ;;  %v3277_v23 = vpop.f32.mrb[8].mxu0  ;;  %v4242_v56 = vpop.f32.mrb[8].mxu1 }
 0x391   : > { %v16530_v22 = vadd.f32 %v3277_v23, %v21075_v54  ;;  %v16594_v45 = vadd.f32 %v4242_v56, %v21077_v34  ;;  %v3279_v51 = vpop.f32.mrb[9].mxu0  ;;  %v4244_v59 = vpop.f32.mrb[9].mxu1 }
 0x392   : > { %4899 = vst [vmem:[%s20279_s27 + $0x30] sm:$0xff] %v16336_v53  ;;  %4900 = vst [vmem:[%s20279_s27 + $0x38] sm:$0xff] %v16337_v28  ;;  %v16531_v37 = vadd.f32 %v3279_v51, %v21079_v41  ;;  %v16595_v5 = vadd.f32 %v4244_v59, %v21081_v55  ;;  %v3281_v39 = vpop.f32.mrb[10].mxu0  ;;  %v4246_v61 = vpop.f32.mrb[10].mxu1 }
 0x393   : > { %v4397_v60 = vmax.f32 %v16530_v22, 0.0  ;;  %v4399_v43 = vmax.f32 %v16594_v45, 0.0  ;;  %v16532_v62 = vadd.f32 %v3281_v39, %v21075_v54  ;;  %v16596_v63 = vadd.f32 %v4246_v61, %v21077_v34  ;;  %v3283_v0 = vpop.f32.mrb[11].mxu0  ;;  %v4248_v2 = vpop.f32.mrb[11].mxu1 }
 0x394   : > { %v4398_v4 = vmax.f32 %v16531_v37, 0.0  ;;  %v4400_v1 = vmax.f32 %v16595_v5, 0.0  ;;  %v16533_v3 = vadd.f32 %v3283_v0, %v21079_v41  ;;  %v16597_v6 = vadd.f32 %v4248_v2, %v21081_v55 }
 0x395   : > { %v4401_v7 = vmax.f32 %v16532_v62, 0.0  ;;  %v4403_v8 = vmax.f32 %v16596_v63, 0.0 }
 0x396   : > { %v16338_v10 = vpack.c.bf16 %v4398_v4, %v4397_v60  ;;  %v16339_v11 = vpack.c.bf16 %v4400_v1, %v4399_v43  ;;  %v4402_v12 = vmax.f32 %v16533_v3, 0.0  ;;  %v4404_v13 = vmax.f32 %v16597_v6, 0.0 }
 0x398   : > { %4901 = vst [vmem:[%s20279_s27 + $0x40] sm:$0xff] %v16338_v10  ;;  %4902 = vst [vmem:[%s20279_s27 + $0x48] sm:$0xff] %v16339_v11  ;;  %v16340_v14 = vpack.c.bf16 %v4402_v12, %v4401_v7  ;;  %v16341_v17 = vpack.c.bf16 %v4404_v13, %v4403_v8  ;;  %v3287_v20 = vpop.f32.mrb[12].mxu0  ;;  %v4252_v29 = vpop.f32.mrb[12].mxu1 }
 0x399   : > { %v16534_v19 = vadd.f32 %v3287_v20, %v21075_v54  ;;  %v16598_v24 = vadd.f32 %v4252_v29, %v21077_v34  ;;  %v3289_v9 = vpop.f32.mrb[13].mxu0  ;;  %v4254_v25 = vpop.f32.mrb[13].mxu1 }
 0x39a   : > { %4903 = vst [vmem:[%s20279_s27 + $0x50] sm:$0xff] %v16340_v14  ;;  %4904 = vst [vmem:[%s20279_s27 + $0x58] sm:$0xff] %v16341_v17  ;;  %v16535_v16 = vadd.f32 %v3289_v9, %v21079_v41  ;;  %v16599_v27 = vadd.f32 %v4254_v25, %v21081_v55  ;;  %v3291_v31 = vpop.f32.mrb[14].mxu0  ;;  %v4256_v15 = vpop.f32.mrb[14].mxu1 }
 0x39b   : > { %v4405_v47 = vmax.f32 %v16534_v19, 0.0  ;;  %v4407_v46 = vmax.f32 %v16598_v24, 0.0  ;;  %v16536_v33 = vadd.f32 %v3291_v31, %v21075_v54  ;;  %v16600_v35 = vadd.f32 %v4256_v15, %v21077_v34  ;;  %v3293_v36 = vpop.f32.mrb[15].mxu0  ;;  %v4258_v38 = vpop.f32.mrb[15].mxu1 }
 0x39c   : > { %v4406_v58 = vmax.f32 %v16535_v16, 0.0  ;;  %v4408_v42 = vmax.f32 %v16599_v27, 0.0  ;;  %v16537_v40 = vadd.f32 %v3293_v36, %v21079_v41  ;;  %v16601_v18 = vadd.f32 %v4258_v38, %v21081_v55 }
 0x39d   : > { %v4409_v44 = vmax.f32 %v16536_v33, 0.0  ;;  %v4411_v30 = vmax.f32 %v16600_v35, 0.0 }
 0x39e   : > { %v16342_v32 = vpack.c.bf16 %v4406_v58, %v4405_v47  ;;  %v16343_v57 = vpack.c.bf16 %v4408_v42, %v4407_v46  ;;  %v4410_v48 = vmax.f32 %v16537_v40, 0.0  ;;  %v4412_v21 = vmax.f32 %v16601_v18, 0.0 }
 0x3a0   : > { %4905 = vst [vmem:[%s20279_s27 + $0x60] sm:$0xff] %v16342_v32  ;;  %4906 = vst [vmem:[%s20279_s27 + $0x68] sm:$0xff] %v16343_v57  ;;  %v16344_v49 = vpack.c.bf16 %v4410_v48, %v4409_v44  ;;  %v16345_v50 = vpack.c.bf16 %v4412_v21, %v4411_v30  ;;  %v3297_v26 = vpop.f32.mrb[16].mxu0  ;;  %v4262_v52 = vpop.f32.mrb[16].mxu1 }
 0x3a1   : > { %v16538_v53 = vadd.f32 %v3297_v26, %v21075_v54  ;;  %v16602_v28 = vadd.f32 %v4262_v52, %v21077_v34  ;;  %v3299_v23 = vpop.f32.mrb[17].mxu0  ;;  %v4264_v56 = vpop.f32.mrb[17].mxu1 }
 0x3a2   : > { %4907 = vst [vmem:[%s20279_s27 + $0x70] sm:$0xff] %v16344_v49  ;;  %4908 = vst [vmem:[%s20279_s27 + $0x78] sm:$0xff] %v16345_v50  ;;  %v16539_v22 = vadd.f32 %v3299_v23, %v21079_v41  ;;  %v16603_v45 = vadd.f32 %v4264_v56, %v21081_v55  ;;  %v3301_v51 = vpop.f32.mrb[18].mxu0  ;;  %v4266_v59 = vpop.f32.mrb[18].mxu1 }
 0x3a3   : > { %v4413_v37 = vmax.f32 %v16538_v53, 0.0  ;;  %v4415_v5 = vmax.f32 %v16602_v28, 0.0  ;;  %v16540_v39 = vadd.f32 %v3301_v51, %v21075_v54  ;;  %v16604_v61 = vadd.f32 %v4266_v59, %v21077_v34  ;;  %v3303_v60 = vpop.f32.mrb[19].mxu0  ;;  %v4268_v43 = vpop.f32.mrb[19].mxu1 }
 0x3a4   : > { %v4414_v62 = vmax.f32 %v16539_v22, 0.0  ;;  %v4416_v63 = vmax.f32 %v16603_v45, 0.0  ;;  %v16541_v0 = vadd.f32 %v3303_v60, %v21079_v41  ;;  %v16605_v2 = vadd.f32 %v4268_v43, %v21081_v55 }
 0x3a5   : > { %v4417_v4 = vmax.f32 %v16540_v39, 0.0  ;;  %v4419_v1 = vmax.f32 %v16604_v61, 0.0 }
 0x3a6   : > { %v16346_v3 = vpack.c.bf16 %v4414_v62, %v4413_v37  ;;  %v16347_v6 = vpack.c.bf16 %v4416_v63, %v4415_v5  ;;  %v4418_v7 = vmax.f32 %v16541_v0, 0.0  ;;  %v4420_v8 = vmax.f32 %v16605_v2, 0.0 }
 0x3a8   : > { %4909 = vst [vmem:[%s20279_s27 + $0x80] sm:$0xff] %v16346_v3  ;;  %4910 = vst [vmem:[%s20279_s27 + $0x88] sm:$0xff] %v16347_v6  ;;  %v16348_v10 = vpack.c.bf16 %v4418_v7, %v4417_v4  ;;  %v16349_v11 = vpack.c.bf16 %v4420_v8, %v4419_v1  ;;  %v3307_v12 = vpop.f32.mrb[20].mxu0  ;;  %v4272_v13 = vpop.f32.mrb[20].mxu1 }
 0x3a9   : > { %v16542_v14 = vadd.f32 %v3307_v12, %v21075_v54  ;;  %v16606_v17 = vadd.f32 %v4272_v13, %v21077_v34  ;;  %v3309_v20 = vpop.f32.mrb[21].mxu0  ;;  %v4274_v29 = vpop.f32.mrb[21].mxu1 }
 0x3aa   : > { %4911 = vst [vmem:[%s20279_s27 + $0x90] sm:$0xff] %v16348_v10  ;;  %4912 = vst [vmem:[%s20279_s27 + $0x98] sm:$0xff] %v16349_v11  ;;  %v16543_v19 = vadd.f32 %v3309_v20, %v21079_v41  ;;  %v16607_v24 = vadd.f32 %v4274_v29, %v21081_v55  ;;  %v3311_v9 = vpop.f32.mrb[22].mxu0  ;;  %v4276_v25 = vpop.f32.mrb[22].mxu1 }
 0x3ab   : > { %v4421_v16 = vmax.f32 %v16542_v14, 0.0  ;;  %v4423_v27 = vmax.f32 %v16606_v17, 0.0  ;;  %v16544_v31 = vadd.f32 %v3311_v9, %v21075_v54  ;;  %v16608_v15 = vadd.f32 %v4276_v25, %v21077_v34  ;;  %v3313_v47 = vpop.f32.mrb[23].mxu0  ;;  %v4278_v46 = vpop.f32.mrb[23].mxu1 }
 0x3ac   : > { %v4422_v33 = vmax.f32 %v16543_v19, 0.0  ;;  %v4424_v35 = vmax.f32 %v16607_v24, 0.0  ;;  %v16545_v36 = vadd.f32 %v3313_v47, %v21079_v41  ;;  %v16609_v38 = vadd.f32 %v4278_v46, %v21081_v55 }
 0x3ad   : > { %v4425_v58 = vmax.f32 %v16544_v31, 0.0  ;;  %v4427_v42 = vmax.f32 %v16608_v15, 0.0 }
 0x3ae   : > { %v16350_v40 = vpack.c.bf16 %v4422_v33, %v4421_v16  ;;  %v16351_v18 = vpack.c.bf16 %v4424_v35, %v4423_v27  ;;  %v4426_v44 = vmax.f32 %v16545_v36, 0.0  ;;  %v4428_v30 = vmax.f32 %v16609_v38, 0.0 }
 0x3b0   : > { %4913 = vst [vmem:[%s20279_s27 + $0xa0] sm:$0xff] %v16350_v40  ;;  %4914 = vst [vmem:[%s20279_s27 + $0xa8] sm:$0xff] %v16351_v18  ;;  %v16352_v32 = vpack.c.bf16 %v4426_v44, %v4425_v58  ;;  %v16353_v57 = vpack.c.bf16 %v4428_v30, %v4427_v42  ;;  %v3317_v48 = vpop.f32.mrb[24].mxu0  ;;  %v4282_v21 = vpop.f32.mrb[24].mxu1 }
 0x3b1   : > { %v16546_v49 = vadd.f32 %v3317_v48, %v21075_v54  ;;  %v16610_v50 = vadd.f32 %v4282_v21, %v21077_v34  ;;  %v3319_v26 = vpop.f32.mrb[25].mxu0  ;;  %v4284_v52 = vpop.f32.mrb[25].mxu1 }
 0x3b2   : > { %4915 = vst [vmem:[%s20279_s27 + $0xb0] sm:$0xff] %v16352_v32  ;;  %4916 = vst [vmem:[%s20279_s27 + $0xb8] sm:$0xff] %v16353_v57  ;;  %v16547_v53 = vadd.f32 %v3319_v26, %v21079_v41  ;;  %v16611_v28 = vadd.f32 %v4284_v52, %v21081_v55  ;;  %v3321_v23 = vpop.f32.mrb[26].mxu0  ;;  %v4286_v56 = vpop.f32.mrb[26].mxu1 }
 0x3b3   : > { %v4429_v22 = vmax.f32 %v16546_v49, 0.0  ;;  %v4431_v45 = vmax.f32 %v16610_v50, 0.0  ;;  %v16548_v51 = vadd.f32 %v3321_v23, %v21075_v54  ;;  %v16612_v59 = vadd.f32 %v4286_v56, %v21077_v34  ;;  %v3323_v37 = vpop.f32.mrb[27].mxu0  ;;  %v4288_v5 = vpop.f32.mrb[27].mxu1 }
 0x3b4   : > { %v4430_v39 = vmax.f32 %v16547_v53, 0.0  ;;  %v4432_v61 = vmax.f32 %v16611_v28, 0.0  ;;  %v16549_v60 = vadd.f32 %v3323_v37, %v21079_v41  ;;  %v16613_v43 = vadd.f32 %v4288_v5, %v21081_v55 }
 0x3b5   : > { %v4433_v62 = vmax.f32 %v16548_v51, 0.0  ;;  %v4435_v63 = vmax.f32 %v16612_v59, 0.0 }
 0x3b6   : > { %v16354_v0 = vpack.c.bf16 %v4430_v39, %v4429_v22  ;;  %v16355_v2 = vpack.c.bf16 %v4432_v61, %v4431_v45  ;;  %v4434_v4 = vmax.f32 %v16549_v60, 0.0  ;;  %v4436_v1 = vmax.f32 %v16613_v43, 0.0 }
 0x3b8   : > { %4917 = vst [vmem:[%s20279_s27 + $0xc0] sm:$0xff] %v16354_v0  ;;  %4918 = vst [vmem:[%s20279_s27 + $0xc8] sm:$0xff] %v16355_v2  ;;  %v16356_v3 = vpack.c.bf16 %v4434_v4, %v4433_v62  ;;  %v16357_v6 = vpack.c.bf16 %v4436_v1, %v4435_v63  ;;  %v3327_v7 = vpop.f32.mrb[28].mxu0  ;;  %v4292_v8 = vpop.f32.mrb[28].mxu1 }
 0x3b9   : > { %v16550_v10 = vadd.f32 %v3327_v7, %v21075_v54  ;;  %v16614_v11 = vadd.f32 %v4292_v8, %v21077_v34  ;;  %v3329_v12 = vpop.f32.mrb[29].mxu0  ;;  %v4294_v13 = vpop.f32.mrb[29].mxu1 }
 0x3ba   : > { %4919 = vst [vmem:[%s20279_s27 + $0xd0] sm:$0xff] %v16356_v3  ;;  %4920 = vst [vmem:[%s20279_s27 + $0xd8] sm:$0xff] %v16357_v6  ;;  %v16551_v14 = vadd.f32 %v3329_v12, %v21079_v41  ;;  %v16615_v17 = vadd.f32 %v4294_v13, %v21081_v55  ;;  %v3331_v20 = vpop.f32.mrb[30].mxu0  ;;  %v4296_v29 = vpop.f32.mrb[30].mxu1 }
 0x3bb   : > { %v4437_v19 = vmax.f32 %v16550_v10, 0.0  ;;  %v4439_v24 = vmax.f32 %v16614_v11, 0.0  ;;  %v16552_v9 = vadd.f32 %v3331_v20, %v21075_v54  ;;  %v16616_v25 = vadd.f32 %v4296_v29, %v21077_v34  ;;  %v3333_v16 = vpop.f32.mrb[31].mxu0  ;;  %v4298_v27 = vpop.f32.mrb[31].mxu1 }
 0x3bc   : > { %v4438_v31 = vmax.f32 %v16551_v14, 0.0  ;;  %v4440_v15 = vmax.f32 %v16615_v17, 0.0  ;;  %v16553_v47 = vadd.f32 %v3333_v16, %v21079_v41  ;;  %v16617_v46 = vadd.f32 %v4298_v27, %v21081_v55 }
 0x3bd   : > { %v4441_v33 = vmax.f32 %v16552_v9, 0.0  ;;  %v4443_v35 = vmax.f32 %v16616_v25, 0.0 }
 0x3be   : > { %v16358_v36 = vpack.c.bf16 %v4438_v31, %v4437_v19  ;;  %v16359_v38 = vpack.c.bf16 %v4440_v15, %v4439_v24  ;;  %v4442_v58 = vmax.f32 %v16553_v47, 0.0  ;;  %v4444_v42 = vmax.f32 %v16617_v46, 0.0 }
 0x3c0   : > { %4921 = vst [vmem:[%s20279_s27 + $0xe0] sm:$0xff] %v16358_v36  ;;  %4922 = vst [vmem:[%s20279_s27 + $0xe8] sm:$0xff] %v16359_v38  ;;  %v16360_v40 = vpack.c.bf16 %v4442_v58, %v4441_v33  ;;  %v16361_v18 = vpack.c.bf16 %v4444_v42, %v4443_v35  ;;  %v3337_v44 = vpop.f32.mrb[32].mxu0  ;;  %v4302_v30 = vpop.f32.mrb[32].mxu1 }
 0x3c1   : > { %v16554_v32 = vadd.f32 %v3337_v44, %v21075_v54  ;;  %v16618_v57 = vadd.f32 %v4302_v30, %v21077_v34  ;;  %v3339_v48 = vpop.f32.mrb[33].mxu0  ;;  %v4304_v21 = vpop.f32.mrb[33].mxu1 }
 0x3c2   : > { %4923 = vst [vmem:[%s20279_s27 + $0xf0] sm:$0xff] %v16360_v40  ;;  %4924 = vst [vmem:[%s20279_s27 + $0xf8] sm:$0xff] %v16361_v18  ;;  %v16555_v49 = vadd.f32 %v3339_v48, %v21079_v41  ;;  %v16619_v50 = vadd.f32 %v4304_v21, %v21081_v55  ;;  %v3341_v26 = vpop.f32.mrb[34].mxu0  ;;  %v4306_v52 = vpop.f32.mrb[34].mxu1 }
 0x3c3   : > { %v4445_v53 = vmax.f32 %v16554_v32, 0.0  ;;  %v4447_v28 = vmax.f32 %v16618_v57, 0.0  ;;  %v16556_v23 = vadd.f32 %v3341_v26, %v21075_v54  ;;  %v16620_v56 = vadd.f32 %v4306_v52, %v21077_v34  ;;  %v3343_v22 = vpop.f32.mrb[35].mxu0  ;;  %v4308_v45 = vpop.f32.mrb[35].mxu1 }
 0x3c4   : > { %v4446_v51 = vmax.f32 %v16555_v49, 0.0  ;;  %v4448_v59 = vmax.f32 %v16619_v50, 0.0  ;;  %v16557_v37 = vadd.f32 %v3343_v22, %v21079_v41  ;;  %v16621_v5 = vadd.f32 %v4308_v45, %v21081_v55 }
 0x3c5   : > { %v4449_v39 = vmax.f32 %v16556_v23, 0.0  ;;  %v4451_v61 = vmax.f32 %v16620_v56, 0.0 }
 0x3c6   : > { %v16362_v60 = vpack.c.bf16 %v4446_v51, %v4445_v53  ;;  %v16363_v43 = vpack.c.bf16 %v4448_v59, %v4447_v28  ;;  %v4450_v62 = vmax.f32 %v16557_v37, 0.0  ;;  %v4452_v63 = vmax.f32 %v16621_v5, 0.0 }
 0x3c8   : > { %4925 = vst [vmem:[%s20279_s27 + $0x100] sm:$0xff] %v16362_v60  ;;  %4926 = vst [vmem:[%s20279_s27 + $0x108] sm:$0xff] %v16363_v43  ;;  %v16364_v0 = vpack.c.bf16 %v4450_v62, %v4449_v39  ;;  %v16365_v2 = vpack.c.bf16 %v4452_v63, %v4451_v61  ;;  %v3347_v4 = vpop.f32.mrb[36].mxu0  ;;  %v4312_v1 = vpop.f32.mrb[36].mxu1 }
 0x3c9   : > { %v16558_v3 = vadd.f32 %v3347_v4, %v21075_v54  ;;  %v16622_v6 = vadd.f32 %v4312_v1, %v21077_v34  ;;  %v3349_v7 = vpop.f32.mrb[37].mxu0  ;;  %v4314_v8 = vpop.f32.mrb[37].mxu1 }
 0x3ca   : > { %4927 = vst [vmem:[%s20279_s27 + $0x110] sm:$0xff] %v16364_v0  ;;  %4928 = vst [vmem:[%s20279_s27 + $0x118] sm:$0xff] %v16365_v2  ;;  %v16559_v10 = vadd.f32 %v3349_v7, %v21079_v41  ;;  %v16623_v11 = vadd.f32 %v4314_v8, %v21081_v55  ;;  %v3351_v12 = vpop.f32.mrb[38].mxu0  ;;  %v4316_v13 = vpop.f32.mrb[38].mxu1 }
 0x3cb   : > { %v4453_v14 = vmax.f32 %v16558_v3, 0.0  ;;  %v4455_v17 = vmax.f32 %v16622_v6, 0.0  ;;  %v16560_v20 = vadd.f32 %v3351_v12, %v21075_v54  ;;  %v16624_v29 = vadd.f32 %v4316_v13, %v21077_v34  ;;  %v3353_v19 = vpop.f32.mrb[39].mxu0  ;;  %v4318_v24 = vpop.f32.mrb[39].mxu1 }
 0x3cc   : > { %v4454_v9 = vmax.f32 %v16559_v10, 0.0  ;;  %v4456_v25 = vmax.f32 %v16623_v11, 0.0  ;;  %v16561_v16 = vadd.f32 %v3353_v19, %v21079_v41  ;;  %v16625_v27 = vadd.f32 %v4318_v24, %v21081_v55 }
 0x3cd   : > { %v4457_v31 = vmax.f32 %v16560_v20, 0.0  ;;  %v4459_v15 = vmax.f32 %v16624_v29, 0.0 }
 0x3ce   : > { %v16366_v47 = vpack.c.bf16 %v4454_v9, %v4453_v14  ;;  %v16367_v46 = vpack.c.bf16 %v4456_v25, %v4455_v17  ;;  %v4458_v33 = vmax.f32 %v16561_v16, 0.0  ;;  %v4460_v35 = vmax.f32 %v16625_v27, 0.0 }
 0x3d0   : > { %4929 = vst [vmem:[%s20279_s27 + $0x120] sm:$0xff] %v16366_v47  ;;  %4930 = vst [vmem:[%s20279_s27 + $0x128] sm:$0xff] %v16367_v46  ;;  %v16368_v36 = vpack.c.bf16 %v4458_v33, %v4457_v31  ;;  %v16369_v38 = vpack.c.bf16 %v4460_v35, %v4459_v15  ;;  %v3357_v58 = vpop.f32.mrb[40].mxu0  ;;  %v4322_v42 = vpop.f32.mrb[40].mxu1 }
 0x3d1   : > { %v16562_v40 = vadd.f32 %v3357_v58, %v21075_v54  ;;  %v16626_v18 = vadd.f32 %v4322_v42, %v21077_v34  ;;  %v3359_v44 = vpop.f32.mrb[41].mxu0  ;;  %v4324_v30 = vpop.f32.mrb[41].mxu1 }
 0x3d2   : > { %4931 = vst [vmem:[%s20279_s27 + $0x130] sm:$0xff] %v16368_v36  ;;  %4932 = vst [vmem:[%s20279_s27 + $0x138] sm:$0xff] %v16369_v38  ;;  %v16563_v32 = vadd.f32 %v3359_v44, %v21079_v41  ;;  %v16627_v57 = vadd.f32 %v4324_v30, %v21081_v55  ;;  %v3361_v48 = vpop.f32.mrb[42].mxu0  ;;  %v4326_v21 = vpop.f32.mrb[42].mxu1 }
 0x3d3   : > { %v4461_v49 = vmax.f32 %v16562_v40, 0.0  ;;  %v4463_v50 = vmax.f32 %v16626_v18, 0.0  ;;  %v16564_v26 = vadd.f32 %v3361_v48, %v21075_v54  ;;  %v16628_v52 = vadd.f32 %v4326_v21, %v21077_v34  ;;  %v3363_v53 = vpop.f32.mrb[43].mxu0  ;;  %v4328_v28 = vpop.f32.mrb[43].mxu1 }
 0x3d4   : > { %v4462_v23 = vmax.f32 %v16563_v32, 0.0  ;;  %v4464_v56 = vmax.f32 %v16627_v57, 0.0  ;;  %v16565_v22 = vadd.f32 %v3363_v53, %v21079_v41  ;;  %v16629_v45 = vadd.f32 %v4328_v28, %v21081_v55 }
 0x3d5   : > { %v4465_v51 = vmax.f32 %v16564_v26, 0.0  ;;  %v4467_v59 = vmax.f32 %v16628_v52, 0.0 }
 0x3d6   : > { %v16370_v37 = vpack.c.bf16 %v4462_v23, %v4461_v49  ;;  %v16371_v5 = vpack.c.bf16 %v4464_v56, %v4463_v50  ;;  %v4466_v39 = vmax.f32 %v16565_v22, 0.0  ;;  %v4468_v61 = vmax.f32 %v16629_v45, 0.0 }
 0x3d8   : > { %4933 = vst [vmem:[%s20279_s27 + $0x140] sm:$0xff] %v16370_v37  ;;  %4934 = vst [vmem:[%s20279_s27 + $0x148] sm:$0xff] %v16371_v5  ;;  %v16372_v60 = vpack.c.bf16 %v4466_v39, %v4465_v51  ;;  %v16373_v43 = vpack.c.bf16 %v4468_v61, %v4467_v59  ;;  %v3367_v62 = vpop.f32.mrb[44].mxu0  ;;  %v4332_v63 = vpop.f32.mrb[44].mxu1 }
 0x3d9   : > { %v16566_v0 = vadd.f32 %v3367_v62, %v21075_v54  ;;  %v16630_v2 = vadd.f32 %v4332_v63, %v21077_v34  ;;  %v3369_v4 = vpop.f32.mrb[45].mxu0  ;;  %v4334_v1 = vpop.f32.mrb[45].mxu1 }
 0x3da   : > { %4935 = vst [vmem:[%s20279_s27 + $0x150] sm:$0xff] %v16372_v60  ;;  %4936 = vst [vmem:[%s20279_s27 + $0x158] sm:$0xff] %v16373_v43  ;;  %v16567_v3 = vadd.f32 %v3369_v4, %v21079_v41  ;;  %v16631_v6 = vadd.f32 %v4334_v1, %v21081_v55  ;;  %v3371_v7 = vpop.f32.mrb[46].mxu0  ;;  %v4336_v8 = vpop.f32.mrb[46].mxu1 }
 0x3db   : > { %v4469_v10 = vmax.f32 %v16566_v0, 0.0  ;;  %v4471_v11 = vmax.f32 %v16630_v2, 0.0  ;;  %v16568_v12 = vadd.f32 %v3371_v7, %v21075_v54  ;;  %v16632_v13 = vadd.f32 %v4336_v8, %v21077_v34  ;;  %v3373_v14 = vpop.f32.mrb[47].mxu0  ;;  %v4338_v17 = vpop.f32.mrb[47].mxu1 }
 0x3dc   : > { %v4470_v20 = vmax.f32 %v16567_v3, 0.0  ;;  %v4472_v29 = vmax.f32 %v16631_v6, 0.0  ;;  %v16569_v19 = vadd.f32 %v3373_v14, %v21079_v41  ;;  %v16633_v24 = vadd.f32 %v4338_v17, %v21081_v55 }
 0x3dd   : > { %v4473_v9 = vmax.f32 %v16568_v12, 0.0  ;;  %v4475_v25 = vmax.f32 %v16632_v13, 0.0 }
 0x3de   : > { %v16374_v16 = vpack.c.bf16 %v4470_v20, %v4469_v10  ;;  %v16375_v27 = vpack.c.bf16 %v4472_v29, %v4471_v11  ;;  %v4474_v31 = vmax.f32 %v16569_v19, 0.0  ;;  %v4476_v15 = vmax.f32 %v16633_v24, 0.0 }
 0x3e0   : > { %4937 = vst [vmem:[%s20279_s27 + $0x160] sm:$0xff] %v16374_v16  ;;  %4938 = vst [vmem:[%s20279_s27 + $0x168] sm:$0xff] %v16375_v27  ;;  %v16376_v47 = vpack.c.bf16 %v4474_v31, %v4473_v9  ;;  %v16377_v46 = vpack.c.bf16 %v4476_v15, %v4475_v25  ;;  %v3377_v33 = vpop.f32.mrb[48].mxu0  ;;  %v4342_v35 = vpop.f32.mrb[48].mxu1 }
 0x3e1   : > { %v16570_v36 = vadd.f32 %v3377_v33, %v21075_v54  ;;  %v16634_v38 = vadd.f32 %v4342_v35, %v21077_v34  ;;  %v3379_v58 = vpop.f32.mrb[49].mxu0  ;;  %v4344_v42 = vpop.f32.mrb[49].mxu1 }
 0x3e2   : > { %4939 = vst [vmem:[%s20279_s27 + $0x170] sm:$0xff] %v16376_v47  ;;  %4940 = vst [vmem:[%s20279_s27 + $0x178] sm:$0xff] %v16377_v46  ;;  %v16571_v40 = vadd.f32 %v3379_v58, %v21079_v41  ;;  %v16635_v18 = vadd.f32 %v4344_v42, %v21081_v55  ;;  %v3381_v44 = vpop.f32.mrb[50].mxu0  ;;  %v4346_v30 = vpop.f32.mrb[50].mxu1 }
 0x3e3   : > { %v4477_v32 = vmax.f32 %v16570_v36, 0.0  ;;  %v4479_v57 = vmax.f32 %v16634_v38, 0.0  ;;  %v16572_v48 = vadd.f32 %v3381_v44, %v21075_v54  ;;  %v16636_v21 = vadd.f32 %v4346_v30, %v21077_v34  ;;  %v3383_v49 = vpop.f32.mrb[51].mxu0  ;;  %v4348_v50 = vpop.f32.mrb[51].mxu1 }
 0x3e4   : > { %v4478_v26 = vmax.f32 %v16571_v40, 0.0  ;;  %v4480_v52 = vmax.f32 %v16635_v18, 0.0  ;;  %v16573_v53 = vadd.f32 %v3383_v49, %v21079_v41  ;;  %v16637_v28 = vadd.f32 %v4348_v50, %v21081_v55 }
 0x3e5   : > { %v4481_v23 = vmax.f32 %v16572_v48, 0.0  ;;  %v4483_v56 = vmax.f32 %v16636_v21, 0.0 }
 0x3e6   : > { %v16378_v22 = vpack.c.bf16 %v4478_v26, %v4477_v32  ;;  %v16379_v45 = vpack.c.bf16 %v4480_v52, %v4479_v57  ;;  %v4482_v51 = vmax.f32 %v16573_v53, 0.0  ;;  %v4484_v59 = vmax.f32 %v16637_v28, 0.0 }
 0x3e8   : > { %4941 = vst [vmem:[%s20279_s27 + $0x180] sm:$0xff] %v16378_v22  ;;  %4942 = vst [vmem:[%s20279_s27 + $0x188] sm:$0xff] %v16379_v45  ;;  %v16380_v37 = vpack.c.bf16 %v4482_v51, %v4481_v23  ;;  %v16381_v5 = vpack.c.bf16 %v4484_v59, %v4483_v56  ;;  %v3387_v39 = vpop.f32.mrb[52].mxu0  ;;  %v4352_v61 = vpop.f32.mrb[52].mxu1 }
 0x3e9   : > { %v16574_v60 = vadd.f32 %v3387_v39, %v21075_v54  ;;  %v16638_v43 = vadd.f32 %v4352_v61, %v21077_v34  ;;  %v3389_v62 = vpop.f32.mrb[53].mxu0  ;;  %v4354_v63 = vpop.f32.mrb[53].mxu1 }
 0x3ea   : > { %4943 = vst [vmem:[%s20279_s27 + $0x190] sm:$0xff] %v16380_v37  ;;  %4944 = vst [vmem:[%s20279_s27 + $0x198] sm:$0xff] %v16381_v5  ;;  %v16575_v0 = vadd.f32 %v3389_v62, %v21079_v41  ;;  %v16639_v2 = vadd.f32 %v4354_v63, %v21081_v55  ;;  %v3391_v4 = vpop.f32.mrb[54].mxu0  ;;  %v4356_v1 = vpop.f32.mrb[54].mxu1 }
 0x3eb   : > { %v4485_v3 = vmax.f32 %v16574_v60, 0.0  ;;  %v4487_v6 = vmax.f32 %v16638_v43, 0.0  ;;  %v16576_v7 = vadd.f32 %v3391_v4, %v21075_v54  ;;  %v16640_v8 = vadd.f32 %v4356_v1, %v21077_v34  ;;  %v3393_v10 = vpop.f32.mrb[55].mxu0  ;;  %v4358_v11 = vpop.f32.mrb[55].mxu1 }
 0x3ec   : > { %v4486_v12 = vmax.f32 %v16575_v0, 0.0  ;;  %v4488_v13 = vmax.f32 %v16639_v2, 0.0  ;;  %v16577_v14 = vadd.f32 %v3393_v10, %v21079_v41  ;;  %v16641_v17 = vadd.f32 %v4358_v11, %v21081_v55 }
 0x3ed   : > { %v4489_v20 = vmax.f32 %v16576_v7, 0.0  ;;  %v4491_v29 = vmax.f32 %v16640_v8, 0.0 }
 0x3ee   : > { %v16382_v19 = vpack.c.bf16 %v4486_v12, %v4485_v3  ;;  %v16383_v24 = vpack.c.bf16 %v4488_v13, %v4487_v6  ;;  %v4490_v9 = vmax.f32 %v16577_v14, 0.0  ;;  %v4492_v25 = vmax.f32 %v16641_v17, 0.0 }
 0x3f0   : > { %4945 = vst [vmem:[%s20279_s27 + $0x1a0] sm:$0xff] %v16382_v19  ;;  %4946 = vst [vmem:[%s20279_s27 + $0x1a8] sm:$0xff] %v16383_v24  ;;  %v16384_v16 = vpack.c.bf16 %v4490_v9, %v4489_v20  ;;  %v16385_v27 = vpack.c.bf16 %v4492_v25, %v4491_v29  ;;  %v3397_v31 = vpop.f32.mrb[56].mxu0  ;;  %v4362_v15 = vpop.f32.mrb[56].mxu1 }
 0x3f1   : > { %v16578_v47 = vadd.f32 %v3397_v31, %v21075_v54  ;;  %v16642_v46 = vadd.f32 %v4362_v15, %v21077_v34  ;;  %v3399_v33 = vpop.f32.mrb[57].mxu0  ;;  %v4364_v35 = vpop.f32.mrb[57].mxu1 }
 0x3f2   : > { %4947 = vst [vmem:[%s20279_s27 + $0x1b0] sm:$0xff] %v16384_v16  ;;  %4948 = vst [vmem:[%s20279_s27 + $0x1b8] sm:$0xff] %v16385_v27  ;;  %v16579_v36 = vadd.f32 %v3399_v33, %v21079_v41  ;;  %v16643_v38 = vadd.f32 %v4364_v35, %v21081_v55  ;;  %v3401_v58 = vpop.f32.mrb[58].mxu0  ;;  %v4366_v42 = vpop.f32.mrb[58].mxu1 }
 0x3f3   : > { %v4493_v40 = vmax.f32 %v16578_v47, 0.0  ;;  %v4495_v18 = vmax.f32 %v16642_v46, 0.0  ;;  %v16580_v44 = vadd.f32 %v3401_v58, %v21075_v54  ;;  %v16644_v30 = vadd.f32 %v4366_v42, %v21077_v34  ;;  %v3403_v32 = vpop.f32.mrb[59].mxu0  ;;  %v4368_v57 = vpop.f32.mrb[59].mxu1 }
 0x3f4   : > { %v4494_v48 = vmax.f32 %v16579_v36, 0.0  ;;  %v4496_v21 = vmax.f32 %v16643_v38, 0.0  ;;  %v16581_v49 = vadd.f32 %v3403_v32, %v21079_v41  ;;  %v16645_v50 = vadd.f32 %v4368_v57, %v21081_v55 }
 0x3f5   : > { %v4497_v26 = vmax.f32 %v16580_v44, 0.0  ;;  %v4499_v52 = vmax.f32 %v16644_v30, 0.0 }
 0x3f6   : > { %v16386_v53 = vpack.c.bf16 %v4494_v48, %v4493_v40  ;;  %v16387_v28 = vpack.c.bf16 %v4496_v21, %v4495_v18  ;;  %v4498_v23 = vmax.f32 %v16581_v49, 0.0  ;;  %v4500_v56 = vmax.f32 %v16645_v50, 0.0 }
 0x3f8   : > { %4949 = vst [vmem:[%s20279_s27 + $0x1c0] sm:$0xff] %v16386_v53  ;;  %4950 = vst [vmem:[%s20279_s27 + $0x1c8] sm:$0xff] %v16387_v28  ;;  %v16388_v22 = vpack.c.bf16 %v4498_v23, %v4497_v26  ;;  %v16389_v45 = vpack.c.bf16 %v4500_v56, %v4499_v52  ;;  %v3407_v51 = vpop.f32.mrb[60].mxu0  ;;  %v4372_v59 = vpop.f32.mrb[60].mxu1 }
 0x3f9   : > { %v16582_v37 = vadd.f32 %v3407_v51, %v21075_v54  ;;  %v16646_v5 = vadd.f32 %v4372_v59, %v21077_v34  ;;  %v3409_v39 = vpop.f32.mrb[61].mxu0  ;;  %v4374_v61 = vpop.f32.mrb[61].mxu1 }
 0x3fa   : > { %4951 = vst [vmem:[%s20279_s27 + $0x1d0] sm:$0xff] %v16388_v22  ;;  %4952 = vst [vmem:[%s20279_s27 + $0x1d8] sm:$0xff] %v16389_v45  ;;  %v16583_v60 = vadd.f32 %v3409_v39, %v21079_v41  ;;  %v16647_v43 = vadd.f32 %v4374_v61, %v21081_v55  ;;  %v3411_v62 = vpop.f32.mrb[62].mxu0  ;;  %v4376_v63 = vpop.f32.mrb[62].mxu1 }
 0x3fb   : > { %v4501_v0 = vmax.f32 %v16582_v37, 0.0  ;;  %v4503_v2 = vmax.f32 %v16646_v5, 0.0  ;;  %v16584_v4 = vadd.f32 %v3411_v62, %v21075_v54  ;;  %v16648_v1 = vadd.f32 %v4376_v63, %v21077_v34  ;;  %v3413_v3 = vpop.f32.mrb[63].mxu0  ;;  %v4378_v6 = vpop.f32.mrb[63].mxu1 }
 0x3fc   : > { %v4502_v7 = vmax.f32 %v16583_v60, 0.0  ;;  %v4504_v8 = vmax.f32 %v16647_v43, 0.0  ;;  %v16585_v10 = vadd.f32 %v3413_v3, %v21079_v41  ;;  %v16649_v11 = vadd.f32 %v4378_v6, %v21081_v55 }
 0x3fd   : > { %v4505_v12 = vmax.f32 %v16584_v4, 0.0  ;;  %v4507_v13 = vmax.f32 %v16648_v1, 0.0 }
 0x3fe   : > { %v16390_v14 = vpack.c.bf16 %v4502_v7, %v4501_v0  ;;  %v16391_v17 = vpack.c.bf16 %v4504_v8, %v4503_v2  ;;  %v4506_v20 = vmax.f32 %v16585_v10, 0.0  ;;  %v4508_v29 = vmax.f32 %v16649_v11, 0.0 }
 0x400   : > { %4953 = vst [vmem:[%s20279_s27 + $0x1e0] sm:$0xff] %v16390_v14  ;;  %4954 = vst [vmem:[%s20279_s27 + $0x1e8] sm:$0xff] %v16391_v17  ;;  %v16392_v54 = vpack.c.bf16 %v4506_v20, %v4505_v12  ;;  %v16393_v34 = vpack.c.bf16 %v4508_v29, %v4507_v13 }
 0x402   : > { %4955 = vst [vmem:[%s20279_s27 + $0x1f0] sm:$0xff] %v16392_v54  ;;  %4956 = vst [vmem:[%s20279_s27 + $0x1f8] sm:$0xff] %v16393_v34 }
 0x403 PF: > { %p15137_p2 = scmp.ne.s32.totalorder %s20026_s18, 1 }
 0x404   : > { %v18992_v41 = vld [vmem:[%s20257_s26 + $0x4] ss:$16 sps:$4 sm:$0xff] (!%p15137_p2)   ;;  %v18994_v55 = vld [vmem:[%s20257_s26 + $0xc] ss:$16 sps:$4 sm:$0xff] (!%p15137_p2)   ;;  %v18996_v19 = vld [vmem:[%s20257_s26] ss:$16 sps:$4 sm:$0xff] (!%p15137_p2)  }
 0x405   : > { %4960 = sbr.rel (%p15137_p2) target bundleno = 1947 (0x79b), region = 48  ;;  %7146 = vmatprep.subr.bf16.mxu0 (!%p15137_p2), %v18992_v41  ;;  %v18997_v24 = vld [vmem:[%s20257_s26 + $0x8] ss:$16 sps:$4 sm:$0xff] (!%p15137_p2)   ;;  %8111 = vmatprep.subr.bf16.mxu1 (!%p15137_p2), %v18994_v55  ;;  %v18998_v9 = vld [vmem:[%s20257_s26 + $0x24] ss:$16 sps:$4 sm:$0xff] (!%p15137_p2)  }
 0x406   : > { %7147 = vmatpush1.bf16.msra.mxu0 (!%p15137_p2), %v18996_v19  ;;  %8112 = vmatpush1.bf16.msra.mxu1 (!%p15137_p2), %v18997_v24  ;;  %v19000_v25 = vld [vmem:[%s20257_s26 + $0x2c] ss:$16 sps:$4 sm:$0xff] (!%p15137_p2)   ;;  %v19002_v16 = vld [vmem:[%s20257_s26 + $0x20] ss:$16 sps:$4 sm:$0xff] (!%p15137_p2)   ;;  %v19003_v27 = vld [vmem:[%s20257_s26 + $0x28] ss:$16 sps:$4 sm:$0xff] (!%p15137_p2)  }
 0x407   : > { %7148 = vmatprep.subr.bf16.mxu0 (!%p15137_p2), %v18998_v9  ;;  %8113 = vmatprep.subr.bf16.mxu1 (!%p15137_p2), %v19000_v25  ;;  %v19004_v31 = vld [vmem:[%s20257_s26 + $0x44] ss:$16 sps:$4 sm:$0xff] (!%p15137_p2)   ;;  %v19006_v15 = vld [vmem:[%s20257_s26 + $0x4c] ss:$16 sps:$4 sm:$0xff] (!%p15137_p2)   ;;  %v19008_v47 = vld [vmem:[%s20257_s26 + $0x40] ss:$16 sps:$4 sm:$0xff] (!%p15137_p2)  }
 0x408   : > { %v19009_v46 = vld [vmem:[%s20257_s26 + $0x48] ss:$16 sps:$4 sm:$0xff] (!%p15137_p2)   ;;  %v19010_v33 = vld [vmem:[%s20257_s26 + $0x64] ss:$16 sps:$4 sm:$0xff] (!%p15137_p2)   ;;  %v19012_v35 = vld [vmem:[%s20257_s26 + $0x6c] ss:$16 sps:$4 sm:$0xff] (!%p15137_p2)  }
 0x409   : > { %v19014_v36 = vld [vmem:[%s20257_s26 + $0x60] ss:$16 sps:$4 sm:$0xff] (!%p15137_p2)   ;;  %v19015_v38 = vld [vmem:[%s20257_s26 + $0x68] ss:$16 sps:$4 sm:$0xff] (!%p15137_p2)   ;;  %v19016_v58 = vld [vmem:[%s20257_s26 + $0x84] ss:$16 sps:$4 sm:$0xff] (!%p15137_p2)  }
 0x40a   : > { %7149 = vmatpush1.bf16.msra.mxu0 (!%p15137_p2), %v19002_v16  ;;  %8114 = vmatpush1.bf16.msra.mxu1 (!%p15137_p2), %v19003_v27  ;;  %v19018_v42 = vld [vmem:[%s20257_s26 + $0x8c] ss:$16 sps:$4 sm:$0xff] (!%p15137_p2)   ;;  %v19020_v40 = vld [vmem:[%s20257_s26 + $0x80] ss:$16 sps:$4 sm:$0xff] (!%p15137_p2)   ;;  %v19021_v18 = vld [vmem:[%s20257_s26 + $0x88] ss:$16 sps:$4 sm:$0xff] (!%p15137_p2)  }
 0x40b   : > { %7150 = vmatprep.subr.bf16.mxu0 (!%p15137_p2), %v19004_v31  ;;  %8115 = vmatprep.subr.bf16.mxu1 (!%p15137_p2), %v19006_v15  ;;  %v19022_v44 = vld [vmem:[%s20257_s26 + $0xa4] ss:$16 sps:$4 sm:$0xff] (!%p15137_p2)   ;;  %v19024_v30 = vld [vmem:[%s20257_s26 + $0xac] ss:$16 sps:$4 sm:$0xff] (!%p15137_p2)   ;;  %v19026_v32 = vld [vmem:[%s20257_s26 + $0xa0] ss:$16 sps:$4 sm:$0xff] (!%p15137_p2)  }
 0x40c   : > { %v19027_v57 = vld [vmem:[%s20257_s26 + $0xa8] ss:$16 sps:$4 sm:$0xff]   ;;  %v19028_v48 = vld [vmem:[%s20257_s26 + $0xc4] ss:$16 sps:$4 sm:$0xff]   ;;  %v19030_v21 = vld [vmem:[%s20257_s26 + $0xcc] ss:$16 sps:$4 sm:$0xff]  }
 0x40d   : > { %v19032_v49 = vld [vmem:[%s20257_s26 + $0xc0] ss:$16 sps:$4 sm:$0xff]   ;;  %v19033_v50 = vld [vmem:[%s20257_s26 + $0xc8] ss:$16 sps:$4 sm:$0xff]   ;;  %v19034_v26 = vld [vmem:[%s20257_s26 + $0xe4] ss:$16 sps:$4 sm:$0xff]  }
 0x40e   : > { %7151 = vmatpush1.bf16.msra.mxu0 %v19008_v47  ;;  %8116 = vmatpush1.bf16.msra.mxu1 %v19009_v46  ;;  %v19036_v52 = vld [vmem:[%s20257_s26 + $0xec] ss:$16 sps:$4 sm:$0xff]   ;;  %v19038_v53 = vld [vmem:[%s20257_s26 + $0xe0] ss:$16 sps:$4 sm:$0xff]   ;;  %v19039_v28 = vld [vmem:[%s20257_s26 + $0xe8] ss:$16 sps:$4 sm:$0xff]  }
 0x40f   : > { %7152 = vmatprep.subr.bf16.mxu0 %v19010_v33  ;;  %8117 = vmatprep.subr.bf16.mxu1 %v19012_v35  ;;  %v19040_v23 = vld [vmem:[%s20257_s26 + $0x104] ss:$16 sps:$4 sm:$0xff]   ;;  %v19042_v56 = vld [vmem:[%s20257_s26 + $0x10c] ss:$16 sps:$4 sm:$0xff]   ;;  %v19044_v22 = vld [vmem:[%s20257_s26 + $0x100] ss:$16 sps:$4 sm:$0xff]  }
 0x410   : > { %v19045_v45 = vld [vmem:[%s20257_s26 + $0x108] ss:$16 sps:$4 sm:$0xff]   ;;  %v19046_v51 = vld [vmem:[%s20257_s26 + $0x124] ss:$16 sps:$4 sm:$0xff]   ;;  %v19048_v59 = vld [vmem:[%s20257_s26 + $0x12c] ss:$16 sps:$4 sm:$0xff]  }
 0x411   : > { %v19050_v37 = vld [vmem:[%s20257_s26 + $0x120] ss:$16 sps:$4 sm:$0xff]   ;;  %v19051_v5 = vld [vmem:[%s20257_s26 + $0x128] ss:$16 sps:$4 sm:$0xff]   ;;  %v19052_v39 = vld [vmem:[%s20257_s26 + $0x144] ss:$16 sps:$4 sm:$0xff]  }
 0x412   : > { %7153 = vmatpush1.bf16.msra.mxu0 %v19014_v36  ;;  %8118 = vmatpush1.bf16.msra.mxu1 %v19015_v38  ;;  %v19054_v61 = vld [vmem:[%s20257_s26 + $0x14c] ss:$16 sps:$4 sm:$0xff]   ;;  %v19056_v60 = vld [vmem:[%s20257_s26 + $0x140] ss:$16 sps:$4 sm:$0xff]   ;;  %v19057_v43 = vld [vmem:[%s20257_s26 + $0x148] ss:$16 sps:$4 sm:$0xff]  }
 0x413   : > { %7154 = vmatprep.subr.bf16.mxu0 %v19016_v58  ;;  %8119 = vmatprep.subr.bf16.mxu1 %v19018_v42  ;;  %v19058_v62 = vld [vmem:[%s20257_s26 + $0x164] ss:$16 sps:$4 sm:$0xff]   ;;  %v19060_v63 = vld [vmem:[%s20257_s26 + $0x16c] ss:$16 sps:$4 sm:$0xff]   ;;  %v19062_v2 = vld [vmem:[%s20257_s26 + $0x160] ss:$16 sps:$4 sm:$0xff]  }
 0x414   : > { %v15170_v0 = vld [vmem:[%s20277_s28 + $0x1b] sm:$0xff]  ;;  %v15171_v1 = vld [vmem:[%s20277_s28 + $0x23] sm:$0xff]  ;;  %v15172_v27 = vld [vmem:[%s20277_s28 + $0x33] sm:$0xff] }
 0x415   : > { %v19063_v4 = vld [vmem:[%s20257_s26 + $0x168] ss:$16 sps:$4 sm:$0xff]   ;;  %v19064_v3 = vld [vmem:[%s20257_s26 + $0x184] ss:$16 sps:$4 sm:$0xff]   ;;  %v5042_v6 = vpack.c.bf16 %v15171_v1, %v15170_v0  ;;  %v19066_v7 = vld [vmem:[%s20257_s26 + $0x18c] ss:$16 sps:$4 sm:$0xff]  }
 0x416   : > { %7155 = vmatpush1.bf16.msra.mxu0 %v19020_v40  ;;  %8120 = vmatpush1.bf16.msra.mxu1 %v19021_v18  ;;  %v19068_v8 = vld [vmem:[%s20257_s26 + $0x180] ss:$16 sps:$4 sm:$0xff]   ;;  %v19069_v10 = vld [vmem:[%s20257_s26 + $0x188] ss:$16 sps:$4 sm:$0xff]   ;;  %v19070_v11 = vld [vmem:[%s20257_s26 + $0x1a4] ss:$16 sps:$4 sm:$0xff]  }
 0x417   : > { %7156 = vmatprep.subr.bf16.mxu0 %v19022_v44  ;;  %8121 = vmatprep.subr.bf16.mxu1 %v19024_v30  ;;  %v19072_v12 = vld [vmem:[%s20257_s26 + $0x1ac] ss:$16 sps:$4 sm:$0xff]   ;;  %v19074_v13 = vld [vmem:[%s20257_s26 + $0x1a0] ss:$16 sps:$4 sm:$0xff]   ;;  %v19075_v14 = vld [vmem:[%s20257_s26 + $0x1a8] ss:$16 sps:$4 sm:$0xff]  }
 0x418   : > { %7178 = vmatprep.mubr.bf16.mxu0 %v5042_v6  ;;  %8143 = vmatprep.mubr.bf16.mxu1 %v5042_v6  ;;  %v19076_v17 = vld [vmem:[%s20257_s26 + $0x1c4] ss:$16 sps:$4 sm:$0xff]   ;;  %v19078_v20 = vld [vmem:[%s20257_s26 + $0x1cc] ss:$16 sps:$4 sm:$0xff]   ;;  %v19080_v29 = vld [vmem:[%s20257_s26 + $0x1c0] ss:$16 sps:$4 sm:$0xff]  }
 0x419   : > { %v19081_v54 = vld [vmem:[%s20257_s26 + $0x1c8] ss:$16 sps:$4 sm:$0xff]   ;;  %v19082_v34 = vld [vmem:[%s20257_s26 + $0x1e4] ss:$16 sps:$4 sm:$0xff]   ;;  %v19084_v41 = vld [vmem:[%s20257_s26 + $0x1ec] ss:$16 sps:$4 sm:$0xff]  }
 0x41a   : > { %7157 = vmatpush1.bf16.msra.mxu0 %v19026_v32  ;;  %8122 = vmatpush1.bf16.msra.mxu1 %v19027_v57  ;;  %v19086_v55 = vld [vmem:[%s20257_s26 + $0x1e0] ss:$16 sps:$4 sm:$0xff]   ;;  %v19087_v19 = vld [vmem:[%s20257_s26 + $0x1e8] ss:$16 sps:$4 sm:$0xff]   ;;  %v19090_v25 = vld [vmem:[%s20257_s26 + $0x204] ss:$16 sps:$4 sm:$0xff]  }
 0x41b   : > { %7158 = vmatprep.subr.bf16.mxu0 %v19028_v48  ;;  %8123 = vmatprep.subr.bf16.mxu1 %v19030_v21  ;;  %v15138_v24 = vld [vmem:[%s20277_s28 + $0x19] sm:$0xff]  ;;  %v15139_v9 = vld [vmem:[%s20277_s28 + $0x21] sm:$0xff]  ;;  %v15140_v35 = vld [vmem:[%s20277_s28 + $0x31] sm:$0xff] }
 0x41c   : > { %v19093_v16 = vld [vmem:[%s20257_s26 + $0x20c] ss:$16 sps:$4 sm:$0xff]   ;;  %v4994_v15 = vpack.c.bf16 %v15139_v9, %v15138_v24  ;;  %v19088_v47 = vld [vmem:[%s20257_s26 + $0x200] ss:$16 sps:$4 sm:$0xff]   ;;  %v19091_v46 = vld [vmem:[%s20257_s26 + $0x208] ss:$16 sps:$4 sm:$0xff]  }
 0x41d   : > { %v15173_v31 = vld [vmem:[%s20277_s28 + $0x3b] sm:$0xff]  ;;  %v19096_v58 = vld [vmem:[%s20257_s26 + $0x224] ss:$16 sps:$4 sm:$0xff]   ;;  %v15174_v18 = vld [vmem:[%s20277_s28 + $0x4b] sm:$0xff] }
 0x41e   : > { %7159 = vmatpush1.bf16.msra.mxu0 %v19032_v49  ;;  %8124 = vmatpush1.bf16.msra.mxu1 %v19033_v50  ;;  %v5043_v33 = vpack.c.bf16 %v15173_v31, %v15172_v27  ;;  %v15141_v36 = vld [vmem:[%s20277_s28 + $0x39] sm:$0xff]  ;;  %v19102_v30 = vld [vmem:[%s20257_s26 + $0x244] ss:$16 sps:$4 sm:$0xff]   ;;  %v15142_v50 = vld [vmem:[%s20277_s28 + $0x49] sm:$0xff] }
 0x41f   : > { %7160 = vmatprep.subr.bf16.mxu0 %v19034_v26  ;;  %8125 = vmatprep.subr.bf16.mxu1 %v19036_v52  ;;  %v19094_v38 = vld [vmem:[%s20257_s26 + $0x220] ss:$16 sps:$4 sm:$0xff]   ;;  %v19099_v42 = vld [vmem:[%s20257_s26 + $0x22c] ss:$16 sps:$4 sm:$0xff]   ;;  %v19097_v40 = vld [vmem:[%s20257_s26 + $0x228] ss:$16 sps:$4 sm:$0xff]   ;;  %v4995_v57 = vpack.c.bf16 %v15141_v36, %v15140_v35 }
 0x420   : > { %v15175_v44 = vld [vmem:[%s20277_s28 + $0x53] sm:$0xff]  ;;  %v19105_v32 = vld [vmem:[%s20257_s26 + $0x24c] ss:$16 sps:$4 sm:$0xff]   ;;  %v15179_v0 = vld [vmem:[%s20277_s28 + $0x83] sm:$0xff] }
 0x421   : > { %v5044_v48 = vpack.c.bf16 %v15175_v44, %v15174_v18  ;;  %v19100_v21 = vld [vmem:[%s20257_s26 + $0x240] ss:$16 sps:$4 sm:$0xff]   ;;  %v19103_v49 = vld [vmem:[%s20257_s26 + $0x248] ss:$16 sps:$4 sm:$0xff]   ;;  %v19108_v26 = vld [vmem:[%s20257_s26 + $0x264] ss:$16 sps:$4 sm:$0xff]  }
 0x422   : > { %7161 = vmatpush1.bf16.msra.mxu0 %v19038_v53  ;;  %8126 = vmatpush1.bf16.msra.mxu1 %v19039_v28  ;;  %v19111_v52 = vld [vmem:[%s20257_s26 + $0x26c] ss:$16 sps:$4 sm:$0xff]   ;;  %v15143_v53 = vld [vmem:[%s20277_s28 + $0x51] sm:$0xff]  ;;  %v15176_v28 = vld [vmem:[%s20277_s28 + $0x63] sm:$0xff] }
 0x423   : > { %7162 = vmatprep.subr.bf16.mxu0 %v19040_v23  ;;  %8127 = vmatprep.subr.bf16.mxu1 %v19042_v56  ;;  %v15177_v23 = vld [vmem:[%s20277_s28 + $0x6b] sm:$0xff]  ;;  %v19126_v1 = vld [vmem:[%s20257_s26 + $0x2c4] ss:$16 sps:$4 sm:$0xff]   ;;  %v15149_v31 = vld [vmem:[%s20277_s28 + $0x99] sm:$0xff] }
 0x424   : > { %v19106_v56 = vld [vmem:[%s20257_s26 + $0x260] ss:$16 sps:$4 sm:$0xff]   ;;  %v19139_v9 = vld [vmem:[%s20257_s26 + $0x308] ss:$16 sps:$4 sm:$0xff]   ;;  %v19147_v27 = vld [vmem:[%s20257_s26 + $0x32c] ss:$16 sps:$4 sm:$0xff]  }
 0x425   : > { %v19136_v24 = vld [vmem:[%s20257_s26 + $0x300] ss:$16 sps:$4 sm:$0xff]   ;;  %v19150_v35 = vld [vmem:[%s20257_s26 + $0x344] ss:$16 sps:$4 sm:$0xff]   ;;  %v19153_v36 = vld [vmem:[%s20257_s26 + $0x34c] ss:$16 sps:$4 sm:$0xff]  }
 0x426   : > { %7163 = vmatpush1.bf16.msra.mxu0 %v19044_v22  ;;  %8128 = vmatpush1.bf16.msra.mxu1 %v19045_v45  ;;  %v19109_v22 = vld [vmem:[%s20257_s26 + $0x268] ss:$16 sps:$4 sm:$0xff]   ;;  %v19114_v45 = vld [vmem:[%s20257_s26 + $0x284] ss:$16 sps:$4 sm:$0xff]  }
 0x427   : > { %7164 = vmatprep.subr.bf16.mxu0 %v19046_v51  ;;  %8129 = vmatprep.subr.bf16.mxu1 %v19048_v59  ;;  %v19117_v51 = vld [vmem:[%s20257_s26 + $0x28c] ss:$16 sps:$4 sm:$0xff]   ;;  %v21372_v59 = vpack.c.bf16 %v15143_v53, %v15142_v50  ;;  %v19156_v44 = vld [vmem:[%s20257_s26 + $0x364] ss:$16 sps:$4 sm:$0xff]  }
 0x428   : > { %v15150_v18 = vld [vmem:[%s20277_s28 + $0xa9] sm:$0xff]  ;;  %v19162_v50 = vld [vmem:[%s20257_s26 + $0x384] ss:$16 sps:$4 sm:$0xff]  }
 0x42a   : > { %7165 = vmatpush1.bf16.msra.mxu0 %v19050_v37  ;;  %8130 = vmatpush1.bf16.msra.mxu1 %v19051_v5  ;;  %v5045_v37 = vpack.c.bf16 %v15177_v23, %v15176_v28  ;;  %v19112_v5 = vld [vmem:[%s20257_s26 + $0x280] ss:$16 sps:$4 sm:$0xff]   ;;  %v19163_v23 = vld [vmem:[%s20257_s26 + $0x388] ss:$16 sps:$4 sm:$0xff]  }
 0x42b   : > { %7166 = vmatprep.subr.bf16.mxu0 %v19052_v39  ;;  %8131 = vmatprep.subr.bf16.mxu1 %v19054_v61  ;;  %v19115_v39 = vld [vmem:[%s20257_s26 + $0x288] ss:$16 sps:$4 sm:$0xff]   ;;  %v19160_v28 = vld [vmem:[%s20257_s26 + $0x380] ss:$16 sps:$4 sm:$0xff]  }
 0x42c   : > { %v15144_v61 = vld [vmem:[%s20277_s28 + $0x61] sm:$0xff] }
 0x42e   : > { %7167 = vmatpush1.bf16.msra.mxu0 %v19056_v60  ;;  %8132 = vmatpush1.bf16.msra.mxu1 %v19057_v43  ;;  %v19120_v60 = vld [vmem:[%s20257_s26 + $0x2a4] ss:$16 sps:$4 sm:$0xff]   ;;  %v19123_v43 = vld [vmem:[%s20257_s26 + $0x2ac] ss:$16 sps:$4 sm:$0xff]  }
 0x42f   : > { %7168 = vmatprep.subr.bf16.mxu0 %v19058_v62  ;;  %8133 = vmatprep.subr.bf16.mxu1 %v19060_v63  ;;  %v15145_v62 = vld [vmem:[%s20277_s28 + $0x69] sm:$0xff]  ;;  %v15178_v63 = vld [vmem:[%s20277_s28 + $0x7b] sm:$0xff] }
 0x430   : > { %v21388_v6 = vpack.c.bf16 %v15145_v62, %v15144_v61  ;;  %v19169_v61 = vld [vmem:[%s20257_s26 + $0x3a8] ss:$16 sps:$4 sm:$0xff]  }
 0x432   : > { %7169 = vmatpush1.bf16.msra.mxu0 %v19062_v2  ;;  %8134 = vmatpush1.bf16.msra.mxu1 %v19063_v4  ;;  %v19118_v2 = vld [vmem:[%s20257_s26 + $0x2a0] ss:$16 sps:$4 sm:$0xff]   ;;  %v19121_v4 = vld [vmem:[%s20257_s26 + $0x2a8] ss:$16 sps:$4 sm:$0xff]  }
 0x433   : > { %7170 = vmatprep.subr.bf16.mxu0 %v19064_v3  ;;  %8135 = vmatprep.subr.bf16.mxu1 %v19066_v7  ;;  %v19129_v3 = vld [vmem:[%s20257_s26 + $0x2cc] ss:$16 sps:$4 sm:$0xff]   ;;  %v5046_v7 = vpack.c.bf16 %v15179_v0, %v15178_v63  ;;  %v19172_v0 = vld [vmem:[%s20257_s26 + $0x3c0] ss:$16 sps:$4 sm:$0xff]  }
 0x436   : > { %7171 = vmatpush1.bf16.msra.mxu0 %v19068_v8  ;;  %8136 = vmatpush1.bf16.msra.mxu1 %v19069_v10  ;;  %v19124_v8 = vld [vmem:[%s20257_s26 + $0x2c0] ss:$16 sps:$4 sm:$0xff]   ;;  %v19127_v10 = vld [vmem:[%s20257_s26 + $0x2c8] ss:$16 sps:$4 sm:$0xff]  }
 0x437   : > { %7172 = vmatprep.subr.bf16.mxu0 %v19070_v11  ;;  %8137 = vmatprep.subr.bf16.mxu1 %v19072_v12  ;;  %v15146_v11 = vld [vmem:[%s20277_s28 + $0x79] sm:$0xff]  ;;  %v19132_v12 = vld [vmem:[%s20257_s26 + $0x2e4] ss:$16 sps:$4 sm:$0xff]  }
 0x43a   : > { %7173 = vmatpush1.bf16.msra.mxu0 %v19074_v13  ;;  %8138 = vmatpush1.bf16.msra.mxu1 %v19075_v14  ;;  %v19135_v13 = vld [vmem:[%s20257_s26 + $0x2ec] ss:$16 sps:$4 sm:$0xff]   ;;  %v15147_v14 = vld [vmem:[%s20277_s28 + $0x81] sm:$0xff] }
 0x43b   : > { %7174 = vmatprep.subr.bf16.mxu0 %v19076_v17  ;;  %8139 = vmatprep.subr.bf16.mxu1 %v19078_v20  ;;  %v15180_v17 = vld [vmem:[%s20277_s28 + $0x93] sm:$0xff]  ;;  %v15181_v20 = vld [vmem:[%s20277_s28 + $0x9b] sm:$0xff] }
 0x43e   : > { %7175 = vmatpush1.bf16.msra.mxu0 %v19080_v29  ;;  %8140 = vmatpush1.bf16.msra.mxu1 %v19081_v54  ;;  %v19130_v29 = vld [vmem:[%s20257_s26 + $0x2e0] ss:$16 sps:$4 sm:$0xff]   ;;  %v19133_v54 = vld [vmem:[%s20257_s26 + $0x2e8] ss:$16 sps:$4 sm:$0xff]  }
 0x43f   : > { %7176 = vmatprep.subr.bf16.mxu0 %v19082_v34  ;;  %8141 = vmatprep.subr.bf16.mxu1 %v19084_v41  ;;  %v19138_v34 = vld [vmem:[%s20257_s26 + $0x304] ss:$16 sps:$4 sm:$0xff]   ;;  %v19141_v41 = vld [vmem:[%s20257_s26 + $0x30c] ss:$16 sps:$4 sm:$0xff]  }
 0x442   : > { %7177 = vmatpush1.bf16.msra.mxu0 %v19086_v55  ;;  %8142 = vmatpush1.bf16.msra.mxu1 %v19087_v19  ;;  %v21404_v55 = vpack.c.bf16 %v15147_v14, %v15146_v11  ;;  %v5047_v19 = vpack.c.bf16 %v15181_v20, %v15180_v17  ;;  %v19178_v11 = vld [vmem:[%s20257_s26 + $0x3e0] ss:$16 sps:$4 sm:$0xff]   ;;  %v19189_v14 = vld [vmem:[%s20257_s26 + $0x40c] ss:$16 sps:$4 sm:$0xff]  }
 0x443   : > { %7339 = vmatprep.subr.bf16.mxu0 %v19090_v25  ;;  %8304 = vmatprep.subr.bf16.mxu1 %v19093_v16  ;;  %v15148_v25 = vld [vmem:[%s20277_s28 + $0x91] sm:$0xff] }
 0x444   : > { %v19144_v16 = vld [vmem:[%s20257_s26 + $0x324] ss:$16 sps:$4 sm:$0xff]  }
 0x445   : > { %7179 = vmatmul.mubr.bf16.vlgmr.msra.gmra.mrb[0].mxu0 %v4994_v15  ;;  %8144 = vmatmul.mubr.bf16.vlgmr.msra.gmra.mrb[0].mxu1 %v4994_v15  ;;  %v15182_v15 = vld [vmem:[%s20277_s28 + $0xab] sm:$0xff] }
 0x446   : > { %7340 = vmatpush1.bf16.msra.mxu0 %v19088_v47  ;;  %8305 = vmatpush1.bf16.msra.mxu1 %v19091_v46  ;;  %v15183_v47 = vld [vmem:[%s20277_s28 + $0xb3] sm:$0xff] }
 0x447   : > { %7188 = vmatprep.mubr.bf16.mxu0 %v5043_v33  ;;  %8153 = vmatprep.mubr.bf16.mxu1 %v5043_v33  ;;  %v19142_v46 = vld [vmem:[%s20257_s26 + $0x320] ss:$16 sps:$4 sm:$0xff]   ;;  %v19145_v33 = vld [vmem:[%s20257_s26 + $0x328] ss:$16 sps:$4 sm:$0xff]  }
 0x448   : > { %7341 = vmatprep.subr.bf16.mxu0 %v19096_v58  ;;  %8306 = vmatprep.subr.bf16.mxu1 %v19099_v42  ;;  %v5048_v58 = vpack.c.bf16 %v15183_v47, %v15182_v15  ;;  %v19148_v42 = vld [vmem:[%s20257_s26 + $0x340] ss:$16 sps:$4 sm:$0xff]  }
 0x449   : > { %v15160_v47 = vld [vmem:[%s20277_s28 + $0x121] sm:$0xff] }
 0x44a   : > { %7342 = vmatpush1.bf16.msra.mxu0 %v19094_v38  ;;  %8307 = vmatpush1.bf16.msra.mxu1 %v19097_v40  ;;  %v21420_v38 = vpack.c.bf16 %v15149_v31, %v15148_v25  ;;  %v19151_v40 = vld [vmem:[%s20257_s26 + $0x348] ss:$16 sps:$4 sm:$0xff]  }
 0x44b   : > { %7343 = vmatprep.subr.bf16.mxu0 %v19102_v30  ;;  %8308 = vmatprep.subr.bf16.mxu1 %v19105_v32  ;;  %v19159_v30 = vld [vmem:[%s20257_s26 + $0x36c] ss:$16 sps:$4 sm:$0xff]   ;;  %v15151_v32 = vld [vmem:[%s20277_s28 + $0xb1] sm:$0xff] }
 0x44c   : > { %v15159_v25 = vld [vmem:[%s20277_s28 + $0x111] sm:$0xff] }
 0x44d   : > { %7189 = vmatmul.mubr.bf16.gmra.mrb[4].mxu0 %v4995_v57  ;;  %8154 = vmatmul.mubr.bf16.gmra.mrb[4].mxu1 %v4995_v57  ;;  %v15184_v57 = vld [vmem:[%s20277_s28 + $0xc3] sm:$0xff] }
 0x44e   : > { %7198 = vmatprep.mubr.bf16.mxu0 %v5044_v48  ;;  %8163 = vmatprep.mubr.bf16.mxu1 %v5044_v48  ;;  %v15185_v48 = vld [vmem:[%s20277_s28 + $0xcb] sm:$0xff] }
 0x44f   : > { %7344 = vmatpush1.bf16.msra.mxu0 %v19100_v21  ;;  %8309 = vmatpush1.bf16.msra.mxu1 %v19103_v49  ;;  %v19154_v21 = vld [vmem:[%s20257_s26 + $0x360] ss:$16 sps:$4 sm:$0xff]   ;;  %v19157_v49 = vld [vmem:[%s20257_s26 + $0x368] ss:$16 sps:$4 sm:$0xff]   ;;  %v5049_v53 = vpack.c.bf16 %v15185_v48, %v15184_v57 }
 0x450   : > { %7345 = vmatprep.subr.bf16.mxu0 %v19108_v26  ;;  %8310 = vmatprep.subr.bf16.mxu1 %v19111_v52  ;;  %v19165_v26 = vld [vmem:[%s20257_s26 + $0x38c] ss:$16 sps:$4 sm:$0xff]   ;;  %v21436_v52 = vpack.c.bf16 %v15151_v32, %v15150_v18  ;;  %v15196_v18 = vld [vmem:[%s20277_s28 + $0x153] sm:$0xff] }
 0x451   : > { %v15164_v57 = vld [vmem:[%s20277_s28 + $0x151] sm:$0xff]  ;;  %v15165_v48 = vld [vmem:[%s20277_s28 + $0x159] sm:$0xff] }
 0x453   : > { %7346 = vmatpush1.bf16.msra.mxu0 %v19106_v56  ;;  %8311 = vmatpush1.bf16.msra.mxu1 %v19109_v22  ;;  %v19168_v56 = vld [vmem:[%s20257_s26 + $0x3a4] ss:$16 sps:$4 sm:$0xff]  }
 0x454   : > { %7347 = vmatprep.subr.bf16.mxu0 %v19114_v45  ;;  %8312 = vmatprep.subr.bf16.mxu1 %v19117_v51  ;;  %v15152_v22 = vld [vmem:[%s20277_s28 + $0xc1] sm:$0xff]  ;;  %v19171_v45 = vld [vmem:[%s20257_s26 + $0x3ac] ss:$16 sps:$4 sm:$0xff]  }
 0x455   : > { %7199 = vmatmul.mubr.bf16.gmra.mrb[8].mxu0 %v21372_v59  ;;  %8164 = vmatmul.mubr.bf16.gmra.mrb[8].mxu1 %v21372_v59  ;;  %v15153_v51 = vld [vmem:[%s20277_s28 + $0xc9] sm:$0xff] }
 0x456   : > { %7208 = vmatprep.mubr.bf16.mxu0 %v5045_v37  ;;  %8173 = vmatprep.mubr.bf16.mxu1 %v5045_v37  ;;  %v15186_v37 = vld [vmem:[%s20277_s28 + $0xdb] sm:$0xff]  ;;  %v21452_v62 = vpack.c.bf16 %v15153_v51, %v15152_v22 }
 0x457   : > { %7348 = vmatpush1.bf16.msra.mxu0 %v19112_v5  ;;  %8313 = vmatpush1.bf16.msra.mxu1 %v19115_v39  ;;  %v15187_v5 = vld [vmem:[%s20277_s28 + $0xe3] sm:$0xff] }
 0x458   : > { %7349 = vmatprep.subr.bf16.mxu0 %v19120_v60  ;;  %8314 = vmatprep.subr.bf16.mxu1 %v19123_v43  ;;  %v19166_v39 = vld [vmem:[%s20257_s26 + $0x3a0] ss:$16 sps:$4 sm:$0xff]   ;;  %v19174_v60 = vld [vmem:[%s20257_s26 + $0x3c4] ss:$16 sps:$4 sm:$0xff]   ;;  %v19177_v43 = vld [vmem:[%s20257_s26 + $0x3cc] ss:$16 sps:$4 sm:$0xff]   ;;  %v5050_v63 = vpack.c.bf16 %v15187_v5, %v15186_v37 }
 0x459   : > { %v15168_v51 = vld [vmem:[%s20277_s28 + $0x181] sm:$0xff]  ;;  %v15169_v37 = vld [vmem:[%s20277_s28 + $0x189] sm:$0xff] }
 0x45a   : > { %v21522_v5 = vpack.c.bf16 %v15169_v37, %v15168_v51  ;;  %v19238_v51 = vld [vmem:[%s20257_s26 + $0x520] ss:$16 sps:$4 sm:$0xff]   ;;  %v19241_v37 = vld [vmem:[%s20257_s26 + $0x528] ss:$16 sps:$4 sm:$0xff]  }
 0x45b   : > { %7350 = vmatpush1.bf16.msra.mxu0 %v19118_v2  ;;  %8315 = vmatpush1.bf16.msra.mxu1 %v19121_v4  ;;  %v19175_v2 = vld [vmem:[%s20257_s26 + $0x3c8] ss:$16 sps:$4 sm:$0xff]   ;;  %v19180_v4 = vld [vmem:[%s20257_s26 + $0x3e4] ss:$16 sps:$4 sm:$0xff]  }
 0x45c   : > { %7351 = vmatprep.subr.bf16.mxu0 %v19126_v1  ;;  %8316 = vmatprep.subr.bf16.mxu1 %v19129_v3  ;;  %v15154_v1 = vld [vmem:[%s20277_s28 + $0xd9] sm:$0xff] }
 0x45d   : > { %7209 = vmatmul.mubr.bf16.gmra.mrb[12].mxu0 %v21388_v6  ;;  %8174 = vmatmul.mubr.bf16.gmra.mrb[12].mxu1 %v21388_v6  ;;  %v19183_v3 = vld [vmem:[%s20257_s26 + $0x3ec] ss:$16 sps:$4 sm:$0xff]  }
 0x45e   : > { %7218 = vmatprep.mubr.bf16.mxu0 %v5046_v7  ;;  %8183 = vmatprep.mubr.bf16.mxu1 %v5046_v7  ;;  %v15155_v7 = vld [vmem:[%s20277_s28 + $0xe1] sm:$0xff] }
 0x45f   : > { %7352 = vmatpush1.bf16.msra.mxu0 %v19124_v8  ;;  %8317 = vmatpush1.bf16.msra.mxu1 %v19127_v10  ;;  %v15188_v8 = vld [vmem:[%s20277_s28 + $0xf3] sm:$0xff]  ;;  %v15189_v10 = vld [vmem:[%s20277_s28 + $0xfb] sm:$0xff]  ;;  %v21468_v17 = vpack.c.bf16 %v15155_v7, %v15154_v1 }
 0x460   : > { %7353 = vmatprep.subr.bf16.mxu0 %v19132_v12  ;;  %8318 = vmatprep.subr.bf16.mxu1 %v19135_v13  ;;  %v19181_v12 = vld [vmem:[%s20257_s26 + $0x3e8] ss:$16 sps:$4 sm:$0xff]   ;;  %v19186_v13 = vld [vmem:[%s20257_s26 + $0x404] ss:$16 sps:$4 sm:$0xff]   ;;  %v5051_v20 = vpack.c.bf16 %v15189_v10, %v15188_v8  ;;  %v19201_v8 = vld [vmem:[%s20257_s26 + $0x44c] ss:$16 sps:$4 sm:$0xff]  }
 0x461   : > { %v15205_v1 = vld [vmem:[%s20277_s28 + $0x3d] sm:$0xff] }
 0x462   : > { %v19198_v7 = vld [vmem:[%s20257_s26 + $0x444] ss:$16 sps:$4 sm:$0xff]  }
 0x463   : > { %7354 = vmatpush1.bf16.msra.mxu0 %v19130_v29  ;;  %8319 = vmatpush1.bf16.msra.mxu1 %v19133_v54  ;;  %v15156_v29 = vld [vmem:[%s20277_s28 + $0xf1] sm:$0xff]  ;;  %v15157_v54 = vld [vmem:[%s20277_s28 + $0xf9] sm:$0xff] }
 0x464   : > { %7355 = vmatprep.subr.bf16.mxu0 %v19138_v34  ;;  %8320 = vmatprep.subr.bf16.mxu1 %v19141_v41  ;;  %v15190_v34 = vld [vmem:[%s20277_s28 + $0x10b] sm:$0xff]  ;;  %v15191_v41 = vld [vmem:[%s20277_s28 + $0x113] sm:$0xff] }
 0x465   : > { %7219 = vmatmul.mubr.bf16.gmra.mrb[16].mxu0 %v21404_v55  ;;  %8184 = vmatmul.mubr.bf16.gmra.mrb[16].mxu1 %v21404_v55 }
 0x466   : > { %7228 = vmatprep.mubr.bf16.mxu0 %v5047_v19  ;;  %8193 = vmatprep.mubr.bf16.mxu1 %v5047_v19  ;;  %v21476_v19 = vpack.c.bf16 %v15157_v54, %v15156_v29  ;;  %v19202_v29 = vld [vmem:[%s20257_s26 + $0x460] ss:$16 sps:$4 sm:$0xff]   ;;  %v19205_v54 = vld [vmem:[%s20257_s26 + $0x468] ss:$16 sps:$4 sm:$0xff]  }
 0x467   : > { %7356 = vmatpush1.bf16.msra.mxu0 %v19136_v24  ;;  %8321 = vmatpush1.bf16.msra.mxu1 %v19139_v9  ;;  %v5052_v24 = vpack.c.bf16 %v15191_v41, %v15190_v34  ;;  %v15158_v9 = vld [vmem:[%s20277_s28 + $0x109] sm:$0xff]  ;;  %v19210_v34 = vld [vmem:[%s20257_s26 + $0x484] ss:$16 sps:$4 sm:$0xff]  }
 0x468   : > { %7357 = vmatprep.subr.bf16.mxu0 %v19144_v16  ;;  %8322 = vmatprep.subr.bf16.mxu1 %v19147_v27  ;;  %v15192_v16 = vld [vmem:[%s20277_s28 + $0x123] sm:$0xff]  ;;  %v15193_v27 = vld [vmem:[%s20277_s28 + $0x12b] sm:$0xff]  ;;  %v21484_v31 = vpack.c.bf16 %v15159_v25, %v15158_v9 }
 0x469   : > { %v5053_v15 = vpack.c.bf16 %v15193_v27, %v15192_v16  ;;  %v19213_v41 = vld [vmem:[%s20257_s26 + $0x48c] ss:$16 sps:$4 sm:$0xff]   ;;  %v19211_v9 = vld [vmem:[%s20257_s26 + $0x488] ss:$16 sps:$4 sm:$0xff]   ;;  %v19216_v25 = vld [vmem:[%s20257_s26 + $0x4a4] ss:$16 sps:$4 sm:$0xff]  }
 0x46a   : > { %v19219_v16 = vld [vmem:[%s20257_s26 + $0x4ac] ss:$16 sps:$4 sm:$0xff]  }
 0x46b   : > { %7358 = vmatpush1.bf16.msra.mxu0 %v19142_v46  ;;  %8323 = vmatpush1.bf16.msra.mxu1 %v19145_v33  ;;  %v15161_v46 = vld [vmem:[%s20277_s28 + $0x129] sm:$0xff]  ;;  %v15194_v33 = vld [vmem:[%s20277_s28 + $0x13b] sm:$0xff] }
 0x46c   : > { %7359 = vmatprep.subr.bf16.mxu0 %v19150_v35  ;;  %8324 = vmatprep.subr.bf16.mxu1 %v19153_v36  ;;  %v15195_v35 = vld [vmem:[%s20277_s28 + $0x143] sm:$0xff]  ;;  %v21492_v36 = vpack.c.bf16 %v15161_v46, %v15160_v47 }
 0x46d   : > { %7229 = vmatmul.mubr.bf16.gmra.mrb[20].mxu0 %v21420_v38  ;;  %8194 = vmatmul.mubr.bf16.gmra.mrb[20].mxu1 %v21420_v38  ;;  %v15208_v27 = vld [vmem:[%s20277_s28 + $0x65] sm:$0xff]  ;;  %v19214_v47 = vld [vmem:[%s20257_s26 + $0x4a0] ss:$16 sps:$4 sm:$0xff]  }
 0x46e   : > { %7238 = vmatprep.mubr.bf16.mxu0 %v5048_v58  ;;  %8203 = vmatprep.mubr.bf16.mxu1 %v5048_v58  ;;  %v5054_v58 = vpack.c.bf16 %v15195_v35, %v15194_v33  ;;  %v19217_v46 = vld [vmem:[%s20257_s26 + $0x4a8] ss:$16 sps:$4 sm:$0xff]   ;;  %v19222_v33 = vld [vmem:[%s20257_s26 + $0x4c4] ss:$16 sps:$4 sm:$0xff]   ;;  %v19225_v35 = vld [vmem:[%s20257_s26 + $0x4cc] ss:$16 sps:$4 sm:$0xff]  }
 0x46f   : > { %7360 = vmatpush1.bf16.msra.mxu0 %v19148_v42  ;;  %8325 = vmatpush1.bf16.msra.mxu1 %v19151_v40  ;;  %v15162_v42 = vld [vmem:[%s20277_s28 + $0x139] sm:$0xff]  ;;  %v15163_v40 = vld [vmem:[%s20277_s28 + $0x141] sm:$0xff] }
 0x470   : > { %7361 = vmatprep.subr.bf16.mxu0 %v19156_v44  ;;  %8326 = vmatprep.subr.bf16.mxu1 %v19159_v30  ;;  %v15197_v44 = vld [vmem:[%s20277_s28 + $0x15b] sm:$0xff]  ;;  %v21500_v30 = vpack.c.bf16 %v15163_v40, %v15162_v42  ;;  %v19228_v40 = vld [vmem:[%s20257_s26 + $0x4e4] ss:$16 sps:$4 sm:$0xff]  }
 0x471   : > { %v5055_v32 = vpack.c.bf16 %v15197_v44, %v15196_v18  ;;  %v19223_v42 = vld [vmem:[%s20257_s26 + $0x4c8] ss:$16 sps:$4 sm:$0xff]   ;;  %v19231_v18 = vld [vmem:[%s20257_s26 + $0x4ec] ss:$16 sps:$4 sm:$0xff]  }
 0x472   : > { %v15210_v44 = vld [vmem:[%s20277_s28 + $0x7d] sm:$0xff] }
 0x473   : > { %7362 = vmatpush1.bf16.msra.mxu0 %v19154_v21  ;;  %8327 = vmatpush1.bf16.msra.mxu1 %v19157_v49  ;;  %v15198_v21 = vld [vmem:[%s20277_s28 + $0x16b] sm:$0xff]  ;;  %v15199_v49 = vld [vmem:[%s20277_s28 + $0x173] sm:$0xff] }
 0x474   : > { %7363 = vmatprep.subr.bf16.mxu0 %v19162_v50  ;;  %8328 = vmatprep.subr.bf16.mxu1 %v19165_v26  ;;  %v21508_v50 = vpack.c.bf16 %v15165_v48, %v15164_v57  ;;  %v5056_v26 = vpack.c.bf16 %v15199_v49, %v15198_v21  ;;  %v19226_v57 = vld [vmem:[%s20257_s26 + $0x4e0] ss:$16 sps:$4 sm:$0xff]   ;;  %v19229_v48 = vld [vmem:[%s20257_s26 + $0x4e8] ss:$16 sps:$4 sm:$0xff]   ;;  %v19234_v21 = vld [vmem:[%s20257_s26 + $0x504] ss:$16 sps:$4 sm:$0xff]  }
 0x475   : > { %7239 = vmatmul.mubr.bf16.gmra.mrb[24].mxu0 %v21436_v52  ;;  %8204 = vmatmul.mubr.bf16.gmra.mrb[24].mxu1 %v21436_v52  ;;  %v19237_v49 = vld [vmem:[%s20257_s26 + $0x50c] ss:$16 sps:$4 sm:$0xff]  }
 0x476   : > { %7248 = vmatprep.mubr.bf16.mxu0 %v5049_v53  ;;  %8213 = vmatprep.mubr.bf16.mxu1 %v5049_v53  ;;  %v15166_v53 = vld [vmem:[%s20277_s28 + $0x169] sm:$0xff] }
 0x477   : > { %7364 = vmatpush1.bf16.msra.mxu0 %v19160_v28  ;;  %8329 = vmatpush1.bf16.msra.mxu1 %v19163_v23  ;;  %v15167_v28 = vld [vmem:[%s20277_s28 + $0x171] sm:$0xff]  ;;  %v15200_v23 = vld [vmem:[%s20277_s28 + $0x183] sm:$0xff] }
 0x478   : > { %7365 = vmatprep.subr.bf16.mxu0 %v19168_v56  ;;  %8330 = vmatprep.subr.bf16.mxu1 %v19171_v45  ;;  %v15201_v56 = vld [vmem:[%s20277_s28 + $0x18b] sm:$0xff]  ;;  %v21516_v22 = vpack.c.bf16 %v15167_v28, %v15166_v53  ;;  %v19240_v28 = vld [vmem:[%s20257_s26 + $0x524] ss:$16 sps:$4 sm:$0xff]  }
 0x479   : > { %v5057_v45 = vpack.c.bf16 %v15201_v56, %v15200_v23  ;;  %v19235_v53 = vld [vmem:[%s20257_s26 + $0x508] ss:$16 sps:$4 sm:$0xff]   ;;  %v19243_v23 = vld [vmem:[%s20257_s26 + $0x52c] ss:$16 sps:$4 sm:$0xff]  }
 0x47a   : > { %v15212_v56 = vld [vmem:[%s20277_s28 + $0x95] sm:$0xff] }
 0x47b   : > { %7366 = vmatpush1.bf16.msra.mxu0 %v19166_v39  ;;  %8331 = vmatpush1.bf16.msra.mxu1 %v19169_v61  ;;  %v15202_v39 = vld [vmem:[%s20277_s28 + $0x1d] sm:$0xff]  ;;  %v15203_v61 = vld [vmem:[%s20277_s28 + $0x25] sm:$0xff] }
 0x47c   : > { %7367 = vmatprep.subr.bf16.mxu0 %v19174_v60  ;;  %8332 = vmatprep.subr.bf16.mxu1 %v19177_v43  ;;  %v19184_v60 = vld [vmem:[%s20257_s26 + $0x400] ss:$16 sps:$4 sm:$0xff]   ;;  %v19187_v43 = vld [vmem:[%s20257_s26 + $0x408] ss:$16 sps:$4 sm:$0xff]  }
 0x47d   : > { %7249 = vmatmul.mubr.bf16.gmra.mrb[28].mxu0 %v21452_v62  ;;  %8214 = vmatmul.mubr.bf16.gmra.mrb[28].mxu1 %v21452_v62 }
 0x47e   : > { %7258 = vmatprep.mubr.bf16.mxu0 %v5050_v63  ;;  %8223 = vmatprep.mubr.bf16.mxu1 %v5050_v63  ;;  %v5090_v63 = vpack.c.bf16 %v15203_v61, %v15202_v39  ;;  %v19246_v39 = vld [vmem:[%s20257_s26 + $0x544] ss:$16 sps:$4 sm:$0xff]   ;;  %v19249_v61 = vld [vmem:[%s20257_s26 + $0x54c] ss:$16 sps:$4 sm:$0xff]  }
 0x47f   : > { %7368 = vmatpush1.bf16.msra.mxu0 %v19172_v0  ;;  %8333 = vmatpush1.bf16.msra.mxu1 %v19175_v2  ;;  %v19192_v0 = vld [vmem:[%s20257_s26 + $0x424] ss:$16 sps:$4 sm:$0xff]   ;;  %v19195_v2 = vld [vmem:[%s20257_s26 + $0x42c] ss:$16 sps:$4 sm:$0xff]  }
 0x480   : > { %7369 = vmatprep.subr.bf16.mxu0 %v19180_v4  ;;  %8334 = vmatprep.subr.bf16.mxu1 %v19183_v3  ;;  %v15204_v4 = vld [vmem:[%s20277_s28 + $0x35] sm:$0xff]  ;;  %v19190_v3 = vld [vmem:[%s20257_s26 + $0x420] ss:$16 sps:$4 sm:$0xff]  }
 0x481   : > { %v5091_v10 = vpack.c.bf16 %v15205_v1, %v15204_v4  ;;  %v15215_v4 = vld [vmem:[%s20277_s28 + $0xb5] sm:$0xff]  ;;  %v19250_v1 = vld [vmem:[%s20257_s26 + $0x560] ss:$16 sps:$4 sm:$0xff]  }
 0x483   : > { %7370 = vmatpush1.bf16.msra.mxu0 %v19178_v11  ;;  %8335 = vmatpush1.bf16.msra.mxu1 %v19181_v12  ;;  %v19196_v11 = vld [vmem:[%s20257_s26 + $0x440] ss:$16 sps:$4 sm:$0xff]   ;;  %v19199_v12 = vld [vmem:[%s20257_s26 + $0x448] ss:$16 sps:$4 sm:$0xff]  }
 0x484   : > { %7532 = vmatprep.subr.bf16.mxu0 %v19186_v13  ;;  %8497 = vmatprep.subr.bf16.mxu1 %v19189_v14  ;;  %v19204_v13 = vld [vmem:[%s20257_s26 + $0x464] ss:$16 sps:$4 sm:$0xff]   ;;  %v19207_v14 = vld [vmem:[%s20257_s26 + $0x46c] ss:$16 sps:$4 sm:$0xff]  }
 0x485   : > { %7259 = vmatmul.mubr.bf16.gmra.mrb[32].mxu0 %v21468_v17  ;;  %8224 = vmatmul.mubr.bf16.gmra.mrb[32].mxu1 %v21468_v17 }
 0x486   : > { %7268 = vmatprep.mubr.bf16.mxu0 %v5051_v20  ;;  %8233 = vmatprep.mubr.bf16.mxu1 %v5051_v20  ;;  %v15207_v20 = vld [vmem:[%s20277_s28 + $0x55] sm:$0xff] }
 0x48d   : > { %7269 = vmatmul.mubr.bf16.gmra.mrb[36].mxu0 %v21476_v19  ;;  %8234 = vmatmul.mubr.bf16.gmra.mrb[36].mxu1 %v21476_v19 }
 0x48e   : > { %7278 = vmatprep.mubr.bf16.mxu0 %v5052_v24  ;;  %8243 = vmatprep.mubr.bf16.mxu1 %v5052_v24 }
 0x495   : > { %7279 = vmatmul.mubr.bf16.gmra.mrb[40].mxu0 %v21484_v31  ;;  %8244 = vmatmul.mubr.bf16.gmra.mrb[40].mxu1 %v21484_v31 }
 0x496   : > { %7288 = vmatprep.mubr.bf16.mxu0 %v5053_v15  ;;  %8253 = vmatprep.mubr.bf16.mxu1 %v5053_v15  ;;  %v15209_v15 = vld [vmem:[%s20277_s28 + $0x6d] sm:$0xff] }
 0x49d   : > { %7289 = vmatmul.mubr.bf16.gmra.mrb[44].mxu0 %v21492_v36  ;;  %8254 = vmatmul.mubr.bf16.gmra.mrb[44].mxu1 %v21492_v36 }
 0x49e   : > { %7298 = vmatprep.mubr.bf16.mxu0 %v5054_v58  ;;  %8263 = vmatprep.mubr.bf16.mxu1 %v5054_v58  ;;  %v21570_v58 = vpack.c.bf16 %v15209_v15, %v15208_v27  ;;  %v19274_v27 = vld [vmem:[%s20257_s26 + $0x5e0] ss:$16 sps:$4 sm:$0xff]   ;;  %v19277_v15 = vld [vmem:[%s20257_s26 + $0x5e8] ss:$16 sps:$4 sm:$0xff]  }
 0x4a5   : > { %7299 = vmatmul.mubr.bf16.gmra.mrb[48].mxu0 %v21500_v30  ;;  %8264 = vmatmul.mubr.bf16.gmra.mrb[48].mxu1 %v21500_v30 }
 0x4a6   : > { %7308 = vmatprep.mubr.bf16.mxu0 %v5055_v32  ;;  %8273 = vmatprep.mubr.bf16.mxu1 %v5055_v32  ;;  %v15211_v32 = vld [vmem:[%s20277_s28 + $0x85] sm:$0xff] }
 0x4ad   : > { %7309 = vmatmul.mubr.bf16.gmra.mrb[52].mxu0 %v21508_v50  ;;  %8274 = vmatmul.mubr.bf16.gmra.mrb[52].mxu1 %v21508_v50 }
 0x4ae   : > { %7318 = vmatprep.mubr.bf16.mxu0 %v5056_v26  ;;  %8283 = vmatprep.mubr.bf16.mxu1 %v5056_v26  ;;  %v21586_v26 = vpack.c.bf16 %v15211_v32, %v15210_v44  ;;  %v15225_v44 = vld [vmem:[%s20277_s28 + $0x12d] sm:$0xff]  ;;  %v15226_v32 = vld [vmem:[%s20277_s28 + $0x13d] sm:$0xff] }
 0x4b5   : > { %7319 = vmatmul.mubr.bf16.gmra.mrb[56].mxu0 %v21516_v22  ;;  %8284 = vmatmul.mubr.bf16.gmra.mrb[56].mxu1 %v21516_v22 }
 0x4b6   : > { %7328 = vmatprep.mubr.bf16.mxu0 %v5057_v45  ;;  %8293 = vmatprep.mubr.bf16.mxu1 %v5057_v45  ;;  %v15213_v45 = vld [vmem:[%s20277_s28 + $0x9d] sm:$0xff] }
 0x4bd   : > { %7329 = vmatmul.mubr.bf16.gmra.mrb[60].mxu0 %v21522_v5  ;;  %8294 = vmatmul.mubr.bf16.gmra.mrb[60].mxu1 %v21522_v5 }
 0x4be   : > { %7371 = vmatprep.mubr.bf16.mxu0 %v21372_v59  ;;  %8336 = vmatprep.mubr.bf16.mxu1 %v21372_v59  ;;  %v19193_v59 = vld [vmem:[%s20257_s26 + $0x428] ss:$16 sps:$4 sm:$0xff]  }
 0x4c5   : > { %7372 = vmatmul.mubr.bf16.vlgmr.msra.gmra.mrb[0].mxu0 %v5090_v63  ;;  %8337 = vmatmul.mubr.bf16.vlgmr.msra.gmra.mrb[0].mxu1 %v5090_v63  ;;  %v19252_v63 = vld [vmem:[%s20257_s26 + $0x564] ss:$16 sps:$4 sm:$0xff]  }
 0x4c6   : > { %7533 = vmatpush1.bf16.msra.mxu0 %v19184_v60  ;;  %8498 = vmatpush1.bf16.msra.mxu1 %v19187_v43  ;;  %v21602_v60 = vpack.c.bf16 %v15213_v45, %v15212_v56  ;;  %v19247_v43 = vld [vmem:[%s20257_s26 + $0x548] ss:$16 sps:$4 sm:$0xff]  }
 0x4c7   : > { %7381 = vmatprep.mubr.bf16.mxu0 %v21388_v6  ;;  %8346 = vmatprep.mubr.bf16.mxu1 %v21388_v6  ;;  %v15206_v6 = vld [vmem:[%s20277_s28 + $0x4d] sm:$0xff] }
 0x4c8   : > { %7534 = vmatprep.subr.bf16.mxu0 %v19192_v0  ;;  %8499 = vmatprep.subr.bf16.mxu1 %v19195_v2  ;;  %v21554_v24 = vpack.c.bf16 %v15207_v20, %v15206_v6  ;;  %v19255_v0 = vld [vmem:[%s20257_s26 + $0x56c] ss:$16 sps:$4 sm:$0xff]   ;;  %v19262_v6 = vld [vmem:[%s20257_s26 + $0x5a0] ss:$16 sps:$4 sm:$0xff]   ;;  %v19265_v20 = vld [vmem:[%s20257_s26 + $0x5a8] ss:$16 sps:$4 sm:$0xff]  }
 0x4c9   : > { %v15214_v2 = vld [vmem:[%s20277_s28 + $0xad] sm:$0xff] }
 0x4ca   : > { %7535 = vmatpush1.bf16.msra.mxu0 %v19190_v3  ;;  %8500 = vmatpush1.bf16.msra.mxu1 %v19193_v59  ;;  %v19253_v3 = vld [vmem:[%s20257_s26 + $0x568] ss:$16 sps:$4 sm:$0xff]   ;;  %v19258_v59 = vld [vmem:[%s20257_s26 + $0x584] ss:$16 sps:$4 sm:$0xff]  }
 0x4cb   : > { %7536 = vmatprep.subr.bf16.mxu0 %v19198_v7  ;;  %8501 = vmatprep.subr.bf16.mxu1 %v19201_v8  ;;  %v19261_v7 = vld [vmem:[%s20257_s26 + $0x58c] ss:$16 sps:$4 sm:$0xff]   ;;  %v21618_v8 = vpack.c.bf16 %v15215_v4, %v15214_v2  ;;  %v15264_v56 = vld [vmem:[%s20277_s28 + $0x1b1] sm:$0xff] }
 0x4cc   : > { %v19283_v2 = vld [vmem:[%s20257_s26 + $0x608] ss:$16 sps:$4 sm:$0xff]   ;;  %v19288_v4 = vld [vmem:[%s20257_s26 + $0x624] ss:$16 sps:$4 sm:$0xff]  }
 0x4cd   : > { %7382 = vmatmul.mubr.bf16.gmra.mrb[4].mxu0 %v5091_v10  ;;  %8347 = vmatmul.mubr.bf16.gmra.mrb[4].mxu1 %v5091_v10  ;;  %v19259_v10 = vld [vmem:[%s20257_s26 + $0x588] ss:$16 sps:$4 sm:$0xff]  }
 0x4ce   : > { %7391 = vmatprep.mubr.bf16.mxu0 %v21404_v55  ;;  %8356 = vmatprep.mubr.bf16.mxu1 %v21404_v55  ;;  %v19208_v55 = vld [vmem:[%s20257_s26 + $0x480] ss:$16 sps:$4 sm:$0xff]  }
 0x4cf   : > { %7537 = vmatpush1.bf16.msra.mxu0 %v19196_v11  ;;  %8502 = vmatpush1.bf16.msra.mxu1 %v19199_v12  ;;  %v19264_v11 = vld [vmem:[%s20257_s26 + $0x5a4] ss:$16 sps:$4 sm:$0xff]   ;;  %v19267_v12 = vld [vmem:[%s20257_s26 + $0x5ac] ss:$16 sps:$4 sm:$0xff]  }
 0x4d0   : > { %7538 = vmatprep.subr.bf16.mxu0 %v19204_v13  ;;  %8503 = vmatprep.subr.bf16.mxu1 %v19207_v14  ;;  %v15216_v13 = vld [vmem:[%s20277_s28 + $0xc5] sm:$0xff]  ;;  %v15217_v14 = vld [vmem:[%s20277_s28 + $0xcd] sm:$0xff] }
 0x4d3   : > { %7539 = vmatpush1.bf16.msra.mxu0 %v19202_v29  ;;  %8504 = vmatpush1.bf16.msra.mxu1 %v19205_v54  ;;  %v19270_v29 = vld [vmem:[%s20257_s26 + $0x5c4] ss:$16 sps:$4 sm:$0xff]   ;;  %v19273_v54 = vld [vmem:[%s20257_s26 + $0x5cc] ss:$16 sps:$4 sm:$0xff]  }
 0x4d4   : > { %7540 = vmatprep.subr.bf16.mxu0 %v19210_v34  ;;  %8505 = vmatprep.subr.bf16.mxu1 %v19213_v41  ;;  %v21634_v34 = vpack.c.bf16 %v15217_v14, %v15216_v13  ;;  %v19271_v41 = vld [vmem:[%s20257_s26 + $0x5c8] ss:$16 sps:$4 sm:$0xff]   ;;  %v19300_v14 = vld [vmem:[%s20257_s26 + $0x664] ss:$16 sps:$4 sm:$0xff]  }
 0x4d5   : > { %7392 = vmatmul.mubr.bf16.gmra.mrb[8].mxu0 %v21554_v24  ;;  %8357 = vmatmul.mubr.bf16.gmra.mrb[8].mxu1 %v21554_v24  ;;  %v19295_v13 = vld [vmem:[%s20257_s26 + $0x648] ss:$16 sps:$4 sm:$0xff]  }
 0x4d6   : > { %7401 = vmatprep.mubr.bf16.mxu0 %v21420_v38  ;;  %8366 = vmatprep.mubr.bf16.mxu1 %v21420_v38  ;;  %v19220_v38 = vld [vmem:[%s20257_s26 + $0x4c0] ss:$16 sps:$4 sm:$0xff]  }
 0x4d7   : > { %7541 = vmatpush1.bf16.msra.mxu0 %v19208_v55  ;;  %8506 = vmatpush1.bf16.msra.mxu1 %v19211_v9  ;;  %v19276_v55 = vld [vmem:[%s20257_s26 + $0x5e4] ss:$16 sps:$4 sm:$0xff]   ;;  %v19279_v9 = vld [vmem:[%s20257_s26 + $0x5ec] ss:$16 sps:$4 sm:$0xff]  }
 0x4d8   : > { %7542 = vmatprep.subr.bf16.mxu0 %v19216_v25  ;;  %8507 = vmatprep.subr.bf16.mxu1 %v19219_v16  ;;  %v15218_v25 = vld [vmem:[%s20277_s28 + $0xdd] sm:$0xff]  ;;  %v15219_v16 = vld [vmem:[%s20277_s28 + $0xe5] sm:$0xff] }
 0x4db   : > { %7543 = vmatpush1.bf16.msra.mxu0 %v19214_v47  ;;  %8508 = vmatpush1.bf16.msra.mxu1 %v19217_v46  ;;  %v19282_v47 = vld [vmem:[%s20257_s26 + $0x604] ss:$16 sps:$4 sm:$0xff]   ;;  %v19285_v46 = vld [vmem:[%s20257_s26 + $0x60c] ss:$16 sps:$4 sm:$0xff]  }
 0x4dc   : > { %7544 = vmatprep.subr.bf16.mxu0 %v19222_v33  ;;  %8509 = vmatprep.subr.bf16.mxu1 %v19225_v35  ;;  %v21650_v33 = vpack.c.bf16 %v15219_v16, %v15218_v25  ;;  %v15221_v35 = vld [vmem:[%s20277_s28 + $0xfd] sm:$0xff] }
 0x4dd   : > { %7402 = vmatmul.mubr.bf16.gmra.mrb[12].mxu0 %v21570_v58  ;;  %8367 = vmatmul.mubr.bf16.gmra.mrb[12].mxu1 %v21570_v58  ;;  %v19312_v25 = vld [vmem:[%s20257_s26 + $0x6a4] ss:$16 sps:$4 sm:$0xff]   ;;  %v19315_v16 = vld [vmem:[%s20257_s26 + $0x6ac] ss:$16 sps:$4 sm:$0xff]  }
 0x4de   : > { %7411 = vmatprep.mubr.bf16.mxu0 %v21436_v52  ;;  %8376 = vmatprep.mubr.bf16.mxu1 %v21436_v52  ;;  %v19232_v52 = vld [vmem:[%s20257_s26 + $0x500] ss:$16 sps:$4 sm:$0xff]  }
 0x4df   : > { %7545 = vmatpush1.bf16.msra.mxu0 %v19220_v38  ;;  %8510 = vmatpush1.bf16.msra.mxu1 %v19223_v42  ;;  %v15222_v42 = vld [vmem:[%s20277_s28 + $0x10d] sm:$0xff] }
 0x4e0   : > { %7546 = vmatprep.subr.bf16.mxu0 %v19228_v40  ;;  %8511 = vmatprep.subr.bf16.mxu1 %v19231_v18  ;;  %v15223_v40 = vld [vmem:[%s20277_s28 + $0x115] sm:$0xff] }
 0x4e1   : > { %v21666_v18 = vpack.c.bf16 %v15223_v40, %v15222_v42  ;;  %v19319_v40 = vld [vmem:[%s20257_s26 + $0x6c8] ss:$16 sps:$4 sm:$0xff]  }
 0x4e3   : > { %7547 = vmatpush1.bf16.msra.mxu0 %v19226_v57  ;;  %8512 = vmatpush1.bf16.msra.mxu1 %v19229_v48  ;;  %v15227_v57 = vld [vmem:[%s20277_s28 + $0x145] sm:$0xff] }
 0x4e4   : > { %7548 = vmatprep.subr.bf16.mxu0 %v19234_v21  ;;  %8513 = vmatprep.subr.bf16.mxu1 %v19237_v49  ;;  %v21682_v48 = vpack.c.bf16 %v15227_v57, %v15226_v32  ;;  %v15229_v21 = vld [vmem:[%s20277_s28 + $0x15d] sm:$0xff]  ;;  %v15274_v32 = vld [vmem:[%s20277_s28 + $0xab] sm:$0xff]  ;;  %v15275_v57 = vld [vmem:[%s20277_s28 + $0xb3] sm:$0xff] }
 0x4e5   : > { %7412 = vmatmul.mubr.bf16.gmra.mrb[16].mxu0 %v21586_v26  ;;  %8377 = vmatmul.mubr.bf16.gmra.mrb[16].mxu1 %v21586_v26  ;;  %v15262_v49 = vld [vmem:[%s20277_s28 + $0x199] sm:$0xff] }
 0x4e6   : > { %7421 = vmatprep.mubr.bf16.mxu0 %v21452_v62  ;;  %8386 = vmatprep.mubr.bf16.mxu1 %v21452_v62  ;;  %v19244_v62 = vld [vmem:[%s20257_s26 + $0x540] ss:$16 sps:$4 sm:$0xff]  }
 0x4e7   : > { %7549 = vmatpush1.bf16.msra.mxu0 %v19232_v52  ;;  %8514 = vmatpush1.bf16.msra.mxu1 %v19235_v53 }
 0x4e8   : > { %7550 = vmatprep.subr.bf16.mxu0 %v19240_v28  ;;  %8515 = vmatprep.subr.bf16.mxu1 %v19243_v23  ;;  %v15230_v28 = vld [vmem:[%s20277_s28 + $0x16d] sm:$0xff]  ;;  %v15231_v23 = vld [vmem:[%s20277_s28 + $0x175] sm:$0xff] }
 0x4e9   : > { %v21700_v45 = vpack.c.bf16 %v15231_v23, %v15230_v28  ;;  %v19331_v28 = vld [vmem:[%s20257_s26 + $0x708] ss:$16 sps:$4 sm:$0xff]   ;;  %v19336_v23 = vld [vmem:[%s20257_s26 + $0x724] ss:$16 sps:$4 sm:$0xff]  }
 0x4eb   : > { %7551 = vmatpush1.bf16.msra.mxu0 %v19238_v51  ;;  %8516 = vmatpush1.bf16.msra.mxu1 %v19241_v37  ;;  %v15232_v37 = vld [vmem:[%s20277_s28 + $0x185] sm:$0xff] }
 0x4ec   : > { %7552 = vmatprep.subr.bf16.mxu0 %v19246_v39  ;;  %8517 = vmatprep.subr.bf16.mxu1 %v19249_v61  ;;  %v15233_v39 = vld [vmem:[%s20277_s28 + $0x18d] sm:$0xff] }
 0x4ed   : > { %7422 = vmatmul.mubr.bf16.gmra.mrb[20].mxu0 %v21602_v60  ;;  %8387 = vmatmul.mubr.bf16.gmra.mrb[20].mxu1 %v21602_v60  ;;  %v21706_v61 = vpack.c.bf16 %v15233_v39, %v15232_v37  ;;  %v19334_v37 = vld [vmem:[%s20257_s26 + $0x720] ss:$16 sps:$4 sm:$0xff]   ;;  %v19337_v39 = vld [vmem:[%s20257_s26 + $0x728] ss:$16 sps:$4 sm:$0xff]  }
 0x4ee   : > { %7431 = vmatprep.mubr.bf16.mxu0 %v21468_v17  ;;  %8396 = vmatprep.mubr.bf16.mxu1 %v21468_v17  ;;  %v19256_v17 = vld [vmem:[%s20257_s26 + $0x580] ss:$16 sps:$4 sm:$0xff]  }
 0x4ef   : > { %7553 = vmatpush1.bf16.msra.mxu0 %v19244_v62  ;;  %8518 = vmatpush1.bf16.msra.mxu1 %v19247_v43  ;;  %v15266_v62 = vld [vmem:[%s20277_s28 + $0x4b] sm:$0xff]  ;;  %v15267_v43 = vld [vmem:[%s20277_s28 + $0x53] sm:$0xff] }
 0x4f0   : > { %7554 = vmatprep.subr.bf16.mxu0 %v19252_v63  ;;  %8519 = vmatprep.subr.bf16.mxu1 %v19255_v0  ;;  %v5187_v63 = vpack.c.bf16 %v15267_v43, %v15266_v62  ;;  %v19280_v0 = vld [vmem:[%s20257_s26 + $0x600] ss:$16 sps:$4 sm:$0xff]   ;;  %v19342_v62 = vld [vmem:[%s20257_s26 + $0x744] ss:$16 sps:$4 sm:$0xff]   ;;  %v19345_v43 = vld [vmem:[%s20257_s26 + $0x74c] ss:$16 sps:$4 sm:$0xff]  }
 0x4f3   : > { %7555 = vmatpush1.bf16.msra.mxu0 %v19250_v1  ;;  %8520 = vmatpush1.bf16.msra.mxu1 %v19253_v3  ;;  %v19291_v1 = vld [vmem:[%s20257_s26 + $0x62c] ss:$16 sps:$4 sm:$0xff]   ;;  %v15268_v3 = vld [vmem:[%s20277_s28 + $0x63] sm:$0xff] }
 0x4f4   : > { %7556 = vmatprep.subr.bf16.mxu0 %v19258_v59  ;;  %8521 = vmatprep.subr.bf16.mxu1 %v19261_v7  ;;  %v15269_v59 = vld [vmem:[%s20277_s28 + $0x6b] sm:$0xff] }
 0x4f5   : > { %7432 = vmatmul.mubr.bf16.gmra.mrb[24].mxu0 %v21618_v8  ;;  %8397 = vmatmul.mubr.bf16.gmra.mrb[24].mxu1 %v21618_v8  ;;  %v19286_v7 = vld [vmem:[%s20257_s26 + $0x620] ss:$16 sps:$4 sm:$0xff]  }
 0x4f6   : > { %7441 = vmatprep.mubr.bf16.mxu0 %v21476_v19  ;;  %8406 = vmatprep.mubr.bf16.mxu1 %v21476_v19  ;;  %v19268_v19 = vld [vmem:[%s20257_s26 + $0x5c0] ss:$16 sps:$4 sm:$0xff]  }
 0x4f7   : > { %7557 = vmatpush1.bf16.msra.mxu0 %v19256_v17  ;;  %8522 = vmatpush1.bf16.msra.mxu1 %v19259_v10  ;;  %v19294_v17 = vld [vmem:[%s20257_s26 + $0x644] ss:$16 sps:$4 sm:$0xff]   ;;  %v19297_v10 = vld [vmem:[%s20257_s26 + $0x64c] ss:$16 sps:$4 sm:$0xff]  }
 0x4f8   : > { %7558 = vmatprep.subr.bf16.mxu0 %v19264_v11  ;;  %8523 = vmatprep.subr.bf16.mxu1 %v19267_v12  ;;  %v5188_v11 = vpack.c.bf16 %v15269_v59, %v15268_v3  ;;  %v19292_v12 = vld [vmem:[%s20257_s26 + $0x640] ss:$16 sps:$4 sm:$0xff]  }
 0x4f9   : > { %v15279_v3 = vld [vmem:[%s20277_s28 + $0xe3] sm:$0xff] }
 0x4fa   : > { %v19346_v59 = vld [vmem:[%s20257_s26 + $0x760] ss:$16 sps:$4 sm:$0xff]  }
 0x4fb   : > { %7559 = vmatpush1.bf16.msra.mxu0 %v19262_v6  ;;  %8524 = vmatpush1.bf16.msra.mxu1 %v19265_v20  ;;  %v19303_v6 = vld [vmem:[%s20257_s26 + $0x66c] ss:$16 sps:$4 sm:$0xff]   ;;  %v15271_v20 = vld [vmem:[%s20277_s28 + $0x83] sm:$0xff] }
 0x4fc   : > { %7560 = vmatprep.subr.bf16.mxu0 %v19270_v29  ;;  %8525 = vmatprep.subr.bf16.mxu1 %v19273_v54  ;;  %v19298_v29 = vld [vmem:[%s20257_s26 + $0x660] ss:$16 sps:$4 sm:$0xff]   ;;  %v19301_v54 = vld [vmem:[%s20257_s26 + $0x668] ss:$16 sps:$4 sm:$0xff]  }
 0x4fd   : > { %7442 = vmatmul.mubr.bf16.gmra.mrb[28].mxu0 %v21634_v34  ;;  %8407 = vmatmul.mubr.bf16.gmra.mrb[28].mxu1 %v21634_v34 }
 0x4fe   : > { %7451 = vmatprep.mubr.bf16.mxu0 %v21484_v31  ;;  %8416 = vmatprep.mubr.bf16.mxu1 %v21484_v31  ;;  %v15220_v31 = vld [vmem:[%s20277_s28 + $0xf5] sm:$0xff] }
 0x4ff   : > { %7561 = vmatpush1.bf16.msra.mxu0 %v19268_v19  ;;  %8526 = vmatpush1.bf16.msra.mxu1 %v19271_v41  ;;  %v21658_v38 = vpack.c.bf16 %v15221_v35, %v15220_v31  ;;  %v19306_v19 = vld [vmem:[%s20257_s26 + $0x684] ss:$16 sps:$4 sm:$0xff]   ;;  %v19309_v41 = vld [vmem:[%s20257_s26 + $0x68c] ss:$16 sps:$4 sm:$0xff]  }
 0x500   : > { %7562 = vmatprep.subr.bf16.mxu0 %v19276_v55  ;;  %8527 = vmatprep.subr.bf16.mxu1 %v19279_v9  ;;  %v19307_v9 = vld [vmem:[%s20257_s26 + $0x688] ss:$16 sps:$4 sm:$0xff]   ;;  %v19318_v31 = vld [vmem:[%s20257_s26 + $0x6c4] ss:$16 sps:$4 sm:$0xff]   ;;  %v19321_v35 = vld [vmem:[%s20257_s26 + $0x6cc] ss:$16 sps:$4 sm:$0xff]  }
 0x503   : > { %7563 = vmatpush1.bf16.msra.mxu0 %v19274_v27  ;;  %8528 = vmatpush1.bf16.msra.mxu1 %v19277_v15  ;;  %v15272_v27 = vld [vmem:[%s20277_s28 + $0x93] sm:$0xff]  ;;  %v15273_v15 = vld [vmem:[%s20277_s28 + $0x9b] sm:$0xff] }
 0x504   : > { %7725 = vmatprep.subr.bf16.mxu0 %v19282_v47  ;;  %8690 = vmatprep.subr.bf16.mxu1 %v19285_v46  ;;  %v19310_v47 = vld [vmem:[%s20257_s26 + $0x6a0] ss:$16 sps:$4 sm:$0xff]   ;;  %v19313_v46 = vld [vmem:[%s20257_s26 + $0x6a8] ss:$16 sps:$4 sm:$0xff]   ;;  %v21754_v42 = vpack.c.bf16 %v15273_v15, %v15272_v27 }
 0x505   : > { %7452 = vmatmul.mubr.bf16.gmra.mrb[32].mxu0 %v21650_v33  ;;  %8417 = vmatmul.mubr.bf16.gmra.mrb[32].mxu1 %v21650_v33  ;;  %v19370_v27 = vld [vmem:[%s20257_s26 + $0x7e0] ss:$16 sps:$4 sm:$0xff]   ;;  %v19373_v15 = vld [vmem:[%s20257_s26 + $0x7e8] ss:$16 sps:$4 sm:$0xff]  }
 0x506   : > { %7461 = vmatprep.mubr.bf16.mxu0 %v21492_v36  ;;  %8426 = vmatprep.mubr.bf16.mxu1 %v21492_v36  ;;  %v15224_v36 = vld [vmem:[%s20277_s28 + $0x125] sm:$0xff] }
 0x50d   : > { %7462 = vmatmul.mubr.bf16.gmra.mrb[36].mxu0 %v21658_v38  ;;  %8427 = vmatmul.mubr.bf16.gmra.mrb[36].mxu1 %v21658_v38 }
 0x50e   : > { %7471 = vmatprep.mubr.bf16.mxu0 %v21500_v30  ;;  %8436 = vmatprep.mubr.bf16.mxu1 %v21500_v30  ;;  %v21674_v30 = vpack.c.bf16 %v15225_v44, %v15224_v36  ;;  %v19324_v36 = vld [vmem:[%s20257_s26 + $0x6e4] ss:$16 sps:$4 sm:$0xff]   ;;  %v19327_v44 = vld [vmem:[%s20257_s26 + $0x6ec] ss:$16 sps:$4 sm:$0xff]  }
 0x515   : > { %7472 = vmatmul.mubr.bf16.gmra.mrb[40].mxu0 %v21666_v18  ;;  %8437 = vmatmul.mubr.bf16.gmra.mrb[40].mxu1 %v21666_v18 }
 0x516   : > { %7481 = vmatprep.mubr.bf16.mxu0 %v21508_v50  ;;  %8446 = vmatprep.mubr.bf16.mxu1 %v21508_v50  ;;  %v15228_v50 = vld [vmem:[%s20277_s28 + $0x155] sm:$0xff] }
 0x517   : > { %v21692_v52 = vpack.c.bf16 %v15229_v21, %v15228_v50  ;;  %v19322_v50 = vld [vmem:[%s20257_s26 + $0x6e0] ss:$16 sps:$4 sm:$0xff]   ;;  %v19325_v21 = vld [vmem:[%s20257_s26 + $0x6e8] ss:$16 sps:$4 sm:$0xff]  }
 0x51d   : > { %7482 = vmatmul.mubr.bf16.gmra.mrb[44].mxu0 %v21674_v30  ;;  %8447 = vmatmul.mubr.bf16.gmra.mrb[44].mxu1 %v21674_v30 }
 0x51e   : > { %7491 = vmatprep.mubr.bf16.mxu0 %v21516_v22  ;;  %8456 = vmatprep.mubr.bf16.mxu1 %v21516_v22  ;;  %v15263_v22 = vld [vmem:[%s20277_s28 + $0x1a1] sm:$0xff] }
 0x51f   : > { %v5153_v53 = vpack.c.bf16 %v15263_v22, %v15262_v49  ;;  %v19330_v49 = vld [vmem:[%s20257_s26 + $0x704] ss:$16 sps:$4 sm:$0xff]   ;;  %v19333_v22 = vld [vmem:[%s20257_s26 + $0x70c] ss:$16 sps:$4 sm:$0xff]  }
 0x525   : > { %7492 = vmatmul.mubr.bf16.gmra.mrb[48].mxu0 %v21682_v48  ;;  %8457 = vmatmul.mubr.bf16.gmra.mrb[48].mxu1 %v21682_v48 }
 0x526   : > { %7501 = vmatprep.mubr.bf16.mxu0 %v21522_v5  ;;  %8466 = vmatprep.mubr.bf16.mxu1 %v21522_v5  ;;  %v15265_v5 = vld [vmem:[%s20277_s28 + $0x1b9] sm:$0xff] }
 0x527   : > { %v5154_v51 = vpack.c.bf16 %v15265_v5, %v15264_v56  ;;  %v19339_v56 = vld [vmem:[%s20257_s26 + $0x72c] ss:$16 sps:$4 sm:$0xff]   ;;  %v15276_v5 = vld [vmem:[%s20277_s28 + $0xc3] sm:$0xff] }
 0x52d   : > { %7502 = vmatmul.mubr.bf16.gmra.mrb[52].mxu0 %v21692_v52  ;;  %8467 = vmatmul.mubr.bf16.gmra.mrb[52].mxu1 %v21692_v52 }
 0x52e   : > { %7511 = vmatprep.mubr.bf16.mxu0 %v5153_v53  ;;  %8476 = vmatprep.mubr.bf16.mxu1 %v5153_v53  ;;  %v21770_v53 = vpack.c.bf16 %v15275_v57, %v15274_v32  ;;  %v15289_v32 = vld [vmem:[%s20277_s28 + $0x15b] sm:$0xff]  ;;  %v15290_v57 = vld [vmem:[%s20277_s28 + $0x16b] sm:$0xff] }
 0x535   : > { %7512 = vmatmul.mubr.bf16.gmra.mrb[56].mxu0 %v21700_v45  ;;  %8477 = vmatmul.mubr.bf16.gmra.mrb[56].mxu1 %v21700_v45 }
 0x536   : > { %7521 = vmatprep.mubr.bf16.mxu0 %v5154_v51  ;;  %8486 = vmatprep.mubr.bf16.mxu1 %v5154_v51  ;;  %v15277_v51 = vld [vmem:[%s20277_s28 + $0xcb] sm:$0xff] }
 0x53d   : > { %7522 = vmatmul.mubr.bf16.gmra.mrb[60].mxu0 %v21706_v61  ;;  %8487 = vmatmul.mubr.bf16.gmra.mrb[60].mxu1 %v21706_v61 }
 0x53e   : > { %7564 = vmatprep.mubr.bf16.mxu0 %v21554_v24  ;;  %8529 = vmatprep.mubr.bf16.mxu1 %v21554_v24  ;;  %v19289_v24 = vld [vmem:[%s20257_s26 + $0x628] ss:$16 sps:$4 sm:$0xff]  }
 0x545   : > { %7565 = vmatmul.mubr.bf16.vlgmr.msra.gmra.mrb[0].mxu0 %v5187_v63  ;;  %8530 = vmatmul.mubr.bf16.vlgmr.msra.gmra.mrb[0].mxu1 %v5187_v63  ;;  %v21786_v63 = vpack.c.bf16 %v15277_v51, %v15276_v5  ;;  %v15329_v5 = vld [vmem:[%s20277_s28 + $0x1bd] sm:$0xff] }
 0x546   : > { %7726 = vmatpush1.bf16.msra.mxu0 %v19280_v0  ;;  %8691 = vmatpush1.bf16.msra.mxu1 %v19283_v2  ;;  %v19343_v0 = vld [vmem:[%s20257_s26 + $0x748] ss:$16 sps:$4 sm:$0xff]   ;;  %v19348_v2 = vld [vmem:[%s20257_s26 + $0x764] ss:$16 sps:$4 sm:$0xff]  }
 0x547   : > { %7574 = vmatprep.mubr.bf16.mxu0 %v21570_v58  ;;  %8539 = vmatprep.mubr.bf16.mxu1 %v21570_v58  ;;  %v15270_v58 = vld [vmem:[%s20277_s28 + $0x7b] sm:$0xff] }
 0x548   : > { %7727 = vmatprep.subr.bf16.mxu0 %v19288_v4  ;;  %8692 = vmatprep.subr.bf16.mxu1 %v19291_v1  ;;  %v21738_v55 = vpack.c.bf16 %v15271_v20, %v15270_v58  ;;  %v19351_v4 = vld [vmem:[%s20257_s26 + $0x76c] ss:$16 sps:$4 sm:$0xff]   ;;  %v19358_v58 = vld [vmem:[%s20257_s26 + $0x7a0] ss:$16 sps:$4 sm:$0xff]   ;;  %v19361_v20 = vld [vmem:[%s20257_s26 + $0x7a8] ss:$16 sps:$4 sm:$0xff]  }
 0x549   : > { %v15278_v1 = vld [vmem:[%s20277_s28 + $0xdb] sm:$0xff] }
 0x54a   : > { %7728 = vmatpush1.bf16.msra.mxu0 %v19286_v7  ;;  %8693 = vmatpush1.bf16.msra.mxu1 %v19289_v24  ;;  %v19349_v7 = vld [vmem:[%s20257_s26 + $0x768] ss:$16 sps:$4 sm:$0xff]   ;;  %v19354_v24 = vld [vmem:[%s20257_s26 + $0x784] ss:$16 sps:$4 sm:$0xff]  }
 0x54b   : > { %7729 = vmatprep.subr.bf16.mxu0 %v19294_v17  ;;  %8694 = vmatprep.subr.bf16.mxu1 %v19297_v10  ;;  %v19357_v17 = vld [vmem:[%s20257_s26 + $0x78c] ss:$16 sps:$4 sm:$0xff]   ;;  %v21802_v10 = vpack.c.bf16 %v15279_v3, %v15278_v1  ;;  %v19379_v1 = vld [vmem:[%s20257_s26 + $0x808] ss:$16 sps:$4 sm:$0xff]   ;;  %v19384_v3 = vld [vmem:[%s20257_s26 + $0x824] ss:$16 sps:$4 sm:$0xff]  }
 0x54d   : > { %7575 = vmatmul.mubr.bf16.gmra.mrb[4].mxu0 %v5188_v11  ;;  %8540 = vmatmul.mubr.bf16.gmra.mrb[4].mxu1 %v5188_v11  ;;  %v19355_v11 = vld [vmem:[%s20257_s26 + $0x788] ss:$16 sps:$4 sm:$0xff]  }
 0x54e   : > { %7584 = vmatprep.mubr.bf16.mxu0 %v21586_v26  ;;  %8549 = vmatprep.mubr.bf16.mxu1 %v21586_v26  ;;  %v19304_v26 = vld [vmem:[%s20257_s26 + $0x680] ss:$16 sps:$4 sm:$0xff]  }
 0x54f   : > { %7730 = vmatpush1.bf16.msra.mxu0 %v19292_v12  ;;  %8695 = vmatpush1.bf16.msra.mxu1 %v19295_v13  ;;  %v19360_v12 = vld [vmem:[%s20257_s26 + $0x7a4] ss:$16 sps:$4 sm:$0xff]   ;;  %v19363_v13 = vld [vmem:[%s20257_s26 + $0x7ac] ss:$16 sps:$4 sm:$0xff]  }
 0x550   : > { %7731 = vmatprep.subr.bf16.mxu0 %v19300_v14  ;;  %8696 = vmatprep.subr.bf16.mxu1 %v19303_v6  ;;  %v15280_v14 = vld [vmem:[%s20277_s28 + $0xf3] sm:$0xff]  ;;  %v15281_v6 = vld [vmem:[%s20277_s28 + $0xfb] sm:$0xff] }
 0x553   : > { %7732 = vmatpush1.bf16.msra.mxu0 %v19298_v29  ;;  %8697 = vmatpush1.bf16.msra.mxu1 %v19301_v54  ;;  %v19366_v29 = vld [vmem:[%s20257_s26 + $0x7c4] ss:$16 sps:$4 sm:$0xff]   ;;  %v19369_v54 = vld [vmem:[%s20257_s26 + $0x7cc] ss:$16 sps:$4 sm:$0xff]  }
 0x554   : > { %7733 = vmatprep.subr.bf16.mxu0 %v19306_v19  ;;  %8698 = vmatprep.subr.bf16.mxu1 %v19309_v41  ;;  %v21818_v19 = vpack.c.bf16 %v15281_v6, %v15280_v14  ;;  %v19367_v41 = vld [vmem:[%s20257_s26 + $0x7c8] ss:$16 sps:$4 sm:$0xff]   ;;  %v19396_v6 = vld [vmem:[%s20257_s26 + $0x864] ss:$16 sps:$4 sm:$0xff]  }
 0x555   : > { %7585 = vmatmul.mubr.bf16.gmra.mrb[8].mxu0 %v21738_v55  ;;  %8550 = vmatmul.mubr.bf16.gmra.mrb[8].mxu1 %v21738_v55  ;;  %v19391_v14 = vld [vmem:[%s20257_s26 + $0x848] ss:$16 sps:$4 sm:$0xff]  }
 0x556   : > { %7594 = vmatprep.mubr.bf16.mxu0 %v21602_v60  ;;  %8559 = vmatprep.mubr.bf16.mxu1 %v21602_v60  ;;  %v19316_v60 = vld [vmem:[%s20257_s26 + $0x6c0] ss:$16 sps:$4 sm:$0xff]  }
 0x557   : > { %7734 = vmatpush1.bf16.msra.mxu0 %v19304_v26  ;;  %8699 = vmatpush1.bf16.msra.mxu1 %v19307_v9  ;;  %v19372_v26 = vld [vmem:[%s20257_s26 + $0x7e4] ss:$16 sps:$4 sm:$0xff]   ;;  %v19375_v9 = vld [vmem:[%s20257_s26 + $0x7ec] ss:$16 sps:$4 sm:$0xff]  }
 0x558   : > { %7735 = vmatprep.subr.bf16.mxu0 %v19312_v25  ;;  %8700 = vmatprep.subr.bf16.mxu1 %v19315_v16  ;;  %v15282_v25 = vld [vmem:[%s20277_s28 + $0x10b] sm:$0xff]  ;;  %v15283_v16 = vld [vmem:[%s20277_s28 + $0x113] sm:$0xff] }
 0x55b   : > { %7736 = vmatpush1.bf16.msra.mxu0 %v19310_v47  ;;  %8701 = vmatpush1.bf16.msra.mxu1 %v19313_v46  ;;  %v19378_v47 = vld [vmem:[%s20257_s26 + $0x804] ss:$16 sps:$4 sm:$0xff]   ;;  %v19381_v46 = vld [vmem:[%s20257_s26 + $0x80c] ss:$16 sps:$4 sm:$0xff]  }
 0x55c   : > { %7737 = vmatprep.subr.bf16.mxu0 %v19318_v31  ;;  %8702 = vmatprep.subr.bf16.mxu1 %v19321_v35  ;;  %v21834_v31 = vpack.c.bf16 %v15283_v16, %v15282_v25  ;;  %v15285_v35 = vld [vmem:[%s20277_s28 + $0x12b] sm:$0xff]  ;;  %v19408_v25 = vld [vmem:[%s20257_s26 + $0x8a4] ss:$16 sps:$4 sm:$0xff]  }
 0x55d   : > { %7595 = vmatmul.mubr.bf16.gmra.mrb[12].mxu0 %v21754_v42  ;;  %8560 = vmatmul.mubr.bf16.gmra.mrb[12].mxu1 %v21754_v42  ;;  %v19411_v16 = vld [vmem:[%s20257_s26 + $0x8ac] ss:$16 sps:$4 sm:$0xff]  }
 0x55e   : > { %7604 = vmatprep.mubr.bf16.mxu0 %v21618_v8  ;;  %8569 = vmatprep.mubr.bf16.mxu1 %v21618_v8  ;;  %v19328_v8 = vld [vmem:[%s20257_s26 + $0x700] ss:$16 sps:$4 sm:$0xff]  }
 0x55f   : > { %7738 = vmatpush1.bf16.msra.mxu0 %v19316_v60  ;;  %8703 = vmatpush1.bf16.msra.mxu1 %v19319_v40  ;;  %v15286_v40 = vld [vmem:[%s20277_s28 + $0x13b] sm:$0xff] }
 0x560   : > { %7739 = vmatprep.subr.bf16.mxu0 %v19324_v36  ;;  %8704 = vmatprep.subr.bf16.mxu1 %v19327_v44  ;;  %v15287_v36 = vld [vmem:[%s20277_s28 + $0x143] sm:$0xff] }
 0x561   : > { %v21850_v44 = vpack.c.bf16 %v15287_v36, %v15286_v40  ;;  %v19415_v36 = vld [vmem:[%s20257_s26 + $0x8c8] ss:$16 sps:$4 sm:$0xff]  }
 0x563   : > { %7740 = vmatpush1.bf16.msra.mxu0 %v19322_v50  ;;  %8705 = vmatpush1.bf16.msra.mxu1 %v19325_v21  ;;  %v15291_v50 = vld [vmem:[%s20277_s28 + $0x173] sm:$0xff] }
 0x564   : > { %7741 = vmatprep.subr.bf16.mxu0 %v19330_v49  ;;  %8706 = vmatprep.subr.bf16.mxu1 %v19333_v22  ;;  %v21866_v21 = vpack.c.bf16 %v15291_v50, %v15290_v57  ;;  %v15293_v49 = vld [vmem:[%s20277_s28 + $0x18b] sm:$0xff]  ;;  %v15326_v22 = vld [vmem:[%s20277_s28 + $0x19d] sm:$0xff] }
 0x565   : > { %7605 = vmatmul.mubr.bf16.gmra.mrb[16].mxu0 %v21770_v53  ;;  %8570 = vmatmul.mubr.bf16.gmra.mrb[16].mxu1 %v21770_v53  ;;  %v15338_v57 = vld [vmem:[%s20277_s28 + $0xd9] sm:$0xff]  ;;  %v15339_v50 = vld [vmem:[%s20277_s28 + $0xe1] sm:$0xff] }
 0x566   : > { %7614 = vmatprep.mubr.bf16.mxu0 %v21634_v34  ;;  %8579 = vmatprep.mubr.bf16.mxu1 %v21634_v34  ;;  %v19340_v34 = vld [vmem:[%s20257_s26 + $0x740] ss:$16 sps:$4 sm:$0xff]  }
 0x567   : > { %7742 = vmatpush1.bf16.msra.mxu0 %v19328_v8  ;;  %8707 = vmatpush1.bf16.msra.mxu1 %v19331_v28 }
 0x568   : > { %7743 = vmatprep.subr.bf16.mxu0 %v19336_v23  ;;  %8708 = vmatprep.subr.bf16.mxu1 %v19339_v56  ;;  %v15294_v23 = vld [vmem:[%s20277_s28 + $0x19b] sm:$0xff] }
 0x569   : > { %v15328_v56 = vld [vmem:[%s20277_s28 + $0x1b5] sm:$0xff] }
 0x56b   : > { %7744 = vmatpush1.bf16.msra.mxu0 %v19334_v37  ;;  %8709 = vmatpush1.bf16.msra.mxu1 %v19337_v39  ;;  %v21890_v37 = vpack.c.bf16 %v15329_v5, %v15328_v56  ;;  %v15296_v39 = vld [vmem:[%s20277_s28 + $0x1b3] sm:$0xff] }
 0x56c   : > { %7745 = vmatprep.subr.bf16.mxu0 %v19342_v62  ;;  %8710 = vmatprep.subr.bf16.mxu1 %v19345_v43  ;;  %v15297_v62 = vld [vmem:[%s20277_s28 + $0x1bb] sm:$0xff]  ;;  %v15343_v56 = vld [vmem:[%s20277_s28 + $0x111] sm:$0xff] }
 0x56d   : > { %7615 = vmatmul.mubr.bf16.gmra.mrb[20].mxu0 %v21786_v63  ;;  %8580 = vmatmul.mubr.bf16.gmra.mrb[20].mxu1 %v21786_v63  ;;  %v21898_v43 = vpack.c.bf16 %v15297_v62, %v15296_v39  ;;  %v15345_v39 = vld [vmem:[%s20277_s28 + $0x129] sm:$0xff] }
 0x56e   : > { %7624 = vmatprep.mubr.bf16.mxu0 %v21650_v33  ;;  %8589 = vmatprep.mubr.bf16.mxu1 %v21650_v33  ;;  %v19352_v33 = vld [vmem:[%s20257_s26 + $0x780] ss:$16 sps:$4 sm:$0xff]  }
 0x56f   : > { %7746 = vmatpush1.bf16.msra.mxu0 %v19340_v34  ;;  %8711 = vmatpush1.bf16.msra.mxu1 %v19343_v0  ;;  %v15330_v34 = vld [vmem:[%s20277_s28 + $0x79] sm:$0xff]  ;;  %v15331_v0 = vld [vmem:[%s20277_s28 + $0x81] sm:$0xff] }
 0x570   : > { %7747 = vmatprep.subr.bf16.mxu0 %v19348_v2  ;;  %8712 = vmatprep.subr.bf16.mxu1 %v19351_v4  ;;  %v5284_v2 = vpack.c.bf16 %v15331_v0, %v15330_v34  ;;  %v19376_v4 = vld [vmem:[%s20257_s26 + $0x800] ss:$16 sps:$4 sm:$0xff]  }
 0x571   : > { %v15347_v34 = vld [vmem:[%s20277_s28 + $0x141] sm:$0xff] }
 0x573   : > { %7748 = vmatpush1.bf16.msra.mxu0 %v19346_v59  ;;  %8713 = vmatpush1.bf16.msra.mxu1 %v19349_v7  ;;  %v19387_v59 = vld [vmem:[%s20257_s26 + $0x82c] ss:$16 sps:$4 sm:$0xff]   ;;  %v15332_v7 = vld [vmem:[%s20277_s28 + $0x91] sm:$0xff] }
 0x574   : > { %7749 = vmatprep.subr.bf16.mxu0 %v19354_v24  ;;  %8714 = vmatprep.subr.bf16.mxu1 %v19357_v17  ;;  %v15333_v24 = vld [vmem:[%s20277_s28 + $0x99] sm:$0xff] }
 0x575   : > { %7625 = vmatmul.mubr.bf16.gmra.mrb[24].mxu0 %v21802_v10  ;;  %8590 = vmatmul.mubr.bf16.gmra.mrb[24].mxu1 %v21802_v10  ;;  %v19382_v17 = vld [vmem:[%s20257_s26 + $0x820] ss:$16 sps:$4 sm:$0xff]  }
 0x576   : > { %7634 = vmatprep.mubr.bf16.mxu0 %v21658_v38  ;;  %8599 = vmatprep.mubr.bf16.mxu1 %v21658_v38  ;;  %v19364_v38 = vld [vmem:[%s20257_s26 + $0x7c0] ss:$16 sps:$4 sm:$0xff]  }
 0x577   : > { %7750 = vmatpush1.bf16.msra.mxu0 %v19352_v33  ;;  %8715 = vmatpush1.bf16.msra.mxu1 %v19355_v11  ;;  %v19390_v33 = vld [vmem:[%s20257_s26 + $0x844] ss:$16 sps:$4 sm:$0xff]   ;;  %v19393_v11 = vld [vmem:[%s20257_s26 + $0x84c] ss:$16 sps:$4 sm:$0xff]  }
 0x578   : > { %7751 = vmatprep.subr.bf16.mxu0 %v19360_v12  ;;  %8716 = vmatprep.subr.bf16.mxu1 %v19363_v13  ;;  %v5285_v12 = vpack.c.bf16 %v15333_v24, %v15332_v7  ;;  %v19388_v13 = vld [vmem:[%s20257_s26 + $0x840] ss:$16 sps:$4 sm:$0xff]  }
 0x579   : > { %v15355_v24 = vld [vmem:[%s20277_s28 + $0x1a1] sm:$0xff] }
 0x57b   : > { %7752 = vmatpush1.bf16.msra.mxu0 %v19358_v58  ;;  %8717 = vmatpush1.bf16.msra.mxu1 %v19361_v20  ;;  %v19399_v58 = vld [vmem:[%s20257_s26 + $0x86c] ss:$16 sps:$4 sm:$0xff]   ;;  %v15335_v20 = vld [vmem:[%s20277_s28 + $0xb1] sm:$0xff] }
 0x57c   : > { %7753 = vmatprep.subr.bf16.mxu0 %v19366_v29  ;;  %8718 = vmatprep.subr.bf16.mxu1 %v19369_v54  ;;  %v19394_v29 = vld [vmem:[%s20257_s26 + $0x860] ss:$16 sps:$4 sm:$0xff]   ;;  %v19397_v54 = vld [vmem:[%s20257_s26 + $0x868] ss:$16 sps:$4 sm:$0xff]  }
 0x57d   : > { %7635 = vmatmul.mubr.bf16.gmra.mrb[28].mxu0 %v21818_v19  ;;  %8600 = vmatmul.mubr.bf16.gmra.mrb[28].mxu1 %v21818_v19 }
 0x57e   : > { %7644 = vmatprep.mubr.bf16.mxu0 %v21666_v18  ;;  %8609 = vmatprep.mubr.bf16.mxu1 %v21666_v18  ;;  %v15284_v18 = vld [vmem:[%s20277_s28 + $0x123] sm:$0xff] }
 0x57f   : > { %7754 = vmatpush1.bf16.msra.mxu0 %v19364_v38  ;;  %8719 = vmatpush1.bf16.msra.mxu1 %v19367_v41  ;;  %v21842_v60 = vpack.c.bf16 %v15285_v35, %v15284_v18  ;;  %v19402_v38 = vld [vmem:[%s20257_s26 + $0x884] ss:$16 sps:$4 sm:$0xff]   ;;  %v19405_v41 = vld [vmem:[%s20257_s26 + $0x88c] ss:$16 sps:$4 sm:$0xff]  }
 0x580   : > { %7755 = vmatprep.subr.bf16.mxu0 %v19372_v26  ;;  %8720 = vmatprep.subr.bf16.mxu1 %v19375_v9  ;;  %v19403_v9 = vld [vmem:[%s20257_s26 + $0x888] ss:$16 sps:$4 sm:$0xff]   ;;  %v19414_v18 = vld [vmem:[%s20257_s26 + $0x8c4] ss:$16 sps:$4 sm:$0xff]   ;;  %v19417_v35 = vld [vmem:[%s20257_s26 + $0x8cc] ss:$16 sps:$4 sm:$0xff]  }
 0x583   : > { %7756 = vmatpush1.bf16.msra.mxu0 %v19370_v27  ;;  %8721 = vmatpush1.bf16.msra.mxu1 %v19373_v15  ;;  %v15336_v27 = vld [vmem:[%s20277_s28 + $0xc1] sm:$0xff]  ;;  %v15337_v15 = vld [vmem:[%s20277_s28 + $0xc9] sm:$0xff] }
 0x584   : > { %7918 = vmatprep.subr.bf16.mxu0 %v19378_v47  ;;  %8883 = vmatprep.subr.bf16.mxu1 %v19381_v46  ;;  %v19406_v47 = vld [vmem:[%s20257_s26 + $0x8a0] ss:$16 sps:$4 sm:$0xff]   ;;  %v19409_v46 = vld [vmem:[%s20257_s26 + $0x8a8] ss:$16 sps:$4 sm:$0xff]   ;;  %v5287_v40 = vpack.c.bf16 %v15337_v15, %v15336_v27 }
 0x585   : > { %7645 = vmatmul.mubr.bf16.gmra.mrb[32].mxu0 %v21834_v31  ;;  %8610 = vmatmul.mubr.bf16.gmra.mrb[32].mxu1 %v21834_v31  ;;  %v15398_v27 = vld [vmem:[%s20277_s28 + $0xad] sm:$0xff]  ;;  %v15399_v15 = vld [vmem:[%s20277_s28 + $0xb5] sm:$0xff] }
 0x586   : > { %7654 = vmatprep.mubr.bf16.mxu0 %v21674_v30  ;;  %8619 = vmatprep.mubr.bf16.mxu1 %v21674_v30  ;;  %v15288_v30 = vld [vmem:[%s20277_s28 + $0x153] sm:$0xff] }
 0x58d   : > { %7655 = vmatmul.mubr.bf16.gmra.mrb[36].mxu0 %v21842_v60  ;;  %8620 = vmatmul.mubr.bf16.gmra.mrb[36].mxu1 %v21842_v60 }
 0x58e   : > { %7664 = vmatprep.mubr.bf16.mxu0 %v21682_v48  ;;  %8629 = vmatprep.mubr.bf16.mxu1 %v21682_v48  ;;  %v21858_v48 = vpack.c.bf16 %v15289_v32, %v15288_v30  ;;  %v19420_v30 = vld [vmem:[%s20257_s26 + $0x8e4] ss:$16 sps:$4 sm:$0xff]   ;;  %v19423_v32 = vld [vmem:[%s20257_s26 + $0x8ec] ss:$16 sps:$4 sm:$0xff]  }
 0x595   : > { %7665 = vmatmul.mubr.bf16.gmra.mrb[40].mxu0 %v21850_v44  ;;  %8630 = vmatmul.mubr.bf16.gmra.mrb[40].mxu1 %v21850_v44 }
 0x596   : > { %7674 = vmatprep.mubr.bf16.mxu0 %v21692_v52  ;;  %8639 = vmatprep.mubr.bf16.mxu1 %v21692_v52  ;;  %v15292_v52 = vld [vmem:[%s20277_s28 + $0x183] sm:$0xff] }
 0x597   : > { %v21876_v8 = vpack.c.bf16 %v15293_v49, %v15292_v52  ;;  %v19418_v52 = vld [vmem:[%s20257_s26 + $0x8e0] ss:$16 sps:$4 sm:$0xff]   ;;  %v19421_v49 = vld [vmem:[%s20257_s26 + $0x8e8] ss:$16 sps:$4 sm:$0xff]  }
 0x59d   : > { %7675 = vmatmul.mubr.bf16.gmra.mrb[44].mxu0 %v21858_v48  ;;  %8640 = vmatmul.mubr.bf16.gmra.mrb[44].mxu1 %v21858_v48 }
 0x59e   : > { %7684 = vmatprep.mubr.bf16.mxu0 %v21700_v45  ;;  %8649 = vmatprep.mubr.bf16.mxu1 %v21700_v45  ;;  %v15327_v45 = vld [vmem:[%s20277_s28 + $0x1a5] sm:$0xff] }
 0x59f   : > { %v21878_v28 = vpack.c.bf16 %v15327_v45, %v15326_v22  ;;  %v5288_v22 = vpack.c.bf16 %v15339_v50, %v15338_v57  ;;  %v15341_v45 = vld [vmem:[%s20277_s28 + $0xf9] sm:$0xff]  ;;  %v15406_v50 = vld [vmem:[%s20277_s28 + $0x10d] sm:$0xff] }
 0x5a5   : > { %7685 = vmatmul.mubr.bf16.gmra.mrb[48].mxu0 %v21866_v21  ;;  %8650 = vmatmul.mubr.bf16.gmra.mrb[48].mxu1 %v21866_v21 }
 0x5a6   : > { %7694 = vmatprep.mubr.bf16.mxu0 %v21706_v61  ;;  %8659 = vmatprep.mubr.bf16.mxu1 %v21706_v61  ;;  %v15295_v61 = vld [vmem:[%s20277_s28 + $0x1a3] sm:$0xff] }
 0x5a7   : > { %v21888_v51 = vpack.c.bf16 %v15295_v61, %v15294_v23  ;;  %v15342_v61 = vld [vmem:[%s20277_s28 + $0x109] sm:$0xff] }
 0x5a8   : > { %v5290_v5 = vpack.c.bf16 %v15343_v56, %v15342_v61  ;;  %v15411_v61 = vld [vmem:[%s20277_s28 + $0x145] sm:$0xff] }
 0x5ad   : > { %7695 = vmatmul.mubr.bf16.gmra.mrb[52].mxu0 %v21876_v8  ;;  %8660 = vmatmul.mubr.bf16.gmra.mrb[52].mxu1 %v21876_v8 }
 0x5ae   : > { %7704 = vmatprep.mubr.bf16.mxu0 %v21878_v28  ;;  %8669 = vmatprep.mubr.bf16.mxu1 %v21878_v28 }
 0x5b5   : > { %7705 = vmatmul.mubr.bf16.gmra.mrb[56].mxu0 %v21888_v51  ;;  %8670 = vmatmul.mubr.bf16.gmra.mrb[56].mxu1 %v21888_v51 }
 0x5b6   : > { %7714 = vmatprep.mubr.bf16.mxu0 %v21890_v37  ;;  %8679 = vmatprep.mubr.bf16.mxu1 %v21890_v37 }
 0x5bd   : > { %7715 = vmatmul.mubr.bf16.gmra.mrb[60].mxu0 %v21898_v43  ;;  %8680 = vmatmul.mubr.bf16.gmra.mrb[60].mxu1 %v21898_v43 }
 0x5be   : > { %7757 = vmatprep.mubr.bf16.mxu0 %v21738_v55  ;;  %8722 = vmatprep.mubr.bf16.mxu1 %v21738_v55  ;;  %v19385_v55 = vld [vmem:[%s20257_s26 + $0x828] ss:$16 sps:$4 sm:$0xff]  }
 0x5c5   : > { %7758 = vmatmul.mubr.bf16.vlgmr.msra.gmra.mrb[0].mxu0 %v5284_v2  ;;  %8723 = vmatmul.mubr.bf16.vlgmr.msra.gmra.mrb[0].mxu1 %v5284_v2  ;;  %v15349_v2 = vld [vmem:[%s20277_s28 + $0x159] sm:$0xff] }
 0x5c6   : > { %7919 = vmatpush1.bf16.msra.mxu0 %v19376_v4  ;;  %8884 = vmatpush1.bf16.msra.mxu1 %v19379_v1  ;;  %v15351_v1 = vld [vmem:[%s20277_s28 + $0x171] sm:$0xff] }
 0x5c7   : > { %7767 = vmatprep.mubr.bf16.mxu0 %v21754_v42  ;;  %8732 = vmatprep.mubr.bf16.mxu1 %v21754_v42  ;;  %v15334_v42 = vld [vmem:[%s20277_s28 + $0xa9] sm:$0xff] }
 0x5c8   : > { %7920 = vmatprep.subr.bf16.mxu0 %v19384_v3  ;;  %8885 = vmatprep.subr.bf16.mxu1 %v19387_v59  ;;  %v5286_v26 = vpack.c.bf16 %v15335_v20, %v15334_v42  ;;  %v15353_v59 = vld [vmem:[%s20277_s28 + $0x189] sm:$0xff]  ;;  %v15360_v20 = vld [vmem:[%s20277_s28 + $0x1e1] sm:$0xff] }
 0x5ca   : > { %7921 = vmatpush1.bf16.msra.mxu0 %v19382_v17  ;;  %8886 = vmatpush1.bf16.msra.mxu1 %v19385_v55  ;;  %v15357_v55 = vld [vmem:[%s20277_s28 + $0x1b9] sm:$0xff] }
 0x5cb   : > { %7922 = vmatprep.subr.bf16.mxu0 %v19390_v33  ;;  %8887 = vmatprep.subr.bf16.mxu1 %v19393_v11  ;;  %v15390_v33 = vld [vmem:[%s20277_s28 + $0x1cb] sm:$0xff]  ;;  %v15391_v11 = vld [vmem:[%s20277_s28 + $0x1d3] sm:$0xff] }
 0x5cd   : > { %7768 = vmatmul.mubr.bf16.gmra.mrb[4].mxu0 %v5285_v12  ;;  %8733 = vmatmul.mubr.bf16.gmra.mrb[4].mxu1 %v5285_v12 }
 0x5ce   : > { %7777 = vmatprep.mubr.bf16.mxu0 %v21770_v53  ;;  %8742 = vmatprep.mubr.bf16.mxu1 %v21770_v53  ;;  %v19400_v53 = vld [vmem:[%s20257_s26 + $0x880] ss:$16 sps:$4 sm:$0xff]  }
 0x5cf   : > { %7923 = vmatpush1.bf16.msra.mxu0 %v19388_v13  ;;  %8888 = vmatpush1.bf16.msra.mxu1 %v19391_v14  ;;  %v15358_v13 = vld [vmem:[%s20277_s28 + $0x1c9] sm:$0xff]  ;;  %v15359_v14 = vld [vmem:[%s20277_s28 + $0x1d1] sm:$0xff] }
 0x5d0   : > { %7924 = vmatprep.subr.bf16.mxu0 %v19396_v6  ;;  %8889 = vmatprep.subr.bf16.mxu1 %v19399_v58  ;;  %v15392_v6 = vld [vmem:[%s20277_s28 + $0x1e3] sm:$0xff]  ;;  %v15393_v58 = vld [vmem:[%s20277_s28 + $0x1eb] sm:$0xff]  ;;  %v5298_v42 = vpack.c.bf16 %v15359_v14, %v15358_v13 }
 0x5d3   : > { %7925 = vmatpush1.bf16.msra.mxu0 %v19394_v29  ;;  %8890 = vmatpush1.bf16.msra.mxu1 %v19397_v54  ;;  %v15361_v29 = vld [vmem:[%s20277_s28 + $0x1e9] sm:$0xff] }
 0x5d4   : > { %7926 = vmatprep.subr.bf16.mxu0 %v19402_v38  ;;  %8891 = vmatprep.subr.bf16.mxu1 %v19405_v41  ;;  %v5299_v54 = vpack.c.bf16 %v15361_v29, %v15360_v20  ;;  %v20049_v38 = vmov 0   ;;  %v15394_v41 = vld [vmem:[%s20277_s28 + $0x7d] sm:$0xff] }
 0x5d5   : > { %7778 = vmatmul.mubr.bf16.gmra.mrb[8].mxu0 %v5286_v26  ;;  %8743 = vmatmul.mubr.bf16.gmra.mrb[8].mxu1 %v5286_v26  ;;  %v15395_v26 = vld [vmem:[%s20277_s28 + $0x85] sm:$0xff] }
 0x5d6   : > { %7787 = vmatprep.mubr.bf16.mxu0 %v21786_v63  ;;  %8752 = vmatprep.mubr.bf16.mxu1 %v21786_v63  ;;  %v19412_v63 = vld [vmem:[%s20257_s26 + $0x8c0] ss:$16 sps:$4 sm:$0xff]  }
 0x5d7   : > { %7927 = vmatpush1.bf16.msra.mxu0 %v19400_v53  ;;  %8892 = vmatpush1.bf16.msra.mxu1 %v19403_v9  ;;  %v5380_v53 = vpack.c.bf16 %v15395_v26, %v15394_v41  ;;  %v15396_v9 = vld [vmem:[%s20277_s28 + $0x95] sm:$0xff] }
 0x5d8   : > { %7928 = vmatprep.subr.bf16.mxu0 %v19408_v25  ;;  %8893 = vmatprep.subr.bf16.mxu1 %v19411_v16  ;;  %v15397_v25 = vld [vmem:[%s20277_s28 + $0x9d] sm:$0xff] }
 0x5d9   : > { %v5381_v16 = vpack.c.bf16 %v15397_v25, %v15396_v9 }
 0x5db   : > { %7929 = vmatpush1.bf16.msra.mxu0 %v19406_v47  ;;  %8894 = vmatpush1.bf16.msra.mxu1 %v19409_v46  ;;  %v5382_v47 = vpack.c.bf16 %v15399_v15, %v15398_v27  ;;  %v15400_v46 = vld [vmem:[%s20277_s28 + $0xc5] sm:$0xff] }
 0x5dc   : > { %7930 = vmatprep.subr.bf16.mxu0 %v19414_v18  ;;  %8895 = vmatprep.subr.bf16.mxu1 %v19417_v35  ;;  %v15401_v18 = vld [vmem:[%s20277_s28 + $0xcd] sm:$0xff] }
 0x5dd   : > { %7788 = vmatmul.mubr.bf16.gmra.mrb[12].mxu0 %v5287_v40  ;;  %8753 = vmatmul.mubr.bf16.gmra.mrb[12].mxu1 %v5287_v40  ;;  %v5383_v35 = vpack.c.bf16 %v15401_v18, %v15400_v46  ;;  %v15402_v40 = vld [vmem:[%s20277_s28 + $0xdd] sm:$0xff] }
 0x5de   : > { %7797 = vmatprep.mubr.bf16.mxu0 %v21802_v10  ;;  %8762 = vmatprep.mubr.bf16.mxu1 %v21802_v10  ;;  %v15340_v10 = vld [vmem:[%s20277_s28 + $0xf1] sm:$0xff] }
 0x5df   : > { %7931 = vmatpush1.bf16.msra.mxu0 %v19412_v63  ;;  %8896 = vmatpush1.bf16.msra.mxu1 %v19415_v36  ;;  %v5289_v23 = vpack.c.bf16 %v15341_v45, %v15340_v10  ;;  %v15403_v63 = vld [vmem:[%s20277_s28 + $0xe5] sm:$0xff]  ;;  %v15409_v10 = vld [vmem:[%s20277_s28 + $0x12d] sm:$0xff] }
 0x5e0   : > { %7932 = vmatprep.subr.bf16.mxu0 %v19420_v30  ;;  %8897 = vmatprep.subr.bf16.mxu1 %v19423_v32  ;;  %v5384_v36 = vpack.c.bf16 %v15403_v63, %v15402_v40  ;;  %v15404_v30 = vld [vmem:[%s20277_s28 + $0xf5] sm:$0xff]  ;;  %v15405_v32 = vld [vmem:[%s20277_s28 + $0xfd] sm:$0xff] }
 0x5e1   : > { %v5385_v57 = vpack.c.bf16 %v15405_v32, %v15404_v30 }
 0x5e3   : > { %7933 = vmatpush1.bf16.msra.mxu0 %v19418_v52  ;;  %8898 = vmatpush1.bf16.msra.mxu1 %v19421_v49  ;;  %v15407_v52 = vld [vmem:[%s20277_s28 + $0x115] sm:$0xff] }
 0x5e4   : > { %v5386_v49 = vpack.c.bf16 %v15407_v52, %v15406_v50 }
 0x5e5   : > { %7798 = vmatmul.mubr.bf16.gmra.mrb[16].mxu0 %v5288_v22  ;;  %8763 = vmatmul.mubr.bf16.gmra.mrb[16].mxu1 %v5288_v22  ;;  %v15408_v22 = vld [vmem:[%s20277_s28 + $0x125] sm:$0xff] }
 0x5e6   : > { %7807 = vmatprep.mubr.bf16.mxu0 %v21818_v19  ;;  %8772 = vmatprep.mubr.bf16.mxu1 %v21818_v19  ;;  %v15344_v19 = vld [vmem:[%s20277_s28 + $0x121] sm:$0xff]  ;;  %v5387_v45 = vpack.c.bf16 %v15409_v10, %v15408_v22 }
 0x5e7   : > { %v5291_v62 = vpack.c.bf16 %v15345_v39, %v15344_v19  ;;  %v15413_v19 = vld [vmem:[%s20277_s28 + $0x15d] sm:$0xff] }
 0x5ed   : > { %7808 = vmatmul.mubr.bf16.gmra.mrb[20].mxu0 %v5289_v23  ;;  %8773 = vmatmul.mubr.bf16.gmra.mrb[20].mxu1 %v5289_v23  ;;  %v15410_v23 = vld [vmem:[%s20277_s28 + $0x13d] sm:$0xff] }
 0x5ee   : > { %7817 = vmatprep.mubr.bf16.mxu0 %v21834_v31  ;;  %8782 = vmatprep.mubr.bf16.mxu1 %v21834_v31  ;;  %v15346_v31 = vld [vmem:[%s20277_s28 + $0x139] sm:$0xff]  ;;  %v5388_v56 = vpack.c.bf16 %v15411_v61, %v15410_v23 }
 0x5ef   : > { %v5292_v0 = vpack.c.bf16 %v15347_v34, %v15346_v31  ;;  %v15415_v31 = vld [vmem:[%s20277_s28 + $0x175] sm:$0xff] }
 0x5f5   : > { %7818 = vmatmul.mubr.bf16.gmra.mrb[24].mxu0 %v5290_v5  ;;  %8783 = vmatmul.mubr.bf16.gmra.mrb[24].mxu1 %v5290_v5  ;;  %v15412_v5 = vld [vmem:[%s20277_s28 + $0x155] sm:$0xff] }
 0x5f6   : > { %7827 = vmatprep.mubr.bf16.mxu0 %v21842_v60  ;;  %8792 = vmatprep.mubr.bf16.mxu1 %v21842_v60  ;;  %v15348_v60 = vld [vmem:[%s20277_s28 + $0x151] sm:$0xff]  ;;  %v5389_v39 = vpack.c.bf16 %v15413_v19, %v15412_v5 }
 0x5f7   : > { %v5293_v4 = vpack.c.bf16 %v15349_v2, %v15348_v60  ;;  %v15417_v60 = vld [vmem:[%s20277_s28 + $0x18d] sm:$0xff] }
 0x5fd   : > { %7828 = vmatmul.mubr.bf16.gmra.mrb[28].mxu0 %v5291_v62  ;;  %8793 = vmatmul.mubr.bf16.gmra.mrb[28].mxu1 %v5291_v62  ;;  %v15414_v62 = vld [vmem:[%s20277_s28 + $0x16d] sm:$0xff] }
 0x5fe   : > { %7837 = vmatprep.mubr.bf16.mxu0 %v21850_v44  ;;  %8802 = vmatprep.mubr.bf16.mxu1 %v21850_v44  ;;  %v15350_v44 = vld [vmem:[%s20277_s28 + $0x169] sm:$0xff]  ;;  %v5390_v34 = vpack.c.bf16 %v15415_v31, %v15414_v62 }
 0x5ff   : > { %v5294_v3 = vpack.c.bf16 %v15351_v1, %v15350_v44  ;;  %v15423_v44 = vld [vmem:[%s20277_s28 + $0x1d5] sm:$0xff] }
 0x605   : > { %7838 = vmatmul.mubr.bf16.gmra.mrb[32].mxu0 %v5292_v0  ;;  %8803 = vmatmul.mubr.bf16.gmra.mrb[32].mxu1 %v5292_v0  ;;  %v15416_v0 = vld [vmem:[%s20277_s28 + $0x185] sm:$0xff] }
 0x606   : > { %7847 = vmatprep.mubr.bf16.mxu0 %v21858_v48  ;;  %8812 = vmatprep.mubr.bf16.mxu1 %v21858_v48  ;;  %v15352_v48 = vld [vmem:[%s20277_s28 + $0x181] sm:$0xff]  ;;  %v5391_v2 = vpack.c.bf16 %v15417_v60, %v15416_v0 }
 0x607   : > { %v5295_v7 = vpack.c.bf16 %v15353_v59, %v15352_v48 }
 0x60d   : > { %7848 = vmatmul.mubr.bf16.gmra.mrb[36].mxu0 %v5293_v4  ;;  %8813 = vmatmul.mubr.bf16.gmra.mrb[36].mxu1 %v5293_v4  ;;  %v15422_v4 = vld [vmem:[%s20277_s28 + $0x1cd] sm:$0xff] }
 0x60e   : > { %7857 = vmatprep.mubr.bf16.mxu0 %v21866_v21  ;;  %8822 = vmatprep.mubr.bf16.mxu1 %v21866_v21  ;;  %v15354_v21 = vld [vmem:[%s20277_s28 + $0x199] sm:$0xff]  ;;  %v5394_v1 = vpack.c.bf16 %v15423_v44, %v15422_v4 }
 0x60f   : > { %v5296_v17 = vpack.c.bf16 %v15355_v24, %v15354_v21  ;;  %v5684_v24 = vld [vmem:[%s20263_s6] sm:$0xf] }
 0x615   : > { %7858 = vmatmul.mubr.bf16.gmra.mrb[40].mxu0 %v5294_v3  ;;  %8823 = vmatmul.mubr.bf16.gmra.mrb[40].mxu1 %v5294_v3  ;;  %v15425_v3 = vld [vmem:[%s20277_s28 + $0x1ed] sm:$0xff] }
 0x616   : > { %7867 = vmatprep.mubr.bf16.mxu0 %v21876_v8  ;;  %8832 = vmatprep.mubr.bf16.mxu1 %v21876_v8  ;;  %v15356_v8 = vld [vmem:[%s20277_s28 + $0x1b1] sm:$0xff] }
 0x617   : > { %v5297_v12 = vpack.c.bf16 %v15357_v55, %v15356_v8 }
 0x61d   : > { %7868 = vmatmul.mubr.bf16.gmra.mrb[44].mxu0 %v5295_v7  ;;  %8833 = vmatmul.mubr.bf16.gmra.mrb[44].mxu1 %v5295_v7 }
 0x61e   : > { %7877 = vmatprep.mubr.bf16.mxu0 %v21888_v51  ;;  %8842 = vmatprep.mubr.bf16.mxu1 %v21888_v51  ;;  %v5346_v51 = vpack.c.bf16 %v15391_v11, %v15390_v33 }
 0x625   : > { %7878 = vmatmul.mubr.bf16.gmra.mrb[48].mxu0 %v5296_v17  ;;  %8843 = vmatmul.mubr.bf16.gmra.mrb[48].mxu1 %v5296_v17 }
 0x626   : > { %7887 = vmatprep.mubr.bf16.mxu0 %v21898_v43  ;;  %8852 = vmatprep.mubr.bf16.mxu1 %v21898_v43  ;;  %v5347_v43 = vpack.c.bf16 %v15393_v58, %v15392_v6 }
 0x62d   : > { %7888 = vmatmul.mubr.bf16.gmra.mrb[52].mxu0 %v5297_v12  ;;  %8853 = vmatmul.mubr.bf16.gmra.mrb[52].mxu1 %v5297_v12 }
 0x62e   : > { %7897 = vmatprep.mubr.bf16.mxu0 %v5346_v51  ;;  %8862 = vmatprep.mubr.bf16.mxu1 %v5346_v51 }
 0x635   : > { %7898 = vmatmul.mubr.bf16.gmra.mrb[56].mxu0 %v5298_v42  ;;  %8863 = vmatmul.mubr.bf16.gmra.mrb[56].mxu1 %v5298_v42 }
 0x636   : > { %7907 = vmatprep.mubr.bf16.mxu0 %v5347_v43  ;;  %8872 = vmatprep.mubr.bf16.mxu1 %v5347_v43 }
 0x63d   : > { %7908 = vmatmul.mubr.bf16.gmra.mrb[60].mxu0 %v5299_v54  ;;  %8873 = vmatmul.mubr.bf16.gmra.mrb[60].mxu1 %v5299_v54 }
 0x63e   : > { %7950 = vmatprep.mubr.bf16.mxu0 %v20049_v38  ;;  %8915 = vmatprep.mubr.bf16.mxu1 %v20049_v38 }
 0x645   : > { %7951 = vmatmul.mubr.bf16.vlgmr.msra.gmra.mrb[0].mxu0 %v5380_v53  ;;  %8916 = vmatmul.mubr.bf16.vlgmr.msra.gmra.mrb[0].mxu1 %v5380_v53 }
 0x646   : > { %7960 = vmatprep.mubr.bf16.mxu0 %v20049_v38  ;;  %8925 = vmatprep.mubr.bf16.mxu1 %v20049_v38 }
 0x64d   : > { %7961 = vmatmul.mubr.bf16.gmra.mrb[4].mxu0 %v5381_v16  ;;  %8926 = vmatmul.mubr.bf16.gmra.mrb[4].mxu1 %v5381_v16 }
 0x64e   : > { %7970 = vmatprep.mubr.bf16.mxu0 %v20049_v38  ;;  %8935 = vmatprep.mubr.bf16.mxu1 %v20049_v38 }
 0x655   : > { %7971 = vmatmul.mubr.bf16.gmra.mrb[8].mxu0 %v5382_v47  ;;  %8936 = vmatmul.mubr.bf16.gmra.mrb[8].mxu1 %v5382_v47 }
 0x656   : > { %7980 = vmatprep.mubr.bf16.mxu0 %v20049_v38  ;;  %8945 = vmatprep.mubr.bf16.mxu1 %v20049_v38 }
 0x65d   : > { %7981 = vmatmul.mubr.bf16.gmra.mrb[12].mxu0 %v5383_v35  ;;  %8946 = vmatmul.mubr.bf16.gmra.mrb[12].mxu1 %v5383_v35 }
 0x65e   : > { %7990 = vmatprep.mubr.bf16.mxu0 %v20049_v38  ;;  %8955 = vmatprep.mubr.bf16.mxu1 %v20049_v38 }
 0x665   : > { %7991 = vmatmul.mubr.bf16.gmra.mrb[16].mxu0 %v5384_v36  ;;  %8956 = vmatmul.mubr.bf16.gmra.mrb[16].mxu1 %v5384_v36 }
 0x666   : > { %8000 = vmatprep.mubr.bf16.mxu0 %v20049_v38  ;;  %8965 = vmatprep.mubr.bf16.mxu1 %v20049_v38 }
 0x66d   : > { %8001 = vmatmul.mubr.bf16.gmra.mrb[20].mxu0 %v5385_v57  ;;  %8966 = vmatmul.mubr.bf16.gmra.mrb[20].mxu1 %v5385_v57 }
 0x66e   : > { %8010 = vmatprep.mubr.bf16.mxu0 %v20049_v38  ;;  %8975 = vmatprep.mubr.bf16.mxu1 %v20049_v38 }
 0x675   : > { %8011 = vmatmul.mubr.bf16.gmra.mrb[24].mxu0 %v5386_v49  ;;  %8976 = vmatmul.mubr.bf16.gmra.mrb[24].mxu1 %v5386_v49 }
 0x676   : > { %8020 = vmatprep.mubr.bf16.mxu0 %v20049_v38  ;;  %8985 = vmatprep.mubr.bf16.mxu1 %v20049_v38 }
 0x67d   : > { %8021 = vmatmul.mubr.bf16.gmra.mrb[28].mxu0 %v5387_v45  ;;  %8986 = vmatmul.mubr.bf16.gmra.mrb[28].mxu1 %v5387_v45 }
 0x67e   : > { %8030 = vmatprep.mubr.bf16.mxu0 %v20049_v38  ;;  %8995 = vmatprep.mubr.bf16.mxu1 %v20049_v38 }
 0x685   : > { %8031 = vmatmul.mubr.bf16.gmra.mrb[32].mxu0 %v5388_v56  ;;  %8996 = vmatmul.mubr.bf16.gmra.mrb[32].mxu1 %v5388_v56 }
 0x686   : > { %8040 = vmatprep.mubr.bf16.mxu0 %v20049_v38  ;;  %9005 = vmatprep.mubr.bf16.mxu1 %v20049_v38 }
 0x68d   : > { %8041 = vmatmul.mubr.bf16.gmra.mrb[36].mxu0 %v5389_v39  ;;  %9006 = vmatmul.mubr.bf16.gmra.mrb[36].mxu1 %v5389_v39 }
 0x68e   : > { %8050 = vmatprep.mubr.bf16.mxu0 %v20049_v38  ;;  %9015 = vmatprep.mubr.bf16.mxu1 %v20049_v38 }
 0x695   : > { %8051 = vmatmul.mubr.bf16.gmra.mrb[40].mxu0 %v5390_v34  ;;  %9016 = vmatmul.mubr.bf16.gmra.mrb[40].mxu1 %v5390_v34 }
 0x696   : > { %8060 = vmatprep.mubr.bf16.mxu0 %v20049_v38  ;;  %9025 = vmatprep.mubr.bf16.mxu1 %v20049_v38 }
 0x69d   : > { %8061 = vmatmul.mubr.bf16.gmra.mrb[44].mxu0 %v5391_v2  ;;  %9026 = vmatmul.mubr.bf16.gmra.mrb[44].mxu1 %v5391_v2 }
 0x69e   : > { %8070 = vmatprep.mubr.bf16.mxu0 %v20049_v38  ;;  %9035 = vmatprep.mubr.bf16.mxu1 %v20049_v38 }
 0x6a5   : > { %8071 = vmatmul.mubr.bf16.gmra.mrb[48].mxu0 %v21878_v28  ;;  %9036 = vmatmul.mubr.bf16.gmra.mrb[48].mxu1 %v21878_v28  ;;  %v15424_v28 = vld [vmem:[%s20277_s28 + $0x1e5] sm:$0xff] }
 0x6a6   : > { %8080 = vmatprep.mubr.bf16.mxu0 %v20049_v38  ;;  %9045 = vmatprep.mubr.bf16.mxu1 %v20049_v38  ;;  %v5395_v48 = vpack.c.bf16 %v15425_v3, %v15424_v28 }
 0x6ad   : > { %8081 = vmatmul.mubr.bf16.gmra.mrb[52].mxu0 %v21890_v37  ;;  %9046 = vmatmul.mubr.bf16.gmra.mrb[52].mxu1 %v21890_v37  ;;  %v5686_v37 = vlaneseq }
 0x6ae   : > { %8090 = vmatprep.mubr.bf16.mxu0 %v20049_v38  ;;  %9055 = vmatprep.mubr.bf16.mxu1 %v20049_v38 }
 0x6af   : > { %v5687_v59 = vshrl.u32 %v5686_v37, 7 }
 0x6b1   : > { %v5688_v7 = vsub.s32 0, %v5687_v59  ;;  %v5696_v21 = vsub.s32 2, %v5687_v59  ;;  %v5692_v17 = vsub.s32 1, %v5687_v59  ;;  %v5700_v8 = vsub.s32 3, %v5687_v59 }
 0x6b3   : > { %v22061_v55 = vrot.slane %v5684_v24, %v5688_v7  ;;  %v22063_v33 = vrot.slane %v5684_v24, %v5696_v21  ;;  %v22065_v11 = vrot.slane %v5684_v24, %v5692_v17  ;;  %v22067_v12 = vrot.slane %v5684_v24, %v5700_v8 }
 0x6b5   : > { %8091 = vmatmul.mubr.bf16.gmra.mrb[56].mxu0 %v5394_v1  ;;  %9056 = vmatmul.mubr.bf16.gmra.mrb[56].mxu1 %v5394_v1 }
 0x6b6   : > { %8100 = vmatprep.mubr.bf16.mxu0 %v20049_v38  ;;  %9065 = vmatprep.mubr.bf16.mxu1 %v20049_v38 }
 0x6bd   : > { %8101 = vmatmul.mubr.bf16.gmra.mrb[60].mxu0 %v5395_v48  ;;  %9066 = vmatmul.mubr.bf16.gmra.mrb[60].mxu1 %v5395_v48 }
 0x718   : > { %v7952_v51 = vpop.f32.mrb[0].mxu0  ;;  %v8917_v13 = vpop.f32.mrb[0].mxu1 }
 0x719   : > { %v17162_v14 = vadd.f32 %v7952_v51, %v22061_v55  ;;  %v17226_v6 = vadd.f32 %v8917_v13, %v22063_v33  ;;  %v7954_v58 = vpop.f32.mrb[1].mxu0  ;;  %v8919_v42 = vpop.f32.mrb[1].mxu1 }
 0x71a   : > { %v17163_v43 = vadd.f32 %v7954_v58, %v22065_v11  ;;  %v17227_v20 = vadd.f32 %v8919_v42, %v22067_v12  ;;  %v7956_v29 = vpop.f32.mrb[2].mxu0  ;;  %v8921_v54 = vpop.f32.mrb[2].mxu1 }
 0x71b   : > { %v9076_v38 = vmax.f32 %v17162_v14, 0.0  ;;  %v9078_v41 = vmax.f32 %v17226_v6, 0.0  ;;  %v17164_v26 = vadd.f32 %v7956_v29, %v22061_v55  ;;  %v17228_v53 = vadd.f32 %v8921_v54, %v22063_v33  ;;  %v7958_v9 = vpop.f32.mrb[3].mxu0  ;;  %v8923_v25 = vpop.f32.mrb[3].mxu1 }
 0x71c   : > { %v9077_v16 = vmax.f32 %v17163_v43, 0.0  ;;  %v9079_v27 = vmax.f32 %v17227_v20, 0.0  ;;  %v17165_v15 = vadd.f32 %v7958_v9, %v22065_v11  ;;  %v17229_v47 = vadd.f32 %v8923_v25, %v22067_v12 }
 0x71d   : > { %v9080_v46 = vmax.f32 %v17164_v26, 0.0  ;;  %v9082_v18 = vmax.f32 %v17228_v53, 0.0 }
 0x71e   : > { %v16394_v35 = vpack.c.bf16 %v9077_v16, %v9076_v38  ;;  %v16395_v40 = vpack.c.bf16 %v9079_v27, %v9078_v41  ;;  %v9081_v63 = vmax.f32 %v17165_v15, 0.0  ;;  %v9083_v36 = vmax.f32 %v17229_v47, 0.0 }
 0x720   : > { %9588 = vst [vmem:[%s20279_s27] sm:$0xff] %v16394_v35  ;;  %9589 = vst [vmem:[%s20279_s27 + $0x8] sm:$0xff] %v16395_v40  ;;  %v16396_v30 = vpack.c.bf16 %v9081_v63, %v9080_v46  ;;  %v16397_v32 = vpack.c.bf16 %v9083_v36, %v9082_v18  ;;  %v7962_v57 = vpop.f32.mrb[4].mxu0  ;;  %v8927_v50 = vpop.f32.mrb[4].mxu1 }
 0x721   : > { %v17166_v52 = vadd.f32 %v7962_v57, %v22061_v55  ;;  %v17230_v49 = vadd.f32 %v8927_v50, %v22063_v33  ;;  %v7964_v22 = vpop.f32.mrb[5].mxu0  ;;  %v8929_v10 = vpop.f32.mrb[5].mxu1 }
 0x722   : > { %9590 = vst [vmem:[%s20279_s27 + $0x10] sm:$0xff] %v16396_v30  ;;  %9591 = vst [vmem:[%s20279_s27 + $0x18] sm:$0xff] %v16397_v32  ;;  %v17167_v45 = vadd.f32 %v7964_v22, %v22065_v11  ;;  %v17231_v23 = vadd.f32 %v8929_v10, %v22067_v12  ;;  %v7966_v61 = vpop.f32.mrb[6].mxu0  ;;  %v8931_v56 = vpop.f32.mrb[6].mxu1 }
 0x723   : > { %v9084_v5 = vmax.f32 %v17166_v52, 0.0  ;;  %v9086_v19 = vmax.f32 %v17230_v49, 0.0  ;;  %v17168_v39 = vadd.f32 %v7966_v61, %v22061_v55  ;;  %v17232_v62 = vadd.f32 %v8931_v56, %v22063_v33  ;;  %v7968_v31 = vpop.f32.mrb[7].mxu0  ;;  %v8933_v34 = vpop.f32.mrb[7].mxu1 }
 0x724   : > { %v9085_v0 = vmax.f32 %v17167_v45, 0.0  ;;  %v9087_v60 = vmax.f32 %v17231_v23, 0.0  ;;  %v17169_v2 = vadd.f32 %v7968_v31, %v22065_v11  ;;  %v17233_v4 = vadd.f32 %v8933_v34, %v22067_v12 }
 0x725   : > { %v9088_v44 = vmax.f32 %v17168_v39, 0.0  ;;  %v9090_v1 = vmax.f32 %v17232_v62, 0.0 }
 0x726   : > { %v16398_v28 = vpack.c.bf16 %v9085_v0, %v9084_v5  ;;  %v16399_v3 = vpack.c.bf16 %v9087_v60, %v9086_v19  ;;  %v9089_v48 = vmax.f32 %v17169_v2, 0.0  ;;  %v9091_v37 = vmax.f32 %v17233_v4, 0.0 }
 0x728   : > { %9592 = vst [vmem:[%s20279_s27 + $0x20] sm:$0xff] %v16398_v28  ;;  %9593 = vst [vmem:[%s20279_s27 + $0x28] sm:$0xff] %v16399_v3  ;;  %v16400_v59 = vpack.c.bf16 %v9089_v48, %v9088_v44  ;;  %v16401_v7 = vpack.c.bf16 %v9091_v37, %v9090_v1  ;;  %v7972_v21 = vpop.f32.mrb[8].mxu0  ;;  %v8937_v24 = vpop.f32.mrb[8].mxu1 }
 0x729   : > { %v17170_v17 = vadd.f32 %v7972_v21, %v22061_v55  ;;  %v17234_v8 = vadd.f32 %v8937_v24, %v22063_v33  ;;  %v7974_v51 = vpop.f32.mrb[9].mxu0  ;;  %v8939_v13 = vpop.f32.mrb[9].mxu1 }
 0x72a   : > { %9594 = vst [vmem:[%s20279_s27 + $0x30] sm:$0xff] %v16400_v59  ;;  %9595 = vst [vmem:[%s20279_s27 + $0x38] sm:$0xff] %v16401_v7  ;;  %v17171_v14 = vadd.f32 %v7974_v51, %v22065_v11  ;;  %v17235_v6 = vadd.f32 %v8939_v13, %v22067_v12  ;;  %v7976_v58 = vpop.f32.mrb[10].mxu0  ;;  %v8941_v42 = vpop.f32.mrb[10].mxu1 }
 0x72b   : > { %v9092_v43 = vmax.f32 %v17170_v17, 0.0  ;;  %v9094_v20 = vmax.f32 %v17234_v8, 0.0  ;;  %v17172_v29 = vadd.f32 %v7976_v58, %v22061_v55  ;;  %v17236_v54 = vadd.f32 %v8941_v42, %v22063_v33  ;;  %v7978_v38 = vpop.f32.mrb[11].mxu0  ;;  %v8943_v41 = vpop.f32.mrb[11].mxu1 }
 0x72c   : > { %v9093_v26 = vmax.f32 %v17171_v14, 0.0  ;;  %v9095_v53 = vmax.f32 %v17235_v6, 0.0  ;;  %v17173_v9 = vadd.f32 %v7978_v38, %v22065_v11  ;;  %v17237_v25 = vadd.f32 %v8943_v41, %v22067_v12 }
 0x72d   : > { %v9096_v16 = vmax.f32 %v17172_v29, 0.0  ;;  %v9098_v27 = vmax.f32 %v17236_v54, 0.0 }
 0x72e   : > { %v16402_v15 = vpack.c.bf16 %v9093_v26, %v9092_v43  ;;  %v16403_v47 = vpack.c.bf16 %v9095_v53, %v9094_v20  ;;  %v9097_v46 = vmax.f32 %v17173_v9, 0.0  ;;  %v9099_v18 = vmax.f32 %v17237_v25, 0.0 }
 0x730   : > { %9596 = vst [vmem:[%s20279_s27 + $0x40] sm:$0xff] %v16402_v15  ;;  %9597 = vst [vmem:[%s20279_s27 + $0x48] sm:$0xff] %v16403_v47  ;;  %v16404_v35 = vpack.c.bf16 %v9097_v46, %v9096_v16  ;;  %v16405_v40 = vpack.c.bf16 %v9099_v18, %v9098_v27  ;;  %v7982_v63 = vpop.f32.mrb[12].mxu0  ;;  %v8947_v36 = vpop.f32.mrb[12].mxu1 }
 0x731   : > { %v17174_v30 = vadd.f32 %v7982_v63, %v22061_v55  ;;  %v17238_v32 = vadd.f32 %v8947_v36, %v22063_v33  ;;  %v7984_v57 = vpop.f32.mrb[13].mxu0  ;;  %v8949_v50 = vpop.f32.mrb[13].mxu1 }
 0x732   : > { %9598 = vst [vmem:[%s20279_s27 + $0x50] sm:$0xff] %v16404_v35  ;;  %9599 = vst [vmem:[%s20279_s27 + $0x58] sm:$0xff] %v16405_v40  ;;  %v17175_v52 = vadd.f32 %v7984_v57, %v22065_v11  ;;  %v17239_v49 = vadd.f32 %v8949_v50, %v22067_v12  ;;  %v7986_v22 = vpop.f32.mrb[14].mxu0  ;;  %v8951_v10 = vpop.f32.mrb[14].mxu1 }
 0x733   : > { %v9100_v45 = vmax.f32 %v17174_v30, 0.0  ;;  %v9102_v23 = vmax.f32 %v17238_v32, 0.0  ;;  %v17176_v61 = vadd.f32 %v7986_v22, %v22061_v55  ;;  %v17240_v56 = vadd.f32 %v8951_v10, %v22063_v33  ;;  %v7988_v5 = vpop.f32.mrb[15].mxu0  ;;  %v8953_v19 = vpop.f32.mrb[15].mxu1 }
 0x734   : > { %v9101_v39 = vmax.f32 %v17175_v52, 0.0  ;;  %v9103_v62 = vmax.f32 %v17239_v49, 0.0  ;;  %v17177_v31 = vadd.f32 %v7988_v5, %v22065_v11  ;;  %v17241_v34 = vadd.f32 %v8953_v19, %v22067_v12 }
 0x735   : > { %v9104_v0 = vmax.f32 %v17176_v61, 0.0  ;;  %v9106_v60 = vmax.f32 %v17240_v56, 0.0 }
 0x736   : > { %v16406_v2 = vpack.c.bf16 %v9101_v39, %v9100_v45  ;;  %v16407_v4 = vpack.c.bf16 %v9103_v62, %v9102_v23  ;;  %v9105_v44 = vmax.f32 %v17177_v31, 0.0  ;;  %v9107_v1 = vmax.f32 %v17241_v34, 0.0 }
 0x738   : > { %9600 = vst [vmem:[%s20279_s27 + $0x60] sm:$0xff] %v16406_v2  ;;  %9601 = vst [vmem:[%s20279_s27 + $0x68] sm:$0xff] %v16407_v4  ;;  %v16408_v28 = vpack.c.bf16 %v9105_v44, %v9104_v0  ;;  %v16409_v3 = vpack.c.bf16 %v9107_v1, %v9106_v60  ;;  %v7992_v48 = vpop.f32.mrb[16].mxu0  ;;  %v8957_v37 = vpop.f32.mrb[16].mxu1 }
 0x739   : > { %v17178_v59 = vadd.f32 %v7992_v48, %v22061_v55  ;;  %v17242_v7 = vadd.f32 %v8957_v37, %v22063_v33  ;;  %v7994_v21 = vpop.f32.mrb[17].mxu0  ;;  %v8959_v24 = vpop.f32.mrb[17].mxu1 }
 0x73a   : > { %9602 = vst [vmem:[%s20279_s27 + $0x70] sm:$0xff] %v16408_v28  ;;  %9603 = vst [vmem:[%s20279_s27 + $0x78] sm:$0xff] %v16409_v3  ;;  %v17179_v17 = vadd.f32 %v7994_v21, %v22065_v11  ;;  %v17243_v8 = vadd.f32 %v8959_v24, %v22067_v12  ;;  %v7996_v51 = vpop.f32.mrb[18].mxu0  ;;  %v8961_v13 = vpop.f32.mrb[18].mxu1 }
 0x73b   : > { %v9108_v14 = vmax.f32 %v17178_v59, 0.0  ;;  %v9110_v6 = vmax.f32 %v17242_v7, 0.0  ;;  %v17180_v58 = vadd.f32 %v7996_v51, %v22061_v55  ;;  %v17244_v42 = vadd.f32 %v8961_v13, %v22063_v33  ;;  %v7998_v43 = vpop.f32.mrb[19].mxu0  ;;  %v8963_v20 = vpop.f32.mrb[19].mxu1 }
 0x73c   : > { %v9109_v29 = vmax.f32 %v17179_v17, 0.0  ;;  %v9111_v54 = vmax.f32 %v17243_v8, 0.0  ;;  %v17181_v38 = vadd.f32 %v7998_v43, %v22065_v11  ;;  %v17245_v41 = vadd.f32 %v8963_v20, %v22067_v12 }
 0x73d   : > { %v9112_v26 = vmax.f32 %v17180_v58, 0.0  ;;  %v9114_v53 = vmax.f32 %v17244_v42, 0.0 }
 0x73e   : > { %v16410_v9 = vpack.c.bf16 %v9109_v29, %v9108_v14  ;;  %v16411_v25 = vpack.c.bf16 %v9111_v54, %v9110_v6  ;;  %v9113_v16 = vmax.f32 %v17181_v38, 0.0  ;;  %v9115_v27 = vmax.f32 %v17245_v41, 0.0 }
 0x740   : > { %9604 = vst [vmem:[%s20279_s27 + $0x80] sm:$0xff] %v16410_v9  ;;  %9605 = vst [vmem:[%s20279_s27 + $0x88] sm:$0xff] %v16411_v25  ;;  %v16412_v15 = vpack.c.bf16 %v9113_v16, %v9112_v26  ;;  %v16413_v47 = vpack.c.bf16 %v9115_v27, %v9114_v53  ;;  %v8002_v46 = vpop.f32.mrb[20].mxu0  ;;  %v8967_v18 = vpop.f32.mrb[20].mxu1 }
 0x741   : > { %v17182_v35 = vadd.f32 %v8002_v46, %v22061_v55  ;;  %v17246_v40 = vadd.f32 %v8967_v18, %v22063_v33  ;;  %v8004_v63 = vpop.f32.mrb[21].mxu0  ;;  %v8969_v36 = vpop.f32.mrb[21].mxu1 }
 0x742   : > { %9606 = vst [vmem:[%s20279_s27 + $0x90] sm:$0xff] %v16412_v15  ;;  %9607 = vst [vmem:[%s20279_s27 + $0x98] sm:$0xff] %v16413_v47  ;;  %v17183_v30 = vadd.f32 %v8004_v63, %v22065_v11  ;;  %v17247_v32 = vadd.f32 %v8969_v36, %v22067_v12  ;;  %v8006_v57 = vpop.f32.mrb[22].mxu0  ;;  %v8971_v50 = vpop.f32.mrb[22].mxu1 }
 0x743   : > { %v9116_v52 = vmax.f32 %v17182_v35, 0.0  ;;  %v9118_v49 = vmax.f32 %v17246_v40, 0.0  ;;  %v17184_v22 = vadd.f32 %v8006_v57, %v22061_v55  ;;  %v17248_v10 = vadd.f32 %v8971_v50, %v22063_v33  ;;  %v8008_v45 = vpop.f32.mrb[23].mxu0  ;;  %v8973_v23 = vpop.f32.mrb[23].mxu1 }
 0x744   : > { %v9117_v61 = vmax.f32 %v17183_v30, 0.0  ;;  %v9119_v56 = vmax.f32 %v17247_v32, 0.0  ;;  %v17185_v5 = vadd.f32 %v8008_v45, %v22065_v11  ;;  %v17249_v19 = vadd.f32 %v8973_v23, %v22067_v12 }
 0x745   : > { %v9120_v39 = vmax.f32 %v17184_v22, 0.0  ;;  %v9122_v62 = vmax.f32 %v17248_v10, 0.0 }
 0x746   : > { %v16414_v31 = vpack.c.bf16 %v9117_v61, %v9116_v52  ;;  %v16415_v34 = vpack.c.bf16 %v9119_v56, %v9118_v49  ;;  %v9121_v0 = vmax.f32 %v17185_v5, 0.0  ;;  %v9123_v60 = vmax.f32 %v17249_v19, 0.0 }
 0x748   : > { %9608 = vst [vmem:[%s20279_s27 + $0xa0] sm:$0xff] %v16414_v31  ;;  %9609 = vst [vmem:[%s20279_s27 + $0xa8] sm:$0xff] %v16415_v34  ;;  %v16416_v2 = vpack.c.bf16 %v9121_v0, %v9120_v39  ;;  %v16417_v4 = vpack.c.bf16 %v9123_v60, %v9122_v62  ;;  %v8012_v44 = vpop.f32.mrb[24].mxu0  ;;  %v8977_v1 = vpop.f32.mrb[24].mxu1 }
 0x749   : > { %v17186_v28 = vadd.f32 %v8012_v44, %v22061_v55  ;;  %v17250_v3 = vadd.f32 %v8977_v1, %v22063_v33  ;;  %v8014_v48 = vpop.f32.mrb[25].mxu0  ;;  %v8979_v37 = vpop.f32.mrb[25].mxu1 }
 0x74a   : > { %9610 = vst [vmem:[%s20279_s27 + $0xb0] sm:$0xff] %v16416_v2  ;;  %9611 = vst [vmem:[%s20279_s27 + $0xb8] sm:$0xff] %v16417_v4  ;;  %v17187_v59 = vadd.f32 %v8014_v48, %v22065_v11  ;;  %v17251_v7 = vadd.f32 %v8979_v37, %v22067_v12  ;;  %v8016_v21 = vpop.f32.mrb[26].mxu0  ;;  %v8981_v24 = vpop.f32.mrb[26].mxu1 }
 0x74b   : > { %v9124_v17 = vmax.f32 %v17186_v28, 0.0  ;;  %v9126_v8 = vmax.f32 %v17250_v3, 0.0  ;;  %v17188_v51 = vadd.f32 %v8016_v21, %v22061_v55  ;;  %v17252_v13 = vadd.f32 %v8981_v24, %v22063_v33  ;;  %v8018_v14 = vpop.f32.mrb[27].mxu0  ;;  %v8983_v6 = vpop.f32.mrb[27].mxu1 }
 0x74c   : > { %v9125_v58 = vmax.f32 %v17187_v59, 0.0  ;;  %v9127_v42 = vmax.f32 %v17251_v7, 0.0  ;;  %v17189_v43 = vadd.f32 %v8018_v14, %v22065_v11  ;;  %v17253_v20 = vadd.f32 %v8983_v6, %v22067_v12 }
 0x74d   : > { %v9128_v29 = vmax.f32 %v17188_v51, 0.0  ;;  %v9130_v54 = vmax.f32 %v17252_v13, 0.0 }
 0x74e   : > { %v16418_v38 = vpack.c.bf16 %v9125_v58, %v9124_v17  ;;  %v16419_v41 = vpack.c.bf16 %v9127_v42, %v9126_v8  ;;  %v9129_v26 = vmax.f32 %v17189_v43, 0.0  ;;  %v9131_v53 = vmax.f32 %v17253_v20, 0.0 }
 0x750   : > { %9612 = vst [vmem:[%s20279_s27 + $0xc0] sm:$0xff] %v16418_v38  ;;  %9613 = vst [vmem:[%s20279_s27 + $0xc8] sm:$0xff] %v16419_v41  ;;  %v16420_v9 = vpack.c.bf16 %v9129_v26, %v9128_v29  ;;  %v16421_v25 = vpack.c.bf16 %v9131_v53, %v9130_v54  ;;  %v8022_v16 = vpop.f32.mrb[28].mxu0  ;;  %v8987_v27 = vpop.f32.mrb[28].mxu1 }
 0x751   : > { %v17190_v15 = vadd.f32 %v8022_v16, %v22061_v55  ;;  %v17254_v47 = vadd.f32 %v8987_v27, %v22063_v33  ;;  %v8024_v46 = vpop.f32.mrb[29].mxu0  ;;  %v8989_v18 = vpop.f32.mrb[29].mxu1 }
 0x752   : > { %9614 = vst [vmem:[%s20279_s27 + $0xd0] sm:$0xff] %v16420_v9  ;;  %9615 = vst [vmem:[%s20279_s27 + $0xd8] sm:$0xff] %v16421_v25  ;;  %v17191_v35 = vadd.f32 %v8024_v46, %v22065_v11  ;;  %v17255_v40 = vadd.f32 %v8989_v18, %v22067_v12  ;;  %v8026_v63 = vpop.f32.mrb[30].mxu0  ;;  %v8991_v36 = vpop.f32.mrb[30].mxu1 }
 0x753   : > { %v9132_v30 = vmax.f32 %v17190_v15, 0.0  ;;  %v9134_v32 = vmax.f32 %v17254_v47, 0.0  ;;  %v17192_v57 = vadd.f32 %v8026_v63, %v22061_v55  ;;  %v17256_v50 = vadd.f32 %v8991_v36, %v22063_v33  ;;  %v8028_v52 = vpop.f32.mrb[31].mxu0  ;;  %v8993_v49 = vpop.f32.mrb[31].mxu1 }
 0x754   : > { %v9133_v22 = vmax.f32 %v17191_v35, 0.0  ;;  %v9135_v10 = vmax.f32 %v17255_v40, 0.0  ;;  %v17193_v45 = vadd.f32 %v8028_v52, %v22065_v11  ;;  %v17257_v23 = vadd.f32 %v8993_v49, %v22067_v12 }
 0x755   : > { %v9136_v61 = vmax.f32 %v17192_v57, 0.0  ;;  %v9138_v56 = vmax.f32 %v17256_v50, 0.0 }
 0x756   : > { %v16422_v5 = vpack.c.bf16 %v9133_v22, %v9132_v30  ;;  %v16423_v19 = vpack.c.bf16 %v9135_v10, %v9134_v32  ;;  %v9137_v39 = vmax.f32 %v17193_v45, 0.0  ;;  %v9139_v62 = vmax.f32 %v17257_v23, 0.0 }
 0x758   : > { %9616 = vst [vmem:[%s20279_s27 + $0xe0] sm:$0xff] %v16422_v5  ;;  %9617 = vst [vmem:[%s20279_s27 + $0xe8] sm:$0xff] %v16423_v19  ;;  %v16424_v31 = vpack.c.bf16 %v9137_v39, %v9136_v61  ;;  %v16425_v34 = vpack.c.bf16 %v9139_v62, %v9138_v56  ;;  %v8032_v0 = vpop.f32.mrb[32].mxu0  ;;  %v8997_v60 = vpop.f32.mrb[32].mxu1 }
 0x759   : > { %v17194_v2 = vadd.f32 %v8032_v0, %v22061_v55  ;;  %v17258_v4 = vadd.f32 %v8997_v60, %v22063_v33  ;;  %v8034_v44 = vpop.f32.mrb[33].mxu0  ;;  %v8999_v1 = vpop.f32.mrb[33].mxu1 }
 0x75a   : > { %9618 = vst [vmem:[%s20279_s27 + $0xf0] sm:$0xff] %v16424_v31  ;;  %9619 = vst [vmem:[%s20279_s27 + $0xf8] sm:$0xff] %v16425_v34  ;;  %v17195_v28 = vadd.f32 %v8034_v44, %v22065_v11  ;;  %v17259_v3 = vadd.f32 %v8999_v1, %v22067_v12  ;;  %v8036_v48 = vpop.f32.mrb[34].mxu0  ;;  %v9001_v37 = vpop.f32.mrb[34].mxu1 }
 0x75b   : > { %v9140_v59 = vmax.f32 %v17194_v2, 0.0  ;;  %v9142_v7 = vmax.f32 %v17258_v4, 0.0  ;;  %v17196_v21 = vadd.f32 %v8036_v48, %v22061_v55  ;;  %v17260_v24 = vadd.f32 %v9001_v37, %v22063_v33  ;;  %v8038_v17 = vpop.f32.mrb[35].mxu0  ;;  %v9003_v8 = vpop.f32.mrb[35].mxu1 }
 0x75c   : > { %v9141_v51 = vmax.f32 %v17195_v28, 0.0  ;;  %v9143_v13 = vmax.f32 %v17259_v3, 0.0  ;;  %v17197_v14 = vadd.f32 %v8038_v17, %v22065_v11  ;;  %v17261_v6 = vadd.f32 %v9003_v8, %v22067_v12 }
 0x75d   : > { %v9144_v58 = vmax.f32 %v17196_v21, 0.0  ;;  %v9146_v42 = vmax.f32 %v17260_v24, 0.0 }
 0x75e   : > { %v16426_v43 = vpack.c.bf16 %v9141_v51, %v9140_v59  ;;  %v16427_v20 = vpack.c.bf16 %v9143_v13, %v9142_v7  ;;  %v9145_v29 = vmax.f32 %v17197_v14, 0.0  ;;  %v9147_v54 = vmax.f32 %v17261_v6, 0.0 }
 0x760   : > { %9620 = vst [vmem:[%s20279_s27 + $0x100] sm:$0xff] %v16426_v43  ;;  %9621 = vst [vmem:[%s20279_s27 + $0x108] sm:$0xff] %v16427_v20  ;;  %v16428_v38 = vpack.c.bf16 %v9145_v29, %v9144_v58  ;;  %v16429_v41 = vpack.c.bf16 %v9147_v54, %v9146_v42  ;;  %v8042_v26 = vpop.f32.mrb[36].mxu0  ;;  %v9007_v53 = vpop.f32.mrb[36].mxu1 }
 0x761   : > { %v17198_v9 = vadd.f32 %v8042_v26, %v22061_v55  ;;  %v17262_v25 = vadd.f32 %v9007_v53, %v22063_v33  ;;  %v8044_v16 = vpop.f32.mrb[37].mxu0  ;;  %v9009_v27 = vpop.f32.mrb[37].mxu1 }
 0x762   : > { %9622 = vst [vmem:[%s20279_s27 + $0x110] sm:$0xff] %v16428_v38  ;;  %9623 = vst [vmem:[%s20279_s27 + $0x118] sm:$0xff] %v16429_v41  ;;  %v17199_v15 = vadd.f32 %v8044_v16, %v22065_v11  ;;  %v17263_v47 = vadd.f32 %v9009_v27, %v22067_v12  ;;  %v8046_v46 = vpop.f32.mrb[38].mxu0  ;;  %v9011_v18 = vpop.f32.mrb[38].mxu1 }
 0x763   : > { %v9148_v35 = vmax.f32 %v17198_v9, 0.0  ;;  %v9150_v40 = vmax.f32 %v17262_v25, 0.0  ;;  %v17200_v63 = vadd.f32 %v8046_v46, %v22061_v55  ;;  %v17264_v36 = vadd.f32 %v9011_v18, %v22063_v33  ;;  %v8048_v30 = vpop.f32.mrb[39].mxu0  ;;  %v9013_v32 = vpop.f32.mrb[39].mxu1 }
 0x764   : > { %v9149_v57 = vmax.f32 %v17199_v15, 0.0  ;;  %v9151_v50 = vmax.f32 %v17263_v47, 0.0  ;;  %v17201_v52 = vadd.f32 %v8048_v30, %v22065_v11  ;;  %v17265_v49 = vadd.f32 %v9013_v32, %v22067_v12 }
 0x765   : > { %v9152_v22 = vmax.f32 %v17200_v63, 0.0  ;;  %v9154_v10 = vmax.f32 %v17264_v36, 0.0 }
 0x766   : > { %v16430_v45 = vpack.c.bf16 %v9149_v57, %v9148_v35  ;;  %v16431_v23 = vpack.c.bf16 %v9151_v50, %v9150_v40  ;;  %v9153_v61 = vmax.f32 %v17201_v52, 0.0  ;;  %v9155_v56 = vmax.f32 %v17265_v49, 0.0 }
 0x768   : > { %9624 = vst [vmem:[%s20279_s27 + $0x120] sm:$0xff] %v16430_v45  ;;  %9625 = vst [vmem:[%s20279_s27 + $0x128] sm:$0xff] %v16431_v23  ;;  %v16432_v5 = vpack.c.bf16 %v9153_v61, %v9152_v22  ;;  %v16433_v19 = vpack.c.bf16 %v9155_v56, %v9154_v10  ;;  %v8052_v39 = vpop.f32.mrb[40].mxu0  ;;  %v9017_v62 = vpop.f32.mrb[40].mxu1 }
 0x769   : > { %v17202_v31 = vadd.f32 %v8052_v39, %v22061_v55  ;;  %v17266_v34 = vadd.f32 %v9017_v62, %v22063_v33  ;;  %v8054_v0 = vpop.f32.mrb[41].mxu0  ;;  %v9019_v60 = vpop.f32.mrb[41].mxu1 }
 0x76a   : > { %9626 = vst [vmem:[%s20279_s27 + $0x130] sm:$0xff] %v16432_v5  ;;  %9627 = vst [vmem:[%s20279_s27 + $0x138] sm:$0xff] %v16433_v19  ;;  %v17203_v2 = vadd.f32 %v8054_v0, %v22065_v11  ;;  %v17267_v4 = vadd.f32 %v9019_v60, %v22067_v12  ;;  %v8056_v44 = vpop.f32.mrb[42].mxu0  ;;  %v9021_v1 = vpop.f32.mrb[42].mxu1 }
 0x76b   : > { %v9156_v28 = vmax.f32 %v17202_v31, 0.0  ;;  %v9158_v3 = vmax.f32 %v17266_v34, 0.0  ;;  %v17204_v48 = vadd.f32 %v8056_v44, %v22061_v55  ;;  %v17268_v37 = vadd.f32 %v9021_v1, %v22063_v33  ;;  %v8058_v59 = vpop.f32.mrb[43].mxu0  ;;  %v9023_v7 = vpop.f32.mrb[43].mxu1 }
 0x76c   : > { %v9157_v21 = vmax.f32 %v17203_v2, 0.0  ;;  %v9159_v24 = vmax.f32 %v17267_v4, 0.0  ;;  %v17205_v17 = vadd.f32 %v8058_v59, %v22065_v11  ;;  %v17269_v8 = vadd.f32 %v9023_v7, %v22067_v12 }
 0x76d   : > { %v9160_v51 = vmax.f32 %v17204_v48, 0.0  ;;  %v9162_v13 = vmax.f32 %v17268_v37, 0.0 }
 0x76e   : > { %v16434_v14 = vpack.c.bf16 %v9157_v21, %v9156_v28  ;;  %v16435_v6 = vpack.c.bf16 %v9159_v24, %v9158_v3  ;;  %v9161_v58 = vmax.f32 %v17205_v17, 0.0  ;;  %v9163_v42 = vmax.f32 %v17269_v8, 0.0 }
 0x770   : > { %9628 = vst [vmem:[%s20279_s27 + $0x140] sm:$0xff] %v16434_v14  ;;  %9629 = vst [vmem:[%s20279_s27 + $0x148] sm:$0xff] %v16435_v6  ;;  %v16436_v43 = vpack.c.bf16 %v9161_v58, %v9160_v51  ;;  %v16437_v20 = vpack.c.bf16 %v9163_v42, %v9162_v13  ;;  %v8062_v29 = vpop.f32.mrb[44].mxu0  ;;  %v9027_v54 = vpop.f32.mrb[44].mxu1 }
 0x771   : > { %v17206_v38 = vadd.f32 %v8062_v29, %v22061_v55  ;;  %v17270_v41 = vadd.f32 %v9027_v54, %v22063_v33  ;;  %v8064_v26 = vpop.f32.mrb[45].mxu0  ;;  %v9029_v53 = vpop.f32.mrb[45].mxu1 }
 0x772   : > { %9630 = vst [vmem:[%s20279_s27 + $0x150] sm:$0xff] %v16436_v43  ;;  %9631 = vst [vmem:[%s20279_s27 + $0x158] sm:$0xff] %v16437_v20  ;;  %v17207_v9 = vadd.f32 %v8064_v26, %v22065_v11  ;;  %v17271_v25 = vadd.f32 %v9029_v53, %v22067_v12  ;;  %v8066_v16 = vpop.f32.mrb[46].mxu0  ;;  %v9031_v27 = vpop.f32.mrb[46].mxu1 }
 0x773   : > { %v9164_v15 = vmax.f32 %v17206_v38, 0.0  ;;  %v9166_v47 = vmax.f32 %v17270_v41, 0.0  ;;  %v17208_v46 = vadd.f32 %v8066_v16, %v22061_v55  ;;  %v17272_v18 = vadd.f32 %v9031_v27, %v22063_v33  ;;  %v8068_v35 = vpop.f32.mrb[47].mxu0  ;;  %v9033_v40 = vpop.f32.mrb[47].mxu1 }
 0x774   : > { %v9165_v63 = vmax.f32 %v17207_v9, 0.0  ;;  %v9167_v36 = vmax.f32 %v17271_v25, 0.0  ;;  %v17209_v30 = vadd.f32 %v8068_v35, %v22065_v11  ;;  %v17273_v32 = vadd.f32 %v9033_v40, %v22067_v12 }
 0x775   : > { %v9168_v57 = vmax.f32 %v17208_v46, 0.0  ;;  %v9170_v50 = vmax.f32 %v17272_v18, 0.0 }
 0x776   : > { %v16438_v52 = vpack.c.bf16 %v9165_v63, %v9164_v15  ;;  %v16439_v49 = vpack.c.bf16 %v9167_v36, %v9166_v47  ;;  %v9169_v22 = vmax.f32 %v17209_v30, 0.0  ;;  %v9171_v10 = vmax.f32 %v17273_v32, 0.0 }
 0x778   : > { %9632 = vst [vmem:[%s20279_s27 + $0x160] sm:$0xff] %v16438_v52  ;;  %9633 = vst [vmem:[%s20279_s27 + $0x168] sm:$0xff] %v16439_v49  ;;  %v16440_v45 = vpack.c.bf16 %v9169_v22, %v9168_v57  ;;  %v16441_v23 = vpack.c.bf16 %v9171_v10, %v9170_v50  ;;  %v8072_v61 = vpop.f32.mrb[48].mxu0  ;;  %v9037_v56 = vpop.f32.mrb[48].mxu1 }
 0x779   : > { %v17210_v5 = vadd.f32 %v8072_v61, %v22061_v55  ;;  %v17274_v19 = vadd.f32 %v9037_v56, %v22063_v33  ;;  %v8074_v39 = vpop.f32.mrb[49].mxu0  ;;  %v9039_v62 = vpop.f32.mrb[49].mxu1 }
 0x77a   : > { %9634 = vst [vmem:[%s20279_s27 + $0x170] sm:$0xff] %v16440_v45  ;;  %9635 = vst [vmem:[%s20279_s27 + $0x178] sm:$0xff] %v16441_v23  ;;  %v17211_v31 = vadd.f32 %v8074_v39, %v22065_v11  ;;  %v17275_v34 = vadd.f32 %v9039_v62, %v22067_v12  ;;  %v8076_v0 = vpop.f32.mrb[50].mxu0  ;;  %v9041_v60 = vpop.f32.mrb[50].mxu1 }
 0x77b   : > { %v9172_v2 = vmax.f32 %v17210_v5, 0.0  ;;  %v9174_v4 = vmax.f32 %v17274_v19, 0.0  ;;  %v17212_v44 = vadd.f32 %v8076_v0, %v22061_v55  ;;  %v17276_v1 = vadd.f32 %v9041_v60, %v22063_v33  ;;  %v8078_v28 = vpop.f32.mrb[51].mxu0  ;;  %v9043_v3 = vpop.f32.mrb[51].mxu1 }
 0x77c   : > { %v9173_v48 = vmax.f32 %v17211_v31, 0.0  ;;  %v9175_v37 = vmax.f32 %v17275_v34, 0.0  ;;  %v17213_v59 = vadd.f32 %v8078_v28, %v22065_v11  ;;  %v17277_v7 = vadd.f32 %v9043_v3, %v22067_v12 }
 0x77d   : > { %v9176_v21 = vmax.f32 %v17212_v44, 0.0  ;;  %v9178_v24 = vmax.f32 %v17276_v1, 0.0 }
 0x77e   : > { %v16442_v17 = vpack.c.bf16 %v9173_v48, %v9172_v2  ;;  %v16443_v8 = vpack.c.bf16 %v9175_v37, %v9174_v4  ;;  %v9177_v51 = vmax.f32 %v17213_v59, 0.0  ;;  %v9179_v13 = vmax.f32 %v17277_v7, 0.0 }
 0x780   : > { %9636 = vst [vmem:[%s20279_s27 + $0x180] sm:$0xff] %v16442_v17  ;;  %9637 = vst [vmem:[%s20279_s27 + $0x188] sm:$0xff] %v16443_v8  ;;  %v16444_v14 = vpack.c.bf16 %v9177_v51, %v9176_v21  ;;  %v16445_v6 = vpack.c.bf16 %v9179_v13, %v9178_v24  ;;  %v8082_v58 = vpop.f32.mrb[52].mxu0  ;;  %v9047_v42 = vpop.f32.mrb[52].mxu1 }
 0x781   : > { %v17214_v43 = vadd.f32 %v8082_v58, %v22061_v55  ;;  %v17278_v20 = vadd.f32 %v9047_v42, %v22063_v33  ;;  %v8084_v29 = vpop.f32.mrb[53].mxu0  ;;  %v9049_v54 = vpop.f32.mrb[53].mxu1 }
 0x782   : > { %9638 = vst [vmem:[%s20279_s27 + $0x190] sm:$0xff] %v16444_v14  ;;  %9639 = vst [vmem:[%s20279_s27 + $0x198] sm:$0xff] %v16445_v6  ;;  %v17215_v38 = vadd.f32 %v8084_v29, %v22065_v11  ;;  %v17279_v41 = vadd.f32 %v9049_v54, %v22067_v12  ;;  %v8086_v26 = vpop.f32.mrb[54].mxu0  ;;  %v9051_v53 = vpop.f32.mrb[54].mxu1 }
 0x783   : > { %v9180_v9 = vmax.f32 %v17214_v43, 0.0  ;;  %v9182_v25 = vmax.f32 %v17278_v20, 0.0  ;;  %v17216_v16 = vadd.f32 %v8086_v26, %v22061_v55  ;;  %v17280_v27 = vadd.f32 %v9051_v53, %v22063_v33  ;;  %v8088_v15 = vpop.f32.mrb[55].mxu0  ;;  %v9053_v47 = vpop.f32.mrb[55].mxu1 }
 0x784   : > { %v9181_v46 = vmax.f32 %v17215_v38, 0.0  ;;  %v9183_v18 = vmax.f32 %v17279_v41, 0.0  ;;  %v17217_v35 = vadd.f32 %v8088_v15, %v22065_v11  ;;  %v17281_v40 = vadd.f32 %v9053_v47, %v22067_v12 }
 0x785   : > { %v9184_v63 = vmax.f32 %v17216_v16, 0.0  ;;  %v9186_v36 = vmax.f32 %v17280_v27, 0.0 }
 0x786   : > { %v16446_v30 = vpack.c.bf16 %v9181_v46, %v9180_v9  ;;  %v16447_v32 = vpack.c.bf16 %v9183_v18, %v9182_v25  ;;  %v9185_v57 = vmax.f32 %v17217_v35, 0.0  ;;  %v9187_v50 = vmax.f32 %v17281_v40, 0.0 }
 0x788   : > { %9640 = vst [vmem:[%s20279_s27 + $0x1a0] sm:$0xff] %v16446_v30  ;;  %9641 = vst [vmem:[%s20279_s27 + $0x1a8] sm:$0xff] %v16447_v32  ;;  %v16448_v52 = vpack.c.bf16 %v9185_v57, %v9184_v63  ;;  %v16449_v49 = vpack.c.bf16 %v9187_v50, %v9186_v36  ;;  %v8092_v22 = vpop.f32.mrb[56].mxu0  ;;  %v9057_v10 = vpop.f32.mrb[56].mxu1 }
 0x789   : > { %v17218_v45 = vadd.f32 %v8092_v22, %v22061_v55  ;;  %v17282_v23 = vadd.f32 %v9057_v10, %v22063_v33  ;;  %v8094_v61 = vpop.f32.mrb[57].mxu0  ;;  %v9059_v56 = vpop.f32.mrb[57].mxu1 }
 0x78a   : > { %9642 = vst [vmem:[%s20279_s27 + $0x1b0] sm:$0xff] %v16448_v52  ;;  %9643 = vst [vmem:[%s20279_s27 + $0x1b8] sm:$0xff] %v16449_v49  ;;  %v17219_v5 = vadd.f32 %v8094_v61, %v22065_v11  ;;  %v17283_v19 = vadd.f32 %v9059_v56, %v22067_v12  ;;  %v8096_v39 = vpop.f32.mrb[58].mxu0  ;;  %v9061_v62 = vpop.f32.mrb[58].mxu1 }
 0x78b   : > { %v9188_v31 = vmax.f32 %v17218_v45, 0.0  ;;  %v9190_v34 = vmax.f32 %v17282_v23, 0.0  ;;  %v17220_v0 = vadd.f32 %v8096_v39, %v22061_v55  ;;  %v17284_v60 = vadd.f32 %v9061_v62, %v22063_v33  ;;  %v8098_v2 = vpop.f32.mrb[59].mxu0  ;;  %v9063_v4 = vpop.f32.mrb[59].mxu1 }
 0x78c   : > { %v9189_v44 = vmax.f32 %v17219_v5, 0.0  ;;  %v9191_v1 = vmax.f32 %v17283_v19, 0.0  ;;  %v17221_v28 = vadd.f32 %v8098_v2, %v22065_v11  ;;  %v17285_v3 = vadd.f32 %v9063_v4, %v22067_v12 }
 0x78d   : > { %v9192_v48 = vmax.f32 %v17220_v0, 0.0  ;;  %v9194_v37 = vmax.f32 %v17284_v60, 0.0 }
 0x78e   : > { %v16450_v59 = vpack.c.bf16 %v9189_v44, %v9188_v31  ;;  %v16451_v7 = vpack.c.bf16 %v9191_v1, %v9190_v34  ;;  %v9193_v21 = vmax.f32 %v17221_v28, 0.0  ;;  %v9195_v24 = vmax.f32 %v17285_v3, 0.0 }
 0x790   : > { %9644 = vst [vmem:[%s20279_s27 + $0x1c0] sm:$0xff] %v16450_v59  ;;  %9645 = vst [vmem:[%s20279_s27 + $0x1c8] sm:$0xff] %v16451_v7  ;;  %v16452_v17 = vpack.c.bf16 %v9193_v21, %v9192_v48  ;;  %v16453_v8 = vpack.c.bf16 %v9195_v24, %v9194_v37  ;;  %v8102_v51 = vpop.f32.mrb[60].mxu0  ;;  %v9067_v13 = vpop.f32.mrb[60].mxu1 }
 0x791   : > { %v17222_v14 = vadd.f32 %v8102_v51, %v22061_v55  ;;  %v17286_v6 = vadd.f32 %v9067_v13, %v22063_v33  ;;  %v8104_v58 = vpop.f32.mrb[61].mxu0  ;;  %v9069_v42 = vpop.f32.mrb[61].mxu1 }
 0x792   : > { %9646 = vst [vmem:[%s20279_s27 + $0x1d0] sm:$0xff] %v16452_v17  ;;  %9647 = vst [vmem:[%s20279_s27 + $0x1d8] sm:$0xff] %v16453_v8  ;;  %v17223_v43 = vadd.f32 %v8104_v58, %v22065_v11  ;;  %v17287_v20 = vadd.f32 %v9069_v42, %v22067_v12  ;;  %v8106_v29 = vpop.f32.mrb[62].mxu0  ;;  %v9071_v54 = vpop.f32.mrb[62].mxu1 }
 0x793   : > { %v9196_v38 = vmax.f32 %v17222_v14, 0.0  ;;  %v9198_v41 = vmax.f32 %v17286_v6, 0.0  ;;  %v17224_v26 = vadd.f32 %v8106_v29, %v22061_v55  ;;  %v17288_v53 = vadd.f32 %v9071_v54, %v22063_v33  ;;  %v8108_v9 = vpop.f32.mrb[63].mxu0  ;;  %v9073_v25 = vpop.f32.mrb[63].mxu1 }
 0x794   : > { %v9197_v16 = vmax.f32 %v17223_v43, 0.0  ;;  %v9199_v27 = vmax.f32 %v17287_v20, 0.0  ;;  %v17225_v15 = vadd.f32 %v8108_v9, %v22065_v11  ;;  %v17289_v47 = vadd.f32 %v9073_v25, %v22067_v12 }
 0x795   : > { %v9200_v46 = vmax.f32 %v17224_v26, 0.0  ;;  %v9202_v18 = vmax.f32 %v17288_v53, 0.0 }
 0x796   : > { %v16454_v35 = vpack.c.bf16 %v9197_v16, %v9196_v38  ;;  %v16455_v40 = vpack.c.bf16 %v9199_v27, %v9198_v41  ;;  %v9201_v63 = vmax.f32 %v17225_v15, 0.0  ;;  %v9203_v36 = vmax.f32 %v17289_v47, 0.0 }
 0x798   : > { %9648 = vst [vmem:[%s20279_s27 + $0x1e0] sm:$0xff] %v16454_v35  ;;  %9649 = vst [vmem:[%s20279_s27 + $0x1e8] sm:$0xff] %v16455_v40  ;;  %v16456_v55 = vpack.c.bf16 %v9201_v63, %v9200_v46  ;;  %v16457_v33 = vpack.c.bf16 %v9203_v36, %v9202_v18 }
 0x79a   : > { %9650 = vst [vmem:[%s20279_s27 + $0x1f0] sm:$0xff] %v16456_v55  ;;  %9651 = vst [vmem:[%s20279_s27 + $0x1f8] sm:$0xff] %v16457_v33 }
 0x79b PF: > { %p15778_p10 = scmp.ne.s32.totalorder %s20026_s18, 2 }
 0x79c   : > { %v19424_v11 = vld [vmem:[%s20257_s26 + $0x4] ss:$16 sps:$4 sm:$0xff] (!%p15778_p10)   ;;  %v19426_v12 = vld [vmem:[%s20257_s26 + $0xc] ss:$16 sps:$4 sm:$0xff] (!%p15778_p10)   ;;  %v19428_v30 = vld [vmem:[%s20257_s26] ss:$16 sps:$4 sm:$0xff] (!%p15778_p10)  }
 0x79d   : > { %9655 = sbr.rel (%p15778_p10) target bundleno = 2867 (0xb33), region = 52  ;;  %11840 = vmatprep.subr.bf16.mxu0 (!%p15778_p10), %v19424_v11  ;;  %v19429_v32 = vld [vmem:[%s20257_s26 + $0x8] ss:$16 sps:$4 sm:$0xff] (!%p15778_p10)   ;;  %12805 = vmatprep.subr.bf16.mxu1 (!%p15778_p10), %v19426_v12  ;;  %v19430_v57 = vld [vmem:[%s20257_s26 + $0x24] ss:$16 sps:$4 sm:$0xff] (!%p15778_p10)  }
 0x79e   : > { %11841 = vmatpush1.bf16.msra.mxu0 (!%p15778_p10), %v19428_v30  ;;  %12806 = vmatpush1.bf16.msra.mxu1 (!%p15778_p10), %v19429_v32  ;;  %v19432_v50 = vld [vmem:[%s20257_s26 + $0x2c] ss:$16 sps:$4 sm:$0xff] (!%p15778_p10)   ;;  %v19434_v52 = vld [vmem:[%s20257_s26 + $0x20] ss:$16 sps:$4 sm:$0xff] (!%p15778_p10)   ;;  %v19435_v49 = vld [vmem:[%s20257_s26 + $0x28] ss:$16 sps:$4 sm:$0xff] (!%p15778_p10)  }
 0x79f   : > { %11842 = vmatprep.subr.bf16.mxu0 (!%p15778_p10), %v19430_v57  ;;  %12807 = vmatprep.subr.bf16.mxu1 (!%p15778_p10), %v19432_v50  ;;  %v19436_v22 = vld [vmem:[%s20257_s26 + $0x44] ss:$16 sps:$4 sm:$0xff] (!%p15778_p10)   ;;  %v19438_v10 = vld [vmem:[%s20257_s26 + $0x4c] ss:$16 sps:$4 sm:$0xff] (!%p15778_p10)   ;;  %v19440_v45 = vld [vmem:[%s20257_s26 + $0x40] ss:$16 sps:$4 sm:$0xff] (!%p15778_p10)  }
 0x7a0   : > { %v19441_v23 = vld [vmem:[%s20257_s26 + $0x48] ss:$16 sps:$4 sm:$0xff] (!%p15778_p10)   ;;  %v19442_v61 = vld [vmem:[%s20257_s26 + $0x64] ss:$16 sps:$4 sm:$0xff] (!%p15778_p10)   ;;  %v19444_v56 = vld [vmem:[%s20257_s26 + $0x6c] ss:$16 sps:$4 sm:$0xff] (!%p15778_p10)  }
 0x7a1   : > { %v19446_v5 = vld [vmem:[%s20257_s26 + $0x60] ss:$16 sps:$4 sm:$0xff] (!%p15778_p10)   ;;  %v19447_v19 = vld [vmem:[%s20257_s26 + $0x68] ss:$16 sps:$4 sm:$0xff] (!%p15778_p10)   ;;  %v19448_v39 = vld [vmem:[%s20257_s26 + $0x84] ss:$16 sps:$4 sm:$0xff] (!%p15778_p10)  }
 0x7a2   : > { %11843 = vmatpush1.bf16.msra.mxu0 (!%p15778_p10), %v19434_v52  ;;  %12808 = vmatpush1.bf16.msra.mxu1 (!%p15778_p10), %v19435_v49  ;;  %v19450_v62 = vld [vmem:[%s20257_s26 + $0x8c] ss:$16 sps:$4 sm:$0xff] (!%p15778_p10)   ;;  %v19452_v31 = vld [vmem:[%s20257_s26 + $0x80] ss:$16 sps:$4 sm:$0xff] (!%p15778_p10)   ;;  %v19453_v34 = vld [vmem:[%s20257_s26 + $0x88] ss:$16 sps:$4 sm:$0xff] (!%p15778_p10)  }
 0x7a3   : > { %11844 = vmatprep.subr.bf16.mxu0 (!%p15778_p10), %v19436_v22  ;;  %12809 = vmatprep.subr.bf16.mxu1 (!%p15778_p10), %v19438_v10  ;;  %v19454_v0 = vld [vmem:[%s20257_s26 + $0xa4] ss:$16 sps:$4 sm:$0xff] (!%p15778_p10)   ;;  %v19456_v60 = vld [vmem:[%s20257_s26 + $0xac] ss:$16 sps:$4 sm:$0xff] (!%p15778_p10)   ;;  %v19458_v2 = vld [vmem:[%s20257_s26 + $0xa0] ss:$16 sps:$4 sm:$0xff] (!%p15778_p10)  }
 0x7a4   : > { %v19459_v4 = vld [vmem:[%s20257_s26 + $0xa8] ss:$16 sps:$4 sm:$0xff]   ;;  %v19460_v44 = vld [vmem:[%s20257_s26 + $0xc4] ss:$16 sps:$4 sm:$0xff]   ;;  %v19462_v1 = vld [vmem:[%s20257_s26 + $0xcc] ss:$16 sps:$4 sm:$0xff]  }
 0x7a5   : > { %v19464_v28 = vld [vmem:[%s20257_s26 + $0xc0] ss:$16 sps:$4 sm:$0xff]   ;;  %v19465_v3 = vld [vmem:[%s20257_s26 + $0xc8] ss:$16 sps:$4 sm:$0xff]   ;;  %v19466_v48 = vld [vmem:[%s20257_s26 + $0xe4] ss:$16 sps:$4 sm:$0xff]  }
 0x7a6   : > { %11845 = vmatpush1.bf16.msra.mxu0 %v19440_v45  ;;  %12810 = vmatpush1.bf16.msra.mxu1 %v19441_v23  ;;  %v19468_v37 = vld [vmem:[%s20257_s26 + $0xec] ss:$16 sps:$4 sm:$0xff]   ;;  %v19470_v59 = vld [vmem:[%s20257_s26 + $0xe0] ss:$16 sps:$4 sm:$0xff]   ;;  %v19471_v7 = vld [vmem:[%s20257_s26 + $0xe8] ss:$16 sps:$4 sm:$0xff]  }
 0x7a7   : > { %11846 = vmatprep.subr.bf16.mxu0 %v19442_v61  ;;  %12811 = vmatprep.subr.bf16.mxu1 %v19444_v56  ;;  %v19472_v21 = vld [vmem:[%s20257_s26 + $0x104] ss:$16 sps:$4 sm:$0xff]   ;;  %v19474_v24 = vld [vmem:[%s20257_s26 + $0x10c] ss:$16 sps:$4 sm:$0xff]   ;;  %v19476_v17 = vld [vmem:[%s20257_s26 + $0x100] ss:$16 sps:$4 sm:$0xff]  }
 0x7a8   : > { %v19477_v8 = vld [vmem:[%s20257_s26 + $0x108] ss:$16 sps:$4 sm:$0xff]   ;;  %v19478_v51 = vld [vmem:[%s20257_s26 + $0x124] ss:$16 sps:$4 sm:$0xff]   ;;  %v19480_v13 = vld [vmem:[%s20257_s26 + $0x12c] ss:$16 sps:$4 sm:$0xff]  }
 0x7a9   : > { %v19482_v14 = vld [vmem:[%s20257_s26 + $0x120] ss:$16 sps:$4 sm:$0xff]   ;;  %v19483_v6 = vld [vmem:[%s20257_s26 + $0x128] ss:$16 sps:$4 sm:$0xff]   ;;  %v19484_v58 = vld [vmem:[%s20257_s26 + $0x144] ss:$16 sps:$4 sm:$0xff]  }
 0x7aa   : > { %11847 = vmatpush1.bf16.msra.mxu0 %v19446_v5  ;;  %12812 = vmatpush1.bf16.msra.mxu1 %v19447_v19  ;;  %v19486_v42 = vld [vmem:[%s20257_s26 + $0x14c] ss:$16 sps:$4 sm:$0xff]   ;;  %v19488_v43 = vld [vmem:[%s20257_s26 + $0x140] ss:$16 sps:$4 sm:$0xff]   ;;  %v19489_v20 = vld [vmem:[%s20257_s26 + $0x148] ss:$16 sps:$4 sm:$0xff]  }
 0x7ab   : > { %11848 = vmatprep.subr.bf16.mxu0 %v19448_v39  ;;  %12813 = vmatprep.subr.bf16.mxu1 %v19450_v62  ;;  %v19490_v29 = vld [vmem:[%s20257_s26 + $0x164] ss:$16 sps:$4 sm:$0xff]   ;;  %v19492_v54 = vld [vmem:[%s20257_s26 + $0x16c] ss:$16 sps:$4 sm:$0xff]   ;;  %v19494_v41 = vld [vmem:[%s20257_s26 + $0x160] ss:$16 sps:$4 sm:$0xff]  }
 0x7ac   : > { %v9704_v38 = vld [vmem:[%s20277_s28 + $0x3] sm:$0xff]  ;;  %v9705_v53 = vld [vmem:[%s20277_s28 + $0xb] sm:$0xff]  ;;  %v9706_v49 = vld [vmem:[%s20277_s28 + $0x1b] sm:$0xff] }
 0x7ad   : > { %v19495_v26 = vld [vmem:[%s20257_s26 + $0x168] ss:$16 sps:$4 sm:$0xff]   ;;  %v19496_v9 = vld [vmem:[%s20257_s26 + $0x184] ss:$16 sps:$4 sm:$0xff]   ;;  %v9736_v25 = vpack.c.bf16 %v9705_v53, %v9704_v38  ;;  %v19498_v16 = vld [vmem:[%s20257_s26 + $0x18c] ss:$16 sps:$4 sm:$0xff]  }
 0x7ae   : > { %11849 = vmatpush1.bf16.msra.mxu0 %v19452_v31  ;;  %12814 = vmatpush1.bf16.msra.mxu1 %v19453_v34  ;;  %v19500_v27 = vld [vmem:[%s20257_s26 + $0x180] ss:$16 sps:$4 sm:$0xff]   ;;  %v19501_v15 = vld [vmem:[%s20257_s26 + $0x188] ss:$16 sps:$4 sm:$0xff]   ;;  %v19502_v47 = vld [vmem:[%s20257_s26 + $0x1a4] ss:$16 sps:$4 sm:$0xff]  }
 0x7af   : > { %11850 = vmatprep.subr.bf16.mxu0 %v19454_v0  ;;  %12815 = vmatprep.subr.bf16.mxu1 %v19456_v60  ;;  %v19504_v46 = vld [vmem:[%s20257_s26 + $0x1ac] ss:$16 sps:$4 sm:$0xff]   ;;  %v19506_v18 = vld [vmem:[%s20257_s26 + $0x1a0] ss:$16 sps:$4 sm:$0xff]   ;;  %v19507_v35 = vld [vmem:[%s20257_s26 + $0x1a8] ss:$16 sps:$4 sm:$0xff]  }
 0x7b0   : > { %11872 = vmatprep.mubr.bf16.mxu0 %v9736_v25  ;;  %12837 = vmatprep.mubr.bf16.mxu1 %v9736_v25  ;;  %v19508_v40 = vld [vmem:[%s20257_s26 + $0x1c4] ss:$16 sps:$4 sm:$0xff]   ;;  %v19510_v63 = vld [vmem:[%s20257_s26 + $0x1cc] ss:$16 sps:$4 sm:$0xff]   ;;  %v19512_v36 = vld [vmem:[%s20257_s26 + $0x1c0] ss:$16 sps:$4 sm:$0xff]  }
 0x7b1   : > { %v19513_v55 = vld [vmem:[%s20257_s26 + $0x1c8] ss:$16 sps:$4 sm:$0xff]   ;;  %v19514_v33 = vld [vmem:[%s20257_s26 + $0x1e4] ss:$16 sps:$4 sm:$0xff]   ;;  %v19516_v11 = vld [vmem:[%s20257_s26 + $0x1ec] ss:$16 sps:$4 sm:$0xff]  }
 0x7b2   : > { %11851 = vmatpush1.bf16.msra.mxu0 %v19458_v2  ;;  %12816 = vmatpush1.bf16.msra.mxu1 %v19459_v4  ;;  %v19518_v12 = vld [vmem:[%s20257_s26 + $0x1e0] ss:$16 sps:$4 sm:$0xff]   ;;  %v19519_v30 = vld [vmem:[%s20257_s26 + $0x1e8] ss:$16 sps:$4 sm:$0xff]   ;;  %v19522_v50 = vld [vmem:[%s20257_s26 + $0x204] ss:$16 sps:$4 sm:$0xff]  }
 0x7b3   : > { %11852 = vmatprep.subr.bf16.mxu0 %v19460_v44  ;;  %12817 = vmatprep.subr.bf16.mxu1 %v19462_v1  ;;  %v9656_v32 = vld [vmem:[%s20277_s28] sm:$0xff]  ;;  %v9657_v57 = vld [vmem:[%s20277_s28 + $0x8] sm:$0xff]  ;;  %v9658_v56 = vld [vmem:[%s20277_s28 + $0x18] sm:$0xff] }
 0x7b4   : > { %v19525_v52 = vld [vmem:[%s20257_s26 + $0x20c] ss:$16 sps:$4 sm:$0xff]   ;;  %v9707_v22 = vld [vmem:[%s20277_s28 + $0x23] sm:$0xff]  ;;  %v9688_v10 = vpack.c.bf16 %v9657_v57, %v9656_v32  ;;  %v9708_v34 = vld [vmem:[%s20277_s28 + $0x33] sm:$0xff] }
 0x7b5   : > { %v19520_v45 = vld [vmem:[%s20257_s26 + $0x200] ss:$16 sps:$4 sm:$0xff]   ;;  %v19523_v23 = vld [vmem:[%s20257_s26 + $0x208] ss:$16 sps:$4 sm:$0xff]   ;;  %v9737_v61 = vpack.c.bf16 %v9707_v22, %v9706_v49  ;;  %v19528_v39 = vld [vmem:[%s20257_s26 + $0x224] ss:$16 sps:$4 sm:$0xff]  }
 0x7b6   : > { %11853 = vmatpush1.bf16.msra.mxu0 %v19464_v28  ;;  %12818 = vmatpush1.bf16.msra.mxu1 %v19465_v3  ;;  %v9659_v5 = vld [vmem:[%s20277_s28 + $0x20] sm:$0xff]  ;;  %v19531_v62 = vld [vmem:[%s20257_s26 + $0x22c] ss:$16 sps:$4 sm:$0xff]   ;;  %v19529_v31 = vld [vmem:[%s20257_s26 + $0x228] ss:$16 sps:$4 sm:$0xff]  }
 0x7b7   : > { %11854 = vmatprep.subr.bf16.mxu0 %v19466_v48  ;;  %12819 = vmatprep.subr.bf16.mxu1 %v19468_v37  ;;  %v19526_v19 = vld [vmem:[%s20257_s26 + $0x220] ss:$16 sps:$4 sm:$0xff]   ;;  %v19534_v60 = vld [vmem:[%s20257_s26 + $0x244] ss:$16 sps:$4 sm:$0xff]   ;;  %v19537_v2 = vld [vmem:[%s20257_s26 + $0x24c] ss:$16 sps:$4 sm:$0xff]   ;;  %v9689_v4 = vpack.c.bf16 %v9659_v5, %v9658_v56 }
 0x7b8   : > { %v9709_v0 = vld [vmem:[%s20277_s28 + $0x3b] sm:$0xff]  ;;  %v9660_v3 = vld [vmem:[%s20277_s28 + $0x30] sm:$0xff] }
 0x7b9   : > { %v9738_v44 = vpack.c.bf16 %v9709_v0, %v9708_v34  ;;  %v19532_v1 = vld [vmem:[%s20257_s26 + $0x240] ss:$16 sps:$4 sm:$0xff]   ;;  %v19535_v28 = vld [vmem:[%s20257_s26 + $0x248] ss:$16 sps:$4 sm:$0xff]   ;;  %v19540_v48 = vld [vmem:[%s20257_s26 + $0x264] ss:$16 sps:$4 sm:$0xff]  }
 0x7ba   : > { %11855 = vmatpush1.bf16.msra.mxu0 %v19470_v59  ;;  %12820 = vmatpush1.bf16.msra.mxu1 %v19471_v7  ;;  %v19543_v37 = vld [vmem:[%s20257_s26 + $0x26c] ss:$16 sps:$4 sm:$0xff]   ;;  %v19558_v53 = vld [vmem:[%s20257_s26 + $0x2c4] ss:$16 sps:$4 sm:$0xff]   ;;  %v19568_v32 = vld [vmem:[%s20257_s26 + $0x300] ss:$16 sps:$4 sm:$0xff]  }
 0x7bb   : > { %11856 = vmatprep.subr.bf16.mxu0 %v19472_v21  ;;  %12821 = vmatprep.subr.bf16.mxu1 %v19474_v24  ;;  %v9661_v59 = vld [vmem:[%s20277_s28 + $0x38] sm:$0xff]  ;;  %v9710_v7 = vld [vmem:[%s20277_s28 + $0x4b] sm:$0xff]  ;;  %v9667_v22 = vld [vmem:[%s20277_s28 + $0x80] sm:$0xff] }
 0x7bc   : > { %v9711_v21 = vld [vmem:[%s20277_s28 + $0x53] sm:$0xff]  ;;  %v9713_v38 = vld [vmem:[%s20277_s28 + $0x6b] sm:$0xff] }
 0x7bd   : > { %v19538_v24 = vld [vmem:[%s20257_s26 + $0x260] ss:$16 sps:$4 sm:$0xff]   ;;  %v19571_v57 = vld [vmem:[%s20257_s26 + $0x308] ss:$16 sps:$4 sm:$0xff]   ;;  %v19579_v49 = vld [vmem:[%s20257_s26 + $0x32c] ss:$16 sps:$4 sm:$0xff]  }
 0x7be   : > { %11857 = vmatpush1.bf16.msra.mxu0 %v19476_v17  ;;  %12822 = vmatpush1.bf16.msra.mxu1 %v19477_v8  ;;  %v19541_v17 = vld [vmem:[%s20257_s26 + $0x268] ss:$16 sps:$4 sm:$0xff]   ;;  %v19546_v8 = vld [vmem:[%s20257_s26 + $0x284] ss:$16 sps:$4 sm:$0xff]   ;;  %v19585_v5 = vld [vmem:[%s20257_s26 + $0x34c] ss:$16 sps:$4 sm:$0xff]  }
 0x7bf   : > { %11858 = vmatprep.subr.bf16.mxu0 %v19478_v51  ;;  %12823 = vmatprep.subr.bf16.mxu1 %v19480_v13  ;;  %v19549_v51 = vld [vmem:[%s20257_s26 + $0x28c] ss:$16 sps:$4 sm:$0xff]   ;;  %v9690_v13 = vpack.c.bf16 %v9661_v59, %v9660_v3  ;;  %v19582_v56 = vld [vmem:[%s20257_s26 + $0x344] ss:$16 sps:$4 sm:$0xff]  }
 0x7c0   : > { %v9668_v34 = vld [vmem:[%s20277_s28 + $0x90] sm:$0xff] }
 0x7c1   : > { %v19588_v0 = vld [vmem:[%s20257_s26 + $0x364] ss:$16 sps:$4 sm:$0xff]  }
 0x7c2   : > { %11859 = vmatpush1.bf16.msra.mxu0 %v19482_v14  ;;  %12824 = vmatpush1.bf16.msra.mxu1 %v19483_v6  ;;  %v9739_v14 = vpack.c.bf16 %v9711_v21, %v9710_v7  ;;  %v19544_v6 = vld [vmem:[%s20257_s26 + $0x280] ss:$16 sps:$4 sm:$0xff]   ;;  %v19594_v3 = vld [vmem:[%s20257_s26 + $0x384] ss:$16 sps:$4 sm:$0xff]   ;;  %v19595_v21 = vld [vmem:[%s20257_s26 + $0x388] ss:$16 sps:$4 sm:$0xff]  }
 0x7c3   : > { %11860 = vmatprep.subr.bf16.mxu0 %v19484_v58  ;;  %12825 = vmatprep.subr.bf16.mxu1 %v19486_v42  ;;  %v19547_v58 = vld [vmem:[%s20257_s26 + $0x288] ss:$16 sps:$4 sm:$0xff]   ;;  %v19592_v7 = vld [vmem:[%s20257_s26 + $0x380] ss:$16 sps:$4 sm:$0xff]  }
 0x7c4   : > { %v9662_v42 = vld [vmem:[%s20277_s28 + $0x48] sm:$0xff] }
 0x7c6   : > { %11861 = vmatpush1.bf16.msra.mxu0 %v19488_v43  ;;  %12826 = vmatpush1.bf16.msra.mxu1 %v19489_v20  ;;  %v19552_v43 = vld [vmem:[%s20257_s26 + $0x2a4] ss:$16 sps:$4 sm:$0xff]   ;;  %v19555_v20 = vld [vmem:[%s20257_s26 + $0x2ac] ss:$16 sps:$4 sm:$0xff]  }
 0x7c7   : > { %11862 = vmatprep.subr.bf16.mxu0 %v19490_v29  ;;  %12827 = vmatprep.subr.bf16.mxu1 %v19492_v54  ;;  %v9663_v29 = vld [vmem:[%s20277_s28 + $0x50] sm:$0xff]  ;;  %v9712_v54 = vld [vmem:[%s20277_s28 + $0x63] sm:$0xff] }
 0x7c8   : > { %v22370_v25 = vpack.c.bf16 %v9663_v29, %v9662_v42  ;;  %v19606_v42 = vld [vmem:[%s20257_s26 + $0x3c4] ss:$16 sps:$4 sm:$0xff]  }
 0x7ca   : > { %11863 = vmatpush1.bf16.msra.mxu0 %v19494_v41  ;;  %12828 = vmatpush1.bf16.msra.mxu1 %v19495_v26  ;;  %v19550_v41 = vld [vmem:[%s20257_s26 + $0x2a0] ss:$16 sps:$4 sm:$0xff]   ;;  %v19553_v26 = vld [vmem:[%s20257_s26 + $0x2a8] ss:$16 sps:$4 sm:$0xff]  }
 0x7cb   : > { %11864 = vmatprep.subr.bf16.mxu0 %v19496_v9  ;;  %12829 = vmatprep.subr.bf16.mxu1 %v19498_v16  ;;  %v19561_v9 = vld [vmem:[%s20257_s26 + $0x2cc] ss:$16 sps:$4 sm:$0xff]   ;;  %v9740_v16 = vpack.c.bf16 %v9713_v38, %v9712_v54  ;;  %v19604_v54 = vld [vmem:[%s20257_s26 + $0x3c0] ss:$16 sps:$4 sm:$0xff]   ;;  %v19607_v38 = vld [vmem:[%s20257_s26 + $0x3c8] ss:$16 sps:$4 sm:$0xff]  }
 0x7ce   : > { %11865 = vmatpush1.bf16.msra.mxu0 %v19500_v27  ;;  %12830 = vmatpush1.bf16.msra.mxu1 %v19501_v15  ;;  %v19556_v27 = vld [vmem:[%s20257_s26 + $0x2c0] ss:$16 sps:$4 sm:$0xff]   ;;  %v19559_v15 = vld [vmem:[%s20257_s26 + $0x2c8] ss:$16 sps:$4 sm:$0xff]  }
 0x7cf   : > { %11866 = vmatprep.subr.bf16.mxu0 %v19502_v47  ;;  %12831 = vmatprep.subr.bf16.mxu1 %v19504_v46  ;;  %v9664_v47 = vld [vmem:[%s20277_s28 + $0x60] sm:$0xff] }
 0x7d0   : > { %v19564_v46 = vld [vmem:[%s20257_s26 + $0x2e4] ss:$16 sps:$4 sm:$0xff]  }
 0x7d2   : > { %11867 = vmatpush1.bf16.msra.mxu0 %v19506_v18  ;;  %12832 = vmatpush1.bf16.msra.mxu1 %v19507_v35  ;;  %v19567_v18 = vld [vmem:[%s20257_s26 + $0x2ec] ss:$16 sps:$4 sm:$0xff]  }
 0x7d3   : > { %11868 = vmatprep.subr.bf16.mxu0 %v19508_v40  ;;  %12833 = vmatprep.subr.bf16.mxu1 %v19510_v63  ;;  %v9665_v35 = vld [vmem:[%s20277_s28 + $0x68] sm:$0xff]  ;;  %v9714_v40 = vld [vmem:[%s20277_s28 + $0x7b] sm:$0xff] }
 0x7d4   : > { %v9715_v63 = vld [vmem:[%s20277_s28 + $0x83] sm:$0xff] }
 0x7d6   : > { %11869 = vmatpush1.bf16.msra.mxu0 %v19512_v36  ;;  %12834 = vmatpush1.bf16.msra.mxu1 %v19513_v55  ;;  %v19562_v36 = vld [vmem:[%s20257_s26 + $0x2e0] ss:$16 sps:$4 sm:$0xff]   ;;  %v19565_v55 = vld [vmem:[%s20257_s26 + $0x2e8] ss:$16 sps:$4 sm:$0xff]  }
 0x7d7   : > { %11870 = vmatprep.subr.bf16.mxu0 %v19514_v33  ;;  %12835 = vmatprep.subr.bf16.mxu1 %v19516_v11  ;;  %v19570_v33 = vld [vmem:[%s20257_s26 + $0x304] ss:$16 sps:$4 sm:$0xff]   ;;  %v19573_v11 = vld [vmem:[%s20257_s26 + $0x30c] ss:$16 sps:$4 sm:$0xff]  }
 0x7da   : > { %11871 = vmatpush1.bf16.msra.mxu0 %v19518_v12  ;;  %12836 = vmatpush1.bf16.msra.mxu1 %v19519_v30  ;;  %v22386_v12 = vpack.c.bf16 %v9665_v35, %v9664_v47  ;;  %v9741_v30 = vpack.c.bf16 %v9715_v63, %v9714_v40  ;;  %v19613_v47 = vld [vmem:[%s20257_s26 + $0x3e8] ss:$16 sps:$4 sm:$0xff]  }
 0x7db   : > { %12033 = vmatprep.subr.bf16.mxu0 %v19522_v50  ;;  %12998 = vmatprep.subr.bf16.mxu1 %v19525_v52  ;;  %v9666_v50 = vld [vmem:[%s20277_s28 + $0x78] sm:$0xff]  ;;  %v19576_v52 = vld [vmem:[%s20257_s26 + $0x324] ss:$16 sps:$4 sm:$0xff]  }
 0x7dc   : > { %v9674_v63 = vld [vmem:[%s20277_s28 + $0xd8] sm:$0xff] }
 0x7dd   : > { %11873 = vmatmul.mubr.bf16.vlgmr.msra.gmra.mrb[0].mxu0 %v9688_v10  ;;  %12838 = vmatmul.mubr.bf16.vlgmr.msra.gmra.mrb[0].mxu1 %v9688_v10  ;;  %v9716_v10 = vld [vmem:[%s20277_s28 + $0x93] sm:$0xff] }
 0x7de   : > { %12034 = vmatpush1.bf16.msra.mxu0 %v19520_v45  ;;  %12999 = vmatpush1.bf16.msra.mxu1 %v19523_v23  ;;  %v9717_v45 = vld [vmem:[%s20277_s28 + $0x9b] sm:$0xff] }
 0x7df   : > { %11882 = vmatprep.mubr.bf16.mxu0 %v9737_v61  ;;  %12847 = vmatprep.mubr.bf16.mxu1 %v9737_v61  ;;  %v19574_v23 = vld [vmem:[%s20257_s26 + $0x320] ss:$16 sps:$4 sm:$0xff]   ;;  %v19577_v61 = vld [vmem:[%s20257_s26 + $0x328] ss:$16 sps:$4 sm:$0xff]  }
 0x7e0   : > { %12035 = vmatprep.subr.bf16.mxu0 %v19528_v39  ;;  %13000 = vmatprep.subr.bf16.mxu1 %v19531_v62  ;;  %v9742_v39 = vpack.c.bf16 %v9717_v45, %v9716_v10  ;;  %v19580_v62 = vld [vmem:[%s20257_s26 + $0x340] ss:$16 sps:$4 sm:$0xff]   ;;  %v9678_v10 = vld [vmem:[%s20277_s28 + $0x108] sm:$0xff] }
 0x7e1   : > { %v9679_v45 = vld [vmem:[%s20277_s28 + $0x110] sm:$0xff] }
 0x7e2   : > { %12036 = vmatpush1.bf16.msra.mxu0 %v19526_v19  ;;  %13001 = vmatpush1.bf16.msra.mxu1 %v19529_v31  ;;  %v22402_v19 = vpack.c.bf16 %v9667_v22, %v9666_v50  ;;  %v19583_v31 = vld [vmem:[%s20257_s26 + $0x348] ss:$16 sps:$4 sm:$0xff]  }
 0x7e3   : > { %12037 = vmatprep.subr.bf16.mxu0 %v19534_v60  ;;  %13002 = vmatprep.subr.bf16.mxu1 %v19537_v2  ;;  %v19591_v60 = vld [vmem:[%s20257_s26 + $0x36c] ss:$16 sps:$4 sm:$0xff]  }
 0x7e4   : > { %v9669_v2 = vld [vmem:[%s20277_s28 + $0x98] sm:$0xff]  ;;  %v9726_v50 = vld [vmem:[%s20277_s28 + $0x10b] sm:$0xff] }
 0x7e5   : > { %11883 = vmatmul.mubr.bf16.gmra.mrb[4].mxu0 %v9689_v4  ;;  %12848 = vmatmul.mubr.bf16.gmra.mrb[4].mxu1 %v9689_v4  ;;  %v9718_v4 = vld [vmem:[%s20277_s28 + $0xab] sm:$0xff] }
 0x7e6   : > { %11892 = vmatprep.mubr.bf16.mxu0 %v9738_v44  ;;  %12857 = vmatprep.mubr.bf16.mxu1 %v9738_v44  ;;  %v9719_v44 = vld [vmem:[%s20277_s28 + $0xb3] sm:$0xff] }
 0x7e7   : > { %12038 = vmatpush1.bf16.msra.mxu0 %v19532_v1  ;;  %13003 = vmatpush1.bf16.msra.mxu1 %v19535_v28  ;;  %v19586_v1 = vld [vmem:[%s20257_s26 + $0x360] ss:$16 sps:$4 sm:$0xff]   ;;  %v19589_v28 = vld [vmem:[%s20257_s26 + $0x368] ss:$16 sps:$4 sm:$0xff]   ;;  %v9743_v59 = vpack.c.bf16 %v9719_v44, %v9718_v4 }
 0x7e8   : > { %12039 = vmatprep.subr.bf16.mxu0 %v19540_v48  ;;  %13004 = vmatprep.subr.bf16.mxu1 %v19543_v37  ;;  %v19597_v48 = vld [vmem:[%s20257_s26 + $0x38c] ss:$16 sps:$4 sm:$0xff]   ;;  %v22418_v37 = vpack.c.bf16 %v9669_v2, %v9668_v34  ;;  %v9731_v34 = vld [vmem:[%s20277_s28 + $0x143] sm:$0xff]  ;;  %v9732_v44 = vld [vmem:[%s20277_s28 + $0x153] sm:$0xff] }
 0x7e9   : > { %v9682_v2 = vld [vmem:[%s20277_s28 + $0x138] sm:$0xff]  ;;  %v9683_v4 = vld [vmem:[%s20277_s28 + $0x140] sm:$0xff] }
 0x7eb   : > { %12040 = vmatpush1.bf16.msra.mxu0 %v19538_v24  ;;  %13005 = vmatpush1.bf16.msra.mxu1 %v19541_v17  ;;  %v19600_v24 = vld [vmem:[%s20257_s26 + $0x3a4] ss:$16 sps:$4 sm:$0xff]   ;;  %v9670_v17 = vld [vmem:[%s20277_s28 + $0xa8] sm:$0xff] }
 0x7ec   : > { %12041 = vmatprep.subr.bf16.mxu0 %v19546_v8  ;;  %13006 = vmatprep.subr.bf16.mxu1 %v19549_v51  ;;  %v19603_v8 = vld [vmem:[%s20257_s26 + $0x3ac] ss:$16 sps:$4 sm:$0xff]   ;;  %v9671_v51 = vld [vmem:[%s20277_s28 + $0xb0] sm:$0xff] }
 0x7ed   : > { %11893 = vmatmul.mubr.bf16.gmra.mrb[8].mxu0 %v9690_v13  ;;  %12858 = vmatmul.mubr.bf16.gmra.mrb[8].mxu1 %v9690_v13  ;;  %v9720_v13 = vld [vmem:[%s20277_s28 + $0xc3] sm:$0xff] }
 0x7ee   : > { %11902 = vmatprep.mubr.bf16.mxu0 %v9739_v14  ;;  %12867 = vmatprep.mubr.bf16.mxu1 %v9739_v14  ;;  %v9721_v14 = vld [vmem:[%s20277_s28 + $0xcb] sm:$0xff] }
 0x7ef   : > { %12042 = vmatpush1.bf16.msra.mxu0 %v19544_v6  ;;  %13007 = vmatpush1.bf16.msra.mxu1 %v19547_v58  ;;  %v19598_v6 = vld [vmem:[%s20257_s26 + $0x3a0] ss:$16 sps:$4 sm:$0xff]   ;;  %v19601_v58 = vld [vmem:[%s20257_s26 + $0x3a8] ss:$16 sps:$4 sm:$0xff]   ;;  %v9744_v29 = vpack.c.bf16 %v9721_v14, %v9720_v13 }
 0x7f0   : > { %12043 = vmatprep.subr.bf16.mxu0 %v19552_v43  ;;  %13008 = vmatprep.subr.bf16.mxu1 %v19555_v20  ;;  %v19609_v43 = vld [vmem:[%s20257_s26 + $0x3cc] ss:$16 sps:$4 sm:$0xff]   ;;  %v22434_v20 = vpack.c.bf16 %v9671_v51, %v9670_v17  ;;  %v9687_v51 = vld [vmem:[%s20277_s28 + $0x170] sm:$0xff] }
 0x7f1   : > { %v9752_v14 = vld [vmem:[%s20277_s28 + $0x6] sm:$0xff] }
 0x7f3   : > { %12044 = vmatpush1.bf16.msra.mxu0 %v19550_v41  ;;  %13009 = vmatpush1.bf16.msra.mxu1 %v19553_v26  ;;  %v19612_v41 = vld [vmem:[%s20257_s26 + $0x3e4] ss:$16 sps:$4 sm:$0xff]  }
 0x7f4   : > { %12045 = vmatprep.subr.bf16.mxu0 %v19558_v53  ;;  %13010 = vmatprep.subr.bf16.mxu1 %v19561_v9  ;;  %v9672_v26 = vld [vmem:[%s20277_s28 + $0xc0] sm:$0xff]  ;;  %v19615_v53 = vld [vmem:[%s20257_s26 + $0x3ec] ss:$16 sps:$4 sm:$0xff]  }
 0x7f5   : > { %11903 = vmatmul.mubr.bf16.gmra.mrb[12].mxu0 %v22370_v25  ;;  %12868 = vmatmul.mubr.bf16.gmra.mrb[12].mxu1 %v22370_v25  ;;  %v9673_v9 = vld [vmem:[%s20277_s28 + $0xc8] sm:$0xff] }
 0x7f6   : > { %11912 = vmatprep.mubr.bf16.mxu0 %v9740_v16  ;;  %12877 = vmatprep.mubr.bf16.mxu1 %v9740_v16  ;;  %v9722_v16 = vld [vmem:[%s20277_s28 + $0xdb] sm:$0xff]  ;;  %v22450_v35 = vpack.c.bf16 %v9673_v9, %v9672_v26 }
 0x7f7   : > { %12046 = vmatpush1.bf16.msra.mxu0 %v19556_v27  ;;  %13011 = vmatpush1.bf16.msra.mxu1 %v19559_v15  ;;  %v9723_v27 = vld [vmem:[%s20277_s28 + $0xe3] sm:$0xff]  ;;  %v19633_v9 = vld [vmem:[%s20257_s26 + $0x44c] ss:$16 sps:$4 sm:$0xff]  }
 0x7f8   : > { %12047 = vmatprep.subr.bf16.mxu0 %v19564_v46  ;;  %13012 = vmatprep.subr.bf16.mxu1 %v19567_v18  ;;  %v19610_v15 = vld [vmem:[%s20257_s26 + $0x3e0] ss:$16 sps:$4 sm:$0xff]   ;;  %v19618_v46 = vld [vmem:[%s20257_s26 + $0x404] ss:$16 sps:$4 sm:$0xff]   ;;  %v19621_v18 = vld [vmem:[%s20257_s26 + $0x40c] ss:$16 sps:$4 sm:$0xff]   ;;  %v9745_v40 = vpack.c.bf16 %v9723_v27, %v9722_v16 }
 0x7f9   : > { %v19622_v26 = vld [vmem:[%s20257_s26 + $0x420] ss:$16 sps:$4 sm:$0xff]  }
 0x7fa   : > { %v19628_v27 = vld [vmem:[%s20257_s26 + $0x440] ss:$16 sps:$4 sm:$0xff]  }
 0x7fb   : > { %12048 = vmatpush1.bf16.msra.mxu0 %v19562_v36  ;;  %13013 = vmatpush1.bf16.msra.mxu1 %v19565_v55  ;;  %v9675_v36 = vld [vmem:[%s20277_s28 + $0xe0] sm:$0xff]  ;;  %v9724_v55 = vld [vmem:[%s20277_s28 + $0xf3] sm:$0xff] }
 0x7fc   : > { %12049 = vmatprep.subr.bf16.mxu0 %v19570_v33  ;;  %13014 = vmatprep.subr.bf16.mxu1 %v19573_v11  ;;  %v9725_v33 = vld [vmem:[%s20277_s28 + $0xfb] sm:$0xff]  ;;  %v22458_v11 = vpack.c.bf16 %v9675_v36, %v9674_v63  ;;  %v19642_v36 = vld [vmem:[%s20257_s26 + $0x484] ss:$16 sps:$4 sm:$0xff]  }
 0x7fd   : > { %11913 = vmatmul.mubr.bf16.gmra.mrb[16].mxu0 %v22386_v12  ;;  %12878 = vmatmul.mubr.bf16.gmra.mrb[16].mxu1 %v22386_v12  ;;  %v19637_v63 = vld [vmem:[%s20257_s26 + $0x468] ss:$16 sps:$4 sm:$0xff]  }
 0x7fe   : > { %11922 = vmatprep.mubr.bf16.mxu0 %v9741_v30  ;;  %12887 = vmatprep.mubr.bf16.mxu1 %v9741_v30  ;;  %v9746_v30 = vpack.c.bf16 %v9725_v33, %v9724_v55  ;;  %v19645_v55 = vld [vmem:[%s20257_s26 + $0x48c] ss:$16 sps:$4 sm:$0xff]  }
 0x7ff   : > { %12050 = vmatpush1.bf16.msra.mxu0 %v19568_v32  ;;  %13015 = vmatpush1.bf16.msra.mxu1 %v19571_v57  ;;  %v9676_v32 = vld [vmem:[%s20277_s28 + $0xf0] sm:$0xff]  ;;  %v9677_v57 = vld [vmem:[%s20277_s28 + $0xf8] sm:$0xff] }
 0x800   : > { %12051 = vmatprep.subr.bf16.mxu0 %v19576_v52  ;;  %13016 = vmatprep.subr.bf16.mxu1 %v19579_v49  ;;  %v9727_v52 = vld [vmem:[%s20277_s28 + $0x113] sm:$0xff]  ;;  %v22466_v49 = vpack.c.bf16 %v9677_v57, %v9676_v32  ;;  %v19651_v57 = vld [vmem:[%s20257_s26 + $0x4ac] ss:$16 sps:$4 sm:$0xff]  }
 0x801   : > { %v9747_v22 = vpack.c.bf16 %v9727_v52, %v9726_v50  ;;  %v19648_v32 = vld [vmem:[%s20257_s26 + $0x4a4] ss:$16 sps:$4 sm:$0xff]  }
 0x802   : > { %v9758_v50 = vld [vmem:[%s20277_s28 + $0x4e] sm:$0xff]  ;;  %v9759_v52 = vld [vmem:[%s20277_s28 + $0x56] sm:$0xff] }
 0x803   : > { %12052 = vmatpush1.bf16.msra.mxu0 %v19574_v23  ;;  %13017 = vmatpush1.bf16.msra.mxu1 %v19577_v61  ;;  %v9728_v23 = vld [vmem:[%s20277_s28 + $0x123] sm:$0xff]  ;;  %v9729_v61 = vld [vmem:[%s20277_s28 + $0x12b] sm:$0xff] }
 0x804   : > { %12053 = vmatprep.subr.bf16.mxu0 %v19582_v56  ;;  %13018 = vmatprep.subr.bf16.mxu1 %v19585_v5  ;;  %v22474_v56 = vpack.c.bf16 %v9679_v45, %v9678_v10  ;;  %v9748_v5 = vpack.c.bf16 %v9729_v61, %v9728_v23  ;;  %v19649_v10 = vld [vmem:[%s20257_s26 + $0x4a8] ss:$16 sps:$4 sm:$0xff]   ;;  %v19654_v45 = vld [vmem:[%s20257_s26 + $0x4c4] ss:$16 sps:$4 sm:$0xff]   ;;  %v19657_v23 = vld [vmem:[%s20257_s26 + $0x4cc] ss:$16 sps:$4 sm:$0xff]   ;;  %v22548_v61 = vpack.c.bf16 %v9759_v52, %v9758_v50 }
 0x805   : > { %11923 = vmatmul.mubr.bf16.gmra.mrb[20].mxu0 %v22402_v19  ;;  %12888 = vmatmul.mubr.bf16.gmra.mrb[20].mxu1 %v22402_v19  ;;  %v19714_v50 = vld [vmem:[%s20257_s26 + $0x604] ss:$16 sps:$4 sm:$0xff]   ;;  %v19717_v52 = vld [vmem:[%s20257_s26 + $0x60c] ss:$16 sps:$4 sm:$0xff]  }
 0x806   : > { %11932 = vmatprep.mubr.bf16.mxu0 %v9742_v39  ;;  %12897 = vmatprep.mubr.bf16.mxu1 %v9742_v39  ;;  %v9680_v39 = vld [vmem:[%s20277_s28 + $0x120] sm:$0xff] }
 0x807   : > { %12054 = vmatpush1.bf16.msra.mxu0 %v19580_v62  ;;  %13019 = vmatpush1.bf16.msra.mxu1 %v19583_v31  ;;  %v9681_v62 = vld [vmem:[%s20277_s28 + $0x128] sm:$0xff]  ;;  %v9730_v31 = vld [vmem:[%s20277_s28 + $0x13b] sm:$0xff] }
 0x808   : > { %12055 = vmatprep.subr.bf16.mxu0 %v19588_v0  ;;  %13020 = vmatprep.subr.bf16.mxu1 %v19591_v60  ;;  %v22482_v0 = vpack.c.bf16 %v9681_v62, %v9680_v39  ;;  %v9749_v60 = vpack.c.bf16 %v9731_v34, %v9730_v31  ;;  %v19660_v39 = vld [vmem:[%s20257_s26 + $0x4e4] ss:$16 sps:$4 sm:$0xff]   ;;  %v19663_v62 = vld [vmem:[%s20257_s26 + $0x4ec] ss:$16 sps:$4 sm:$0xff]  }
 0x809   : > { %v9760_v31 = vld [vmem:[%s20277_s28 + $0x66] sm:$0xff]  ;;  %v9761_v34 = vld [vmem:[%s20277_s28 + $0x6e] sm:$0xff] }
 0x80b   : > { %12056 = vmatpush1.bf16.msra.mxu0 %v19586_v1  ;;  %13021 = vmatpush1.bf16.msra.mxu1 %v19589_v28  ;;  %v9733_v1 = vld [vmem:[%s20277_s28 + $0x15b] sm:$0xff]  ;;  %v22490_v28 = vpack.c.bf16 %v9683_v4, %v9682_v2  ;;  %v19666_v4 = vld [vmem:[%s20257_s26 + $0x504] ss:$16 sps:$4 sm:$0xff]  }
 0x80c   : > { %12057 = vmatprep.subr.bf16.mxu0 %v19594_v3  ;;  %13022 = vmatprep.subr.bf16.mxu1 %v19597_v48  ;;  %v9750_v3 = vpack.c.bf16 %v9733_v1, %v9732_v44  ;;  %v9684_v48 = vld [vmem:[%s20277_s28 + $0x150] sm:$0xff]  ;;  %v19661_v2 = vld [vmem:[%s20257_s26 + $0x4e8] ss:$16 sps:$4 sm:$0xff]   ;;  %v19669_v44 = vld [vmem:[%s20257_s26 + $0x50c] ss:$16 sps:$4 sm:$0xff]   ;;  %v22564_v1 = vpack.c.bf16 %v9761_v34, %v9760_v31 }
 0x80d   : > { %11933 = vmatmul.mubr.bf16.gmra.mrb[24].mxu0 %v22418_v37  ;;  %12898 = vmatmul.mubr.bf16.gmra.mrb[24].mxu1 %v22418_v37  ;;  %v9777_v31 = vld [vmem:[%s20277_s28 + $0x12e] sm:$0xff]  ;;  %v15805_v34 = vld [vmem:[%s20277_s28 + $0x180] sm:$0xff] }
 0x80e   : > { %11942 = vmatprep.mubr.bf16.mxu0 %v9743_v59  ;;  %12907 = vmatprep.mubr.bf16.mxu1 %v9743_v59  ;;  %v9685_v59 = vld [vmem:[%s20277_s28 + $0x158] sm:$0xff] }
 0x80f   : > { %12058 = vmatpush1.bf16.msra.mxu0 %v19592_v7  ;;  %13023 = vmatpush1.bf16.msra.mxu1 %v19595_v21  ;;  %v9734_v7 = vld [vmem:[%s20277_s28 + $0x16b] sm:$0xff]  ;;  %v9735_v21 = vld [vmem:[%s20277_s28 + $0x173] sm:$0xff] }
 0x810   : > { %12059 = vmatprep.subr.bf16.mxu0 %v19600_v24  ;;  %13024 = vmatprep.subr.bf16.mxu1 %v19603_v8  ;;  %v22498_v24 = vpack.c.bf16 %v9685_v59, %v9684_v48  ;;  %v9751_v17 = vpack.c.bf16 %v9735_v21, %v9734_v7  ;;  %v9686_v8 = vld [vmem:[%s20277_s28 + $0x168] sm:$0xff]  ;;  %v19672_v48 = vld [vmem:[%s20257_s26 + $0x524] ss:$16 sps:$4 sm:$0xff]  }
 0x811   : > { %v22504_v13 = vpack.c.bf16 %v9687_v51, %v9686_v8  ;;  %v19675_v59 = vld [vmem:[%s20257_s26 + $0x52c] ss:$16 sps:$4 sm:$0xff]   ;;  %v19673_v8 = vld [vmem:[%s20257_s26 + $0x528] ss:$16 sps:$4 sm:$0xff]   ;;  %v19678_v51 = vld [vmem:[%s20257_s26 + $0x544] ss:$16 sps:$4 sm:$0xff]  }
 0x812   : > { %v9762_v7 = vld [vmem:[%s20277_s28 + $0x7e] sm:$0xff]  ;;  %v9763_v21 = vld [vmem:[%s20277_s28 + $0x86] sm:$0xff] }
 0x813   : > { %12060 = vmatpush1.bf16.msra.mxu0 %v19598_v6  ;;  %13025 = vmatpush1.bf16.msra.mxu1 %v19601_v58  ;;  %v9753_v6 = vld [vmem:[%s20277_s28 + $0xe] sm:$0xff] }
 0x814   : > { %12061 = vmatprep.subr.bf16.mxu0 %v19606_v42  ;;  %13026 = vmatprep.subr.bf16.mxu1 %v19609_v43  ;;  %v19616_v58 = vld [vmem:[%s20257_s26 + $0x400] ss:$16 sps:$4 sm:$0xff]   ;;  %v19619_v42 = vld [vmem:[%s20257_s26 + $0x408] ss:$16 sps:$4 sm:$0xff]   ;;  %v9784_v43 = vpack.c.bf16 %v9753_v6, %v9752_v14  ;;  %v19681_v14 = vld [vmem:[%s20257_s26 + $0x54c] ss:$16 sps:$4 sm:$0xff]   ;;  %v22580_v6 = vpack.c.bf16 %v9763_v21, %v9762_v7 }
 0x815   : > { %11943 = vmatmul.mubr.bf16.gmra.mrb[28].mxu0 %v22434_v20  ;;  %12908 = vmatmul.mubr.bf16.gmra.mrb[28].mxu1 %v22434_v20  ;;  %v9781_v7 = vld [vmem:[%s20277_s28 + $0x15e] sm:$0xff]  ;;  %v15809_v21 = vld [vmem:[%s20277_s28 + $0x1b0] sm:$0xff] }
 0x816   : > { %11952 = vmatprep.mubr.bf16.mxu0 %v9744_v29  ;;  %12917 = vmatprep.mubr.bf16.mxu1 %v9744_v29  ;;  %v19624_v29 = vld [vmem:[%s20257_s26 + $0x424] ss:$16 sps:$4 sm:$0xff]  }
 0x817   : > { %12062 = vmatpush1.bf16.msra.mxu0 %v19604_v54  ;;  %13027 = vmatpush1.bf16.msra.mxu1 %v19607_v38  ;;  %v19627_v54 = vld [vmem:[%s20257_s26 + $0x42c] ss:$16 sps:$4 sm:$0xff]  }
 0x818   : > { %12063 = vmatprep.subr.bf16.mxu0 %v19612_v41  ;;  %13028 = vmatprep.subr.bf16.mxu1 %v19615_v53  ;;  %v9754_v38 = vld [vmem:[%s20277_s28 + $0x1e] sm:$0xff]  ;;  %v9755_v41 = vld [vmem:[%s20277_s28 + $0x26] sm:$0xff] }
 0x819   : > { %v19630_v53 = vld [vmem:[%s20257_s26 + $0x444] ss:$16 sps:$4 sm:$0xff]   ;;  %v9785_v16 = vpack.c.bf16 %v9755_v41, %v9754_v38  ;;  %v19682_v38 = vld [vmem:[%s20257_s26 + $0x560] ss:$16 sps:$4 sm:$0xff]   ;;  %v19685_v41 = vld [vmem:[%s20257_s26 + $0x568] ss:$16 sps:$4 sm:$0xff]  }
 0x81b   : > { %12064 = vmatpush1.bf16.msra.mxu0 %v19610_v15  ;;  %13029 = vmatpush1.bf16.msra.mxu1 %v19613_v47  ;;  %v19631_v15 = vld [vmem:[%s20257_s26 + $0x448] ss:$16 sps:$4 sm:$0xff]   ;;  %v19636_v47 = vld [vmem:[%s20257_s26 + $0x464] ss:$16 sps:$4 sm:$0xff]  }
 0x81c   : > { %12226 = vmatprep.subr.bf16.mxu0 %v19618_v46  ;;  %13191 = vmatprep.subr.bf16.mxu1 %v19621_v18  ;;  %v19639_v46 = vld [vmem:[%s20257_s26 + $0x46c] ss:$16 sps:$4 sm:$0xff]  }
 0x81d   : > { %11953 = vmatmul.mubr.bf16.gmra.mrb[32].mxu0 %v22450_v35  ;;  %12918 = vmatmul.mubr.bf16.gmra.mrb[32].mxu1 %v22450_v35  ;;  %v9757_v18 = vld [vmem:[%s20277_s28 + $0x3e] sm:$0xff] }
 0x81e   : > { %11962 = vmatprep.mubr.bf16.mxu0 %v9745_v40  ;;  %12927 = vmatprep.mubr.bf16.mxu1 %v9745_v40  ;;  %v19634_v40 = vld [vmem:[%s20257_s26 + $0x460] ss:$16 sps:$4 sm:$0xff]  }
 0x825   : > { %11963 = vmatmul.mubr.bf16.gmra.mrb[36].mxu0 %v22458_v11  ;;  %12928 = vmatmul.mubr.bf16.gmra.mrb[36].mxu1 %v22458_v11 }
 0x826   : > { %11972 = vmatprep.mubr.bf16.mxu0 %v9746_v30  ;;  %12937 = vmatprep.mubr.bf16.mxu1 %v9746_v30  ;;  %v19643_v30 = vld [vmem:[%s20257_s26 + $0x488] ss:$16 sps:$4 sm:$0xff]  }
 0x82d   : > { %11973 = vmatmul.mubr.bf16.gmra.mrb[40].mxu0 %v22466_v49  ;;  %12938 = vmatmul.mubr.bf16.gmra.mrb[40].mxu1 %v22466_v49 }
 0x82e   : > { %11982 = vmatprep.mubr.bf16.mxu0 %v9747_v22  ;;  %12947 = vmatprep.mubr.bf16.mxu1 %v9747_v22  ;;  %v19646_v22 = vld [vmem:[%s20257_s26 + $0x4a0] ss:$16 sps:$4 sm:$0xff]  }
 0x835   : > { %11983 = vmatmul.mubr.bf16.gmra.mrb[44].mxu0 %v22474_v56  ;;  %12948 = vmatmul.mubr.bf16.gmra.mrb[44].mxu1 %v22474_v56 }
 0x836   : > { %11992 = vmatprep.mubr.bf16.mxu0 %v9748_v5  ;;  %12957 = vmatprep.mubr.bf16.mxu1 %v9748_v5  ;;  %v19655_v5 = vld [vmem:[%s20257_s26 + $0x4c8] ss:$16 sps:$4 sm:$0xff]  }
 0x83d   : > { %11993 = vmatmul.mubr.bf16.gmra.mrb[48].mxu0 %v22482_v0  ;;  %12958 = vmatmul.mubr.bf16.gmra.mrb[48].mxu1 %v22482_v0 }
 0x83e   : > { %12002 = vmatprep.mubr.bf16.mxu0 %v9749_v60  ;;  %12967 = vmatprep.mubr.bf16.mxu1 %v9749_v60  ;;  %v19658_v60 = vld [vmem:[%s20257_s26 + $0x4e0] ss:$16 sps:$4 sm:$0xff]  }
 0x845   : > { %12003 = vmatmul.mubr.bf16.gmra.mrb[52].mxu0 %v22490_v28  ;;  %12968 = vmatmul.mubr.bf16.gmra.mrb[52].mxu1 %v22490_v28 }
 0x846   : > { %12012 = vmatprep.mubr.bf16.mxu0 %v9750_v3  ;;  %12977 = vmatprep.mubr.bf16.mxu1 %v9750_v3  ;;  %v19667_v3 = vld [vmem:[%s20257_s26 + $0x508] ss:$16 sps:$4 sm:$0xff]  }
 0x84d   : > { %12013 = vmatmul.mubr.bf16.gmra.mrb[56].mxu0 %v22498_v24  ;;  %12978 = vmatmul.mubr.bf16.gmra.mrb[56].mxu1 %v22498_v24 }
 0x84e   : > { %12022 = vmatprep.mubr.bf16.mxu0 %v9751_v17  ;;  %12987 = vmatprep.mubr.bf16.mxu1 %v9751_v17  ;;  %v19670_v17 = vld [vmem:[%s20257_s26 + $0x520] ss:$16 sps:$4 sm:$0xff]  }
 0x855   : > { %12023 = vmatmul.mubr.bf16.gmra.mrb[60].mxu0 %v22504_v13  ;;  %12988 = vmatmul.mubr.bf16.gmra.mrb[60].mxu1 %v22504_v13 }
 0x856   : > { %12065 = vmatprep.mubr.bf16.mxu0 %v22370_v25  ;;  %13030 = vmatprep.mubr.bf16.mxu1 %v22370_v25  ;;  %v19625_v25 = vld [vmem:[%s20257_s26 + $0x428] ss:$16 sps:$4 sm:$0xff]  }
 0x85d   : > { %12066 = vmatmul.mubr.bf16.vlgmr.msra.gmra.mrb[0].mxu0 %v9784_v43  ;;  %13031 = vmatmul.mubr.bf16.vlgmr.msra.gmra.mrb[0].mxu1 %v9784_v43  ;;  %v19687_v43 = vld [vmem:[%s20257_s26 + $0x56c] ss:$16 sps:$4 sm:$0xff]  }
 0x85e   : > { %12227 = vmatpush1.bf16.msra.mxu0 %v19616_v58  ;;  %13192 = vmatpush1.bf16.msra.mxu1 %v19619_v42  ;;  %v19679_v58 = vld [vmem:[%s20257_s26 + $0x548] ss:$16 sps:$4 sm:$0xff]   ;;  %v19684_v42 = vld [vmem:[%s20257_s26 + $0x564] ss:$16 sps:$4 sm:$0xff]  }
 0x85f   : > { %12075 = vmatprep.mubr.bf16.mxu0 %v22386_v12  ;;  %13040 = vmatprep.mubr.bf16.mxu1 %v22386_v12  ;;  %v9756_v12 = vld [vmem:[%s20277_s28 + $0x36] sm:$0xff] }
 0x860   : > { %12228 = vmatprep.subr.bf16.mxu0 %v19624_v29  ;;  %13193 = vmatprep.subr.bf16.mxu1 %v19627_v54  ;;  %v9786_v33 = vpack.c.bf16 %v9757_v18, %v9756_v12  ;;  %v9764_v29 = vld [vmem:[%s20277_s28 + $0x96] sm:$0xff]  ;;  %v9765_v54 = vld [vmem:[%s20277_s28 + $0x9e] sm:$0xff] }
 0x861   : > { %v19697_v12 = vld [vmem:[%s20257_s26 + $0x5a8] ss:$16 sps:$4 sm:$0xff]   ;;  %v19702_v18 = vld [vmem:[%s20257_s26 + $0x5c4] ss:$16 sps:$4 sm:$0xff]  }
 0x862   : > { %12229 = vmatpush1.bf16.msra.mxu0 %v19622_v26  ;;  %13194 = vmatpush1.bf16.msra.mxu1 %v19625_v25  ;;  %v19690_v26 = vld [vmem:[%s20257_s26 + $0x584] ss:$16 sps:$4 sm:$0xff]   ;;  %v19693_v25 = vld [vmem:[%s20257_s26 + $0x58c] ss:$16 sps:$4 sm:$0xff]  }
 0x863   : > { %12230 = vmatprep.subr.bf16.mxu0 %v19630_v53  ;;  %13195 = vmatprep.subr.bf16.mxu1 %v19633_v9  ;;  %v22596_v53 = vpack.c.bf16 %v9765_v54, %v9764_v29  ;;  %v19691_v9 = vld [vmem:[%s20257_s26 + $0x588] ss:$16 sps:$4 sm:$0xff]   ;;  %v19712_v54 = vld [vmem:[%s20257_s26 + $0x600] ss:$16 sps:$4 sm:$0xff]  }
 0x865   : > { %12076 = vmatmul.mubr.bf16.gmra.mrb[4].mxu0 %v9785_v16  ;;  %13041 = vmatmul.mubr.bf16.gmra.mrb[4].mxu1 %v9785_v16  ;;  %v19696_v16 = vld [vmem:[%s20257_s26 + $0x5a4] ss:$16 sps:$4 sm:$0xff]  }
 0x866   : > { %12085 = vmatprep.mubr.bf16.mxu0 %v22402_v19  ;;  %13050 = vmatprep.mubr.bf16.mxu1 %v22402_v19  ;;  %v19640_v19 = vld [vmem:[%s20257_s26 + $0x480] ss:$16 sps:$4 sm:$0xff]  }
 0x867   : > { %12231 = vmatpush1.bf16.msra.mxu0 %v19628_v27  ;;  %13196 = vmatpush1.bf16.msra.mxu1 %v19631_v15  ;;  %v19699_v27 = vld [vmem:[%s20257_s26 + $0x5ac] ss:$16 sps:$4 sm:$0xff]  }
 0x868   : > { %12232 = vmatprep.subr.bf16.mxu0 %v19636_v47  ;;  %13197 = vmatprep.subr.bf16.mxu1 %v19639_v46  ;;  %v9766_v15 = vld [vmem:[%s20277_s28 + $0xae] sm:$0xff]  ;;  %v9767_v47 = vld [vmem:[%s20277_s28 + $0xb6] sm:$0xff] }
 0x869   : > { %v19694_v46 = vld [vmem:[%s20257_s26 + $0x5a0] ss:$16 sps:$4 sm:$0xff]  }
 0x86b   : > { %12233 = vmatpush1.bf16.msra.mxu0 %v19634_v40  ;;  %13198 = vmatpush1.bf16.msra.mxu1 %v19637_v63  ;;  %v19705_v40 = vld [vmem:[%s20257_s26 + $0x5cc] ss:$16 sps:$4 sm:$0xff]   ;;  %v22612_v63 = vpack.c.bf16 %v9767_v47, %v9766_v15  ;;  %v19724_v47 = vld [vmem:[%s20257_s26 + $0x640] ss:$16 sps:$4 sm:$0xff]  }
 0x86c   : > { %12234 = vmatprep.subr.bf16.mxu0 %v19642_v36  ;;  %13199 = vmatprep.subr.bf16.mxu1 %v19645_v55  ;;  %v19703_v36 = vld [vmem:[%s20257_s26 + $0x5c8] ss:$16 sps:$4 sm:$0xff]   ;;  %v19708_v55 = vld [vmem:[%s20257_s26 + $0x5e4] ss:$16 sps:$4 sm:$0xff]  }
 0x86d   : > { %12086 = vmatmul.mubr.bf16.gmra.mrb[8].mxu0 %v9786_v33  ;;  %13051 = vmatmul.mubr.bf16.gmra.mrb[8].mxu1 %v9786_v33  ;;  %v19711_v33 = vld [vmem:[%s20257_s26 + $0x5ec] ss:$16 sps:$4 sm:$0xff]  }
 0x86e   : > { %12095 = vmatprep.mubr.bf16.mxu0 %v22418_v37  ;;  %13060 = vmatprep.mubr.bf16.mxu1 %v22418_v37  ;;  %v19652_v37 = vld [vmem:[%s20257_s26 + $0x4c0] ss:$16 sps:$4 sm:$0xff]  }
 0x86f   : > { %12235 = vmatpush1.bf16.msra.mxu0 %v19640_v19  ;;  %13200 = vmatpush1.bf16.msra.mxu1 %v19643_v30  ;;  %v9768_v19 = vld [vmem:[%s20277_s28 + $0xc6] sm:$0xff]  ;;  %v9769_v30 = vld [vmem:[%s20277_s28 + $0xce] sm:$0xff] }
 0x870   : > { %12236 = vmatprep.subr.bf16.mxu0 %v19648_v32  ;;  %13201 = vmatprep.subr.bf16.mxu1 %v19651_v57  ;;  %v19706_v32 = vld [vmem:[%s20257_s26 + $0x5e0] ss:$16 sps:$4 sm:$0xff]   ;;  %v19709_v57 = vld [vmem:[%s20257_s26 + $0x5e8] ss:$16 sps:$4 sm:$0xff]  }
 0x873   : > { %12237 = vmatpush1.bf16.msra.mxu0 %v19646_v22  ;;  %13202 = vmatpush1.bf16.msra.mxu1 %v19649_v10  ;;  %v22628_v22 = vpack.c.bf16 %v9769_v30, %v9768_v19  ;;  %v9771_v10 = vld [vmem:[%s20277_s28 + $0xe6] sm:$0xff] }
 0x874   : > { %12238 = vmatprep.subr.bf16.mxu0 %v19654_v45  ;;  %13203 = vmatprep.subr.bf16.mxu1 %v19657_v23  ;;  %v9772_v23 = vld [vmem:[%s20277_s28 + $0xf6] sm:$0xff] }
 0x875   : > { %12096 = vmatmul.mubr.bf16.gmra.mrb[12].mxu0 %v22548_v61  ;;  %13061 = vmatmul.mubr.bf16.gmra.mrb[12].mxu1 %v22548_v61  ;;  %v19739_v30 = vld [vmem:[%s20257_s26 + $0x688] ss:$16 sps:$4 sm:$0xff]  }
 0x876   : > { %12105 = vmatprep.mubr.bf16.mxu0 %v22434_v20  ;;  %13070 = vmatprep.mubr.bf16.mxu1 %v22434_v20  ;;  %v19664_v20 = vld [vmem:[%s20257_s26 + $0x500] ss:$16 sps:$4 sm:$0xff]  }
 0x877   : > { %12239 = vmatpush1.bf16.msra.mxu0 %v19652_v37  ;;  %13204 = vmatpush1.bf16.msra.mxu1 %v19655_v5  ;;  %v9773_v37 = vld [vmem:[%s20277_s28 + $0xfe] sm:$0xff]  ;;  %v9774_v5 = vld [vmem:[%s20277_s28 + $0x10e] sm:$0xff] }
 0x878   : > { %12240 = vmatprep.subr.bf16.mxu0 %v19660_v39  ;;  %13205 = vmatprep.subr.bf16.mxu1 %v19663_v62  ;;  %v9775_v39 = vld [vmem:[%s20277_s28 + $0x116] sm:$0xff] }
 0x879   : > { %v22652_v62 = vpack.c.bf16 %v9775_v39, %v9774_v5  ;;  %v19751_v39 = vld [vmem:[%s20257_s26 + $0x6c8] ss:$16 sps:$4 sm:$0xff]  }
 0x87b   : > { %12241 = vmatpush1.bf16.msra.mxu0 %v19658_v60  ;;  %13206 = vmatpush1.bf16.msra.mxu1 %v19661_v2 }
 0x87c   : > { %12242 = vmatprep.subr.bf16.mxu0 %v19666_v4  ;;  %13207 = vmatprep.subr.bf16.mxu1 %v19669_v44  ;;  %v9778_v4 = vld [vmem:[%s20277_s28 + $0x13e] sm:$0xff]  ;;  %v9779_v44 = vld [vmem:[%s20277_s28 + $0x146] sm:$0xff] }
 0x87d   : > { %12106 = vmatmul.mubr.bf16.gmra.mrb[16].mxu0 %v22564_v1  ;;  %13071 = vmatmul.mubr.bf16.gmra.mrb[16].mxu1 %v22564_v1 }
 0x87e   : > { %12115 = vmatprep.mubr.bf16.mxu0 %v22450_v35  ;;  %13080 = vmatprep.mubr.bf16.mxu1 %v22450_v35  ;;  %v19676_v35 = vld [vmem:[%s20257_s26 + $0x540] ss:$16 sps:$4 sm:$0xff]  }
 0x87f   : > { %12243 = vmatpush1.bf16.msra.mxu0 %v19664_v20  ;;  %13208 = vmatpush1.bf16.msra.mxu1 %v19667_v3  ;;  %v15808_v20 = vld [vmem:[%s20277_s28 + $0x1a0] sm:$0xff]  ;;  %v22670_v3 = vpack.c.bf16 %v9779_v44, %v9778_v4  ;;  %v19757_v4 = vld [vmem:[%s20257_s26 + $0x6e8] ss:$16 sps:$4 sm:$0xff]  }
 0x880   : > { %12244 = vmatprep.subr.bf16.mxu0 %v19672_v48  ;;  %13209 = vmatprep.subr.bf16.mxu1 %v19675_v59  ;;  %v9780_v59 = vld [vmem:[%s20277_s28 + $0x156] sm:$0xff] }
 0x881   : > { %v19762_v44 = vld [vmem:[%s20257_s26 + $0x704] ss:$16 sps:$4 sm:$0xff]  }
 0x883   : > { %12245 = vmatpush1.bf16.msra.mxu0 %v19670_v17  ;;  %13210 = vmatpush1.bf16.msra.mxu1 %v19673_v8  ;;  %v15810_v17 = vld [vmem:[%s20277_s28 + $0x1b8] sm:$0xff]  ;;  %v22678_v8 = vpack.c.bf16 %v9781_v7, %v9780_v59  ;;  %v19768_v59 = vld [vmem:[%s20257_s26 + $0x724] ss:$16 sps:$4 sm:$0xff]  }
 0x884   : > { %12246 = vmatprep.subr.bf16.mxu0 %v19678_v51  ;;  %13211 = vmatprep.subr.bf16.mxu1 %v19681_v14  ;;  %v9848_v51 = vpack.c.bf16 %v15810_v17, %v15809_v21  ;;  %v9782_v14 = vld [vmem:[%s20277_s28 + $0x16e] sm:$0xff]  ;;  %v15821_v21 = vld [vmem:[%s20277_s28 + $0xc3] sm:$0xff] }
 0x885   : > { %12116 = vmatmul.mubr.bf16.gmra.mrb[20].mxu0 %v22580_v6  ;;  %13081 = vmatmul.mubr.bf16.gmra.mrb[20].mxu1 %v22580_v6  ;;  %v19771_v7 = vld [vmem:[%s20257_s26 + $0x72c] ss:$16 sps:$4 sm:$0xff]  }
 0x886   : > { %12125 = vmatprep.mubr.bf16.mxu0 %v22458_v11  ;;  %13090 = vmatprep.mubr.bf16.mxu1 %v22458_v11  ;;  %v19688_v11 = vld [vmem:[%s20257_s26 + $0x580] ss:$16 sps:$4 sm:$0xff]  }
 0x887   : > { %12247 = vmatpush1.bf16.msra.mxu0 %v19676_v35  ;;  %13212 = vmatpush1.bf16.msra.mxu1 %v19679_v58  ;;  %v9783_v35 = vld [vmem:[%s20277_s28 + $0x176] sm:$0xff]  ;;  %v15822_v17 = vld [vmem:[%s20277_s28 + $0xcb] sm:$0xff] }
 0x888   : > { %12248 = vmatprep.subr.bf16.mxu0 %v19684_v42  ;;  %13213 = vmatprep.subr.bf16.mxu1 %v19687_v43  ;;  %v22684_v58 = vpack.c.bf16 %v9783_v35, %v9782_v14  ;;  %v15811_v42 = vld [vmem:[%s20277_s28 + $0x4b] sm:$0xff]  ;;  %v15812_v43 = vld [vmem:[%s20277_s28 + $0x53] sm:$0xff] }
 0x889   : > { %v9881_v29 = vpack.c.bf16 %v15812_v43, %v15811_v42  ;;  %v19769_v14 = vld [vmem:[%s20257_s26 + $0x728] ss:$16 sps:$4 sm:$0xff]   ;;  %v19774_v35 = vld [vmem:[%s20257_s26 + $0x744] ss:$16 sps:$4 sm:$0xff]   ;;  %v19777_v42 = vld [vmem:[%s20257_s26 + $0x74c] ss:$16 sps:$4 sm:$0xff]   ;;  %v22760_v43 = vpack.c.bf16 %v15822_v17, %v15821_v21 }
 0x88a   : > { %v15840_v21 = vld [vmem:[%s20277_s28 + $0x1a3] sm:$0xff]  ;;  %v15873_v17 = vld [vmem:[%s20277_s28 + $0x1b6] sm:$0xff] }
 0x88b   : > { %12249 = vmatpush1.bf16.msra.mxu0 %v19682_v38  ;;  %13214 = vmatpush1.bf16.msra.mxu1 %v19685_v41  ;;  %v19715_v38 = vld [vmem:[%s20257_s26 + $0x608] ss:$16 sps:$4 sm:$0xff]   ;;  %v19720_v41 = vld [vmem:[%s20257_s26 + $0x624] ss:$16 sps:$4 sm:$0xff]  }
 0x88c   : > { %12250 = vmatprep.subr.bf16.mxu0 %v19690_v26  ;;  %13215 = vmatprep.subr.bf16.mxu1 %v19693_v25  ;;  %v19723_v26 = vld [vmem:[%s20257_s26 + $0x62c] ss:$16 sps:$4 sm:$0xff]   ;;  %v15813_v25 = vld [vmem:[%s20277_s28 + $0x63] sm:$0xff] }
 0x88d   : > { %12126 = vmatmul.mubr.bf16.gmra.mrb[24].mxu0 %v22596_v53  ;;  %13091 = vmatmul.mubr.bf16.gmra.mrb[24].mxu1 %v22596_v53 }
 0x88e   : > { %12135 = vmatprep.mubr.bf16.mxu0 %v22466_v49  ;;  %13100 = vmatprep.mubr.bf16.mxu1 %v22466_v49  ;;  %v19700_v49 = vld [vmem:[%s20257_s26 + $0x5c0] ss:$16 sps:$4 sm:$0xff]  }
 0x88f   : > { %12251 = vmatpush1.bf16.msra.mxu0 %v19688_v11  ;;  %13216 = vmatpush1.bf16.msra.mxu1 %v19691_v9  ;;  %v15814_v11 = vld [vmem:[%s20277_s28 + $0x6b] sm:$0xff] }
 0x890   : > { %12252 = vmatprep.subr.bf16.mxu0 %v19696_v16  ;;  %13217 = vmatprep.subr.bf16.mxu1 %v19699_v27  ;;  %v19718_v9 = vld [vmem:[%s20257_s26 + $0x620] ss:$16 sps:$4 sm:$0xff]   ;;  %v19726_v16 = vld [vmem:[%s20257_s26 + $0x644] ss:$16 sps:$4 sm:$0xff]   ;;  %v19729_v27 = vld [vmem:[%s20257_s26 + $0x64c] ss:$16 sps:$4 sm:$0xff]   ;;  %v9882_v15 = vpack.c.bf16 %v15814_v11, %v15813_v25 }
 0x891   : > { %v19778_v25 = vld [vmem:[%s20257_s26 + $0x760] ss:$16 sps:$4 sm:$0xff]   ;;  %v19781_v11 = vld [vmem:[%s20257_s26 + $0x768] ss:$16 sps:$4 sm:$0xff]  }
 0x893   : > { %12253 = vmatpush1.bf16.msra.mxu0 %v19694_v46  ;;  %13218 = vmatpush1.bf16.msra.mxu1 %v19697_v12  ;;  %v19727_v46 = vld [vmem:[%s20257_s26 + $0x648] ss:$16 sps:$4 sm:$0xff]   ;;  %v19732_v12 = vld [vmem:[%s20257_s26 + $0x664] ss:$16 sps:$4 sm:$0xff]  }
 0x894   : > { %12254 = vmatprep.subr.bf16.mxu0 %v19702_v18  ;;  %13219 = vmatprep.subr.bf16.mxu1 %v19705_v40  ;;  %v19735_v18 = vld [vmem:[%s20257_s26 + $0x66c] ss:$16 sps:$4 sm:$0xff]   ;;  %v15816_v40 = vld [vmem:[%s20277_s28 + $0x83] sm:$0xff] }
 0x895   : > { %12136 = vmatmul.mubr.bf16.gmra.mrb[28].mxu0 %v22612_v63  ;;  %13101 = vmatmul.mubr.bf16.gmra.mrb[28].mxu1 %v22612_v63 }
 0x896   : > { %12145 = vmatprep.mubr.bf16.mxu0 %v22474_v56  ;;  %13110 = vmatprep.mubr.bf16.mxu1 %v22474_v56  ;;  %v9770_v56 = vld [vmem:[%s20277_s28 + $0xde] sm:$0xff] }
 0x897   : > { %12255 = vmatpush1.bf16.msra.mxu0 %v19700_v49  ;;  %13220 = vmatpush1.bf16.msra.mxu1 %v19703_v36  ;;  %v22636_v45 = vpack.c.bf16 %v9771_v10, %v9770_v56  ;;  %v19730_v49 = vld [vmem:[%s20257_s26 + $0x660] ss:$16 sps:$4 sm:$0xff]   ;;  %v19733_v36 = vld [vmem:[%s20257_s26 + $0x668] ss:$16 sps:$4 sm:$0xff]  }
 0x898   : > { %12256 = vmatprep.subr.bf16.mxu0 %v19708_v55  ;;  %13221 = vmatprep.subr.bf16.mxu1 %v19711_v33  ;;  %v19738_v55 = vld [vmem:[%s20257_s26 + $0x684] ss:$16 sps:$4 sm:$0xff]   ;;  %v19741_v33 = vld [vmem:[%s20257_s26 + $0x68c] ss:$16 sps:$4 sm:$0xff]   ;;  %v19742_v56 = vld [vmem:[%s20257_s26 + $0x6a0] ss:$16 sps:$4 sm:$0xff]  }
 0x899   : > { %v19745_v10 = vld [vmem:[%s20257_s26 + $0x6a8] ss:$16 sps:$4 sm:$0xff]  }
 0x89b   : > { %12257 = vmatpush1.bf16.msra.mxu0 %v19706_v32  ;;  %13222 = vmatpush1.bf16.msra.mxu1 %v19709_v57  ;;  %v19744_v32 = vld [vmem:[%s20257_s26 + $0x6a4] ss:$16 sps:$4 sm:$0xff]   ;;  %v19747_v57 = vld [vmem:[%s20257_s26 + $0x6ac] ss:$16 sps:$4 sm:$0xff]  }
 0x89c   : > { %12419 = vmatprep.subr.bf16.mxu0 %v19714_v50  ;;  %13384 = vmatprep.subr.bf16.mxu1 %v19717_v52  ;;  %v15817_v50 = vld [vmem:[%s20277_s28 + $0x93] sm:$0xff]  ;;  %v15818_v52 = vld [vmem:[%s20277_s28 + $0x9b] sm:$0xff] }
 0x89d   : > { %12146 = vmatmul.mubr.bf16.gmra.mrb[32].mxu0 %v22628_v22  ;;  %13111 = vmatmul.mubr.bf16.gmra.mrb[32].mxu1 %v22628_v22  ;;  %v22728_v5 = vpack.c.bf16 %v15818_v52, %v15817_v50  ;;  %v19810_v50 = vld [vmem:[%s20257_s26 + $0x804] ss:$16 sps:$4 sm:$0xff]   ;;  %v19813_v52 = vld [vmem:[%s20257_s26 + $0x80c] ss:$16 sps:$4 sm:$0xff]  }
 0x89e   : > { %12155 = vmatprep.mubr.bf16.mxu0 %v22482_v0  ;;  %13120 = vmatprep.mubr.bf16.mxu1 %v22482_v0  ;;  %v22644_v0 = vpack.c.bf16 %v9773_v37, %v9772_v23  ;;  %v19750_v23 = vld [vmem:[%s20257_s26 + $0x6c4] ss:$16 sps:$4 sm:$0xff]   ;;  %v19753_v37 = vld [vmem:[%s20257_s26 + $0x6cc] ss:$16 sps:$4 sm:$0xff]  }
 0x8a5   : > { %12156 = vmatmul.mubr.bf16.gmra.mrb[36].mxu0 %v22636_v45  ;;  %13121 = vmatmul.mubr.bf16.gmra.mrb[36].mxu1 %v22636_v45 }
 0x8a6   : > { %12165 = vmatprep.mubr.bf16.mxu0 %v22490_v28  ;;  %13130 = vmatprep.mubr.bf16.mxu1 %v22490_v28  ;;  %v9776_v28 = vld [vmem:[%s20277_s28 + $0x126] sm:$0xff] }
 0x8a7   : > { %v22662_v60 = vpack.c.bf16 %v9777_v31, %v9776_v28  ;;  %v19756_v28 = vld [vmem:[%s20257_s26 + $0x6e4] ss:$16 sps:$4 sm:$0xff]   ;;  %v19759_v31 = vld [vmem:[%s20257_s26 + $0x6ec] ss:$16 sps:$4 sm:$0xff]  }
 0x8ad   : > { %12166 = vmatmul.mubr.bf16.gmra.mrb[40].mxu0 %v22644_v0  ;;  %13131 = vmatmul.mubr.bf16.gmra.mrb[40].mxu1 %v22644_v0 }
 0x8ae   : > { %12175 = vmatprep.mubr.bf16.mxu0 %v22498_v24  ;;  %13140 = vmatprep.mubr.bf16.mxu1 %v22498_v24  ;;  %v15806_v24 = vld [vmem:[%s20277_s28 + $0x188] sm:$0xff] }
 0x8af   : > { %v9846_v2 = vpack.c.bf16 %v15806_v24, %v15805_v34  ;;  %v15819_v34 = vld [vmem:[%s20277_s28 + $0xab] sm:$0xff]  ;;  %v15820_v24 = vld [vmem:[%s20277_s28 + $0xb3] sm:$0xff] }
 0x8b5   : > { %12176 = vmatmul.mubr.bf16.gmra.mrb[44].mxu0 %v22652_v62  ;;  %13141 = vmatmul.mubr.bf16.gmra.mrb[44].mxu1 %v22652_v62 }
 0x8b6   : > { %12185 = vmatprep.mubr.bf16.mxu0 %v22504_v13  ;;  %13150 = vmatprep.mubr.bf16.mxu1 %v22504_v13  ;;  %v15807_v13 = vld [vmem:[%s20277_s28 + $0x198] sm:$0xff] }
 0x8b7   : > { %v9847_v48 = vpack.c.bf16 %v15808_v20, %v15807_v13  ;;  %v19765_v13 = vld [vmem:[%s20257_s26 + $0x70c] ss:$16 sps:$4 sm:$0xff]   ;;  %v22744_v20 = vpack.c.bf16 %v15820_v24, %v15819_v34  ;;  %v15836_v34 = vld [vmem:[%s20277_s28 + $0x173] sm:$0xff] }
 0x8b8   : > { %v15869_v24 = vld [vmem:[%s20277_s28 + $0x186] sm:$0xff] }
 0x8bd   : > { %12186 = vmatmul.mubr.bf16.gmra.mrb[48].mxu0 %v22662_v60  ;;  %13151 = vmatmul.mubr.bf16.gmra.mrb[48].mxu1 %v22662_v60 }
 0x8be   : > { %12195 = vmatprep.mubr.bf16.mxu0 %v9846_v2  ;;  %13160 = vmatprep.mubr.bf16.mxu1 %v9846_v2  ;;  %v19754_v2 = vld [vmem:[%s20257_s26 + $0x6e0] ss:$16 sps:$4 sm:$0xff]  }
 0x8c5   : > { %12196 = vmatmul.mubr.bf16.gmra.mrb[52].mxu0 %v22670_v3  ;;  %13161 = vmatmul.mubr.bf16.gmra.mrb[52].mxu1 %v22670_v3 }
 0x8c6   : > { %12205 = vmatprep.mubr.bf16.mxu0 %v9847_v48  ;;  %13170 = vmatprep.mubr.bf16.mxu1 %v9847_v48  ;;  %v19763_v48 = vld [vmem:[%s20257_s26 + $0x708] ss:$16 sps:$4 sm:$0xff]  }
 0x8cd   : > { %12206 = vmatmul.mubr.bf16.gmra.mrb[56].mxu0 %v22678_v8  ;;  %13171 = vmatmul.mubr.bf16.gmra.mrb[56].mxu1 %v22678_v8 }
 0x8ce   : > { %12215 = vmatprep.mubr.bf16.mxu0 %v9848_v51  ;;  %13180 = vmatprep.mubr.bf16.mxu1 %v9848_v51  ;;  %v19766_v51 = vld [vmem:[%s20257_s26 + $0x720] ss:$16 sps:$4 sm:$0xff]  }
 0x8d5   : > { %12216 = vmatmul.mubr.bf16.gmra.mrb[60].mxu0 %v22684_v58  ;;  %13181 = vmatmul.mubr.bf16.gmra.mrb[60].mxu1 %v22684_v58 }
 0x8d6   : > { %12258 = vmatprep.mubr.bf16.mxu0 %v22548_v61  ;;  %13223 = vmatprep.mubr.bf16.mxu1 %v22548_v61  ;;  %v19721_v61 = vld [vmem:[%s20257_s26 + $0x628] ss:$16 sps:$4 sm:$0xff]  }
 0x8dd   : > { %12259 = vmatmul.mubr.bf16.vlgmr.msra.gmra.mrb[0].mxu0 %v9881_v29  ;;  %13224 = vmatmul.mubr.bf16.vlgmr.msra.gmra.mrb[0].mxu1 %v9881_v29  ;;  %v19775_v29 = vld [vmem:[%s20257_s26 + $0x748] ss:$16 sps:$4 sm:$0xff]  }
 0x8de   : > { %12420 = vmatpush1.bf16.msra.mxu0 %v19712_v54  ;;  %13385 = vmatpush1.bf16.msra.mxu1 %v19715_v38  ;;  %v19780_v54 = vld [vmem:[%s20257_s26 + $0x764] ss:$16 sps:$4 sm:$0xff]   ;;  %v19783_v38 = vld [vmem:[%s20257_s26 + $0x76c] ss:$16 sps:$4 sm:$0xff]  }
 0x8df   : > { %12268 = vmatprep.mubr.bf16.mxu0 %v22564_v1  ;;  %13233 = vmatprep.mubr.bf16.mxu1 %v22564_v1  ;;  %v15815_v1 = vld [vmem:[%s20277_s28 + $0x7b] sm:$0xff] }
 0x8e0   : > { %12421 = vmatprep.subr.bf16.mxu0 %v19720_v41  ;;  %13386 = vmatprep.subr.bf16.mxu1 %v19723_v26  ;;  %v9883_v19 = vpack.c.bf16 %v15816_v40, %v15815_v1  ;;  %v15823_v41 = vld [vmem:[%s20277_s28 + $0xdb] sm:$0xff]  ;;  %v15824_v26 = vld [vmem:[%s20277_s28 + $0xe3] sm:$0xff] }
 0x8e1   : > { %v19793_v1 = vld [vmem:[%s20257_s26 + $0x7a8] ss:$16 sps:$4 sm:$0xff]   ;;  %v19798_v40 = vld [vmem:[%s20257_s26 + $0x7c4] ss:$16 sps:$4 sm:$0xff]  }
 0x8e2   : > { %12422 = vmatpush1.bf16.msra.mxu0 %v19718_v9  ;;  %13387 = vmatpush1.bf16.msra.mxu1 %v19721_v61  ;;  %v19786_v9 = vld [vmem:[%s20257_s26 + $0x784] ss:$16 sps:$4 sm:$0xff]   ;;  %v19789_v61 = vld [vmem:[%s20257_s26 + $0x78c] ss:$16 sps:$4 sm:$0xff]  }
 0x8e3   : > { %12423 = vmatprep.subr.bf16.mxu0 %v19726_v16  ;;  %13388 = vmatprep.subr.bf16.mxu1 %v19729_v27  ;;  %v22776_v16 = vpack.c.bf16 %v15824_v26, %v15823_v41  ;;  %v19787_v27 = vld [vmem:[%s20257_s26 + $0x788] ss:$16 sps:$4 sm:$0xff]   ;;  %v19808_v26 = vld [vmem:[%s20257_s26 + $0x800] ss:$16 sps:$4 sm:$0xff]  }
 0x8e5   : > { %12269 = vmatmul.mubr.bf16.gmra.mrb[4].mxu0 %v9882_v15  ;;  %13234 = vmatmul.mubr.bf16.gmra.mrb[4].mxu1 %v9882_v15  ;;  %v19792_v15 = vld [vmem:[%s20257_s26 + $0x7a4] ss:$16 sps:$4 sm:$0xff]  }
 0x8e6   : > { %12278 = vmatprep.mubr.bf16.mxu0 %v22580_v6  ;;  %13243 = vmatprep.mubr.bf16.mxu1 %v22580_v6  ;;  %v19736_v6 = vld [vmem:[%s20257_s26 + $0x680] ss:$16 sps:$4 sm:$0xff]  }
 0x8e7   : > { %12424 = vmatpush1.bf16.msra.mxu0 %v19724_v47  ;;  %13389 = vmatpush1.bf16.msra.mxu1 %v19727_v46  ;;  %v19795_v47 = vld [vmem:[%s20257_s26 + $0x7ac] ss:$16 sps:$4 sm:$0xff]   ;;  %v15825_v46 = vld [vmem:[%s20277_s28 + $0xf3] sm:$0xff] }
 0x8e8   : > { %12425 = vmatprep.subr.bf16.mxu0 %v19732_v12  ;;  %13390 = vmatprep.subr.bf16.mxu1 %v19735_v18  ;;  %v15826_v12 = vld [vmem:[%s20277_s28 + $0xfb] sm:$0xff] }
 0x8e9   : > { %v19790_v18 = vld [vmem:[%s20257_s26 + $0x7a0] ss:$16 sps:$4 sm:$0xff]  }
 0x8eb   : > { %12426 = vmatpush1.bf16.msra.mxu0 %v19730_v49  ;;  %13391 = vmatpush1.bf16.msra.mxu1 %v19733_v36  ;;  %v19801_v49 = vld [vmem:[%s20257_s26 + $0x7cc] ss:$16 sps:$4 sm:$0xff]   ;;  %v22792_v36 = vpack.c.bf16 %v15826_v12, %v15825_v46  ;;  %v19820_v12 = vld [vmem:[%s20257_s26 + $0x840] ss:$16 sps:$4 sm:$0xff]  }
 0x8ec   : > { %12427 = vmatprep.subr.bf16.mxu0 %v19738_v55  ;;  %13392 = vmatprep.subr.bf16.mxu1 %v19741_v33  ;;  %v19799_v55 = vld [vmem:[%s20257_s26 + $0x7c8] ss:$16 sps:$4 sm:$0xff]   ;;  %v19804_v33 = vld [vmem:[%s20257_s26 + $0x7e4] ss:$16 sps:$4 sm:$0xff]  }
 0x8ed   : > { %12279 = vmatmul.mubr.bf16.gmra.mrb[8].mxu0 %v9883_v19  ;;  %13244 = vmatmul.mubr.bf16.gmra.mrb[8].mxu1 %v9883_v19  ;;  %v19807_v19 = vld [vmem:[%s20257_s26 + $0x7ec] ss:$16 sps:$4 sm:$0xff]  }
 0x8ee   : > { %12288 = vmatprep.mubr.bf16.mxu0 %v22596_v53  ;;  %13253 = vmatprep.mubr.bf16.mxu1 %v22596_v53  ;;  %v19748_v53 = vld [vmem:[%s20257_s26 + $0x6c0] ss:$16 sps:$4 sm:$0xff]  }
 0x8ef   : > { %12428 = vmatpush1.bf16.msra.mxu0 %v19736_v6  ;;  %13393 = vmatpush1.bf16.msra.mxu1 %v19739_v30  ;;  %v15827_v6 = vld [vmem:[%s20277_s28 + $0x10b] sm:$0xff]  ;;  %v15828_v30 = vld [vmem:[%s20277_s28 + $0x113] sm:$0xff] }
 0x8f0   : > { %12429 = vmatprep.subr.bf16.mxu0 %v19744_v32  ;;  %13394 = vmatprep.subr.bf16.mxu1 %v19747_v57  ;;  %v19802_v32 = vld [vmem:[%s20257_s26 + $0x7e0] ss:$16 sps:$4 sm:$0xff]   ;;  %v19805_v57 = vld [vmem:[%s20257_s26 + $0x7e8] ss:$16 sps:$4 sm:$0xff]  }
 0x8f3   : > { %12430 = vmatpush1.bf16.msra.mxu0 %v19742_v56  ;;  %13395 = vmatpush1.bf16.msra.mxu1 %v19745_v10  ;;  %v22808_v56 = vpack.c.bf16 %v15828_v30, %v15827_v6  ;;  %v15830_v10 = vld [vmem:[%s20277_s28 + $0x12b] sm:$0xff] }
 0x8f4   : > { %12431 = vmatprep.subr.bf16.mxu0 %v19750_v23  ;;  %13396 = vmatprep.subr.bf16.mxu1 %v19753_v37  ;;  %v15831_v37 = vld [vmem:[%s20277_s28 + $0x13b] sm:$0xff] }
 0x8f5   : > { %12289 = vmatmul.mubr.bf16.gmra.mrb[12].mxu0 %v22728_v5  ;;  %13254 = vmatmul.mubr.bf16.gmra.mrb[12].mxu1 %v22728_v5  ;;  %v19835_v30 = vld [vmem:[%s20257_s26 + $0x888] ss:$16 sps:$4 sm:$0xff]  }
 0x8f6   : > { %12298 = vmatprep.mubr.bf16.mxu0 %v22612_v63  ;;  %13263 = vmatprep.mubr.bf16.mxu1 %v22612_v63  ;;  %v19760_v63 = vld [vmem:[%s20257_s26 + $0x700] ss:$16 sps:$4 sm:$0xff]  }
 0x8f7   : > { %12432 = vmatpush1.bf16.msra.mxu0 %v19748_v53  ;;  %13397 = vmatpush1.bf16.msra.mxu1 %v19751_v39  ;;  %v15832_v53 = vld [vmem:[%s20277_s28 + $0x143] sm:$0xff]  ;;  %v15833_v39 = vld [vmem:[%s20277_s28 + $0x153] sm:$0xff] }
 0x8f8   : > { %12433 = vmatprep.subr.bf16.mxu0 %v19756_v28  ;;  %13398 = vmatprep.subr.bf16.mxu1 %v19759_v31  ;;  %v15834_v28 = vld [vmem:[%s20277_s28 + $0x15b] sm:$0xff] }
 0x8f9   : > { %v22832_v31 = vpack.c.bf16 %v15834_v28, %v15833_v39  ;;  %v19847_v28 = vld [vmem:[%s20257_s26 + $0x8c8] ss:$16 sps:$4 sm:$0xff]  }
 0x8fb   : > { %12434 = vmatpush1.bf16.msra.mxu0 %v19754_v2  ;;  %13399 = vmatpush1.bf16.msra.mxu1 %v19757_v4 }
 0x8fc   : > { %12435 = vmatprep.subr.bf16.mxu0 %v19762_v44  ;;  %13400 = vmatprep.subr.bf16.mxu1 %v19765_v13  ;;  %v15838_v44 = vld [vmem:[%s20277_s28 + $0x18b] sm:$0xff]  ;;  %v15871_v13 = vld [vmem:[%s20277_s28 + $0x19e] sm:$0xff] }
 0x8fd   : > { %12299 = vmatmul.mubr.bf16.gmra.mrb[16].mxu0 %v22744_v20  ;;  %13264 = vmatmul.mubr.bf16.gmra.mrb[16].mxu1 %v22744_v20 }
 0x8fe   : > { %12308 = vmatprep.mubr.bf16.mxu0 %v22628_v22  ;;  %13273 = vmatprep.mubr.bf16.mxu1 %v22628_v22  ;;  %v19772_v22 = vld [vmem:[%s20257_s26 + $0x740] ss:$16 sps:$4 sm:$0xff]  }
 0x8ff   : > { %12436 = vmatpush1.bf16.msra.mxu0 %v19760_v63  ;;  %13401 = vmatpush1.bf16.msra.mxu1 %v19763_v48  ;;  %v15872_v63 = vld [vmem:[%s20277_s28 + $0x1a6] sm:$0xff] }
 0x900   : > { %12437 = vmatprep.subr.bf16.mxu0 %v19768_v59  ;;  %13402 = vmatprep.subr.bf16.mxu1 %v19771_v7  ;;  %v22856_v59 = vpack.c.bf16 %v15872_v63, %v15871_v13  ;;  %v15839_v7 = vld [vmem:[%s20277_s28 + $0x19b] sm:$0xff]  ;;  %v15886_v63 = vld [vmem:[%s20277_s28 + $0x110] sm:$0xff] }
 0x903   : > { %12438 = vmatpush1.bf16.msra.mxu0 %v19766_v51  ;;  %13403 = vmatpush1.bf16.msra.mxu1 %v19769_v14  ;;  %v15874_v51 = vld [vmem:[%s20277_s28 + $0x1be] sm:$0xff]  ;;  %v22866_v14 = vpack.c.bf16 %v15840_v21, %v15839_v7 }
 0x904   : > { %12439 = vmatprep.subr.bf16.mxu0 %v19774_v35  ;;  %13404 = vmatprep.subr.bf16.mxu1 %v19777_v42  ;;  %v22868_v35 = vpack.c.bf16 %v15874_v51, %v15873_v17  ;;  %v15841_v42 = vld [vmem:[%s20277_s28 + $0x1b3] sm:$0xff]  ;;  %v15887_v21 = vld [vmem:[%s20277_s28 + $0x120] sm:$0xff]  ;;  %v15888_v17 = vld [vmem:[%s20277_s28 + $0x128] sm:$0xff] }
 0x905   : > { %12309 = vmatmul.mubr.bf16.gmra.mrb[20].mxu0 %v22760_v43  ;;  %13274 = vmatmul.mubr.bf16.gmra.mrb[20].mxu1 %v22760_v43  ;;  %v9984_v51 = vpack.c.bf16 %v15888_v17, %v15887_v21  ;;  %v15953_v21 = vld [vmem:[%s20277_s28 + $0x13e] sm:$0xff]  ;;  %v15954_v17 = vld [vmem:[%s20277_s28 + $0x146] sm:$0xff] }
 0x906   : > { %12318 = vmatprep.mubr.bf16.mxu0 %v22636_v45  ;;  %13283 = vmatprep.mubr.bf16.mxu1 %v22636_v45  ;;  %v19784_v45 = vld [vmem:[%s20257_s26 + $0x780] ss:$16 sps:$4 sm:$0xff]  }
 0x907   : > { %12440 = vmatpush1.bf16.msra.mxu0 %v19772_v22  ;;  %13405 = vmatpush1.bf16.msra.mxu1 %v19775_v29  ;;  %v15842_v22 = vld [vmem:[%s20277_s28 + $0x1bb] sm:$0xff] }
 0x908   : > { %12441 = vmatprep.subr.bf16.mxu0 %v19780_v54  ;;  %13406 = vmatprep.subr.bf16.mxu1 %v19783_v38  ;;  %v22876_v29 = vpack.c.bf16 %v15842_v22, %v15841_v42  ;;  %v15875_v54 = vld [vmem:[%s20277_s28 + $0x90] sm:$0xff]  ;;  %v15876_v38 = vld [vmem:[%s20277_s28 + $0x98] sm:$0xff]  ;;  %v15890_v42 = vld [vmem:[%s20277_s28 + $0x140] sm:$0xff] }
 0x909   : > { %v9978_v41 = vpack.c.bf16 %v15876_v38, %v15875_v54  ;;  %v15892_v54 = vld [vmem:[%s20277_s28 + $0x158] sm:$0xff] }
 0x90b   : > { %12442 = vmatpush1.bf16.msra.mxu0 %v19778_v25  ;;  %13407 = vmatpush1.bf16.msra.mxu1 %v19781_v11  ;;  %v19811_v25 = vld [vmem:[%s20257_s26 + $0x808] ss:$16 sps:$4 sm:$0xff]   ;;  %v19816_v11 = vld [vmem:[%s20257_s26 + $0x824] ss:$16 sps:$4 sm:$0xff]  }
 0x90c   : > { %12443 = vmatprep.subr.bf16.mxu0 %v19786_v9  ;;  %13408 = vmatprep.subr.bf16.mxu1 %v19789_v61  ;;  %v19819_v9 = vld [vmem:[%s20257_s26 + $0x82c] ss:$16 sps:$4 sm:$0xff]  }
 0x90d   : > { %12319 = vmatmul.mubr.bf16.gmra.mrb[24].mxu0 %v22776_v16  ;;  %13284 = vmatmul.mubr.bf16.gmra.mrb[24].mxu1 %v22776_v16  ;;  %v15877_v61 = vld [vmem:[%s20277_s28 + $0xa8] sm:$0xff] }
 0x90e   : > { %12328 = vmatprep.mubr.bf16.mxu0 %v22644_v0  ;;  %13293 = vmatprep.mubr.bf16.mxu1 %v22644_v0  ;;  %v19796_v0 = vld [vmem:[%s20257_s26 + $0x7c0] ss:$16 sps:$4 sm:$0xff]  }
 0x90f   : > { %12444 = vmatpush1.bf16.msra.mxu0 %v19784_v45  ;;  %13409 = vmatpush1.bf16.msra.mxu1 %v19787_v27  ;;  %v15878_v45 = vld [vmem:[%s20277_s28 + $0xb0] sm:$0xff] }
 0x910   : > { %12445 = vmatprep.subr.bf16.mxu0 %v19792_v15  ;;  %13410 = vmatprep.subr.bf16.mxu1 %v19795_v47  ;;  %v19814_v27 = vld [vmem:[%s20257_s26 + $0x820] ss:$16 sps:$4 sm:$0xff]   ;;  %v19822_v15 = vld [vmem:[%s20257_s26 + $0x844] ss:$16 sps:$4 sm:$0xff]   ;;  %v19825_v47 = vld [vmem:[%s20257_s26 + $0x84c] ss:$16 sps:$4 sm:$0xff]   ;;  %v9979_v46 = vpack.c.bf16 %v15878_v45, %v15877_v61 }
 0x911   : > { %v15900_v45 = vld [vmem:[%s20277_s28 + $0x1b8] sm:$0xff] }
 0x913   : > { %12446 = vmatpush1.bf16.msra.mxu0 %v19790_v18  ;;  %13411 = vmatpush1.bf16.msra.mxu1 %v19793_v1  ;;  %v19823_v18 = vld [vmem:[%s20257_s26 + $0x848] ss:$16 sps:$4 sm:$0xff]   ;;  %v19828_v1 = vld [vmem:[%s20257_s26 + $0x864] ss:$16 sps:$4 sm:$0xff]  }
 0x914   : > { %12447 = vmatprep.subr.bf16.mxu0 %v19798_v40  ;;  %13412 = vmatprep.subr.bf16.mxu1 %v19801_v49  ;;  %v19831_v40 = vld [vmem:[%s20257_s26 + $0x86c] ss:$16 sps:$4 sm:$0xff]  }
 0x915   : > { %12329 = vmatmul.mubr.bf16.gmra.mrb[28].mxu0 %v22792_v36  ;;  %13294 = vmatmul.mubr.bf16.gmra.mrb[28].mxu1 %v22792_v36  ;;  %v15880_v49 = vld [vmem:[%s20277_s28 + $0xc8] sm:$0xff] }
 0x916   : > { %12338 = vmatprep.mubr.bf16.mxu0 %v22652_v62  ;;  %13303 = vmatprep.mubr.bf16.mxu1 %v22652_v62  ;;  %v15829_v62 = vld [vmem:[%s20277_s28 + $0x123] sm:$0xff] }
 0x917   : > { %12448 = vmatpush1.bf16.msra.mxu0 %v19796_v0  ;;  %13413 = vmatpush1.bf16.msra.mxu1 %v19799_v55  ;;  %v22816_v23 = vpack.c.bf16 %v15830_v10, %v15829_v62  ;;  %v19826_v0 = vld [vmem:[%s20257_s26 + $0x860] ss:$16 sps:$4 sm:$0xff]   ;;  %v19829_v55 = vld [vmem:[%s20257_s26 + $0x868] ss:$16 sps:$4 sm:$0xff]  }
 0x918   : > { %12449 = vmatprep.subr.bf16.mxu0 %v19804_v33  ;;  %13414 = vmatprep.subr.bf16.mxu1 %v19807_v19  ;;  %v19834_v33 = vld [vmem:[%s20257_s26 + $0x884] ss:$16 sps:$4 sm:$0xff]   ;;  %v19837_v19 = vld [vmem:[%s20257_s26 + $0x88c] ss:$16 sps:$4 sm:$0xff]   ;;  %v19838_v62 = vld [vmem:[%s20257_s26 + $0x8a0] ss:$16 sps:$4 sm:$0xff]  }
 0x919   : > { %v19841_v10 = vld [vmem:[%s20257_s26 + $0x8a8] ss:$16 sps:$4 sm:$0xff]  }
 0x91b   : > { %12450 = vmatpush1.bf16.msra.mxu0 %v19802_v32  ;;  %13415 = vmatpush1.bf16.msra.mxu1 %v19805_v57  ;;  %v19840_v32 = vld [vmem:[%s20257_s26 + $0x8a4] ss:$16 sps:$4 sm:$0xff]   ;;  %v19843_v57 = vld [vmem:[%s20257_s26 + $0x8ac] ss:$16 sps:$4 sm:$0xff]  }
 0x91c   : > { %12612 = vmatprep.subr.bf16.mxu0 %v19810_v50  ;;  %13577 = vmatprep.subr.bf16.mxu1 %v19813_v52  ;;  %v15881_v50 = vld [vmem:[%s20277_s28 + $0xd8] sm:$0xff]  ;;  %v15882_v52 = vld [vmem:[%s20277_s28 + $0xe0] sm:$0xff] }
 0x91d   : > { %12339 = vmatmul.mubr.bf16.gmra.mrb[32].mxu0 %v22808_v56  ;;  %13304 = vmatmul.mubr.bf16.gmra.mrb[32].mxu1 %v22808_v56  ;;  %v9981_v39 = vpack.c.bf16 %v15882_v52, %v15881_v50  ;;  %v15941_v52 = vld [vmem:[%s20277_s28 + $0xae] sm:$0xff] }
 0x91e   : > { %12348 = vmatprep.mubr.bf16.mxu0 %v22662_v60  ;;  %13313 = vmatprep.mubr.bf16.mxu1 %v22662_v60  ;;  %v22824_v60 = vpack.c.bf16 %v15832_v53, %v15831_v37  ;;  %v19846_v37 = vld [vmem:[%s20257_s26 + $0x8c4] ss:$16 sps:$4 sm:$0xff]   ;;  %v19849_v53 = vld [vmem:[%s20257_s26 + $0x8cc] ss:$16 sps:$4 sm:$0xff]  }
 0x925   : > { %12349 = vmatmul.mubr.bf16.gmra.mrb[36].mxu0 %v22816_v23  ;;  %13314 = vmatmul.mubr.bf16.gmra.mrb[36].mxu1 %v22816_v23 }
 0x926   : > { %12358 = vmatprep.mubr.bf16.mxu0 %v22670_v3  ;;  %13323 = vmatprep.mubr.bf16.mxu1 %v22670_v3  ;;  %v15835_v3 = vld [vmem:[%s20277_s28 + $0x16b] sm:$0xff] }
 0x927   : > { %v22842_v2 = vpack.c.bf16 %v15836_v34, %v15835_v3  ;;  %v19852_v3 = vld [vmem:[%s20257_s26 + $0x8e4] ss:$16 sps:$4 sm:$0xff]   ;;  %v19855_v34 = vld [vmem:[%s20257_s26 + $0x8ec] ss:$16 sps:$4 sm:$0xff]  }
 0x92d   : > { %12359 = vmatmul.mubr.bf16.gmra.mrb[40].mxu0 %v22824_v60  ;;  %13324 = vmatmul.mubr.bf16.gmra.mrb[40].mxu1 %v22824_v60 }
 0x92e   : > { %12368 = vmatprep.mubr.bf16.mxu0 %v22678_v8  ;;  %13333 = vmatprep.mubr.bf16.mxu1 %v22678_v8  ;;  %v15870_v8 = vld [vmem:[%s20277_s28 + $0x18e] sm:$0xff] }
 0x92f   : > { %v22844_v4 = vpack.c.bf16 %v15870_v8, %v15869_v24  ;;  %v15883_v24 = vld [vmem:[%s20277_s28 + $0xf0] sm:$0xff]  ;;  %v15884_v8 = vld [vmem:[%s20277_s28 + $0xf8] sm:$0xff] }
 0x930   : > { %v9982_v13 = vpack.c.bf16 %v15884_v8, %v15883_v24  ;;  %v15948_v24 = vld [vmem:[%s20277_s28 + $0xfe] sm:$0xff] }
 0x935   : > { %12369 = vmatmul.mubr.bf16.gmra.mrb[44].mxu0 %v22832_v31  ;;  %13334 = vmatmul.mubr.bf16.gmra.mrb[44].mxu1 %v22832_v31 }
 0x936   : > { %12378 = vmatprep.mubr.bf16.mxu0 %v22684_v58  ;;  %13343 = vmatprep.mubr.bf16.mxu1 %v22684_v58  ;;  %v15837_v58 = vld [vmem:[%s20277_s28 + $0x183] sm:$0xff] }
 0x937   : > { %v22854_v48 = vpack.c.bf16 %v15838_v44, %v15837_v58  ;;  %v19850_v58 = vld [vmem:[%s20257_s26 + $0x8e0] ss:$16 sps:$4 sm:$0xff]   ;;  %v19853_v44 = vld [vmem:[%s20257_s26 + $0x8e8] ss:$16 sps:$4 sm:$0xff]  }
 0x93d   : > { %12379 = vmatmul.mubr.bf16.gmra.mrb[48].mxu0 %v22842_v2  ;;  %13344 = vmatmul.mubr.bf16.gmra.mrb[48].mxu1 %v22842_v2 }
 0x93e   : > { %12388 = vmatprep.mubr.bf16.mxu0 %v22844_v4  ;;  %13353 = vmatprep.mubr.bf16.mxu1 %v22844_v4 }
 0x945   : > { %12389 = vmatmul.mubr.bf16.gmra.mrb[52].mxu0 %v22854_v48  ;;  %13354 = vmatmul.mubr.bf16.gmra.mrb[52].mxu1 %v22854_v48 }
 0x946   : > { %12398 = vmatprep.mubr.bf16.mxu0 %v22856_v59  ;;  %13363 = vmatprep.mubr.bf16.mxu1 %v22856_v59 }
 0x94d   : > { %12399 = vmatmul.mubr.bf16.gmra.mrb[56].mxu0 %v22866_v14  ;;  %13364 = vmatmul.mubr.bf16.gmra.mrb[56].mxu1 %v22866_v14 }
 0x94e   : > { %12408 = vmatprep.mubr.bf16.mxu0 %v22868_v35  ;;  %13373 = vmatprep.mubr.bf16.mxu1 %v22868_v35 }
 0x955   : > { %12409 = vmatmul.mubr.bf16.gmra.mrb[60].mxu0 %v22876_v29  ;;  %13374 = vmatmul.mubr.bf16.gmra.mrb[60].mxu1 %v22876_v29 }
 0x956   : > { %12451 = vmatprep.mubr.bf16.mxu0 %v22728_v5  ;;  %13416 = vmatprep.mubr.bf16.mxu1 %v22728_v5  ;;  %v19817_v5 = vld [vmem:[%s20257_s26 + $0x828] ss:$16 sps:$4 sm:$0xff]  }
 0x95d   : > { %12452 = vmatmul.mubr.bf16.vlgmr.msra.gmra.mrb[0].mxu0 %v9978_v41  ;;  %13417 = vmatmul.mubr.bf16.vlgmr.msra.gmra.mrb[0].mxu1 %v9978_v41  ;;  %v15894_v41 = vld [vmem:[%s20277_s28 + $0x170] sm:$0xff] }
 0x95e   : > { %12613 = vmatpush1.bf16.msra.mxu0 %v19808_v26  ;;  %13578 = vmatpush1.bf16.msra.mxu1 %v19811_v25  ;;  %v15896_v25 = vld [vmem:[%s20277_s28 + $0x188] sm:$0xff] }
 0x95f   : > { %12461 = vmatprep.mubr.bf16.mxu0 %v22744_v20  ;;  %13426 = vmatprep.mubr.bf16.mxu1 %v22744_v20  ;;  %v15879_v20 = vld [vmem:[%s20277_s28 + $0xc0] sm:$0xff] }
 0x960   : > { %12614 = vmatprep.subr.bf16.mxu0 %v19816_v11  ;;  %13579 = vmatprep.subr.bf16.mxu1 %v19819_v9  ;;  %v9980_v6 = vpack.c.bf16 %v15880_v49, %v15879_v20  ;;  %v15898_v9 = vld [vmem:[%s20277_s28 + $0x1a0] sm:$0xff]  ;;  %v15904_v20 = vld [vmem:[%s20277_s28 + $0x1e8] sm:$0xff] }
 0x961   : > { %v15937_v49 = vld [vmem:[%s20277_s28 + $0x1fb] sm:$0xff] }
 0x962   : > { %12615 = vmatpush1.bf16.msra.mxu0 %v19814_v27  ;;  %13580 = vmatpush1.bf16.msra.mxu1 %v19817_v5  ;;  %v15933_v27 = vld [vmem:[%s20277_s28 + $0x1cb] sm:$0xff]  ;;  %v15934_v5 = vld [vmem:[%s20277_s28 + $0x1d3] sm:$0xff] }
 0x963   : > { %12616 = vmatprep.subr.bf16.mxu0 %v19822_v15  ;;  %13581 = vmatprep.subr.bf16.mxu1 %v19825_v47  ;;  %v15901_v47 = vld [vmem:[%s20277_s28 + $0x1c8] sm:$0xff] }
 0x965   : > { %12462 = vmatmul.mubr.bf16.gmra.mrb[4].mxu0 %v9979_v46  ;;  %13427 = vmatmul.mubr.bf16.gmra.mrb[4].mxu1 %v9979_v46  ;;  %v15902_v46 = vld [vmem:[%s20277_s28 + $0x1d0] sm:$0xff] }
 0x966   : > { %12471 = vmatprep.mubr.bf16.mxu0 %v22760_v43  ;;  %13436 = vmatprep.mubr.bf16.mxu1 %v22760_v43  ;;  %v19832_v43 = vld [vmem:[%s20257_s26 + $0x880] ss:$16 sps:$4 sm:$0xff]  }
 0x967   : > { %12617 = vmatpush1.bf16.msra.mxu0 %v19820_v12  ;;  %13582 = vmatpush1.bf16.msra.mxu1 %v19823_v18  ;;  %v15935_v12 = vld [vmem:[%s20277_s28 + $0x1e3] sm:$0xff]  ;;  %v15936_v18 = vld [vmem:[%s20277_s28 + $0x1eb] sm:$0xff] }
 0x968   : > { %12618 = vmatprep.subr.bf16.mxu0 %v19828_v1  ;;  %13583 = vmatprep.subr.bf16.mxu1 %v19831_v40  ;;  %v9991_v1 = vpack.c.bf16 %v15902_v46, %v15901_v47  ;;  %v15903_v40 = vld [vmem:[%s20277_s28 + $0x1e0] sm:$0xff] }
 0x96b   : > { %12619 = vmatpush1.bf16.msra.mxu0 %v19826_v0  ;;  %13584 = vmatpush1.bf16.msra.mxu1 %v19829_v55  ;;  %v15938_v0 = vld [vmem:[%s20277_s28 + $0x203] sm:$0xff]  ;;  %v9992_v55 = vpack.c.bf16 %v15904_v20, %v15903_v40 }
 0x96c   : > { %12620 = vmatprep.subr.bf16.mxu0 %v19834_v33  ;;  %13585 = vmatprep.subr.bf16.mxu1 %v19837_v19  ;;  %v10041_v33 = vpack.c.bf16 %v15938_v0, %v15937_v49  ;;  %v15905_v19 = vld [vmem:[%s20277_s28 + $0x1f8] sm:$0xff] }
 0x96d   : > { %12472 = vmatmul.mubr.bf16.gmra.mrb[8].mxu0 %v9980_v6  ;;  %13437 = vmatmul.mubr.bf16.gmra.mrb[8].mxu1 %v9980_v6  ;;  %v15906_v6 = vld [vmem:[%s20277_s28 + $0x200] sm:$0xff] }
 0x96e   : > { %12481 = vmatprep.mubr.bf16.mxu0 %v22776_v16  ;;  %13446 = vmatprep.mubr.bf16.mxu1 %v22776_v16  ;;  %v19844_v16 = vld [vmem:[%s20257_s26 + $0x8c0] ss:$16 sps:$4 sm:$0xff]  }
 0x96f   : > { %12621 = vmatpush1.bf16.msra.mxu0 %v19832_v43  ;;  %13586 = vmatpush1.bf16.msra.mxu1 %v19835_v30  ;;  %v9993_v43 = vpack.c.bf16 %v15906_v6, %v15905_v19  ;;  %v20050_v30 = vmov 0  }
 0x970   : > { %12622 = vmatprep.subr.bf16.mxu0 %v19840_v32  ;;  %13587 = vmatprep.subr.bf16.mxu1 %v19843_v57  ;;  %v15939_v32 = vld [vmem:[%s20277_s28 + $0x96] sm:$0xff]  ;;  %v15940_v57 = vld [vmem:[%s20277_s28 + $0x9e] sm:$0xff] }
 0x971   : > { %v10074_v50 = vpack.c.bf16 %v15940_v57, %v15939_v32 }
 0x973   : > { %12623 = vmatpush1.bf16.msra.mxu0 %v19838_v62  ;;  %13588 = vmatpush1.bf16.msra.mxu1 %v19841_v10  ;;  %v15942_v62 = vld [vmem:[%s20277_s28 + $0xb6] sm:$0xff] }
 0x974   : > { %12624 = vmatprep.subr.bf16.mxu0 %v19846_v37  ;;  %13589 = vmatprep.subr.bf16.mxu1 %v19849_v53  ;;  %v10075_v10 = vpack.c.bf16 %v15942_v62, %v15941_v52  ;;  %v15943_v37 = vld [vmem:[%s20277_s28 + $0xc6] sm:$0xff]  ;;  %v15944_v53 = vld [vmem:[%s20277_s28 + $0xce] sm:$0xff] }
 0x975   : > { %12482 = vmatmul.mubr.bf16.gmra.mrb[12].mxu0 %v9981_v39  ;;  %13447 = vmatmul.mubr.bf16.gmra.mrb[12].mxu1 %v9981_v39  ;;  %v10076_v39 = vpack.c.bf16 %v15944_v53, %v15943_v37 }
 0x976   : > { %12491 = vmatprep.mubr.bf16.mxu0 %v22792_v36  ;;  %13456 = vmatprep.mubr.bf16.mxu1 %v22792_v36  ;;  %v15885_v36 = vld [vmem:[%s20277_s28 + $0x108] sm:$0xff] }
 0x977   : > { %12625 = vmatpush1.bf16.msra.mxu0 %v19844_v16  ;;  %13590 = vmatpush1.bf16.msra.mxu1 %v19847_v28  ;;  %v9983_v7 = vpack.c.bf16 %v15886_v63, %v15885_v36  ;;  %v15945_v16 = vld [vmem:[%s20277_s28 + $0xde] sm:$0xff]  ;;  %v15946_v28 = vld [vmem:[%s20277_s28 + $0xe6] sm:$0xff]  ;;  %v15952_v63 = vld [vmem:[%s20277_s28 + $0x12e] sm:$0xff] }
 0x978   : > { %12626 = vmatprep.subr.bf16.mxu0 %v19852_v3  ;;  %13591 = vmatprep.subr.bf16.mxu1 %v19855_v34  ;;  %v10077_v3 = vpack.c.bf16 %v15946_v28, %v15945_v16  ;;  %v15947_v34 = vld [vmem:[%s20277_s28 + $0xf6] sm:$0xff]  ;;  %v15951_v36 = vld [vmem:[%s20277_s28 + $0x126] sm:$0xff] }
 0x979   : > { %v10078_v8 = vpack.c.bf16 %v15948_v24, %v15947_v34 }
 0x97b   : > { %12627 = vmatpush1.bf16.msra.mxu0 %v19850_v58  ;;  %13592 = vmatpush1.bf16.msra.mxu1 %v19853_v44  ;;  %v15949_v58 = vld [vmem:[%s20277_s28 + $0x10e] sm:$0xff]  ;;  %v15950_v44 = vld [vmem:[%s20277_s28 + $0x116] sm:$0xff] }
 0x97d   : > { %12492 = vmatmul.mubr.bf16.gmra.mrb[16].mxu0 %v9982_v13  ;;  %13457 = vmatmul.mubr.bf16.gmra.mrb[16].mxu1 %v9982_v13  ;;  %v10079_v13 = vpack.c.bf16 %v15950_v44, %v15949_v58 }
 0x97e   : > { %12501 = vmatprep.mubr.bf16.mxu0 %v22808_v56  ;;  %13466 = vmatprep.mubr.bf16.mxu1 %v22808_v56  ;;  %v15889_v56 = vld [vmem:[%s20277_s28 + $0x138] sm:$0xff] }
 0x97f   : > { %v9985_v22 = vpack.c.bf16 %v15890_v42, %v15889_v56  ;;  %v15955_v56 = vld [vmem:[%s20277_s28 + $0x156] sm:$0xff]  ;;  %v15956_v42 = vld [vmem:[%s20277_s28 + $0x15e] sm:$0xff] }
 0x985   : > { %12502 = vmatmul.mubr.bf16.gmra.mrb[20].mxu0 %v9983_v7  ;;  %13467 = vmatmul.mubr.bf16.gmra.mrb[20].mxu1 %v9983_v7  ;;  %v10080_v7 = vpack.c.bf16 %v15952_v63, %v15951_v36 }
 0x986   : > { %12511 = vmatprep.mubr.bf16.mxu0 %v22816_v23  ;;  %13476 = vmatprep.mubr.bf16.mxu1 %v22816_v23  ;;  %v15891_v23 = vld [vmem:[%s20277_s28 + $0x150] sm:$0xff] }
 0x987   : > { %v9986_v38 = vpack.c.bf16 %v15892_v54, %v15891_v23  ;;  %v15957_v23 = vld [vmem:[%s20277_s28 + $0x16e] sm:$0xff]  ;;  %v15958_v54 = vld [vmem:[%s20277_s28 + $0x176] sm:$0xff] }
 0x98d   : > { %12512 = vmatmul.mubr.bf16.gmra.mrb[24].mxu0 %v9984_v51  ;;  %13477 = vmatmul.mubr.bf16.gmra.mrb[24].mxu1 %v9984_v51  ;;  %v10081_v51 = vpack.c.bf16 %v15954_v17, %v15953_v21 }
 0x98e   : > { %12521 = vmatprep.mubr.bf16.mxu0 %v22824_v60  ;;  %13486 = vmatprep.mubr.bf16.mxu1 %v22824_v60  ;;  %v15893_v60 = vld [vmem:[%s20277_s28 + $0x168] sm:$0xff] }
 0x98f   : > { %v9987_v26 = vpack.c.bf16 %v15894_v41, %v15893_v60  ;;  %v15966_v60 = vld [vmem:[%s20277_s28 + $0x1d6] sm:$0xff] }
 0x995   : > { %12522 = vmatmul.mubr.bf16.gmra.mrb[28].mxu0 %v9985_v22  ;;  %13487 = vmatmul.mubr.bf16.gmra.mrb[28].mxu1 %v9985_v22  ;;  %v10082_v22 = vpack.c.bf16 %v15956_v42, %v15955_v56 }
 0x996   : > { %12531 = vmatprep.mubr.bf16.mxu0 %v22832_v31  ;;  %13496 = vmatprep.mubr.bf16.mxu1 %v22832_v31  ;;  %v15895_v31 = vld [vmem:[%s20277_s28 + $0x180] sm:$0xff] }
 0x997   : > { %v9988_v11 = vpack.c.bf16 %v15896_v25, %v15895_v31  ;;  %v15970_v25 = vld [vmem:[%s20277_s28 + $0x206] sm:$0xff] }
 0x99d   : > { %12532 = vmatmul.mubr.bf16.gmra.mrb[32].mxu0 %v9986_v38  ;;  %13497 = vmatmul.mubr.bf16.gmra.mrb[32].mxu1 %v9986_v38  ;;  %v10083_v38 = vpack.c.bf16 %v15958_v54, %v15957_v23 }
 0x99e   : > { %12541 = vmatprep.mubr.bf16.mxu0 %v22842_v2  ;;  %13506 = vmatprep.mubr.bf16.mxu1 %v22842_v2  ;;  %v15897_v2 = vld [vmem:[%s20277_s28 + $0x198] sm:$0xff] }
 0x99f   : > { %v9989_v61 = vpack.c.bf16 %v15898_v9, %v15897_v2  ;;  %v10380_v2 = vlaneseq }
 0x9a1   : > { %v10381_v9 = vshrl.u32 %v10380_v2, 7 }
 0x9a5   : > { %12542 = vmatmul.mubr.bf16.gmra.mrb[36].mxu0 %v9987_v26  ;;  %13507 = vmatmul.mubr.bf16.gmra.mrb[36].mxu1 %v9987_v26  ;;  %v15968_v26 = vld [vmem:[%s20277_s28 + $0x1ee] sm:$0xff] }
 0x9a6   : > { %12551 = vmatprep.mubr.bf16.mxu0 %v22854_v48  ;;  %13516 = vmatprep.mubr.bf16.mxu1 %v22854_v48  ;;  %v15899_v48 = vld [vmem:[%s20277_s28 + $0x1b0] sm:$0xff] }
 0x9a7   : > { %v9990_v15 = vpack.c.bf16 %v15900_v45, %v15899_v48  ;;  %v10390_v48 = vsub.s32 2, %v10381_v9  ;;  %v10378_v45 = vld [vmem:[%s20263_s6] sm:$0xf] }
 0x9ad   : > { %12552 = vmatmul.mubr.bf16.gmra.mrb[40].mxu0 %v9988_v11  ;;  %13517 = vmatmul.mubr.bf16.gmra.mrb[40].mxu1 %v9988_v11 }
 0x9ae   : > { %12561 = vmatprep.mubr.bf16.mxu0 %v22866_v14  ;;  %13526 = vmatprep.mubr.bf16.mxu1 %v22866_v14  ;;  %v10039_v14 = vpack.c.bf16 %v15934_v5, %v15933_v27  ;;  %v10386_v27 = vsub.s32 1, %v10381_v9  ;;  %v10394_v5 = vsub.s32 3, %v10381_v9 }
 0x9b0   : > { %v23043_v47 = vrot.slane %v10378_v45, %v10386_v27  ;;  %v23045_v46 = vrot.slane %v10378_v45, %v10394_v5 }
 0x9b5   : > { %12562 = vmatmul.mubr.bf16.gmra.mrb[44].mxu0 %v9989_v61  ;;  %13527 = vmatmul.mubr.bf16.gmra.mrb[44].mxu1 %v9989_v61  ;;  %v10382_v61 = vsub.s32 0, %v10381_v9 }
 0x9b6   : > { %12571 = vmatprep.mubr.bf16.mxu0 %v22876_v29  ;;  %13536 = vmatprep.mubr.bf16.mxu1 %v22876_v29  ;;  %v10040_v29 = vpack.c.bf16 %v15936_v18, %v15935_v12 }
 0x9bd   : > { %12572 = vmatmul.mubr.bf16.gmra.mrb[48].mxu0 %v9990_v15  ;;  %13537 = vmatmul.mubr.bf16.gmra.mrb[48].mxu1 %v9990_v15  ;;  %v23039_v15 = vrot.slane %v10378_v45, %v10382_v61 }
 0x9be   : > { %12581 = vmatprep.mubr.bf16.mxu0 %v10039_v14  ;;  %13546 = vmatprep.mubr.bf16.mxu1 %v10039_v14  ;;  %v23041_v14 = vrot.slane %v10378_v45, %v10390_v48 }
 0x9c5   : > { %12582 = vmatmul.mubr.bf16.gmra.mrb[52].mxu0 %v9991_v1  ;;  %13547 = vmatmul.mubr.bf16.gmra.mrb[52].mxu1 %v9991_v1 }
 0x9c6   : > { %12591 = vmatprep.mubr.bf16.mxu0 %v10040_v29  ;;  %13556 = vmatprep.mubr.bf16.mxu1 %v10040_v29 }
 0x9cd   : > { %12592 = vmatmul.mubr.bf16.gmra.mrb[56].mxu0 %v9992_v55  ;;  %13557 = vmatmul.mubr.bf16.gmra.mrb[56].mxu1 %v9992_v55 }
 0x9ce   : > { %12601 = vmatprep.mubr.bf16.mxu0 %v10041_v33  ;;  %13566 = vmatprep.mubr.bf16.mxu1 %v10041_v33 }
 0x9d5   : > { %12602 = vmatmul.mubr.bf16.gmra.mrb[60].mxu0 %v9993_v43  ;;  %13567 = vmatmul.mubr.bf16.gmra.mrb[60].mxu1 %v9993_v43 }
 0x9d6   : > { %12644 = vmatprep.mubr.bf16.mxu0 %v20050_v30  ;;  %13609 = vmatprep.mubr.bf16.mxu1 %v20050_v30 }
 0x9dd   : > { %12645 = vmatmul.mubr.bf16.vlgmr.msra.gmra.mrb[0].mxu0 %v10074_v50  ;;  %13610 = vmatmul.mubr.bf16.vlgmr.msra.gmra.mrb[0].mxu1 %v10074_v50 }
 0x9de   : > { %12654 = vmatprep.mubr.bf16.mxu0 %v20050_v30  ;;  %13619 = vmatprep.mubr.bf16.mxu1 %v20050_v30 }
 0x9e5   : > { %12655 = vmatmul.mubr.bf16.gmra.mrb[4].mxu0 %v10075_v10  ;;  %13620 = vmatmul.mubr.bf16.gmra.mrb[4].mxu1 %v10075_v10 }
 0x9e6   : > { %12664 = vmatprep.mubr.bf16.mxu0 %v20050_v30  ;;  %13629 = vmatprep.mubr.bf16.mxu1 %v20050_v30 }
 0x9ed   : > { %12665 = vmatmul.mubr.bf16.gmra.mrb[8].mxu0 %v10076_v39  ;;  %13630 = vmatmul.mubr.bf16.gmra.mrb[8].mxu1 %v10076_v39 }
 0x9ee   : > { %12674 = vmatprep.mubr.bf16.mxu0 %v20050_v30  ;;  %13639 = vmatprep.mubr.bf16.mxu1 %v20050_v30 }
 0x9f5   : > { %12675 = vmatmul.mubr.bf16.gmra.mrb[12].mxu0 %v10077_v3  ;;  %13640 = vmatmul.mubr.bf16.gmra.mrb[12].mxu1 %v10077_v3 }
 0x9f6   : > { %12684 = vmatprep.mubr.bf16.mxu0 %v20050_v30  ;;  %13649 = vmatprep.mubr.bf16.mxu1 %v20050_v30 }
 0x9fd   : > { %12685 = vmatmul.mubr.bf16.gmra.mrb[16].mxu0 %v10078_v8  ;;  %13650 = vmatmul.mubr.bf16.gmra.mrb[16].mxu1 %v10078_v8 }
 0x9fe   : > { %12694 = vmatprep.mubr.bf16.mxu0 %v20050_v30  ;;  %13659 = vmatprep.mubr.bf16.mxu1 %v20050_v30 }
 0xa05   : > { %12695 = vmatmul.mubr.bf16.gmra.mrb[20].mxu0 %v10079_v13  ;;  %13660 = vmatmul.mubr.bf16.gmra.mrb[20].mxu1 %v10079_v13 }
 0xa06   : > { %12704 = vmatprep.mubr.bf16.mxu0 %v20050_v30  ;;  %13669 = vmatprep.mubr.bf16.mxu1 %v20050_v30 }
 0xa0d   : > { %12705 = vmatmul.mubr.bf16.gmra.mrb[24].mxu0 %v10080_v7  ;;  %13670 = vmatmul.mubr.bf16.gmra.mrb[24].mxu1 %v10080_v7 }
 0xa0e   : > { %12714 = vmatprep.mubr.bf16.mxu0 %v20050_v30  ;;  %13679 = vmatprep.mubr.bf16.mxu1 %v20050_v30 }
 0xa15   : > { %12715 = vmatmul.mubr.bf16.gmra.mrb[28].mxu0 %v10081_v51  ;;  %13680 = vmatmul.mubr.bf16.gmra.mrb[28].mxu1 %v10081_v51 }
 0xa16   : > { %12724 = vmatprep.mubr.bf16.mxu0 %v20050_v30  ;;  %13689 = vmatprep.mubr.bf16.mxu1 %v20050_v30 }
 0xa1d   : > { %12725 = vmatmul.mubr.bf16.gmra.mrb[32].mxu0 %v10082_v22  ;;  %13690 = vmatmul.mubr.bf16.gmra.mrb[32].mxu1 %v10082_v22 }
 0xa1e   : > { %12734 = vmatprep.mubr.bf16.mxu0 %v20050_v30  ;;  %13699 = vmatprep.mubr.bf16.mxu1 %v20050_v30 }
 0xa25   : > { %12735 = vmatmul.mubr.bf16.gmra.mrb[36].mxu0 %v10083_v38  ;;  %13700 = vmatmul.mubr.bf16.gmra.mrb[36].mxu1 %v10083_v38 }
 0xa26   : > { %12744 = vmatprep.mubr.bf16.mxu0 %v20050_v30  ;;  %13709 = vmatprep.mubr.bf16.mxu1 %v20050_v30 }
 0xa2d   : > { %12745 = vmatmul.mubr.bf16.gmra.mrb[40].mxu0 %v22844_v4  ;;  %13710 = vmatmul.mubr.bf16.gmra.mrb[40].mxu1 %v22844_v4  ;;  %v15965_v4 = vld [vmem:[%s20277_s28 + $0x1ce] sm:$0xff] }
 0xa2e   : > { %12754 = vmatprep.mubr.bf16.mxu0 %v20050_v30  ;;  %13719 = vmatprep.mubr.bf16.mxu1 %v20050_v30  ;;  %v10087_v41 = vpack.c.bf16 %v15966_v60, %v15965_v4 }
 0xa35   : > { %12755 = vmatmul.mubr.bf16.gmra.mrb[44].mxu0 %v22856_v59  ;;  %13720 = vmatmul.mubr.bf16.gmra.mrb[44].mxu1 %v22856_v59  ;;  %v15967_v59 = vld [vmem:[%s20277_s28 + $0x1e6] sm:$0xff] }
 0xa36   : > { %12764 = vmatprep.mubr.bf16.mxu0 %v20050_v30  ;;  %13729 = vmatprep.mubr.bf16.mxu1 %v20050_v30  ;;  %v10088_v31 = vpack.c.bf16 %v15968_v26, %v15967_v59 }
 0xa3d   : > { %12765 = vmatmul.mubr.bf16.gmra.mrb[48].mxu0 %v22868_v35  ;;  %13730 = vmatmul.mubr.bf16.gmra.mrb[48].mxu1 %v22868_v35  ;;  %v15969_v35 = vld [vmem:[%s20277_s28 + $0x1fe] sm:$0xff] }
 0xa3e   : > { %12774 = vmatprep.mubr.bf16.mxu0 %v20050_v30  ;;  %13739 = vmatprep.mubr.bf16.mxu1 %v20050_v30  ;;  %v10089_v11 = vpack.c.bf16 %v15970_v25, %v15969_v35 }
 0xa45   : > { %12775 = vmatmul.mubr.bf16.gmra.mrb[52].mxu0 %v10087_v41  ;;  %13740 = vmatmul.mubr.bf16.gmra.mrb[52].mxu1 %v10087_v41 }
 0xa46   : > { %12784 = vmatprep.mubr.bf16.mxu0 %v20050_v30  ;;  %13749 = vmatprep.mubr.bf16.mxu1 %v20050_v30 }
 0xa4d   : > { %12785 = vmatmul.mubr.bf16.gmra.mrb[56].mxu0 %v10088_v31  ;;  %13750 = vmatmul.mubr.bf16.gmra.mrb[56].mxu1 %v10088_v31 }
 0xa4e   : > { %12794 = vmatprep.mubr.bf16.mxu0 %v20050_v30  ;;  %13759 = vmatprep.mubr.bf16.mxu1 %v20050_v30 }
 0xa55   : > { %12795 = vmatmul.mubr.bf16.gmra.mrb[60].mxu0 %v10089_v11  ;;  %13760 = vmatmul.mubr.bf16.gmra.mrb[60].mxu1 %v10089_v11 }
 0xab0   : > { %v12646_v12 = vpop.f32.mrb[0].mxu0  ;;  %v13611_v18 = vpop.f32.mrb[0].mxu1 }
 0xab1   : > { %v17802_v1 = vadd.f32 %v12646_v12, %v23039_v15  ;;  %v17866_v29 = vadd.f32 %v13611_v18, %v23041_v14  ;;  %v12648_v40 = vpop.f32.mrb[1].mxu0  ;;  %v13613_v20 = vpop.f32.mrb[1].mxu1 }
 0xab2   : > { %v17803_v49 = vadd.f32 %v12648_v40, %v23043_v47  ;;  %v17867_v0 = vadd.f32 %v13613_v20, %v23045_v46  ;;  %v12650_v55 = vpop.f32.mrb[2].mxu0  ;;  %v13615_v33 = vpop.f32.mrb[2].mxu1 }
 0xab3   : > { %v13770_v19 = vmax.f32 %v17802_v1, 0.0  ;;  %v13772_v6 = vmax.f32 %v17866_v29, 0.0  ;;  %v17804_v43 = vadd.f32 %v12650_v55, %v23039_v15  ;;  %v17868_v30 = vadd.f32 %v13615_v33, %v23041_v14  ;;  %v12652_v32 = vpop.f32.mrb[3].mxu0  ;;  %v13617_v57 = vpop.f32.mrb[3].mxu1 }
 0xab4   : > { %v13771_v50 = vmax.f32 %v17803_v49, 0.0  ;;  %v13773_v52 = vmax.f32 %v17867_v0, 0.0  ;;  %v17805_v62 = vadd.f32 %v12652_v32, %v23043_v47  ;;  %v17869_v10 = vadd.f32 %v13617_v57, %v23045_v46 }
 0xab5   : > { %v13774_v37 = vmax.f32 %v17804_v43, 0.0  ;;  %v13776_v53 = vmax.f32 %v17868_v30, 0.0 }
 0xab6   : > { %v16458_v39 = vpack.c.bf16 %v13771_v50, %v13770_v19  ;;  %v16459_v16 = vpack.c.bf16 %v13773_v52, %v13772_v6  ;;  %v13775_v28 = vmax.f32 %v17805_v62, 0.0  ;;  %v13777_v3 = vmax.f32 %v17869_v10, 0.0 }
 0xab8   : > { %14282 = vst [vmem:[%s20279_s27] sm:$0xff] %v16458_v39  ;;  %14283 = vst [vmem:[%s20279_s27 + $0x8] sm:$0xff] %v16459_v16  ;;  %v16460_v34 = vpack.c.bf16 %v13775_v28, %v13774_v37  ;;  %v16461_v24 = vpack.c.bf16 %v13777_v3, %v13776_v53  ;;  %v12656_v8 = vpop.f32.mrb[4].mxu0  ;;  %v13621_v58 = vpop.f32.mrb[4].mxu1 }
 0xab9   : > { %v17806_v44 = vadd.f32 %v12656_v8, %v23039_v15  ;;  %v17870_v13 = vadd.f32 %v13621_v58, %v23041_v14  ;;  %v12658_v36 = vpop.f32.mrb[5].mxu0  ;;  %v13623_v63 = vpop.f32.mrb[5].mxu1 }
 0xaba   : > { %14284 = vst [vmem:[%s20279_s27 + $0x10] sm:$0xff] %v16460_v34  ;;  %14285 = vst [vmem:[%s20279_s27 + $0x18] sm:$0xff] %v16461_v24  ;;  %v17807_v7 = vadd.f32 %v12658_v36, %v23043_v47  ;;  %v17871_v21 = vadd.f32 %v13623_v63, %v23045_v46  ;;  %v12660_v17 = vpop.f32.mrb[6].mxu0  ;;  %v13625_v51 = vpop.f32.mrb[6].mxu1 }
 0xabb   : > { %v13778_v56 = vmax.f32 %v17806_v44, 0.0  ;;  %v13780_v42 = vmax.f32 %v17870_v13, 0.0  ;;  %v17808_v22 = vadd.f32 %v12660_v17, %v23039_v15  ;;  %v17872_v23 = vadd.f32 %v13625_v51, %v23041_v14  ;;  %v12662_v54 = vpop.f32.mrb[7].mxu0  ;;  %v13627_v38 = vpop.f32.mrb[7].mxu1 }
 0xabc   : > { %v13779_v4 = vmax.f32 %v17807_v7, 0.0  ;;  %v13781_v60 = vmax.f32 %v17871_v21, 0.0  ;;  %v17809_v41 = vadd.f32 %v12662_v54, %v23043_v47  ;;  %v17873_v59 = vadd.f32 %v13627_v38, %v23045_v46 }
 0xabd   : > { %v13782_v26 = vmax.f32 %v17808_v22, 0.0  ;;  %v13784_v31 = vmax.f32 %v17872_v23, 0.0 }
 0xabe   : > { %v16462_v35 = vpack.c.bf16 %v13779_v4, %v13778_v56  ;;  %v16463_v25 = vpack.c.bf16 %v13781_v60, %v13780_v42  ;;  %v13783_v11 = vmax.f32 %v17809_v41, 0.0  ;;  %v13785_v2 = vmax.f32 %v17873_v59, 0.0 }
 0xac0   : > { %14286 = vst [vmem:[%s20279_s27 + $0x20] sm:$0xff] %v16462_v35  ;;  %14287 = vst [vmem:[%s20279_s27 + $0x28] sm:$0xff] %v16463_v25  ;;  %v16464_v9 = vpack.c.bf16 %v13783_v11, %v13782_v26  ;;  %v16465_v61 = vpack.c.bf16 %v13785_v2, %v13784_v31  ;;  %v12666_v48 = vpop.f32.mrb[8].mxu0  ;;  %v13631_v45 = vpop.f32.mrb[8].mxu1 }
 0xac1   : > { %v17810_v27 = vadd.f32 %v12666_v48, %v23039_v15  ;;  %v17874_v5 = vadd.f32 %v13631_v45, %v23041_v14  ;;  %v12668_v12 = vpop.f32.mrb[9].mxu0  ;;  %v13633_v18 = vpop.f32.mrb[9].mxu1 }
 0xac2   : > { %14288 = vst [vmem:[%s20279_s27 + $0x30] sm:$0xff] %v16464_v9  ;;  %14289 = vst [vmem:[%s20279_s27 + $0x38] sm:$0xff] %v16465_v61  ;;  %v17811_v1 = vadd.f32 %v12668_v12, %v23043_v47  ;;  %v17875_v29 = vadd.f32 %v13633_v18, %v23045_v46  ;;  %v12670_v40 = vpop.f32.mrb[10].mxu0  ;;  %v13635_v20 = vpop.f32.mrb[10].mxu1 }
 0xac3   : > { %v13786_v49 = vmax.f32 %v17810_v27, 0.0  ;;  %v13788_v0 = vmax.f32 %v17874_v5, 0.0  ;;  %v17812_v55 = vadd.f32 %v12670_v40, %v23039_v15  ;;  %v17876_v33 = vadd.f32 %v13635_v20, %v23041_v14  ;;  %v12672_v19 = vpop.f32.mrb[11].mxu0  ;;  %v13637_v6 = vpop.f32.mrb[11].mxu1 }
 0xac4   : > { %v13787_v43 = vmax.f32 %v17811_v1, 0.0  ;;  %v13789_v30 = vmax.f32 %v17875_v29, 0.0  ;;  %v17813_v32 = vadd.f32 %v12672_v19, %v23043_v47  ;;  %v17877_v57 = vadd.f32 %v13637_v6, %v23045_v46 }
 0xac5   : > { %v13790_v50 = vmax.f32 %v17812_v55, 0.0  ;;  %v13792_v52 = vmax.f32 %v17876_v33, 0.0 }
 0xac6   : > { %v16466_v62 = vpack.c.bf16 %v13787_v43, %v13786_v49  ;;  %v16467_v10 = vpack.c.bf16 %v13789_v30, %v13788_v0  ;;  %v13791_v37 = vmax.f32 %v17813_v32, 0.0  ;;  %v13793_v53 = vmax.f32 %v17877_v57, 0.0 }
 0xac8   : > { %14290 = vst [vmem:[%s20279_s27 + $0x40] sm:$0xff] %v16466_v62  ;;  %14291 = vst [vmem:[%s20279_s27 + $0x48] sm:$0xff] %v16467_v10  ;;  %v16468_v39 = vpack.c.bf16 %v13791_v37, %v13790_v50  ;;  %v16469_v16 = vpack.c.bf16 %v13793_v53, %v13792_v52  ;;  %v12676_v28 = vpop.f32.mrb[12].mxu0  ;;  %v13641_v3 = vpop.f32.mrb[12].mxu1 }
 0xac9   : > { %v17814_v34 = vadd.f32 %v12676_v28, %v23039_v15  ;;  %v17878_v24 = vadd.f32 %v13641_v3, %v23041_v14  ;;  %v12678_v8 = vpop.f32.mrb[13].mxu0  ;;  %v13643_v58 = vpop.f32.mrb[13].mxu1 }
 0xaca   : > { %14292 = vst [vmem:[%s20279_s27 + $0x50] sm:$0xff] %v16468_v39  ;;  %14293 = vst [vmem:[%s20279_s27 + $0x58] sm:$0xff] %v16469_v16  ;;  %v17815_v44 = vadd.f32 %v12678_v8, %v23043_v47  ;;  %v17879_v13 = vadd.f32 %v13643_v58, %v23045_v46  ;;  %v12680_v36 = vpop.f32.mrb[14].mxu0  ;;  %v13645_v63 = vpop.f32.mrb[14].mxu1 }
 0xacb   : > { %v13794_v7 = vmax.f32 %v17814_v34, 0.0  ;;  %v13796_v21 = vmax.f32 %v17878_v24, 0.0  ;;  %v17816_v17 = vadd.f32 %v12680_v36, %v23039_v15  ;;  %v17880_v51 = vadd.f32 %v13645_v63, %v23041_v14  ;;  %v12682_v56 = vpop.f32.mrb[15].mxu0  ;;  %v13647_v42 = vpop.f32.mrb[15].mxu1 }
 0xacc   : > { %v13795_v22 = vmax.f32 %v17815_v44, 0.0  ;;  %v13797_v23 = vmax.f32 %v17879_v13, 0.0  ;;  %v17817_v54 = vadd.f32 %v12682_v56, %v23043_v47  ;;  %v17881_v38 = vadd.f32 %v13647_v42, %v23045_v46 }
 0xacd   : > { %v13798_v4 = vmax.f32 %v17816_v17, 0.0  ;;  %v13800_v60 = vmax.f32 %v17880_v51, 0.0 }
 0xace   : > { %v16470_v41 = vpack.c.bf16 %v13795_v22, %v13794_v7  ;;  %v16471_v59 = vpack.c.bf16 %v13797_v23, %v13796_v21  ;;  %v13799_v26 = vmax.f32 %v17817_v54, 0.0  ;;  %v13801_v31 = vmax.f32 %v17881_v38, 0.0 }
 0xad0   : > { %14294 = vst [vmem:[%s20279_s27 + $0x60] sm:$0xff] %v16470_v41  ;;  %14295 = vst [vmem:[%s20279_s27 + $0x68] sm:$0xff] %v16471_v59  ;;  %v16472_v35 = vpack.c.bf16 %v13799_v26, %v13798_v4  ;;  %v16473_v25 = vpack.c.bf16 %v13801_v31, %v13800_v60  ;;  %v12686_v11 = vpop.f32.mrb[16].mxu0  ;;  %v13651_v2 = vpop.f32.mrb[16].mxu1 }
 0xad1   : > { %v17818_v9 = vadd.f32 %v12686_v11, %v23039_v15  ;;  %v17882_v61 = vadd.f32 %v13651_v2, %v23041_v14  ;;  %v12688_v48 = vpop.f32.mrb[17].mxu0  ;;  %v13653_v45 = vpop.f32.mrb[17].mxu1 }
 0xad2   : > { %14296 = vst [vmem:[%s20279_s27 + $0x70] sm:$0xff] %v16472_v35  ;;  %14297 = vst [vmem:[%s20279_s27 + $0x78] sm:$0xff] %v16473_v25  ;;  %v17819_v27 = vadd.f32 %v12688_v48, %v23043_v47  ;;  %v17883_v5 = vadd.f32 %v13653_v45, %v23045_v46  ;;  %v12690_v12 = vpop.f32.mrb[18].mxu0  ;;  %v13655_v18 = vpop.f32.mrb[18].mxu1 }
 0xad3   : > { %v13802_v1 = vmax.f32 %v17818_v9, 0.0  ;;  %v13804_v29 = vmax.f32 %v17882_v61, 0.0  ;;  %v17820_v40 = vadd.f32 %v12690_v12, %v23039_v15  ;;  %v17884_v20 = vadd.f32 %v13655_v18, %v23041_v14  ;;  %v12692_v49 = vpop.f32.mrb[19].mxu0  ;;  %v13657_v0 = vpop.f32.mrb[19].mxu1 }
 0xad4   : > { %v13803_v55 = vmax.f32 %v17819_v27, 0.0  ;;  %v13805_v33 = vmax.f32 %v17883_v5, 0.0  ;;  %v17821_v19 = vadd.f32 %v12692_v49, %v23043_v47  ;;  %v17885_v6 = vadd.f32 %v13657_v0, %v23045_v46 }
 0xad5   : > { %v13806_v43 = vmax.f32 %v17820_v40, 0.0  ;;  %v13808_v30 = vmax.f32 %v17884_v20, 0.0 }
 0xad6   : > { %v16474_v32 = vpack.c.bf16 %v13803_v55, %v13802_v1  ;;  %v16475_v57 = vpack.c.bf16 %v13805_v33, %v13804_v29  ;;  %v13807_v50 = vmax.f32 %v17821_v19, 0.0  ;;  %v13809_v52 = vmax.f32 %v17885_v6, 0.0 }
 0xad8   : > { %14298 = vst [vmem:[%s20279_s27 + $0x80] sm:$0xff] %v16474_v32  ;;  %14299 = vst [vmem:[%s20279_s27 + $0x88] sm:$0xff] %v16475_v57  ;;  %v16476_v62 = vpack.c.bf16 %v13807_v50, %v13806_v43  ;;  %v16477_v10 = vpack.c.bf16 %v13809_v52, %v13808_v30  ;;  %v12696_v37 = vpop.f32.mrb[20].mxu0  ;;  %v13661_v53 = vpop.f32.mrb[20].mxu1 }
 0xad9   : > { %v17822_v39 = vadd.f32 %v12696_v37, %v23039_v15  ;;  %v17886_v16 = vadd.f32 %v13661_v53, %v23041_v14  ;;  %v12698_v28 = vpop.f32.mrb[21].mxu0  ;;  %v13663_v3 = vpop.f32.mrb[21].mxu1 }
 0xada   : > { %14300 = vst [vmem:[%s20279_s27 + $0x90] sm:$0xff] %v16476_v62  ;;  %14301 = vst [vmem:[%s20279_s27 + $0x98] sm:$0xff] %v16477_v10  ;;  %v17823_v34 = vadd.f32 %v12698_v28, %v23043_v47  ;;  %v17887_v24 = vadd.f32 %v13663_v3, %v23045_v46  ;;  %v12700_v8 = vpop.f32.mrb[22].mxu0  ;;  %v13665_v58 = vpop.f32.mrb[22].mxu1 }
 0xadb   : > { %v13810_v44 = vmax.f32 %v17822_v39, 0.0  ;;  %v13812_v13 = vmax.f32 %v17886_v16, 0.0  ;;  %v17824_v36 = vadd.f32 %v12700_v8, %v23039_v15  ;;  %v17888_v63 = vadd.f32 %v13665_v58, %v23041_v14  ;;  %v12702_v7 = vpop.f32.mrb[23].mxu0  ;;  %v13667_v21 = vpop.f32.mrb[23].mxu1 }
 0xadc   : > { %v13811_v17 = vmax.f32 %v17823_v34, 0.0  ;;  %v13813_v51 = vmax.f32 %v17887_v24, 0.0  ;;  %v17825_v56 = vadd.f32 %v12702_v7, %v23043_v47  ;;  %v17889_v42 = vadd.f32 %v13667_v21, %v23045_v46 }
 0xadd   : > { %v13814_v22 = vmax.f32 %v17824_v36, 0.0  ;;  %v13816_v23 = vmax.f32 %v17888_v63, 0.0 }
 0xade   : > { %v16478_v54 = vpack.c.bf16 %v13811_v17, %v13810_v44  ;;  %v16479_v38 = vpack.c.bf16 %v13813_v51, %v13812_v13  ;;  %v13815_v4 = vmax.f32 %v17825_v56, 0.0  ;;  %v13817_v60 = vmax.f32 %v17889_v42, 0.0 }
 0xae0   : > { %14302 = vst [vmem:[%s20279_s27 + $0xa0] sm:$0xff] %v16478_v54  ;;  %14303 = vst [vmem:[%s20279_s27 + $0xa8] sm:$0xff] %v16479_v38  ;;  %v16480_v41 = vpack.c.bf16 %v13815_v4, %v13814_v22  ;;  %v16481_v59 = vpack.c.bf16 %v13817_v60, %v13816_v23  ;;  %v12706_v26 = vpop.f32.mrb[24].mxu0  ;;  %v13671_v31 = vpop.f32.mrb[24].mxu1 }
 0xae1   : > { %v17826_v35 = vadd.f32 %v12706_v26, %v23039_v15  ;;  %v17890_v25 = vadd.f32 %v13671_v31, %v23041_v14  ;;  %v12708_v11 = vpop.f32.mrb[25].mxu0  ;;  %v13673_v2 = vpop.f32.mrb[25].mxu1 }
 0xae2   : > { %14304 = vst [vmem:[%s20279_s27 + $0xb0] sm:$0xff] %v16480_v41  ;;  %14305 = vst [vmem:[%s20279_s27 + $0xb8] sm:$0xff] %v16481_v59  ;;  %v17827_v9 = vadd.f32 %v12708_v11, %v23043_v47  ;;  %v17891_v61 = vadd.f32 %v13673_v2, %v23045_v46  ;;  %v12710_v48 = vpop.f32.mrb[26].mxu0  ;;  %v13675_v45 = vpop.f32.mrb[26].mxu1 }
 0xae3   : > { %v13818_v27 = vmax.f32 %v17826_v35, 0.0  ;;  %v13820_v5 = vmax.f32 %v17890_v25, 0.0  ;;  %v17828_v12 = vadd.f32 %v12710_v48, %v23039_v15  ;;  %v17892_v18 = vadd.f32 %v13675_v45, %v23041_v14  ;;  %v12712_v1 = vpop.f32.mrb[27].mxu0  ;;  %v13677_v29 = vpop.f32.mrb[27].mxu1 }
 0xae4   : > { %v13819_v40 = vmax.f32 %v17827_v9, 0.0  ;;  %v13821_v20 = vmax.f32 %v17891_v61, 0.0  ;;  %v17829_v49 = vadd.f32 %v12712_v1, %v23043_v47  ;;  %v17893_v0 = vadd.f32 %v13677_v29, %v23045_v46 }
 0xae5   : > { %v13822_v55 = vmax.f32 %v17828_v12, 0.0  ;;  %v13824_v33 = vmax.f32 %v17892_v18, 0.0 }
 0xae6   : > { %v16482_v19 = vpack.c.bf16 %v13819_v40, %v13818_v27  ;;  %v16483_v6 = vpack.c.bf16 %v13821_v20, %v13820_v5  ;;  %v13823_v43 = vmax.f32 %v17829_v49, 0.0  ;;  %v13825_v30 = vmax.f32 %v17893_v0, 0.0 }
 0xae8   : > { %14306 = vst [vmem:[%s20279_s27 + $0xc0] sm:$0xff] %v16482_v19  ;;  %14307 = vst [vmem:[%s20279_s27 + $0xc8] sm:$0xff] %v16483_v6  ;;  %v16484_v32 = vpack.c.bf16 %v13823_v43, %v13822_v55  ;;  %v16485_v57 = vpack.c.bf16 %v13825_v30, %v13824_v33  ;;  %v12716_v50 = vpop.f32.mrb[28].mxu0  ;;  %v13681_v52 = vpop.f32.mrb[28].mxu1 }
 0xae9   : > { %v17830_v62 = vadd.f32 %v12716_v50, %v23039_v15  ;;  %v17894_v10 = vadd.f32 %v13681_v52, %v23041_v14  ;;  %v12718_v37 = vpop.f32.mrb[29].mxu0  ;;  %v13683_v53 = vpop.f32.mrb[29].mxu1 }
 0xaea   : > { %14308 = vst [vmem:[%s20279_s27 + $0xd0] sm:$0xff] %v16484_v32  ;;  %14309 = vst [vmem:[%s20279_s27 + $0xd8] sm:$0xff] %v16485_v57  ;;  %v17831_v39 = vadd.f32 %v12718_v37, %v23043_v47  ;;  %v17895_v16 = vadd.f32 %v13683_v53, %v23045_v46  ;;  %v12720_v28 = vpop.f32.mrb[30].mxu0  ;;  %v13685_v3 = vpop.f32.mrb[30].mxu1 }
 0xaeb   : > { %v13826_v34 = vmax.f32 %v17830_v62, 0.0  ;;  %v13828_v24 = vmax.f32 %v17894_v10, 0.0  ;;  %v17832_v8 = vadd.f32 %v12720_v28, %v23039_v15  ;;  %v17896_v58 = vadd.f32 %v13685_v3, %v23041_v14  ;;  %v12722_v44 = vpop.f32.mrb[31].mxu0  ;;  %v13687_v13 = vpop.f32.mrb[31].mxu1 }
 0xaec   : > { %v13827_v36 = vmax.f32 %v17831_v39, 0.0  ;;  %v13829_v63 = vmax.f32 %v17895_v16, 0.0  ;;  %v17833_v7 = vadd.f32 %v12722_v44, %v23043_v47  ;;  %v17897_v21 = vadd.f32 %v13687_v13, %v23045_v46 }
 0xaed   : > { %v13830_v17 = vmax.f32 %v17832_v8, 0.0  ;;  %v13832_v51 = vmax.f32 %v17896_v58, 0.0 }
 0xaee   : > { %v16486_v56 = vpack.c.bf16 %v13827_v36, %v13826_v34  ;;  %v16487_v42 = vpack.c.bf16 %v13829_v63, %v13828_v24  ;;  %v13831_v22 = vmax.f32 %v17833_v7, 0.0  ;;  %v13833_v23 = vmax.f32 %v17897_v21, 0.0 }
 0xaf0   : > { %14310 = vst [vmem:[%s20279_s27 + $0xe0] sm:$0xff] %v16486_v56  ;;  %14311 = vst [vmem:[%s20279_s27 + $0xe8] sm:$0xff] %v16487_v42  ;;  %v16488_v54 = vpack.c.bf16 %v13831_v22, %v13830_v17  ;;  %v16489_v38 = vpack.c.bf16 %v13833_v23, %v13832_v51  ;;  %v12726_v4 = vpop.f32.mrb[32].mxu0  ;;  %v13691_v60 = vpop.f32.mrb[32].mxu1 }
 0xaf1   : > { %v17834_v41 = vadd.f32 %v12726_v4, %v23039_v15  ;;  %v17898_v59 = vadd.f32 %v13691_v60, %v23041_v14  ;;  %v12728_v26 = vpop.f32.mrb[33].mxu0  ;;  %v13693_v31 = vpop.f32.mrb[33].mxu1 }
 0xaf2   : > { %14312 = vst [vmem:[%s20279_s27 + $0xf0] sm:$0xff] %v16488_v54  ;;  %14313 = vst [vmem:[%s20279_s27 + $0xf8] sm:$0xff] %v16489_v38  ;;  %v17835_v35 = vadd.f32 %v12728_v26, %v23043_v47  ;;  %v17899_v25 = vadd.f32 %v13693_v31, %v23045_v46  ;;  %v12730_v11 = vpop.f32.mrb[34].mxu0  ;;  %v13695_v2 = vpop.f32.mrb[34].mxu1 }
 0xaf3   : > { %v13834_v9 = vmax.f32 %v17834_v41, 0.0  ;;  %v13836_v61 = vmax.f32 %v17898_v59, 0.0  ;;  %v17836_v48 = vadd.f32 %v12730_v11, %v23039_v15  ;;  %v17900_v45 = vadd.f32 %v13695_v2, %v23041_v14  ;;  %v12732_v27 = vpop.f32.mrb[35].mxu0  ;;  %v13697_v5 = vpop.f32.mrb[35].mxu1 }
 0xaf4   : > { %v13835_v12 = vmax.f32 %v17835_v35, 0.0  ;;  %v13837_v18 = vmax.f32 %v17899_v25, 0.0  ;;  %v17837_v1 = vadd.f32 %v12732_v27, %v23043_v47  ;;  %v17901_v29 = vadd.f32 %v13697_v5, %v23045_v46 }
 0xaf5   : > { %v13838_v40 = vmax.f32 %v17836_v48, 0.0  ;;  %v13840_v20 = vmax.f32 %v17900_v45, 0.0 }
 0xaf6   : > { %v16490_v49 = vpack.c.bf16 %v13835_v12, %v13834_v9  ;;  %v16491_v0 = vpack.c.bf16 %v13837_v18, %v13836_v61  ;;  %v13839_v55 = vmax.f32 %v17837_v1, 0.0  ;;  %v13841_v33 = vmax.f32 %v17901_v29, 0.0 }
 0xaf8   : > { %14314 = vst [vmem:[%s20279_s27 + $0x100] sm:$0xff] %v16490_v49  ;;  %14315 = vst [vmem:[%s20279_s27 + $0x108] sm:$0xff] %v16491_v0  ;;  %v16492_v19 = vpack.c.bf16 %v13839_v55, %v13838_v40  ;;  %v16493_v6 = vpack.c.bf16 %v13841_v33, %v13840_v20  ;;  %v12736_v43 = vpop.f32.mrb[36].mxu0  ;;  %v13701_v30 = vpop.f32.mrb[36].mxu1 }
 0xaf9   : > { %v17838_v32 = vadd.f32 %v12736_v43, %v23039_v15  ;;  %v17902_v57 = vadd.f32 %v13701_v30, %v23041_v14  ;;  %v12738_v50 = vpop.f32.mrb[37].mxu0  ;;  %v13703_v52 = vpop.f32.mrb[37].mxu1 }
 0xafa   : > { %14316 = vst [vmem:[%s20279_s27 + $0x110] sm:$0xff] %v16492_v19  ;;  %14317 = vst [vmem:[%s20279_s27 + $0x118] sm:$0xff] %v16493_v6  ;;  %v17839_v62 = vadd.f32 %v12738_v50, %v23043_v47  ;;  %v17903_v10 = vadd.f32 %v13703_v52, %v23045_v46  ;;  %v12740_v37 = vpop.f32.mrb[38].mxu0  ;;  %v13705_v53 = vpop.f32.mrb[38].mxu1 }
 0xafb   : > { %v13842_v39 = vmax.f32 %v17838_v32, 0.0  ;;  %v13844_v16 = vmax.f32 %v17902_v57, 0.0  ;;  %v17840_v28 = vadd.f32 %v12740_v37, %v23039_v15  ;;  %v17904_v3 = vadd.f32 %v13705_v53, %v23041_v14  ;;  %v12742_v34 = vpop.f32.mrb[39].mxu0  ;;  %v13707_v24 = vpop.f32.mrb[39].mxu1 }
 0xafc   : > { %v13843_v8 = vmax.f32 %v17839_v62, 0.0  ;;  %v13845_v58 = vmax.f32 %v17903_v10, 0.0  ;;  %v17841_v44 = vadd.f32 %v12742_v34, %v23043_v47  ;;  %v17905_v13 = vadd.f32 %v13707_v24, %v23045_v46 }
 0xafd   : > { %v13846_v36 = vmax.f32 %v17840_v28, 0.0  ;;  %v13848_v63 = vmax.f32 %v17904_v3, 0.0 }
 0xafe   : > { %v16494_v7 = vpack.c.bf16 %v13843_v8, %v13842_v39  ;;  %v16495_v21 = vpack.c.bf16 %v13845_v58, %v13844_v16  ;;  %v13847_v17 = vmax.f32 %v17841_v44, 0.0  ;;  %v13849_v51 = vmax.f32 %v17905_v13, 0.0 }
 0xb00   : > { %14318 = vst [vmem:[%s20279_s27 + $0x120] sm:$0xff] %v16494_v7  ;;  %14319 = vst [vmem:[%s20279_s27 + $0x128] sm:$0xff] %v16495_v21  ;;  %v16496_v56 = vpack.c.bf16 %v13847_v17, %v13846_v36  ;;  %v16497_v42 = vpack.c.bf16 %v13849_v51, %v13848_v63  ;;  %v12746_v22 = vpop.f32.mrb[40].mxu0  ;;  %v13711_v23 = vpop.f32.mrb[40].mxu1 }
 0xb01   : > { %v17842_v54 = vadd.f32 %v12746_v22, %v23039_v15  ;;  %v17906_v38 = vadd.f32 %v13711_v23, %v23041_v14  ;;  %v12748_v4 = vpop.f32.mrb[41].mxu0  ;;  %v13713_v60 = vpop.f32.mrb[41].mxu1 }
 0xb02   : > { %14320 = vst [vmem:[%s20279_s27 + $0x130] sm:$0xff] %v16496_v56  ;;  %14321 = vst [vmem:[%s20279_s27 + $0x138] sm:$0xff] %v16497_v42  ;;  %v17843_v41 = vadd.f32 %v12748_v4, %v23043_v47  ;;  %v17907_v59 = vadd.f32 %v13713_v60, %v23045_v46  ;;  %v12750_v26 = vpop.f32.mrb[42].mxu0  ;;  %v13715_v31 = vpop.f32.mrb[42].mxu1 }
 0xb03   : > { %v13850_v35 = vmax.f32 %v17842_v54, 0.0  ;;  %v13852_v25 = vmax.f32 %v17906_v38, 0.0  ;;  %v17844_v11 = vadd.f32 %v12750_v26, %v23039_v15  ;;  %v17908_v2 = vadd.f32 %v13715_v31, %v23041_v14  ;;  %v12752_v9 = vpop.f32.mrb[43].mxu0  ;;  %v13717_v61 = vpop.f32.mrb[43].mxu1 }
 0xb04   : > { %v13851_v48 = vmax.f32 %v17843_v41, 0.0  ;;  %v13853_v45 = vmax.f32 %v17907_v59, 0.0  ;;  %v17845_v27 = vadd.f32 %v12752_v9, %v23043_v47  ;;  %v17909_v5 = vadd.f32 %v13717_v61, %v23045_v46 }
 0xb05   : > { %v13854_v12 = vmax.f32 %v17844_v11, 0.0  ;;  %v13856_v18 = vmax.f32 %v17908_v2, 0.0 }
 0xb06   : > { %v16498_v1 = vpack.c.bf16 %v13851_v48, %v13850_v35  ;;  %v16499_v29 = vpack.c.bf16 %v13853_v45, %v13852_v25  ;;  %v13855_v40 = vmax.f32 %v17845_v27, 0.0  ;;  %v13857_v20 = vmax.f32 %v17909_v5, 0.0 }
 0xb08   : > { %14322 = vst [vmem:[%s20279_s27 + $0x140] sm:$0xff] %v16498_v1  ;;  %14323 = vst [vmem:[%s20279_s27 + $0x148] sm:$0xff] %v16499_v29  ;;  %v16500_v49 = vpack.c.bf16 %v13855_v40, %v13854_v12  ;;  %v16501_v0 = vpack.c.bf16 %v13857_v20, %v13856_v18  ;;  %v12756_v55 = vpop.f32.mrb[44].mxu0  ;;  %v13721_v33 = vpop.f32.mrb[44].mxu1 }
 0xb09   : > { %v17846_v19 = vadd.f32 %v12756_v55, %v23039_v15  ;;  %v17910_v6 = vadd.f32 %v13721_v33, %v23041_v14  ;;  %v12758_v43 = vpop.f32.mrb[45].mxu0  ;;  %v13723_v30 = vpop.f32.mrb[45].mxu1 }
 0xb0a   : > { %14324 = vst [vmem:[%s20279_s27 + $0x150] sm:$0xff] %v16500_v49  ;;  %14325 = vst [vmem:[%s20279_s27 + $0x158] sm:$0xff] %v16501_v0  ;;  %v17847_v32 = vadd.f32 %v12758_v43, %v23043_v47  ;;  %v17911_v57 = vadd.f32 %v13723_v30, %v23045_v46  ;;  %v12760_v50 = vpop.f32.mrb[46].mxu0  ;;  %v13725_v52 = vpop.f32.mrb[46].mxu1 }
 0xb0b   : > { %v13858_v62 = vmax.f32 %v17846_v19, 0.0  ;;  %v13860_v10 = vmax.f32 %v17910_v6, 0.0  ;;  %v17848_v37 = vadd.f32 %v12760_v50, %v23039_v15  ;;  %v17912_v53 = vadd.f32 %v13725_v52, %v23041_v14  ;;  %v12762_v39 = vpop.f32.mrb[47].mxu0  ;;  %v13727_v16 = vpop.f32.mrb[47].mxu1 }
 0xb0c   : > { %v13859_v28 = vmax.f32 %v17847_v32, 0.0  ;;  %v13861_v3 = vmax.f32 %v17911_v57, 0.0  ;;  %v17849_v34 = vadd.f32 %v12762_v39, %v23043_v47  ;;  %v17913_v24 = vadd.f32 %v13727_v16, %v23045_v46 }
 0xb0d   : > { %v13862_v8 = vmax.f32 %v17848_v37, 0.0  ;;  %v13864_v58 = vmax.f32 %v17912_v53, 0.0 }
 0xb0e   : > { %v16502_v44 = vpack.c.bf16 %v13859_v28, %v13858_v62  ;;  %v16503_v13 = vpack.c.bf16 %v13861_v3, %v13860_v10  ;;  %v13863_v36 = vmax.f32 %v17849_v34, 0.0  ;;  %v13865_v63 = vmax.f32 %v17913_v24, 0.0 }
 0xb10   : > { %14326 = vst [vmem:[%s20279_s27 + $0x160] sm:$0xff] %v16502_v44  ;;  %14327 = vst [vmem:[%s20279_s27 + $0x168] sm:$0xff] %v16503_v13  ;;  %v16504_v7 = vpack.c.bf16 %v13863_v36, %v13862_v8  ;;  %v16505_v21 = vpack.c.bf16 %v13865_v63, %v13864_v58  ;;  %v12766_v17 = vpop.f32.mrb[48].mxu0  ;;  %v13731_v51 = vpop.f32.mrb[48].mxu1 }
 0xb11   : > { %v17850_v56 = vadd.f32 %v12766_v17, %v23039_v15  ;;  %v17914_v42 = vadd.f32 %v13731_v51, %v23041_v14  ;;  %v12768_v22 = vpop.f32.mrb[49].mxu0  ;;  %v13733_v23 = vpop.f32.mrb[49].mxu1 }
 0xb12   : > { %14328 = vst [vmem:[%s20279_s27 + $0x170] sm:$0xff] %v16504_v7  ;;  %14329 = vst [vmem:[%s20279_s27 + $0x178] sm:$0xff] %v16505_v21  ;;  %v17851_v54 = vadd.f32 %v12768_v22, %v23043_v47  ;;  %v17915_v38 = vadd.f32 %v13733_v23, %v23045_v46  ;;  %v12770_v4 = vpop.f32.mrb[50].mxu0  ;;  %v13735_v60 = vpop.f32.mrb[50].mxu1 }
 0xb13   : > { %v13866_v41 = vmax.f32 %v17850_v56, 0.0  ;;  %v13868_v59 = vmax.f32 %v17914_v42, 0.0  ;;  %v17852_v26 = vadd.f32 %v12770_v4, %v23039_v15  ;;  %v17916_v31 = vadd.f32 %v13735_v60, %v23041_v14  ;;  %v12772_v35 = vpop.f32.mrb[51].mxu0  ;;  %v13737_v25 = vpop.f32.mrb[51].mxu1 }
 0xb14   : > { %v13867_v11 = vmax.f32 %v17851_v54, 0.0  ;;  %v13869_v2 = vmax.f32 %v17915_v38, 0.0  ;;  %v17853_v9 = vadd.f32 %v12772_v35, %v23043_v47  ;;  %v17917_v61 = vadd.f32 %v13737_v25, %v23045_v46 }
 0xb15   : > { %v13870_v48 = vmax.f32 %v17852_v26, 0.0  ;;  %v13872_v45 = vmax.f32 %v17916_v31, 0.0 }
 0xb16   : > { %v16506_v27 = vpack.c.bf16 %v13867_v11, %v13866_v41  ;;  %v16507_v5 = vpack.c.bf16 %v13869_v2, %v13868_v59  ;;  %v13871_v12 = vmax.f32 %v17853_v9, 0.0  ;;  %v13873_v18 = vmax.f32 %v17917_v61, 0.0 }
 0xb18   : > { %14330 = vst [vmem:[%s20279_s27 + $0x180] sm:$0xff] %v16506_v27  ;;  %14331 = vst [vmem:[%s20279_s27 + $0x188] sm:$0xff] %v16507_v5  ;;  %v16508_v1 = vpack.c.bf16 %v13871_v12, %v13870_v48  ;;  %v16509_v29 = vpack.c.bf16 %v13873_v18, %v13872_v45  ;;  %v12776_v40 = vpop.f32.mrb[52].mxu0  ;;  %v13741_v20 = vpop.f32.mrb[52].mxu1 }
 0xb19   : > { %v17854_v49 = vadd.f32 %v12776_v40, %v23039_v15  ;;  %v17918_v0 = vadd.f32 %v13741_v20, %v23041_v14  ;;  %v12778_v55 = vpop.f32.mrb[53].mxu0  ;;  %v13743_v33 = vpop.f32.mrb[53].mxu1 }
 0xb1a   : > { %14332 = vst [vmem:[%s20279_s27 + $0x190] sm:$0xff] %v16508_v1  ;;  %14333 = vst [vmem:[%s20279_s27 + $0x198] sm:$0xff] %v16509_v29  ;;  %v17855_v19 = vadd.f32 %v12778_v55, %v23043_v47  ;;  %v17919_v6 = vadd.f32 %v13743_v33, %v23045_v46  ;;  %v12780_v43 = vpop.f32.mrb[54].mxu0  ;;  %v13745_v30 = vpop.f32.mrb[54].mxu1 }
 0xb1b   : > { %v13874_v32 = vmax.f32 %v17854_v49, 0.0  ;;  %v13876_v57 = vmax.f32 %v17918_v0, 0.0  ;;  %v17856_v50 = vadd.f32 %v12780_v43, %v23039_v15  ;;  %v17920_v52 = vadd.f32 %v13745_v30, %v23041_v14  ;;  %v12782_v62 = vpop.f32.mrb[55].mxu0  ;;  %v13747_v10 = vpop.f32.mrb[55].mxu1 }
 0xb1c   : > { %v13875_v37 = vmax.f32 %v17855_v19, 0.0  ;;  %v13877_v53 = vmax.f32 %v17919_v6, 0.0  ;;  %v17857_v39 = vadd.f32 %v12782_v62, %v23043_v47  ;;  %v17921_v16 = vadd.f32 %v13747_v10, %v23045_v46 }
 0xb1d   : > { %v13878_v28 = vmax.f32 %v17856_v50, 0.0  ;;  %v13880_v3 = vmax.f32 %v17920_v52, 0.0 }
 0xb1e   : > { %v16510_v34 = vpack.c.bf16 %v13875_v37, %v13874_v32  ;;  %v16511_v24 = vpack.c.bf16 %v13877_v53, %v13876_v57  ;;  %v13879_v8 = vmax.f32 %v17857_v39, 0.0  ;;  %v13881_v58 = vmax.f32 %v17921_v16, 0.0 }
 0xb20   : > { %14334 = vst [vmem:[%s20279_s27 + $0x1a0] sm:$0xff] %v16510_v34  ;;  %14335 = vst [vmem:[%s20279_s27 + $0x1a8] sm:$0xff] %v16511_v24  ;;  %v16512_v44 = vpack.c.bf16 %v13879_v8, %v13878_v28  ;;  %v16513_v13 = vpack.c.bf16 %v13881_v58, %v13880_v3  ;;  %v12786_v36 = vpop.f32.mrb[56].mxu0  ;;  %v13751_v63 = vpop.f32.mrb[56].mxu1 }
 0xb21   : > { %v17858_v7 = vadd.f32 %v12786_v36, %v23039_v15  ;;  %v17922_v21 = vadd.f32 %v13751_v63, %v23041_v14  ;;  %v12788_v17 = vpop.f32.mrb[57].mxu0  ;;  %v13753_v51 = vpop.f32.mrb[57].mxu1 }
 0xb22   : > { %14336 = vst [vmem:[%s20279_s27 + $0x1b0] sm:$0xff] %v16512_v44  ;;  %14337 = vst [vmem:[%s20279_s27 + $0x1b8] sm:$0xff] %v16513_v13  ;;  %v17859_v56 = vadd.f32 %v12788_v17, %v23043_v47  ;;  %v17923_v42 = vadd.f32 %v13753_v51, %v23045_v46  ;;  %v12790_v22 = vpop.f32.mrb[58].mxu0  ;;  %v13755_v23 = vpop.f32.mrb[58].mxu1 }
 0xb23   : > { %v13882_v54 = vmax.f32 %v17858_v7, 0.0  ;;  %v13884_v38 = vmax.f32 %v17922_v21, 0.0  ;;  %v17860_v4 = vadd.f32 %v12790_v22, %v23039_v15  ;;  %v17924_v60 = vadd.f32 %v13755_v23, %v23041_v14  ;;  %v12792_v41 = vpop.f32.mrb[59].mxu0  ;;  %v13757_v59 = vpop.f32.mrb[59].mxu1 }
 0xb24   : > { %v13883_v26 = vmax.f32 %v17859_v56, 0.0  ;;  %v13885_v31 = vmax.f32 %v17923_v42, 0.0  ;;  %v17861_v35 = vadd.f32 %v12792_v41, %v23043_v47  ;;  %v17925_v25 = vadd.f32 %v13757_v59, %v23045_v46 }
 0xb25   : > { %v13886_v11 = vmax.f32 %v17860_v4, 0.0  ;;  %v13888_v2 = vmax.f32 %v17924_v60, 0.0 }
 0xb26   : > { %v16514_v9 = vpack.c.bf16 %v13883_v26, %v13882_v54  ;;  %v16515_v61 = vpack.c.bf16 %v13885_v31, %v13884_v38  ;;  %v13887_v48 = vmax.f32 %v17861_v35, 0.0  ;;  %v13889_v45 = vmax.f32 %v17925_v25, 0.0 }
 0xb28   : > { %14338 = vst [vmem:[%s20279_s27 + $0x1c0] sm:$0xff] %v16514_v9  ;;  %14339 = vst [vmem:[%s20279_s27 + $0x1c8] sm:$0xff] %v16515_v61  ;;  %v16516_v27 = vpack.c.bf16 %v13887_v48, %v13886_v11  ;;  %v16517_v5 = vpack.c.bf16 %v13889_v45, %v13888_v2  ;;  %v12796_v12 = vpop.f32.mrb[60].mxu0  ;;  %v13761_v18 = vpop.f32.mrb[60].mxu1 }
 0xb29   : > { %v17862_v1 = vadd.f32 %v12796_v12, %v23039_v15  ;;  %v17926_v29 = vadd.f32 %v13761_v18, %v23041_v14  ;;  %v12798_v40 = vpop.f32.mrb[61].mxu0  ;;  %v13763_v20 = vpop.f32.mrb[61].mxu1 }
 0xb2a   : > { %14340 = vst [vmem:[%s20279_s27 + $0x1d0] sm:$0xff] %v16516_v27  ;;  %14341 = vst [vmem:[%s20279_s27 + $0x1d8] sm:$0xff] %v16517_v5  ;;  %v17863_v49 = vadd.f32 %v12798_v40, %v23043_v47  ;;  %v17927_v0 = vadd.f32 %v13763_v20, %v23045_v46  ;;  %v12800_v55 = vpop.f32.mrb[62].mxu0  ;;  %v13765_v33 = vpop.f32.mrb[62].mxu1 }
 0xb2b   : > { %v13890_v19 = vmax.f32 %v17862_v1, 0.0  ;;  %v13892_v6 = vmax.f32 %v17926_v29, 0.0  ;;  %v17864_v43 = vadd.f32 %v12800_v55, %v23039_v15  ;;  %v17928_v30 = vadd.f32 %v13765_v33, %v23041_v14  ;;  %v12802_v32 = vpop.f32.mrb[63].mxu0  ;;  %v13767_v57 = vpop.f32.mrb[63].mxu1 }
 0xb2c   : > { %v13891_v50 = vmax.f32 %v17863_v49, 0.0  ;;  %v13893_v52 = vmax.f32 %v17927_v0, 0.0  ;;  %v17865_v62 = vadd.f32 %v12802_v32, %v23043_v47  ;;  %v17929_v10 = vadd.f32 %v13767_v57, %v23045_v46 }
 0xb2d   : > { %v13894_v37 = vmax.f32 %v17864_v43, 0.0  ;;  %v13896_v53 = vmax.f32 %v17928_v30, 0.0 }
 0xb2e   : > { %v16518_v39 = vpack.c.bf16 %v13891_v50, %v13890_v19  ;;  %v16519_v16 = vpack.c.bf16 %v13893_v52, %v13892_v6  ;;  %v13895_v28 = vmax.f32 %v17865_v62, 0.0  ;;  %v13897_v3 = vmax.f32 %v17929_v10, 0.0 }
 0xb30   : > { %14342 = vst [vmem:[%s20279_s27 + $0x1e0] sm:$0xff] %v16518_v39  ;;  %14343 = vst [vmem:[%s20279_s27 + $0x1e8] sm:$0xff] %v16519_v16  ;;  %v16520_v15 = vpack.c.bf16 %v13895_v28, %v13894_v37  ;;  %v16521_v14 = vpack.c.bf16 %v13897_v3, %v13896_v53 }
 0xb32   : > { %14344 = vst [vmem:[%s20279_s27 + $0x1f0] sm:$0xff] %v16520_v15  ;;  %14345 = vst [vmem:[%s20279_s27 + $0x1f8] sm:$0xff] %v16521_v14 }
 0xb33 PF: > { %s16324_s4 = sshll.u32 %s20030_s19, 7  ;;  %s16325_s7 = sshll.u32 %s20026_s18, 8 }
 0xb34   : > { %s14362_s29 = sshll.u32 %s20279_s27, 4  ;;  %s14359_s25 = sadd.s32 %s16325_s7, %s16324_s4  ;;  %s23242_s29 = int_to_ptr.vmem [resolvable:$true] %s14362_s29 }
 0xb35   : > { %s16326_s26 = sshll.u32 %s14359_s25, 6  ;;  %s23251_s15 = scalar_lea.sflag [#allocation4], %s253_s30 }
 0xb36   : > { %s23247_s6 = scalar_lea.hbm %s23315_s3, %s16326_s26  ;;  %s19916_s21 = scalar_lea.vmem %s23242_s29, 8192 }
 0xb37   : > { %p19917_p11 = scmp.ne.s32.totalorder %s23242_s29, %s19916_s21  ;;  %p23336_p12 = scmp.ne.s32.totalorder %s23328_s9, 0 }
 0xb38   : > { %s20051_s18 = smov [#allocation7]  }
 0xb39   : > { %p19918_p5 = pnand %p19917_p11, %p23336_p12  ;;  %s19920_s19 = sshll.u32 %s20051_s18, 4  ;;  %s19921_s19 = int_to_ptr.vmem [resolvable:$false] %s19920_s19 }
 0xb3a   : > { %s19922_s24 = scalar_lea.vmem %s19921_s19, 16384  ;;  %p19923_p9 = scmp.lt.s32.totalorder %s23242_s29, %s19921_s19 }
 0xb3b   : > { %p19919_p13 = pneg %p19918_p5  ;;  %p19924_p0 = scmp.lt.s32.totalorder %s19922_s24, %s19916_s21 }
 0xb3d   : > { %p19925_p3 = por %p19924_p0, %p19923_p9 }
 0xb3f   : > { %p19926_p7 = pnand %p19925_p3, %p19919_p13 }
 0xb41   : > { %19929 = shalt.err (!%p19926_p7)
}
 0xb42   : > { %s19930_s30 = scalar_lea.hbm %s23247_s6, 8192  ;;  %s19934_s28 = scalar_lea.hbm %s23315_s3, 49152 }
 0xb43   : > { %p19931_p1 = scmp.ne.s32.totalorder %s23247_s6, %s19930_s30  ;;  %p19935_p4 = scmp.lt.u32.totalorder %s23247_s6, %s23315_s3 }
 0xb44   : > { %p19936_p2 = scmp.lt.u32.totalorder %s19934_s28, %s19930_s30  ;;  %p19938_p11 = scmp.lt.u32.totalorder %s19930_s30, %s23247_s6 }
 0xb45   : > { %p19932_p6 = pnand %p19931_p1, %p23336_p12 }
 0xb46   : > { %p19937_p10 = por %p19936_p2, %p19935_p4 }
 0xb47   : > { %p19933_p8 = pneg %p19932_p6 }
 0xb48   : > { %p19939_p5 = por %p19938_p11, %p19937_p10 }
 0xb4a   : > { %p19940_p13 = pnand %p19939_p5, %p19933_p8 }
 0xb4c   : > { %19943 = shalt.err (!%p19940_p13)
}
 0xb4d   : > { %s20052_s7 = smov 256   ;;  %s20053_s25 = smov 16  }
 0xb4e   : > { %18450 = dma.vmem_to_hbm [thread:$0]  (%p23336_p12), %s23242_s29, 8192, %s23247_s6, %s23251_s15, %s20052_s7, %s20052_s7, %s20053_s25  }
 0xb4f PF: > { %p18464_p9 = scmp.ge.s32.totalorder %s20042_s22, 2  ;;  %s14377_s26 = sand.u32 1, %s20002_s12  }
 0xb50   : > { %p23337_p0 = scmp.ne.s32.totalorder %s23329_s10, 0  ;;  %s14378_s5 = scalar_lea.sflag [#allocation4], %s14377_s26 }
 0xb52   : > { %p18460_p3 = pnand %p18464_p9, %p23337_p0 }
 0xb54   : > { %19997 = dma.done.wait (!%p18460_p3), %s14378_s5, 8192  }
 0xb55   : > { %19999 = vsyncadd (!%p18460_p3), %s14378_s5, 4294959104  ;;  %s22_s22 = sadd.s32 1, %s20042_s22   ;;  %s23338_s9 = sld [smem:[#allocation14_spill]] }
 0xb56   : > { %p19_p7 = scmp.ge.s32.totalorder %s22_s22, 8   ;;  %s23339_s19 = sld [smem:[#allocation11_spill]] }
 0xb57   : > { %s23340_s29 = sld [smem:[#allocation12_spill]]  ;;  %s23341_s21 = sld [smem:[#allocation13_spill]] }
 0xb58   : > { %s23342_s12 = smov %s20006_s13  ;;  %s23343_s13 = smov %s20010_s14 }
 0xb59   : > { %s23344_s14 = smov %s20162_s8  ;;  %s23345_s15 = smov %s20018_s16 }
 0xb5a   : > { %s23346_s16 = smov %s20022_s17  ;;  %s23348_s18 = smov %s20034_s20 }
 0xb5b   : > { %s23347_s17 = smov %s23338_s9  ;;  %21 = sbr.rel (!%p19_p7) target bundleno = 13 (0xd), region = 113 }
 0xb5d   : > { %s23349_s20 = smov %s23340_s29 }
 0xb62   :  { %14383 = vsyncpa [#allocation3], 1 }
 0xb63   :  { %14385 = vsyncpa [#allocation3 + $0x1], 1 }
 0xb64   :  { %14386 = vsyncpa [#allocation6], 1 }
 0xb65   :  { %14388 = vsyncpa [#allocation6 + $0x1], 1 }
 0xb66   :  { %14389 = vsyncpa [#allocation4], 1 }
 0xb67   :  { %14391 = vsyncpa [#allocation4 + $0x1], 1 }

</bundles_post_ra>
